<compile_context>
chip_gen: v7x
topology: tpu7x:2x2x1
jax: 0.10.0
libtpu: 0.0.40
codegen_flags: <defaults>
</compile_context>

<pallas_src>
import functools

import jax
import jax.numpy as jnp
from jax import lax
from jax.experimental import pallas as pl
from jax.experimental.pallas import tpu as pltpu

# -----------------------------------------------------------------------------
# Config (small shapes, scaled down from npoint=(2048,1024,512,256), nsample=(64,32,16,16))
# -----------------------------------------------------------------------------
INPUT_FEATURE_DIM = 1
WIDTH, DEPTH, OUTPUT_DIM = 1, 2, 288
NPOINTS = (64, 32, 16, 8)
RADII = (0.2, 0.4, 0.8, 1.2)
NSAMPLES = (16, 8, 8, 8)

_VMEM_TILE_BUDGET = 6 * 1024 * 1024  # per-tile working-set target (safe on v5e/v6e/v7x)


# -----------------------------------------------------------------------------
# Pallas kernel: shared pointwise MLP (+ optional max-pool over nsample)
# -----------------------------------------------------------------------------
def _mlp_kernel(num_layers, nsample, x_ref, *refs):
    """x_ref: (rows, Cin) bf16. refs = [W0, b0, W1, b1, ..., out_ref].

    Per layer: bf16 MXU matmul with f32 accumulation, then bias + ReLU in f32.
    BN scale (and 1/radius for the SA first layer) is pre-folded into W, so only
    a bias remains. If nsample is not None, rows are groups of `nsample`
    neighbors and we max-pool over them before writing (rows//nsample, Cout).
    """
    out_ref = refs[-1]
    params = refs[:-1]
    h = x_ref[...]                                        # bf16 (rows, Cin)
    for l in range(num_layers):
        w = params[2 * l][...]                            # bf16 (Cin_l, Cout_l)
        b = params[2 * l + 1][...]                        # f32  (1, Cout_l)
        h = jnp.dot(h.astype(jnp.bfloat16), w, preferred_element_type=jnp.float32)
        h = jnp.maximum(h + b, 0.0)                       # affine + ReLU in f32 (VPU)
    if nsample is not None:
        rows = h.shape[0]
        h = jnp.max(h.reshape(rows // nsample, nsample, h.shape[-1]), axis=1)
    out_ref[...] = h.astype(out_ref.dtype)


def _pick_group_tile(ngroups, group, cin, cmax, cout_p):
    """Groups handled per grid step. Returns a divisor of ngroups that keeps the
    per-tile working set under budget, keeps block row dims (8/16,128)-friendly,
    and leaves >=2 grid steps so v7x's two TensorCores both get work."""
    quantum = 8 if group > 1 else 16
    per_group = group * (2 * 2 * cin + 4 * cmax) + 8 * cout_p   # bytes (dbl-buffered bf16 in)
    cap = max(quantum, _VMEM_TILE_BUDGET // max(per_group, 1))
    cap = min(cap, ngroups)
    if ngroups >= 2 * quantum:
        cap = min(cap, ngroups // 2)
    t = cap - cap % quantum
    while t >= quantum:
        if ngroups % t == 0:
            return t
        t -= quantum
    return ngroups   # full extent: exempt from the (8,128) divisibility rule


def _run_shared_mlp(x, layers, nsample=None):
    """x: (B, P, S, Cin) grouped points (nsample=S) or (B, N, Cin) pointwise.
    layers: list of (W[Cin_l, Cout_l] bf16, bias[1, Cout_l] f32) with BN folded in.
    Returns (B, P, Cout) f32 (max-pooled over S) or (B, N, Cout) f32."""
    layers = list(layers)
    cout = layers[-1][0].shape[1]
    cout_p = -(-cout // 128) * 128
    if cout_p != cout:
        # Lane-dense output store (avoid masked vst tail on e.g. 288-wide fp2);
        # zero-padded columns are sliced back off below.
        w, b = layers[-1]
        layers[-1] = (jnp.pad(w, ((0, 0), (0, cout_p - cout))),
                      jnp.pad(b, ((0, 0), (0, cout_p - cout))))

    cin = x.shape[-1]
    lead = x.shape[:-1]
    rows = 1
    for d in lead:
        rows *= d
    group = nsample if nsample is not None else 1
    ngroups = rows // group
    cmax = max([cin] + [w.shape[1] for w, _ in layers])
    tg = _pick_group_tile(ngroups, group, cin, cmax, cout_p)
    row_blk = tg * group

    # Fold batch into the matmul M dim; bf16 halves the activation DMA bytes.
    # No Cin padding: the (8,128) rule is satisfied because Cin is the full
    # array extent, and Mosaic handles K < 128 in the MXU.
    x2 = x.reshape(rows, cin).astype(jnp.bfloat16)

    in_specs = [pl.BlockSpec((row_blk, cin), lambda i: (i, 0))]
    args = [x2]
    for w, b in layers:
        in_specs.append(pl.BlockSpec(w.shape, lambda i: (0, 0)))
        in_specs.append(pl.BlockSpec(b.shape, lambda i: (0, 0)))
        args.append(w)
        args.append(b)

    out_shape = jax.ShapeDtypeStruct((ngroups, cout_p), jnp.float32)
    out_spec = pl.BlockSpec((tg, cout_p), lambda i: (i, 0))

    flops = 2 * rows * sum(w.shape[0] * w.shape[1] for w, _ in layers)
    bytes_acc = (x2.size * 2 + ngroups * cout_p * 4
                 + sum(w.size * 2 + b.size * 4 for w, b in layers))

    out = pl.pallas_call(
        functools.partial(_mlp_kernel, len(layers), nsample),
        out_shape=out_shape,
        grid=(ngroups // tg,),
        in_specs=in_specs,
        out_specs=out_spec,
        compiler_params=pltpu.CompilerParams(
            dimension_semantics=("parallel",),
            vmem_limit_bytes=32 * 1024 * 1024),
        cost_estimate=pl.CostEstimate(flops=flops, transcendentals=0,
                                      bytes_accessed=bytes_acc),
    )(*args)

    out = out.reshape(lead[0], lead[1], cout_p)
    return out[..., :cout] if cout_p != cout else out


# -----------------------------------------------------------------------------
# Pallas kernel: furthest point sampling (sequential selection, dists in VMEM)
# -----------------------------------------------------------------------------
def _fps_kernel(npoint, xyzt_ref, out_ref, dist_ref, sel_ref):
    """xyzt_ref: (1, 3, N) f32 (N on the lane axis). out_ref: (1, 1, npoint) int32.
    dist_ref: (1, N) f32 scratch. sel_ref: (1, npoint) int32 scratch."""
    pts = xyzt_ref[0]                                     # (3, N)
    N = pts.shape[-1]
    lane = lax.broadcasted_iota(jnp.int32, (1, N), 1)
    out_lane = lax.broadcasted_iota(jnp.int32, (1, npoint), 1)
    dist_ref[...] = jnp.full((1, N), 1e10, jnp.float32)
    sel_ref[...] = jnp.zeros((1, npoint), jnp.int32)      # slot 0 <- point 0

    def body(i, last):
        sel_mask = lane == last                                               # (1, N)
        center = jnp.sum(jnp.where(sel_mask, pts, 0.0), axis=1, keepdims=True)  # (3, 1)
        d = jnp.sum((pts - center) ** 2, axis=0, keepdims=True)               # (1, N)
        nd = jnp.minimum(dist_ref[...], d)
        dist_ref[...] = nd
        m = jnp.max(nd, axis=-1, keepdims=True)                               # (1, 1)
        nxt = jnp.min(jnp.where(nd >= m, lane, N)).astype(jnp.int32)          # first argmax
        sel_ref[...] = jnp.where(out_lane == i, nxt, sel_ref[...])
        return nxt

    lax.fori_loop(1, npoint, body, jnp.int32(0))
    out_ref[0] = sel_ref[...]


def furthest_point_sample(xyz, npoint):
    """(B, N, 3) -> (B, npoint) int32. Matches pointnet2 FPS (seed index 0)."""
    B, N, _ = xyz.shape
    xyzt = jnp.transpose(xyz, (0, 2, 1))                  # (B, 3, N)
    out = pl.pallas_call(
        functools.partial(_fps_kernel, npoint),
        out_shape=jax.ShapeDtypeStruct((B, 1, npoint), jnp.int32),
        grid=(B,),
        in_specs=[pl.BlockSpec((1, 3, N), lambda b: (b, 0, 0))],
        out_specs=pl.BlockSpec((1, 1, npoint), lambda b: (b, 0, 0)),
        scratch_shapes=[pltpu.VMEM((1, N), jnp.float32),
                        pltpu.VMEM((1, npoint), jnp.int32)],
        compiler_params=pltpu.CompilerParams(dimension_semantics=("parallel",)),
    )(xyzt)
    return out.reshape(B, npoint)


# -----------------------------------------------------------------------------
# Point-cloud glue ops (data-dependent selection / gathers -> plain JAX)
# -----------------------------------------------------------------------------
def ball_query(new_xyz, xyz, radius, nsample):
    # First `nsample` points within radius in scan order; empty slots filled
    # with the first hit (0 if no hit). Single top_k instead of an unrolled slot loop.
    d2 = jnp.sum((new_xyz[:, :, None, :] - xyz[:, None, :, :]) ** 2, axis=-1)
    within = d2 < radius * radius
    N = xyz.shape[1]
    jidx = jnp.arange(N, dtype=jnp.int32)
    key = jnp.where(within, jidx, jidx + N)        # in-radius points sort first, scan order
    neg_topk, _ = lax.top_k(-key, nsample)         # nsample smallest keys
    idx = -neg_topk
    first = idx[..., 0:1]
    fill = jnp.where(first < N, first, 0)
    idx = jnp.where(idx < N, idx, fill)
    return idx.astype(jnp.int32)


def gather_groups(data, idx):
    # data: (B, N, C); idx: (B, M, S) -> (B, M, S, C)
    # TODO(synk): fuse this gather into the MLP kernel (scalar-prefetched idx +
    # pl.ANY HBM refs + per-group DMA) to avoid materializing the grouped tensor in HBM.
    B, M, S = idx.shape
    flat = idx.reshape(B, M * S)
    out = jnp.take_along_axis(data, flat[:, :, None], axis=1)
    return out.reshape(B, M, S, data.shape[-1])


# -----------------------------------------------------------------------------
# SA / FP modules
# -----------------------------------------------------------------------------
def sa_module(xyz, features, npoint, radius, nsample, layers):
    fps_idx = furthest_point_sample(xyz, npoint)                  # (B, npoint)
    new_xyz = jnp.take_along_axis(xyz, fps_idx[..., None], axis=1)
    idx = ball_query(new_xyz, xyz, radius, nsample)               # (B, npoint, nsample)
    # normalize_xyz: the 1/radius factor is folded into the first-layer weights.
    grouped_xyz = gather_groups(xyz, idx) - new_xyz[:, :, None, :]
    if features is not None:
        grouped = jnp.concatenate([grouped_xyz, gather_groups(features, idx)], axis=-1)
    else:
        grouped = grouped_xyz                                     # use_xyz=True
    new_features = _run_shared_mlp(grouped, layers, nsample=nsample)  # (B, npoint, Cout)
    return new_xyz, new_features, fps_idx


def fp_module(unknown_xyz, known_xyz, unknown_feats, known_feats, layers):
    d2 = jnp.sum((unknown_xyz[:, :, None, :] - known_xyz[:, None, :, :]) ** 2, axis=-1)
    neg_d2, idx = lax.top_k(-d2, 3)
    dist = -neg_d2                                                # squared dists (three_nn)
    recip = 1.0 / (dist + 1e-8)
    weight = recip / jnp.sum(recip, axis=-1, keepdims=True)
    gathered = gather_groups(known_feats, idx.astype(jnp.int32))  # (B, n, 3, C)
    interpolated = jnp.sum(gathered * weight[..., None], axis=2)  # (B, n, C)
    new_feats = jnp.concatenate([interpolated, unknown_feats], axis=-1)
    return _run_shared_mlp(new_feats, layers, nsample=None)


# -----------------------------------------------------------------------------
# Parameters (deterministic synthetic init; eval-mode BN folded into W + bias)
# -----------------------------------------------------------------------------
def _init_shared_mlp(key, dims):
    layers = []
    for i in range(len(dims) - 1):
        key, kw, kb = jax.random.split(key, 3)
        w = jax.random.normal(kw, (dims[i], dims[i + 1]), jnp.float32) * jnp.sqrt(2.0 / dims[i])
        scale = jnp.ones((1, dims[i + 1]), jnp.float32)   # eval-mode BN gamma/sqrt(var+eps)
        bias = 0.01 * jax.random.normal(kb, (1, dims[i + 1]), jnp.float32)
        w = w * scale                                     # fold BN scale into the weight
        layers.append((w, bias))
    return key, layers


def _to_bf16(layers):
    return [(w.astype(jnp.bfloat16), b) for w, b in layers]


def build_params(key):
    w, d = WIDTH, DEPTH
    sa_mlps = [
        [INPUT_FEATURE_DIM] + [64 * w] * d + [128 * w],
        [128 * w] + [128 * w] * d + [256 * w],
        [256 * w] + [128 * w] * d + [256 * w],
        [256 * w] + [128 * w] * d + [256 * w],
    ]
    params = {}
    for i, mlp in enumerate(sa_mlps):
        dims = [mlp[0] + 3] + mlp[1:]            # use_xyz=True adds 3 channels
        key, layers = _init_shared_mlp(key, dims)
        # normalize_xyz=True: fold 1/radius into the xyz rows of the first layer.
        w0, b0 = layers[0]
        layers[0] = (w0.at[:3, :].multiply(1.0 / RADII[i]), b0)
        params[f"sa{i + 1}"] = _to_bf16(layers)
    key, fp1 = _init_shared_mlp(key, [256 * w + 256 * w, 256 * w, 256 * w])
    params["fp1"] = _to_bf16(fp1)
    key, fp2 = _init_shared_mlp(key, [256 * w + 256 * w, 256 * w, OUTPUT_DIM])
    params["fp2"] = _to_bf16(fp2)
    return params


# -----------------------------------------------------------------------------
# Backbone forward
# -----------------------------------------------------------------------------
def backbone_forward(pointcloud, params):
    xyz = pointcloud[..., 0:3]
    features = pointcloud[..., 3:] if pointcloud.shape[-1] > 3 else None

    ep = {}
    cur_xyz, cur_feat = xyz, features
    for i in range(4):
        cur_xyz, cur_feat, inds = sa_module(
            cur_xyz, cur_feat, NPOINTS[i], RADII[i], NSAMPLES[i], params[f"sa{i + 1}"])
        if i < 2:
            ep[f"sa{i + 1}_inds"] = inds
        ep[f"sa{i + 1}_xyz"] = cur_xyz
        ep[f"sa{i + 1}_features"] = cur_feat

    feats = fp_module(ep["sa3_xyz"], ep["sa4_xyz"],
                      ep["sa3_features"], ep["sa4_features"], params["fp1"])
    feats = fp_module(ep["sa2_xyz"], ep["sa3_xyz"],
                      ep["sa2_features"], feats, params["fp2"])
    ep["fp2_features"] = feats
    ep["fp2_xyz"] = ep["sa2_xyz"]
    num_seed = ep["fp2_xyz"].shape[1]
    ep["fp2_inds"] = ep["sa1_inds"][:, 0:num_seed]
    return ep


if __name__ == "__main__":
    key = jax.random.PRNGKey(0)
    kpc, kparams = jax.random.split(key)
    B, N = 2, 128
    pointcloud = jax.random.normal(kpc, (B, N, 3 + INPUT_FEATURE_DIM), jnp.float32)
    params = build_params(kparams)

    fwd = jax.jit(backbone_forward)
    ep = fwd(pointcloud, params)
    jax.block_until_ready(ep["fp2_features"])

    assert ep["fp2_features"].shape == (B, NPOINTS[1], OUTPUT_DIM)
    assert ep["fp2_xyz"].shape == (B, NPOINTS[1], 3)
    assert ep["fp2_inds"].shape == (B, NPOINTS[1])
    print("KERNEL_OK")
</pallas_src>

<mosaic_0001>
module attributes {stable_mosaic.version = 11 : i64} {
  func.func @_fps_kernel(%arg0: i32, %arg1: memref<1x3x128xf32, #tpu.memory_space<vmem>>, %arg2: memref<1x1x64xi32, #tpu.memory_space<vmem>>, %arg3: memref<1x128xf32, #tpu.memory_space<vmem>>, %arg4: memref<1x64xi32, #tpu.memory_space<vmem>>) attributes {dimension_semantics = [#tpu.dimension_semantics<parallel>], iteration_bounds = array<i64: 2>, scalar_prefetch = 0 : i64, scratch_operands = 2 : i64, tpu.core_type = #tpu.core_type<tc>, window_params = [{transform_indices = @transform_0, window_bounds = array<i64: 1, 3, 128>}, {transform_indices = @transform_1, window_bounds = array<i64: 1, 1, 64>}]} {
    %c0 = arith.constant 0 : index
    %c0_0 = arith.constant 0 : index
    %c0_1 = arith.constant 0 : index
    %0 = vector.load %arg1[%c0, %c0_0, %c0_1] : memref<1x3x128xf32, #tpu.memory_space<vmem>>, vector<1x3x128xf32>
    %1 = vector.shape_cast %0 : vector<1x3x128xf32> to vector<3x128xf32>
    %2 = tpu.iota {dimensions = array<i32: 1>} : vector<1x128xi32>
    %3 = tpu.iota {dimensions = array<i32: 1>} : vector<1x64xi32>
    %cst = arith.constant 1.000000e+10 : f32
    %4 = vector.broadcast %cst : f32 to vector<1x128xf32>
    %c0_2 = arith.constant 0 : index
    %c0_3 = arith.constant 0 : index
    %5 = vector.load %arg3[%c0_2, %c0_3] : memref<1x128xf32, #tpu.memory_space<vmem>>, vector<1x128xf32>
    tpu.vector_store %arg3[%c0_2, %c0_3], %4 {strides = array<i32>} : memref<1x128xf32, #tpu.memory_space<vmem>>, vector<1x128xf32>,
    %c0_i32 = arith.constant 0 : i32
    %6 = vector.broadcast %c0_i32 : i32 to vector<1x64xi32>
    %c0_4 = arith.constant 0 : index
    %c0_5 = arith.constant 0 : index
    %7 = vector.load %arg4[%c0_4, %c0_5] : memref<1x64xi32, #tpu.memory_space<vmem>>, vector<1x64xi32>
    tpu.vector_store %arg4[%c0_4, %c0_5], %6 {strides = array<i32>} : memref<1x64xi32, #tpu.memory_space<vmem>>, vector<1x64xi32>,
    %c0_i32_6 = arith.constant 0 : i32
    %c1_i32 = arith.constant 1 : i32
    %c63_i32 = arith.constant 63 : i32
    %8 = arith.addi %c1_i32, %c63_i32 : i32
    %c1_i32_7 = arith.constant 1 : i32
    %9 = scf.for %arg5 = %c1_i32 to %8 step %c1_i32_7 iter_args(%arg6 = %c0_i32_6) -> (i32)  : i32 {
      %14 = vector.broadcast %arg6 : i32 to vector<1x128xi32>
      %15 = arith.cmpi eq, %2, %14 : vector<1x128xi32>
      %cst_14 = arith.constant 0.000000e+00 : f32
      %16 = vector.shape_cast %15 : vector<1x128xi1> to vector<1x128xi1>
      %17 = vector.broadcast %16 : vector<1x128xi1> to vector<3x128xi1>
      %18 = vector.broadcast %cst_14 : f32 to vector<3x128xf32>
      %19 = arith.select %17, %1, %18 : vector<3x128xi1>, vector<3x128xf32>
      %cst_15 = arith.constant dense<0.000000e+00> : vector<3xf32>
      %20 = vector.multi_reduction <add>, %19, %cst_15 [1] : vector<3x128xf32> to vector<3xf32>
      %21 = vector.shape_cast %20 : vector<3xf32> to vector<3x1xf32>
      %22 = vector.broadcast %21 : vector<3x1xf32> to vector<3x128xf32>
      %23 = arith.subf %1, %22 : vector<3x128xf32>
      %24 = arith.mulf %23, %23 : vector<3x128xf32>
      %cst_16 = arith.constant dense<0.000000e+00> : vector<128xf32>
      %25 = vector.multi_reduction <add>, %24, %cst_16 [0] : vector<3x128xf32> to vector<128xf32>
      %26 = vector.shape_cast %25 : vector<128xf32> to vector<1x128xf32>
      %c0_17 = arith.constant 0 : index
      %c0_18 = arith.constant 0 : index
      %27 = vector.load %arg3[%c0_17, %c0_18] : memref<1x128xf32, #tpu.memory_space<vmem>>, vector<1x128xf32>
      %28 = arith.minimumf %27, %26 : vector<1x128xf32>
      %c0_19 = arith.constant 0 : index
      %c0_20 = arith.constant 0 : index
      %29 = vector.load %arg3[%c0_19, %c0_20] : memref<1x128xf32, #tpu.memory_space<vmem>>, vector<1x128xf32>
      tpu.vector_store %arg3[%c0_19, %c0_20], %28 {strides = array<i32>} : memref<1x128xf32, #tpu.memory_space<vmem>>, vector<1x128xf32>,
      %cst_21 = arith.constant dense<0xFF800000> : vector<1xf32>
      %30 = vector.multi_reduction <maximumf>, %28, %cst_21 [1] : vector<1x128xf32> to vector<1xf32>
      %31 = vector.shape_cast %30 : vector<1xf32> to vector<1x1xf32>
      %32 = vector.broadcast %31 : vector<1x1xf32> to vector<1x128xf32>
      %33 = arith.cmpf oge, %28, %32 : vector<1x128xf32>
      %c128_i32 = arith.constant 128 : i32
      %34 = vector.broadcast %c128_i32 : i32 to vector<1x128xi32>
      %35 = arith.select %33, %2, %34 : vector<1x128xi1>, vector<1x128xi32>
      %36 = vector.shape_cast %35 : vector<1x128xi32> to vector<1x1x128xi32>
      %cst_22 = arith.constant dense<2147483647> : vector<1xi32>
      %37 = vector.multi_reduction <minsi>, %36, %cst_22 [1, 2] : vector<1x1x128xi32> to vector<1xi32>
      %38 = vector.shape_cast %37 : vector<1xi32> to vector<1x1x1xi32>
      %39 = vector.extract %38[0, 0, 0] : i32 from vector<1x1x1xi32>
      %40 = vector.broadcast %arg5 : i32 to vector<1x64xi32>
      %41 = arith.cmpi eq, %3, %40 : vector<1x64xi32>
      %c0_23 = arith.constant 0 : index
      %c0_24 = arith.constant 0 : index
      %42 = vector.load %arg4[%c0_23, %c0_24] : memref<1x64xi32, #tpu.memory_space<vmem>>, vector<1x64xi32>
      %43 = vector.broadcast %39 : i32 to vector<1x64xi32>
      %44 = arith.select %41, %43, %42 : vector<1x64xi1>, vector<1x64xi32>
      %c0_25 = arith.constant 0 : index
      %c0_26 = arith.constant 0 : index
      %45 = vector.load %arg4[%c0_25, %c0_26] : memref<1x64xi32, #tpu.memory_space<vmem>>, vector<1x64xi32>
      tpu.vector_store %arg4[%c0_25, %c0_26], %44 {strides = array<i32>} : memref<1x64xi32, #tpu.memory_space<vmem>>, vector<1x64xi32>,
      scf.yield %39 : i32
    }
    %c63_i32_8 = arith.constant 63 : i32
    %c0_9 = arith.constant 0 : index
    %c0_10 = arith.constant 0 : index
    %10 = vector.load %arg4[%c0_9, %c0_10] : memref<1x64xi32, #tpu.memory_space<vmem>>, vector<1x64xi32>
    %c0_11 = arith.constant 0 : index
    %c0_12 = arith.constant 0 : index
    %c0_13 = arith.constant 0 : index
    %11 = vector.load %arg2[%c0_11, %c0_12, %c0_13] : memref<1x1x64xi32, #tpu.memory_space<vmem>>, vector<1x1x64xi32>
    %12 = vector.shape_cast %11 : vector<1x1x64xi32> to vector<1x64xi32>
    %13 = vector.shape_cast %10 : vector<1x64xi32> to vector<1x1x64xi32>
    tpu.vector_store %arg2[%c0_11, %c0_12, %c0_13], %13 {strides = array<i32>} : memref<1x1x64xi32, #tpu.memory_space<vmem>>, vector<1x1x64xi32>,
    return
  }
  func.func @transform_0(%arg0: i32) -> (i32, i32, i32) {
    %c0_i32 = arith.constant 0 : i32
    %c0_i32_0 = arith.constant 0 : i32
    %c0_i32_1 = arith.constant 0 : i32
    return %arg0, %c0_i32, %c0_i32_0 : i32, i32, i32
  }
  func.func @transform_1(%arg0: i32) -> (i32, i32, i32) {
    %c0_i32 = arith.constant 0 : i32
    %c0_i32_0 = arith.constant 0 : i32
    %c0_i32_1 = arith.constant 0 : i32
    return %arg0, %c0_i32, %c0_i32_0 : i32, i32, i32
  }
}

module attributes {stable_mosaic.version = 11 : i64} {
  func.func @_fps_kernel(%arg0: i32, %arg1: memref<1x3x64xf32, #tpu.memory_space<vmem>>, %arg2: memref<1x1x32xi32, #tpu.memory_space<vmem>>, %arg3: memref<1x64xf32, #tpu.memory_space<vmem>>, %arg4: memref<1x32xi32, #tpu.memory_space<vmem>>) attributes {dimension_semantics = [#tpu.dimension_semantics<parallel>], iteration_bounds = array<i64: 2>, scalar_prefetch = 0 : i64, scratch_operands = 2 : i64, tpu.core_type = #tpu.core_type<tc>, window_params = [{transform_indices = @transform_0, window_bounds = array<i64: 1, 3, 64>}, {transform_indices = @transform_1, window_bounds = array<i64: 1, 1, 32>}]} {
    %c0 = arith.constant 0 : index
    %c0_0 = arith.constant 0 : index
    %c0_1 = arith.constant 0 : index
    %0 = vector.load %arg1[%c0, %c0_0, %c0_1] : memref<1x3x64xf32, #tpu.memory_space<vmem>>, vector<1x3x64xf32>
    %1 = vector.shape_cast %0 : vector<1x3x64xf32> to vector<3x64xf32>
    %2 = tpu.iota {dimensions = array<i32: 1>} : vector<1x64xi32>
    %3 = tpu.iota {dimensions = array<i32: 1>} : vector<1x32xi32>
    %cst = arith.constant 1.000000e+10 : f32
    %4 = vector.broadcast %cst : f32 to vector<1x64xf32>
    %c0_2 = arith.constant 0 : index
    %c0_3 = arith.constant 0 : index
    %5 = vector.load %arg3[%c0_2, %c0_3] : memref<1x64xf32, #tpu.memory_space<vmem>>, vector<1x64xf32>
    tpu.vector_store %arg3[%c0_2, %c0_3], %4 {strides = array<i32>} : memref<1x64xf32, #tpu.memory_space<vmem>>, vector<1x64xf32>,
    %c0_i32 = arith.constant 0 : i32
    %6 = vector.broadcast %c0_i32 : i32 to vector<1x32xi32>
    %c0_4 = arith.constant 0 : index
    %c0_5 = arith.constant 0 : index
    %7 = vector.load %arg4[%c0_4, %c0_5] : memref<1x32xi32, #tpu.memory_space<vmem>>, vector<1x32xi32>
    tpu.vector_store %arg4[%c0_4, %c0_5], %6 {strides = array<i32>} : memref<1x32xi32, #tpu.memory_space<vmem>>, vector<1x32xi32>,
    %c0_i32_6 = arith.constant 0 : i32
    %c1_i32 = arith.constant 1 : i32
    %c31_i32 = arith.constant 31 : i32
    %8 = arith.addi %c1_i32, %c31_i32 : i32
    %c1_i32_7 = arith.constant 1 : i32
    %9 = scf.for %arg5 = %c1_i32 to %8 step %c1_i32_7 iter_args(%arg6 = %c0_i32_6) -> (i32)  : i32 {
      %14 = vector.broadcast %arg6 : i32 to vector<1x64xi32>
      %15 = arith.cmpi eq, %2, %14 : vector<1x64xi32>
      %cst_14 = arith.constant 0.000000e+00 : f32
      %16 = vector.shape_cast %15 : vector<1x64xi1> to vector<1x64xi1>
      %17 = vector.broadcast %16 : vector<1x64xi1> to vector<3x64xi1>
      %18 = vector.broadcast %cst_14 : f32 to vector<3x64xf32>
      %19 = arith.select %17, %1, %18 : vector<3x64xi1>, vector<3x64xf32>
      %cst_15 = arith.constant dense<0.000000e+00> : vector<3xf32>
      %20 = vector.multi_reduction <add>, %19, %cst_15 [1] : vector<3x64xf32> to vector<3xf32>
      %21 = vector.shape_cast %20 : vector<3xf32> to vector<3x1xf32>
      %22 = vector.broadcast %21 : vector<3x1xf32> to vector<3x64xf32>
      %23 = arith.subf %1, %22 : vector<3x64xf32>
      %24 = arith.mulf %23, %23 : vector<3x64xf32>
      %cst_16 = arith.constant dense<0.000000e+00> : vector<64xf32>
      %25 = vector.multi_reduction <add>, %24, %cst_16 [0] : vector<3x64xf32> to vector<64xf32>
      %26 = vector.shape_cast %25 : vector<64xf32> to vector<1x64xf32>
      %c0_17 = arith.constant 0 : index
      %c0_18 = arith.constant 0 : index
      %27 = vector.load %arg3[%c0_17, %c0_18] : memref<1x64xf32, #tpu.memory_space<vmem>>, vector<1x64xf32>
      %28 = arith.minimumf %27, %26 : vector<1x64xf32>
      %c0_19 = arith.constant 0 : index
      %c0_20 = arith.constant 0 : index
      %29 = vector.load %arg3[%c0_19, %c0_20] : memref<1x64xf32, #tpu.memory_space<vmem>>, vector<1x64xf32>
      tpu.vector_store %arg3[%c0_19, %c0_20], %28 {strides = array<i32>} : memref<1x64xf32, #tpu.memory_space<vmem>>, vector<1x64xf32>,
      %cst_21 = arith.constant dense<0xFF800000> : vector<1xf32>
      %30 = vector.multi_reduction <maximumf>, %28, %cst_21 [1] : vector<1x64xf32> to vector<1xf32>
      %31 = vector.shape_cast %30 : vector<1xf32> to vector<1x1xf32>
      %32 = vector.broadcast %31 : vector<1x1xf32> to vector<1x64xf32>
      %33 = arith.cmpf oge, %28, %32 : vector<1x64xf32>
      %c64_i32 = arith.constant 64 : i32
      %34 = vector.broadcast %c64_i32 : i32 to vector<1x64xi32>
      %35 = arith.select %33, %2, %34 : vector<1x64xi1>, vector<1x64xi32>
      %36 = vector.shape_cast %35 : vector<1x64xi32> to vector<1x1x64xi32>
      %cst_22 = arith.constant dense<2147483647> : vector<1xi32>
      %37 = vector.multi_reduction <minsi>, %36, %cst_22 [1, 2] : vector<1x1x64xi32> to vector<1xi32>
      %38 = vector.shape_cast %37 : vector<1xi32> to vector<1x1x1xi32>
      %39 = vector.extract %38[0, 0, 0] : i32 from vector<1x1x1xi32>
      %40 = vector.broadcast %arg5 : i32 to vector<1x32xi32>
      %41 = arith.cmpi eq, %3, %40 : vector<1x32xi32>
      %c0_23 = arith.constant 0 : index
      %c0_24 = arith.constant 0 : index
      %42 = vector.load %arg4[%c0_23, %c0_24] : memref<1x32xi32, #tpu.memory_space<vmem>>, vector<1x32xi32>
      %43 = vector.broadcast %39 : i32 to vector<1x32xi32>
      %44 = arith.select %41, %43, %42 : vector<1x32xi1>, vector<1x32xi32>
      %c0_25 = arith.constant 0 : index
      %c0_26 = arith.constant 0 : index
      %45 = vector.load %arg4[%c0_25, %c0_26] : memref<1x32xi32, #tpu.memory_space<vmem>>, vector<1x32xi32>
      tpu.vector_store %arg4[%c0_25, %c0_26], %44 {strides = array<i32>} : memref<1x32xi32, #tpu.memory_space<vmem>>, vector<1x32xi32>,
      scf.yield %39 : i32
    }
    %c31_i32_8 = arith.constant 31 : i32
    %c0_9 = arith.constant 0 : index
    %c0_10 = arith.constant 0 : index
    %10 = vector.load %arg4[%c0_9, %c0_10] : memref<1x32xi32, #tpu.memory_space<vmem>>, vector<1x32xi32>
    %c0_11 = arith.constant 0 : index
    %c0_12 = arith.constant 0 : index
    %c0_13 = arith.constant 0 : index
    %11 = vector.load %arg2[%c0_11, %c0_12, %c0_13] : memref<1x1x32xi32, #tpu.memory_space<vmem>>, vector<1x1x32xi32>
    %12 = vector.shape_cast %11 : vector<1x1x32xi32> to vector<1x32xi32>
    %13 = vector.shape_cast %10 : vector<1x32xi32> to vector<1x1x32xi32>
    tpu.vector_store %arg2[%c0_11, %c0_12, %c0_13], %13 {strides = array<i32>} : memref<1x1x32xi32, #tpu.memory_space<vmem>>, vector<1x1x32xi32>,
    return
  }
  func.func @transform_0(%arg0: i32) -> (i32, i32, i32) {
    %c0_i32 = arith.constant 0 : i32
    %c0_i32_0 = arith.constant 0 : i32
    %c0_i32_1 = arith.constant 0 : i32
    return %arg0, %c0_i32, %c0_i32_0 : i32, i32, i32
  }
  func.func @transform_1(%arg0: i32) -> (i32, i32, i32) {
    %c0_i32 = arith.constant 0 : i32
    %c0_i32_0 = arith.constant 0 : i32
    %c0_i32_1 = arith.constant 0 : i32
    return %arg0, %c0_i32, %c0_i32_0 : i32, i32, i32
  }
}

module attributes {stable_mosaic.version = 11 : i64} {
  func.func @_fps_kernel(%arg0: i32, %arg1: memref<1x3x32xf32, #tpu.memory_space<vmem>>, %arg2: memref<1x1x16xi32, #tpu.memory_space<vmem>>, %arg3: memref<1x32xf32, #tpu.memory_space<vmem>>, %arg4: memref<1x16xi32, #tpu.memory_space<vmem>>) attributes {dimension_semantics = [#tpu.dimension_semantics<parallel>], iteration_bounds = array<i64: 2>, scalar_prefetch = 0 : i64, scratch_operands = 2 : i64, tpu.core_type = #tpu.core_type<tc>, window_params = [{transform_indices = @transform_0, window_bounds = array<i64: 1, 3, 32>}, {transform_indices = @transform_1, window_bounds = array<i64: 1, 1, 16>}]} {
    %c0 = arith.constant 0 : index
    %c0_0 = arith.constant 0 : index
    %c0_1 = arith.constant 0 : index
    %0 = vector.load %arg1[%c0, %c0_0, %c0_1] : memref<1x3x32xf32, #tpu.memory_space<vmem>>, vector<1x3x32xf32>
    %1 = vector.shape_cast %0 : vector<1x3x32xf32> to vector<3x32xf32>
    %2 = tpu.iota {dimensions = array<i32: 1>} : vector<1x32xi32>
    %3 = tpu.iota {dimensions = array<i32: 1>} : vector<1x16xi32>
    %cst = arith.constant 1.000000e+10 : f32
    %4 = vector.broadcast %cst : f32 to vector<1x32xf32>
    %c0_2 = arith.constant 0 : index
    %c0_3 = arith.constant 0 : index
    %5 = vector.load %arg3[%c0_2, %c0_3] : memref<1x32xf32, #tpu.memory_space<vmem>>, vector<1x32xf32>
    tpu.vector_store %arg3[%c0_2, %c0_3], %4 {strides = array<i32>} : memref<1x32xf32, #tpu.memory_space<vmem>>, vector<1x32xf32>,
    %c0_i32 = arith.constant 0 : i32
    %6 = vector.broadcast %c0_i32 : i32 to vector<1x16xi32>
    %c0_4 = arith.constant 0 : index
    %c0_5 = arith.constant 0 : index
    %7 = vector.load %arg4[%c0_4, %c0_5] : memref<1x16xi32, #tpu.memory_space<vmem>>, vector<1x16xi32>
    tpu.vector_store %arg4[%c0_4, %c0_5], %6 {strides = array<i32>} : memref<1x16xi32, #tpu.memory_space<vmem>>, vector<1x16xi32>,
    %c0_i32_6 = arith.constant 0 : i32
    %c1_i32 = arith.constant 1 : i32
    %c15_i32 = arith.constant 15 : i32
    %8 = arith.addi %c1_i32, %c15_i32 : i32
    %c1_i32_7 = arith.constant 1 : i32
    %9 = scf.for %arg5 = %c1_i32 to %8 step %c1_i32_7 iter_args(%arg6 = %c0_i32_6) -> (i32)  : i32 {
      %14 = vector.broadcast %arg6 : i32 to vector<1x32xi32>
      %15 = arith.cmpi eq, %2, %14 : vector<1x32xi32>
      %cst_14 = arith.constant 0.000000e+00 : f32
      %16 = vector.shape_cast %15 : vector<1x32xi1> to vector<1x32xi1>
      %17 = vector.broadcast %16 : vector<1x32xi1> to vector<3x32xi1>
      %18 = vector.broadcast %cst_14 : f32 to vector<3x32xf32>
      %19 = arith.select %17, %1, %18 : vector<3x32xi1>, vector<3x32xf32>
      %cst_15 = arith.constant dense<0.000000e+00> : vector<3xf32>
      %20 = vector.multi_reduction <add>, %19, %cst_15 [1] : vector<3x32xf32> to vector<3xf32>
      %21 = vector.shape_cast %20 : vector<3xf32> to vector<3x1xf32>
      %22 = vector.broadcast %21 : vector<3x1xf32> to vector<3x32xf32>
      %23 = arith.subf %1, %22 : vector<3x32xf32>
      %24 = arith.mulf %23, %23 : vector<3x32xf32>
      %cst_16 = arith.constant dense<0.000000e+00> : vector<32xf32>
      %25 = vector.multi_reduction <add>, %24, %cst_16 [0] : vector<3x32xf32> to vector<32xf32>
      %26 = vector.shape_cast %25 : vector<32xf32> to vector<1x32xf32>
      %c0_17 = arith.constant 0 : index
      %c0_18 = arith.constant 0 : index
      %27 = vector.load %arg3[%c0_17, %c0_18] : memref<1x32xf32, #tpu.memory_space<vmem>>, vector<1x32xf32>
      %28 = arith.minimumf %27, %26 : vector<1x32xf32>
      %c0_19 = arith.constant 0 : index
      %c0_20 = arith.constant 0 : index
      %29 = vector.load %arg3[%c0_19, %c0_20] : memref<1x32xf32, #tpu.memory_space<vmem>>, vector<1x32xf32>
      tpu.vector_store %arg3[%c0_19, %c0_20], %28 {strides = array<i32>} : memref<1x32xf32, #tpu.memory_space<vmem>>, vector<1x32xf32>,
      %cst_21 = arith.constant dense<0xFF800000> : vector<1xf32>
      %30 = vector.multi_reduction <maximumf>, %28, %cst_21 [1] : vector<1x32xf32> to vector<1xf32>
      %31 = vector.shape_cast %30 : vector<1xf32> to vector<1x1xf32>
      %32 = vector.broadcast %31 : vector<1x1xf32> to vector<1x32xf32>
      %33 = arith.cmpf oge, %28, %32 : vector<1x32xf32>
      %c32_i32 = arith.constant 32 : i32
      %34 = vector.broadcast %c32_i32 : i32 to vector<1x32xi32>
      %35 = arith.select %33, %2, %34 : vector<1x32xi1>, vector<1x32xi32>
      %36 = vector.shape_cast %35 : vector<1x32xi32> to vector<1x1x32xi32>
      %cst_22 = arith.constant dense<2147483647> : vector<1xi32>
      %37 = vector.multi_reduction <minsi>, %36, %cst_22 [1, 2] : vector<1x1x32xi32> to vector<1xi32>
      %38 = vector.shape_cast %37 : vector<1xi32> to vector<1x1x1xi32>
      %39 = vector.extract %38[0, 0, 0] : i32 from vector<1x1x1xi32>
      %40 = vector.broadcast %arg5 : i32 to vector<1x16xi32>
      %41 = arith.cmpi eq, %3, %40 : vector<1x16xi32>
      %c0_23 = arith.constant 0 : index
      %c0_24 = arith.constant 0 : index
      %42 = vector.load %arg4[%c0_23, %c0_24] : memref<1x16xi32, #tpu.memory_space<vmem>>, vector<1x16xi32>
      %43 = vector.broadcast %39 : i32 to vector<1x16xi32>
      %44 = arith.select %41, %43, %42 : vector<1x16xi1>, vector<1x16xi32>
      %c0_25 = arith.constant 0 : index
      %c0_26 = arith.constant 0 : index
      %45 = vector.load %arg4[%c0_25, %c0_26] : memref<1x16xi32, #tpu.memory_space<vmem>>, vector<1x16xi32>
      tpu.vector_store %arg4[%c0_25, %c0_26], %44 {strides = array<i32>} : memref<1x16xi32, #tpu.memory_space<vmem>>, vector<1x16xi32>,
      scf.yield %39 : i32
    }
    %c15_i32_8 = arith.constant 15 : i32
    %c0_9 = arith.constant 0 : index
    %c0_10 = arith.constant 0 : index
    %10 = vector.load %arg4[%c0_9, %c0_10] : memref<1x16xi32, #tpu.memory_space<vmem>>, vector<1x16xi32>
    %c0_11 = arith.constant 0 : index
    %c0_12 = arith.constant 0 : index
    %c0_13 = arith.constant 0 : index
    %11 = vector.load %arg2[%c0_11, %c0_12, %c0_13] : memref<1x1x16xi32, #tpu.memory_space<vmem>>, vector<1x1x16xi32>
    %12 = vector.shape_cast %11 : vector<1x1x16xi32> to vector<1x16xi32>
    %13 = vector.shape_cast %10 : vector<1x16xi32> to vector<1x1x16xi32>
    tpu.vector_store %arg2[%c0_11, %c0_12, %c0_13], %13 {strides = array<i32>} : memref<1x1x16xi32, #tpu.memory_space<vmem>>, vector<1x1x16xi32>,
    return
  }
  func.func @transform_0(%arg0: i32) -> (i32, i32, i32) {
    %c0_i32 = arith.constant 0 : i32
    %c0_i32_0 = arith.constant 0 : i32
    %c0_i32_1 = arith.constant 0 : i32
    return %arg0, %c0_i32, %c0_i32_0 : i32, i32, i32
  }
  func.func @transform_1(%arg0: i32) -> (i32, i32, i32) {
    %c0_i32 = arith.constant 0 : i32
    %c0_i32_0 = arith.constant 0 : i32
    %c0_i32_1 = arith.constant 0 : i32
    return %arg0, %c0_i32, %c0_i32_0 : i32, i32, i32
  }
}

module attributes {stable_mosaic.version = 11 : i64} {
  func.func @_fps_kernel(%arg0: i32, %arg1: memref<1x3x16xf32, #tpu.memory_space<vmem>>, %arg2: memref<1x1x8xi32, #tpu.memory_space<vmem>>, %arg3: memref<1x16xf32, #tpu.memory_space<vmem>>, %arg4: memref<1x8xi32, #tpu.memory_space<vmem>>) attributes {dimension_semantics = [#tpu.dimension_semantics<parallel>], iteration_bounds = array<i64: 2>, scalar_prefetch = 0 : i64, scratch_operands = 2 : i64, tpu.core_type = #tpu.core_type<tc>, window_params = [{transform_indices = @transform_0, window_bounds = array<i64: 1, 3, 16>}, {transform_indices = @transform_1, window_bounds = array<i64: 1, 1, 8>}]} {
    %c0 = arith.constant 0 : index
    %c0_0 = arith.constant 0 : index
    %c0_1 = arith.constant 0 : index
    %0 = vector.load %arg1[%c0, %c0_0, %c0_1] : memref<1x3x16xf32, #tpu.memory_space<vmem>>, vector<1x3x16xf32>
    %1 = vector.shape_cast %0 : vector<1x3x16xf32> to vector<3x16xf32>
    %2 = tpu.iota {dimensions = array<i32: 1>} : vector<1x16xi32>
    %3 = tpu.iota {dimensions = array<i32: 1>} : vector<1x8xi32>
    %cst = arith.constant 1.000000e+10 : f32
    %4 = vector.broadcast %cst : f32 to vector<1x16xf32>
    %c0_2 = arith.constant 0 : index
    %c0_3 = arith.constant 0 : index
    %5 = vector.load %arg3[%c0_2, %c0_3] : memref<1x16xf32, #tpu.memory_space<vmem>>, vector<1x16xf32>
    tpu.vector_store %arg3[%c0_2, %c0_3], %4 {strides = array<i32>} : memref<1x16xf32, #tpu.memory_space<vmem>>, vector<1x16xf32>,
    %c0_i32 = arith.constant 0 : i32
    %6 = vector.broadcast %c0_i32 : i32 to vector<1x8xi32>
    %c0_4 = arith.constant 0 : index
    %c0_5 = arith.constant 0 : index
    %7 = vector.load %arg4[%c0_4, %c0_5] : memref<1x8xi32, #tpu.memory_space<vmem>>, vector<1x8xi32>
    tpu.vector_store %arg4[%c0_4, %c0_5], %6 {strides = array<i32>} : memref<1x8xi32, #tpu.memory_space<vmem>>, vector<1x8xi32>,
    %c0_i32_6 = arith.constant 0 : i32
    %c1_i32 = arith.constant 1 : i32
    %c7_i32 = arith.constant 7 : i32
    %8 = arith.addi %c1_i32, %c7_i32 : i32
    %c1_i32_7 = arith.constant 1 : i32
    %9 = scf.for %arg5 = %c1_i32 to %8 step %c1_i32_7 iter_args(%arg6 = %c0_i32_6) -> (i32)  : i32 {
      %14 = vector.broadcast %arg6 : i32 to vector<1x16xi32>
      %15 = arith.cmpi eq, %2, %14 : vector<1x16xi32>
      %cst_14 = arith.constant 0.000000e+00 : f32
      %16 = vector.shape_cast %15 : vector<1x16xi1> to vector<1x16xi1>
      %17 = vector.broadcast %16 : vector<1x16xi1> to vector<3x16xi1>
      %18 = vector.broadcast %cst_14 : f32 to vector<3x16xf32>
      %19 = arith.select %17, %1, %18 : vector<3x16xi1>, vector<3x16xf32>
      %cst_15 = arith.constant dense<0.000000e+00> : vector<3xf32>
      %20 = vector.multi_reduction <add>, %19, %cst_15 [1] : vector<3x16xf32> to vector<3xf32>
      %21 = vector.shape_cast %20 : vector<3xf32> to vector<3x1xf32>
      %22 = vector.broadcast %21 : vector<3x1xf32> to vector<3x16xf32>
      %23 = arith.subf %1, %22 : vector<3x16xf32>
      %24 = arith.mulf %23, %23 : vector<3x16xf32>
      %cst_16 = arith.constant dense<0.000000e+00> : vector<16xf32>
      %25 = vector.multi_reduction <add>, %24, %cst_16 [0] : vector<3x16xf32> to vector<16xf32>
      %26 = vector.shape_cast %25 : vector<16xf32> to vector<1x16xf32>
      %c0_17 = arith.constant 0 : index
      %c0_18 = arith.constant 0 : index
      %27 = vector.load %arg3[%c0_17, %c0_18] : memref<1x16xf32, #tpu.memory_space<vmem>>, vector<1x16xf32>
      %28 = arith.minimumf %27, %26 : vector<1x16xf32>
      %c0_19 = arith.constant 0 : index
      %c0_20 = arith.constant 0 : index
      %29 = vector.load %arg3[%c0_19, %c0_20] : memref<1x16xf32, #tpu.memory_space<vmem>>, vector<1x16xf32>
      tpu.vector_store %arg3[%c0_19, %c0_20], %28 {strides = array<i32>} : memref<1x16xf32, #tpu.memory_space<vmem>>, vector<1x16xf32>,
      %cst_21 = arith.constant dense<0xFF800000> : vector<1xf32>
      %30 = vector.multi_reduction <maximumf>, %28, %cst_21 [1] : vector<1x16xf32> to vector<1xf32>
      %31 = vector.shape_cast %30 : vector<1xf32> to vector<1x1xf32>
      %32 = vector.broadcast %31 : vector<1x1xf32> to vector<1x16xf32>
      %33 = arith.cmpf oge, %28, %32 : vector<1x16xf32>
      %c16_i32 = arith.constant 16 : i32
      %34 = vector.broadcast %c16_i32 : i32 to vector<1x16xi32>
      %35 = arith.select %33, %2, %34 : vector<1x16xi1>, vector<1x16xi32>
      %36 = vector.shape_cast %35 : vector<1x16xi32> to vector<1x1x16xi32>
      %cst_22 = arith.constant dense<2147483647> : vector<1xi32>
      %37 = vector.multi_reduction <minsi>, %36, %cst_22 [1, 2] : vector<1x1x16xi32> to vector<1xi32>
      %38 = vector.shape_cast %37 : vector<1xi32> to vector<1x1x1xi32>
      %39 = vector.extract %38[0, 0, 0] : i32 from vector<1x1x1xi32>
      %40 = vector.broadcast %arg5 : i32 to vector<1x8xi32>
      %41 = arith.cmpi eq, %3, %40 : vector<1x8xi32>
      %c0_23 = arith.constant 0 : index
      %c0_24 = arith.constant 0 : index
      %42 = vector.load %arg4[%c0_23, %c0_24] : memref<1x8xi32, #tpu.memory_space<vmem>>, vector<1x8xi32>
      %43 = vector.broadcast %39 : i32 to vector<1x8xi32>
      %44 = arith.select %41, %43, %42 : vector<1x8xi1>, vector<1x8xi32>
      %c0_25 = arith.constant 0 : index
      %c0_26 = arith.constant 0 : index
      %45 = vector.load %arg4[%c0_25, %c0_26] : memref<1x8xi32, #tpu.memory_space<vmem>>, vector<1x8xi32>
      tpu.vector_store %arg4[%c0_25, %c0_26], %44 {strides = array<i32>} : memref<1x8xi32, #tpu.memory_space<vmem>>, vector<1x8xi32>,
      scf.yield %39 : i32
    }
    %c7_i32_8 = arith.constant 7 : i32
    %c0_9 = arith.constant 0 : index
    %c0_10 = arith.constant 0 : index
    %10 = vector.load %arg4[%c0_9, %c0_10] : memref<1x8xi32, #tpu.memory_space<vmem>>, vector<1x8xi32>
    %c0_11 = arith.constant 0 : index
    %c0_12 = arith.constant 0 : index
    %c0_13 = arith.constant 0 : index
    %11 = vector.load %arg2[%c0_11, %c0_12, %c0_13] : memref<1x1x8xi32, #tpu.memory_space<vmem>>, vector<1x1x8xi32>
    %12 = vector.shape_cast %11 : vector<1x1x8xi32> to vector<1x8xi32>
    %13 = vector.shape_cast %10 : vector<1x8xi32> to vector<1x1x8xi32>
    tpu.vector_store %arg2[%c0_11, %c0_12, %c0_13], %13 {strides = array<i32>} : memref<1x1x8xi32, #tpu.memory_space<vmem>>, vector<1x1x8xi32>,
    return
  }
  func.func @transform_0(%arg0: i32) -> (i32, i32, i32) {
    %c0_i32 = arith.constant 0 : i32
    %c0_i32_0 = arith.constant 0 : i32
    %c0_i32_1 = arith.constant 0 : i32
    return %arg0, %c0_i32, %c0_i32_0 : i32, i32, i32
  }
  func.func @transform_1(%arg0: i32) -> (i32, i32, i32) {
    %c0_i32 = arith.constant 0 : i32
    %c0_i32_0 = arith.constant 0 : i32
    %c0_i32_1 = arith.constant 0 : i32
    return %arg0, %c0_i32, %c0_i32_0 : i32, i32, i32
  }
}

module attributes {stable_mosaic.version = 11 : i64} {
  func.func @_mlp_kernel(%arg0: i32, %arg1: memref<1024x4xbf16, #tpu.memory_space<vmem>>, %arg2: memref<4x64xbf16, #tpu.memory_space<vmem>>, %arg3: memref<1x64xf32, #tpu.memory_space<vmem>>, %arg4: memref<64x64xbf16, #tpu.memory_space<vmem>>, %arg5: memref<1x64xf32, #tpu.memory_space<vmem>>, %arg6: memref<64x128xbf16, #tpu.memory_space<vmem>>, %arg7: memref<1x128xf32, #tpu.memory_space<vmem>>, %arg8: memref<64x128xf32, #tpu.memory_space<vmem>>) attributes {dimension_semantics = [#tpu.dimension_semantics<parallel>], iteration_bounds = array<i64: 2>, scalar_prefetch = 0 : i64, scratch_operands = 0 : i64, tpu.core_type = #tpu.core_type<tc>, window_params = [{transform_indices = @transform_0, window_bounds = array<i64: 1024, 4>}, {pipeline_mode = #tpu.pipeline_mode<synchronous>, transform_indices = @transform_1, window_bounds = array<i64: 4, 64>}, {pipeline_mode = #tpu.pipeline_mode<synchronous>, transform_indices = @transform_2, window_bounds = array<i64: 1, 64>}, {pipeline_mode = #tpu.pipeline_mode<synchronous>, transform_indices = @transform_3, window_bounds = array<i64: 64, 64>}, {pipeline_mode = #tpu.pipeline_mode<synchronous>, transform_indices = @transform_4, window_bounds = array<i64: 1, 64>}, {pipeline_mode = #tpu.pipeline_mode<synchronous>, transform_indices = @transform_5, window_bounds = array<i64: 64, 128>}, {pipeline_mode = #tpu.pipeline_mode<synchronous>, transform_indices = @transform_6, window_bounds = array<i64: 1, 128>}, {transform_indices = @transform_7, window_bounds = array<i64: 64, 128>}]} {
    %c0 = arith.constant 0 : index
    %c0_0 = arith.constant 0 : index
    %0 = vector.load %arg1[%c0, %c0_0] : memref<1024x4xbf16, #tpu.memory_space<vmem>>, vector<1024x4xbf16>
    %c0_1 = arith.constant 0 : index
    %c0_2 = arith.constant 0 : index
    %1 = vector.load %arg2[%c0_1, %c0_2] : memref<4x64xbf16, #tpu.memory_space<vmem>>, vector<4x64xbf16>
    %c0_3 = arith.constant 0 : index
    %c0_4 = arith.constant 0 : index
    %2 = vector.load %arg3[%c0_3, %c0_4] : memref<1x64xf32, #tpu.memory_space<vmem>>, vector<1x64xf32>
    %cst = arith.constant dense<0.000000e+00> : vector<1024x64xf32>
    %3 = tpu.matmul %0, %1, %cst {dimension_numbers = #tpu.dot_dimension_numbers<[1], [0], [0], [1], [0, 0, 1, 1], [], []>} : vector<1024x4xbf16>, vector<4x64xbf16>, vector<1024x64xf32> -> vector<1024x64xf32>
    %4 = vector.broadcast %2 : vector<1x64xf32> to vector<1024x64xf32>
    %5 = arith.addf %3, %4 : vector<1024x64xf32>
    %cst_5 = arith.constant 0.000000e+00 : f32
    %6 = vector.broadcast %cst_5 : f32 to vector<1024x64xf32>
    %7 = arith.maximumf %5, %6 : vector<1024x64xf32>
    %c0_6 = arith.constant 0 : index
    %c0_7 = arith.constant 0 : index
    %8 = vector.load %arg4[%c0_6, %c0_7] : memref<64x64xbf16, #tpu.memory_space<vmem>>, vector<64x64xbf16>
    %c0_8 = arith.constant 0 : index
    %c0_9 = arith.constant 0 : index
    %9 = vector.load %arg5[%c0_8, %c0_9] : memref<1x64xf32, #tpu.memory_space<vmem>>, vector<1x64xf32>
    %10 = arith.truncf %7 : vector<1024x64xf32> to vector<1024x64xbf16>
    %cst_10 = arith.constant dense<0.000000e+00> : vector<1024x64xf32>
    %11 = tpu.matmul %10, %8, %cst_10 {dimension_numbers = #tpu.dot_dimension_numbers<[1], [0], [0], [1], [0, 0, 1, 1], [], []>} : vector<1024x64xbf16>, vector<64x64xbf16>, vector<1024x64xf32> -> vector<1024x64xf32>
    %12 = vector.broadcast %9 : vector<1x64xf32> to vector<1024x64xf32>
    %13 = arith.addf %11, %12 : vector<1024x64xf32>
    %cst_11 = arith.constant 0.000000e+00 : f32
    %14 = vector.broadcast %cst_11 : f32 to vector<1024x64xf32>
    %15 = arith.maximumf %13, %14 : vector<1024x64xf32>
    %c0_12 = arith.constant 0 : index
    %c0_13 = arith.constant 0 : index
    %16 = vector.load %arg6[%c0_12, %c0_13] : memref<64x128xbf16, #tpu.memory_space<vmem>>, vector<64x128xbf16>
    %c0_14 = arith.constant 0 : index
    %c0_15 = arith.constant 0 : index
    %17 = vector.load %arg7[%c0_14, %c0_15] : memref<1x128xf32, #tpu.memory_space<vmem>>, vector<1x128xf32>
    %18 = arith.truncf %15 : vector<1024x64xf32> to vector<1024x64xbf16>
    %cst_16 = arith.constant dense<0.000000e+00> : vector<1024x128xf32>
    %19 = tpu.matmul %18, %16, %cst_16 {dimension_numbers = #tpu.dot_dimension_numbers<[1], [0], [0], [1], [0, 0, 1, 1], [], []>} : vector<1024x64xbf16>, vector<64x128xbf16>, vector<1024x128xf32> -> vector<1024x128xf32>
    %20 = vector.broadcast %17 : vector<1x128xf32> to vector<1024x128xf32>
    %21 = arith.addf %19, %20 : vector<1024x128xf32>
    %cst_17 = arith.constant 0.000000e+00 : f32
    %22 = vector.broadcast %cst_17 : f32 to vector<1024x128xf32>
    %23 = arith.maximumf %21, %22 : vector<1024x128xf32>
    %24 = vector.shape_cast %23 : vector<1024x128xf32> to vector<64x16x128xf32>
    %cst_18 = arith.constant dense<0xFF800000> : vector<64x128xf32>
    %25 = vector.multi_reduction <maximumf>, %24, %cst_18 [1] : vector<64x16x128xf32> to vector<64x128xf32>
    %c0_19 = arith.constant 0 : index
    %c0_20 = arith.constant 0 : index
    %26 = vector.load %arg8[%c0_19, %c0_20] : memref<64x128xf32, #tpu.memory_space<vmem>>, vector<64x128xf32>
    tpu.vector_store %arg8[%c0_19, %c0_20], %25 {strides = array<i32>} : memref<64x128xf32, #tpu.memory_space<vmem>>, vector<64x128xf32>,
    return
  }
  func.func @transform_0(%arg0: i32) -> (i32, i32) {
    %c0_i32 = arith.constant 0 : i32
    %c0_i32_0 = arith.constant 0 : i32
    return %arg0, %c0_i32 : i32, i32
  }
  func.func @transform_1(%arg0: i32) -> (i32, i32) {
    %c0_i32 = arith.constant 0 : i32
    %c0_i32_0 = arith.constant 0 : i32
    %c0_i32_1 = arith.constant 0 : i32
    return %c0_i32, %c0_i32_0 : i32, i32
  }
  func.func @transform_2(%arg0: i32) -> (i32, i32) {
    %c0_i32 = arith.constant 0 : i32
    %c0_i32_0 = arith.constant 0 : i32
    %c0_i32_1 = arith.constant 0 : i32
    return %c0_i32, %c0_i32_0 : i32, i32
  }
  func.func @transform_3(%arg0: i32) -> (i32, i32) {
    %c0_i32 = arith.constant 0 : i32
    %c0_i32_0 = arith.constant 0 : i32
    %c0_i32_1 = arith.constant 0 : i32
    return %c0_i32, %c0_i32_0 : i32, i32
  }
  func.func @transform_4(%arg0: i32) -> (i32, i32) {
    %c0_i32 = arith.constant 0 : i32
    %c0_i32_0 = arith.constant 0 : i32
    %c0_i32_1 = arith.constant 0 : i32
    return %c0_i32, %c0_i32_0 : i32, i32
  }
  func.func @transform_5(%arg0: i32) -> (i32, i32) {
    %c0_i32 = arith.constant 0 : i32
    %c0_i32_0 = arith.constant 0 : i32
    %c0_i32_1 = arith.constant 0 : i32
    return %c0_i32, %c0_i32_0 : i32, i32
  }
  func.func @transform_6(%arg0: i32) -> (i32, i32) {
    %c0_i32 = arith.constant 0 : i32
    %c0_i32_0 = arith.constant 0 : i32
    %c0_i32_1 = arith.constant 0 : i32
    return %c0_i32, %c0_i32_0 : i32, i32
  }
  func.func @transform_7(%arg0: i32) -> (i32, i32) {
    %c0_i32 = arith.constant 0 : i32
    %c0_i32_0 = arith.constant 0 : i32
    return %arg0, %c0_i32 : i32, i32
  }
}

module attributes {stable_mosaic.version = 11 : i64} {
  func.func @_mlp_kernel(%arg0: i32, %arg1: memref<256x131xbf16, #tpu.memory_space<vmem>>, %arg2: memref<131x128xbf16, #tpu.memory_space<vmem>>, %arg3: memref<1x128xf32, #tpu.memory_space<vmem>>, %arg4: memref<128x128xbf16, #tpu.memory_space<vmem>>, %arg5: memref<1x128xf32, #tpu.memory_space<vmem>>, %arg6: memref<128x256xbf16, #tpu.memory_space<vmem>>, %arg7: memref<1x256xf32, #tpu.memory_space<vmem>>, %arg8: memref<32x256xf32, #tpu.memory_space<vmem>>) attributes {dimension_semantics = [#tpu.dimension_semantics<parallel>], iteration_bounds = array<i64: 2>, scalar_prefetch = 0 : i64, scratch_operands = 0 : i64, tpu.core_type = #tpu.core_type<tc>, window_params = [{transform_indices = @transform_0, window_bounds = array<i64: 256, 131>}, {pipeline_mode = #tpu.pipeline_mode<synchronous>, transform_indices = @transform_1, window_bounds = array<i64: 131, 128>}, {pipeline_mode = #tpu.pipeline_mode<synchronous>, transform_indices = @transform_2, window_bounds = array<i64: 1, 128>}, {pipeline_mode = #tpu.pipeline_mode<synchronous>, transform_indices = @transform_3, window_bounds = array<i64: 128, 128>}, {pipeline_mode = #tpu.pipeline_mode<synchronous>, transform_indices = @transform_4, window_bounds = array<i64: 1, 128>}, {pipeline_mode = #tpu.pipeline_mode<synchronous>, transform_indices = @transform_5, window_bounds = array<i64: 128, 256>}, {pipeline_mode = #tpu.pipeline_mode<synchronous>, transform_indices = @transform_6, window_bounds = array<i64: 1, 256>}, {transform_indices = @transform_7, window_bounds = array<i64: 32, 256>}]} {
    %c0 = arith.constant 0 : index
    %c0_0 = arith.constant 0 : index
    %0 = vector.load %arg1[%c0, %c0_0] : memref<256x131xbf16, #tpu.memory_space<vmem>>, vector<256x131xbf16>
    %c0_1 = arith.constant 0 : index
    %c0_2 = arith.constant 0 : index
    %1 = vector.load %arg2[%c0_1, %c0_2] : memref<131x128xbf16, #tpu.memory_space<vmem>>, vector<131x128xbf16>
    %c0_3 = arith.constant 0 : index
    %c0_4 = arith.constant 0 : index
    %2 = vector.load %arg3[%c0_3, %c0_4] : memref<1x128xf32, #tpu.memory_space<vmem>>, vector<1x128xf32>
    %cst = arith.constant dense<0.000000e+00> : vector<256x128xf32>
    %3 = tpu.matmul %0, %1, %cst {dimension_numbers = #tpu.dot_dimension_numbers<[1], [0], [0], [1], [0, 0, 1, 1], [], []>} : vector<256x131xbf16>, vector<131x128xbf16>, vector<256x128xf32> -> vector<256x128xf32>
    %4 = vector.broadcast %2 : vector<1x128xf32> to vector<256x128xf32>
    %5 = arith.addf %3, %4 : vector<256x128xf32>
    %cst_5 = arith.constant 0.000000e+00 : f32
    %6 = vector.broadcast %cst_5 : f32 to vector<256x128xf32>
    %7 = arith.maximumf %5, %6 : vector<256x128xf32>
    %c0_6 = arith.constant 0 : index
    %c0_7 = arith.constant 0 : index
    %8 = vector.load %arg4[%c0_6, %c0_7] : memref<128x128xbf16, #tpu.memory_space<vmem>>, vector<128x128xbf16>
    %c0_8 = arith.constant 0 : index
    %c0_9 = arith.constant 0 : index
    %9 = vector.load %arg5[%c0_8, %c0_9] : memref<1x128xf32, #tpu.memory_space<vmem>>, vector<1x128xf32>
    %10 = arith.truncf %7 : vector<256x128xf32> to vector<256x128xbf16>
    %cst_10 = arith.constant dense<0.000000e+00> : vector<256x128xf32>
    %11 = tpu.matmul %10, %8, %cst_10 {dimension_numbers = #tpu.dot_dimension_numbers<[1], [0], [0], [1], [0, 0, 1, 1], [], []>} : vector<256x128xbf16>, vector<128x128xbf16>, vector<256x128xf32> -> vector<256x128xf32>
    %12 = vector.broadcast %9 : vector<1x128xf32> to vector<256x128xf32>
    %13 = arith.addf %11, %12 : vector<256x128xf32>
    %cst_11 = arith.constant 0.000000e+00 : f32
    %14 = vector.broadcast %cst_11 : f32 to vector<256x128xf32>
    %15 = arith.maximumf %13, %14 : vector<256x128xf32>
    %c0_12 = arith.constant 0 : index
    %c0_13 = arith.constant 0 : index
    %16 = vector.load %arg6[%c0_12, %c0_13] : memref<128x256xbf16, #tpu.memory_space<vmem>>, vector<128x256xbf16>
    %c0_14 = arith.constant 0 : index
    %c0_15 = arith.constant 0 : index
    %17 = vector.load %arg7[%c0_14, %c0_15] : memref<1x256xf32, #tpu.memory_space<vmem>>, vector<1x256xf32>
    %18 = arith.truncf %15 : vector<256x128xf32> to vector<256x128xbf16>
    %cst_16 = arith.constant dense<0.000000e+00> : vector<256x256xf32>
    %19 = tpu.matmul %18, %16, %cst_16 {dimension_numbers = #tpu.dot_dimension_numbers<[1], [0], [0], [1], [0, 0, 1, 1], [], []>} : vector<256x128xbf16>, vector<128x256xbf16>, vector<256x256xf32> -> vector<256x256xf32>
    %20 = vector.broadcast %17 : vector<1x256xf32> to vector<256x256xf32>
    %21 = arith.addf %19, %20 : vector<256x256xf32>
    %cst_17 = arith.constant 0.000000e+00 : f32
    %22 = vector.broadcast %cst_17 : f32 to vector<256x256xf32>
    %23 = arith.maximumf %21, %22 : vector<256x256xf32>
    %24 = vector.shape_cast %23 : vector<256x256xf32> to vector<32x8x256xf32>
    %cst_18 = arith.constant dense<0xFF800000> : vector<32x256xf32>
    %25 = vector.multi_reduction <maximumf>, %24, %cst_18 [1] : vector<32x8x256xf32> to vector<32x256xf32>
    %c0_19 = arith.constant 0 : index
    %c0_20 = arith.constant 0 : index
    %26 = vector.load %arg8[%c0_19, %c0_20] : memref<32x256xf32, #tpu.memory_space<vmem>>, vector<32x256xf32>
    tpu.vector_store %arg8[%c0_19, %c0_20], %25 {strides = array<i32>} : memref<32x256xf32, #tpu.memory_space<vmem>>, vector<32x256xf32>,
    return
  }
  func.func @transform_0(%arg0: i32) -> (i32, i32) {
    %c0_i32 = arith.constant 0 : i32
    %c0_i32_0 = arith.constant 0 : i32
    return %arg0, %c0_i32 : i32, i32
  }
  func.func @transform_1(%arg0: i32) -> (i32, i32) {
    %c0_i32 = arith.constant 0 : i32
    %c0_i32_0 = arith.constant 0 : i32
    %c0_i32_1 = arith.constant 0 : i32
    return %c0_i32, %c0_i32_0 : i32, i32
  }
  func.func @transform_2(%arg0: i32) -> (i32, i32) {
    %c0_i32 = arith.constant 0 : i32
    %c0_i32_0 = arith.constant 0 : i32
    %c0_i32_1 = arith.constant 0 : i32
    return %c0_i32, %c0_i32_0 : i32, i32
  }
  func.func @transform_3(%arg0: i32) -> (i32, i32) {
    %c0_i32 = arith.constant 0 : i32
    %c0_i32_0 = arith.constant 0 : i32
    %c0_i32_1 = arith.constant 0 : i32
    return %c0_i32, %c0_i32_0 : i32, i32
  }
  func.func @transform_4(%arg0: i32) -> (i32, i32) {
    %c0_i32 = arith.constant 0 : i32
    %c0_i32_0 = arith.constant 0 : i32
    %c0_i32_1 = arith.constant 0 : i32
    return %c0_i32, %c0_i32_0 : i32, i32
  }
  func.func @transform_5(%arg0: i32) -> (i32, i32) {
    %c0_i32 = arith.constant 0 : i32
    %c0_i32_0 = arith.constant 0 : i32
    %c0_i32_1 = arith.constant 0 : i32
    return %c0_i32, %c0_i32_0 : i32, i32
  }
  func.func @transform_6(%arg0: i32) -> (i32, i32) {
    %c0_i32 = arith.constant 0 : i32
    %c0_i32_0 = arith.constant 0 : i32
    %c0_i32_1 = arith.constant 0 : i32
    return %c0_i32, %c0_i32_0 : i32, i32
  }
  func.func @transform_7(%arg0: i32) -> (i32, i32) {
    %c0_i32 = arith.constant 0 : i32
    %c0_i32_0 = arith.constant 0 : i32
    return %arg0, %c0_i32 : i32, i32
  }
}

module attributes {stable_mosaic.version = 11 : i64} {
  func.func @_mlp_kernel(%arg0: i32, %arg1: memref<128x259xbf16, #tpu.memory_space<vmem>>, %arg2: memref<259x128xbf16, #tpu.memory_space<vmem>>, %arg3: memref<1x128xf32, #tpu.memory_space<vmem>>, %arg4: memref<128x128xbf16, #tpu.memory_space<vmem>>, %arg5: memref<1x128xf32, #tpu.memory_space<vmem>>, %arg6: memref<128x256xbf16, #tpu.memory_space<vmem>>, %arg7: memref<1x256xf32, #tpu.memory_space<vmem>>, %arg8: memref<16x256xf32, #tpu.memory_space<vmem>>) attributes {dimension_semantics = [#tpu.dimension_semantics<parallel>], iteration_bounds = array<i64: 2>, scalar_prefetch = 0 : i64, scratch_operands = 0 : i64, tpu.core_type = #tpu.core_type<tc>, window_params = [{transform_indices = @transform_0, window_bounds = array<i64: 128, 259>}, {pipeline_mode = #tpu.pipeline_mode<synchronous>, transform_indices = @transform_1, window_bounds = array<i64: 259, 128>}, {pipeline_mode = #tpu.pipeline_mode<synchronous>, transform_indices = @transform_2, window_bounds = array<i64: 1, 128>}, {pipeline_mode = #tpu.pipeline_mode<synchronous>, transform_indices = @transform_3, window_bounds = array<i64: 128, 128>}, {pipeline_mode = #tpu.pipeline_mode<synchronous>, transform_indices = @transform_4, window_bounds = array<i64: 1, 128>}, {pipeline_mode = #tpu.pipeline_mode<synchronous>, transform_indices = @transform_5, window_bounds = array<i64: 128, 256>}, {pipeline_mode = #tpu.pipeline_mode<synchronous>, transform_indices = @transform_6, window_bounds = array<i64: 1, 256>}, {transform_indices = @transform_7, window_bounds = array<i64: 16, 256>}]} {
    %c0 = arith.constant 0 : index
    %c0_0 = arith.constant 0 : index
    %0 = vector.load %arg1[%c0, %c0_0] : memref<128x259xbf16, #tpu.memory_space<vmem>>, vector<128x259xbf16>
    %c0_1 = arith.constant 0 : index
    %c0_2 = arith.constant 0 : index
    %1 = vector.load %arg2[%c0_1, %c0_2] : memref<259x128xbf16, #tpu.memory_space<vmem>>, vector<259x128xbf16>
    %c0_3 = arith.constant 0 : index
    %c0_4 = arith.constant 0 : index
    %2 = vector.load %arg3[%c0_3, %c0_4] : memref<1x128xf32, #tpu.memory_space<vmem>>, vector<1x128xf32>
    %cst = arith.constant dense<0.000000e+00> : vector<128x128xf32>
    %3 = tpu.matmul %0, %1, %cst {dimension_numbers = #tpu.dot_dimension_numbers<[1], [0], [0], [1], [0, 0, 1, 1], [], []>} : vector<128x259xbf16>, vector<259x128xbf16>, vector<128x128xf32> -> vector<128x128xf32>
    %4 = vector.broadcast %2 : vector<1x128xf32> to vector<128x128xf32>
    %5 = arith.addf %3, %4 : vector<128x128xf32>
    %cst_5 = arith.constant 0.000000e+00 : f32
    %6 = vector.broadcast %cst_5 : f32 to vector<128x128xf32>
    %7 = arith.maximumf %5, %6 : vector<128x128xf32>
    %c0_6 = arith.constant 0 : index
    %c0_7 = arith.constant 0 : index
    %8 = vector.load %arg4[%c0_6, %c0_7] : memref<128x128xbf16, #tpu.memory_space<vmem>>, vector<128x128xbf16>
    %c0_8 = arith.constant 0 : index
    %c0_9 = arith.constant 0 : index
    %9 = vector.load %arg5[%c0_8, %c0_9] : memref<1x128xf32, #tpu.memory_space<vmem>>, vector<1x128xf32>
    %10 = arith.truncf %7 : vector<128x128xf32> to vector<128x128xbf16>
    %cst_10 = arith.constant dense<0.000000e+00> : vector<128x128xf32>
    %11 = tpu.matmul %10, %8, %cst_10 {dimension_numbers = #tpu.dot_dimension_numbers<[1], [0], [0], [1], [0, 0, 1, 1], [], []>} : vector<128x128xbf16>, vector<128x128xbf16>, vector<128x128xf32> -> vector<128x128xf32>
    %12 = vector.broadcast %9 : vector<1x128xf32> to vector<128x128xf32>
    %13 = arith.addf %11, %12 : vector<128x128xf32>
    %cst_11 = arith.constant 0.000000e+00 : f32
    %14 = vector.broadcast %cst_11 : f32 to vector<128x128xf32>
    %15 = arith.maximumf %13, %14 : vector<128x128xf32>
    %c0_12 = arith.constant 0 : index
    %c0_13 = arith.constant 0 : index
    %16 = vector.load %arg6[%c0_12, %c0_13] : memref<128x256xbf16, #tpu.memory_space<vmem>>, vector<128x256xbf16>
    %c0_14 = arith.constant 0 : index
    %c0_15 = arith.constant 0 : index
    %17 = vector.load %arg7[%c0_14, %c0_15] : memref<1x256xf32, #tpu.memory_space<vmem>>, vector<1x256xf32>
    %18 = arith.truncf %15 : vector<128x128xf32> to vector<128x128xbf16>
    %cst_16 = arith.constant dense<0.000000e+00> : vector<128x256xf32>
    %19 = tpu.matmul %18, %16, %cst_16 {dimension_numbers = #tpu.dot_dimension_numbers<[1], [0], [0], [1], [0, 0, 1, 1], [], []>} : vector<128x128xbf16>, vector<128x256xbf16>, vector<128x256xf32> -> vector<128x256xf32>
    %20 = vector.broadcast %17 : vector<1x256xf32> to vector<128x256xf32>
    %21 = arith.addf %19, %20 : vector<128x256xf32>
    %cst_17 = arith.constant 0.000000e+00 : f32
    %22 = vector.broadcast %cst_17 : f32 to vector<128x256xf32>
    %23 = arith.maximumf %21, %22 : vector<128x256xf32>
    %24 = vector.shape_cast %23 : vector<128x256xf32> to vector<16x8x256xf32>
    %cst_18 = arith.constant dense<0xFF800000> : vector<16x256xf32>
    %25 = vector.multi_reduction <maximumf>, %24, %cst_18 [1] : vector<16x8x256xf32> to vector<16x256xf32>
    %c0_19 = arith.constant 0 : index
    %c0_20 = arith.constant 0 : index
    %26 = vector.load %arg8[%c0_19, %c0_20] : memref<16x256xf32, #tpu.memory_space<vmem>>, vector<16x256xf32>
    tpu.vector_store %arg8[%c0_19, %c0_20], %25 {strides = array<i32>} : memref<16x256xf32, #tpu.memory_space<vmem>>, vector<16x256xf32>,
    return
  }
  func.func @transform_0(%arg0: i32) -> (i32, i32) {
    %c0_i32 = arith.constant 0 : i32
    %c0_i32_0 = arith.constant 0 : i32
    return %arg0, %c0_i32 : i32, i32
  }
  func.func @transform_1(%arg0: i32) -> (i32, i32) {
    %c0_i32 = arith.constant 0 : i32
    %c0_i32_0 = arith.constant 0 : i32
    %c0_i32_1 = arith.constant 0 : i32
    return %c0_i32, %c0_i32_0 : i32, i32
  }
  func.func @transform_2(%arg0: i32) -> (i32, i32) {
    %c0_i32 = arith.constant 0 : i32
    %c0_i32_0 = arith.constant 0 : i32
    %c0_i32_1 = arith.constant 0 : i32
    return %c0_i32, %c0_i32_0 : i32, i32
  }
  func.func @transform_3(%arg0: i32) -> (i32, i32) {
    %c0_i32 = arith.constant 0 : i32
    %c0_i32_0 = arith.constant 0 : i32
    %c0_i32_1 = arith.constant 0 : i32
    return %c0_i32, %c0_i32_0 : i32, i32
  }
  func.func @transform_4(%arg0: i32) -> (i32, i32) {
    %c0_i32 = arith.constant 0 : i32
    %c0_i32_0 = arith.constant 0 : i32
    %c0_i32_1 = arith.constant 0 : i32
    return %c0_i32, %c0_i32_0 : i32, i32
  }
  func.func @transform_5(%arg0: i32) -> (i32, i32) {
    %c0_i32 = arith.constant 0 : i32
    %c0_i32_0 = arith.constant 0 : i32
    %c0_i32_1 = arith.constant 0 : i32
    return %c0_i32, %c0_i32_0 : i32, i32
  }
  func.func @transform_6(%arg0: i32) -> (i32, i32) {
    %c0_i32 = arith.constant 0 : i32
    %c0_i32_0 = arith.constant 0 : i32
    %c0_i32_1 = arith.constant 0 : i32
    return %c0_i32, %c0_i32_0 : i32, i32
  }
  func.func @transform_7(%arg0: i32) -> (i32, i32) {
    %c0_i32 = arith.constant 0 : i32
    %c0_i32_0 = arith.constant 0 : i32
    return %arg0, %c0_i32 : i32, i32
  }
}

module attributes {stable_mosaic.version = 11 : i64} {
  func.func @_mlp_kernel(%arg0: i32, %arg1: memref<64x259xbf16, #tpu.memory_space<vmem>>, %arg2: memref<259x128xbf16, #tpu.memory_space<vmem>>, %arg3: memref<1x128xf32, #tpu.memory_space<vmem>>, %arg4: memref<128x128xbf16, #tpu.memory_space<vmem>>, %arg5: memref<1x128xf32, #tpu.memory_space<vmem>>, %arg6: memref<128x256xbf16, #tpu.memory_space<vmem>>, %arg7: memref<1x256xf32, #tpu.memory_space<vmem>>, %arg8: memref<8x256xf32, #tpu.memory_space<vmem>>) attributes {dimension_semantics = [#tpu.dimension_semantics<parallel>], iteration_bounds = array<i64: 2>, scalar_prefetch = 0 : i64, scratch_operands = 0 : i64, tpu.core_type = #tpu.core_type<tc>, window_params = [{transform_indices = @transform_0, window_bounds = array<i64: 64, 259>}, {pipeline_mode = #tpu.pipeline_mode<synchronous>, transform_indices = @transform_1, window_bounds = array<i64: 259, 128>}, {pipeline_mode = #tpu.pipeline_mode<synchronous>, transform_indices = @transform_2, window_bounds = array<i64: 1, 128>}, {pipeline_mode = #tpu.pipeline_mode<synchronous>, transform_indices = @transform_3, window_bounds = array<i64: 128, 128>}, {pipeline_mode = #tpu.pipeline_mode<synchronous>, transform_indices = @transform_4, window_bounds = array<i64: 1, 128>}, {pipeline_mode = #tpu.pipeline_mode<synchronous>, transform_indices = @transform_5, window_bounds = array<i64: 128, 256>}, {pipeline_mode = #tpu.pipeline_mode<synchronous>, transform_indices = @transform_6, window_bounds = array<i64: 1, 256>}, {transform_indices = @transform_7, window_bounds = array<i64: 8, 256>}]} {
    %c0 = arith.constant 0 : index
    %c0_0 = arith.constant 0 : index
    %0 = vector.load %arg1[%c0, %c0_0] : memref<64x259xbf16, #tpu.memory_space<vmem>>, vector<64x259xbf16>
    %c0_1 = arith.constant 0 : index
    %c0_2 = arith.constant 0 : index
    %1 = vector.load %arg2[%c0_1, %c0_2] : memref<259x128xbf16, #tpu.memory_space<vmem>>, vector<259x128xbf16>
    %c0_3 = arith.constant 0 : index
    %c0_4 = arith.constant 0 : index
    %2 = vector.load %arg3[%c0_3, %c0_4] : memref<1x128xf32, #tpu.memory_space<vmem>>, vector<1x128xf32>
    %cst = arith.constant dense<0.000000e+00> : vector<64x128xf32>
    %3 = tpu.matmul %0, %1, %cst {dimension_numbers = #tpu.dot_dimension_numbers<[1], [0], [0], [1], [0, 0, 1, 1], [], []>} : vector<64x259xbf16>, vector<259x128xbf16>, vector<64x128xf32> -> vector<64x128xf32>
    %4 = vector.broadcast %2 : vector<1x128xf32> to vector<64x128xf32>
    %5 = arith.addf %3, %4 : vector<64x128xf32>
    %cst_5 = arith.constant 0.000000e+00 : f32
    %6 = vector.broadcast %cst_5 : f32 to vector<64x128xf32>
    %7 = arith.maximumf %5, %6 : vector<64x128xf32>
    %c0_6 = arith.constant 0 : index
    %c0_7 = arith.constant 0 : index
    %8 = vector.load %arg4[%c0_6, %c0_7] : memref<128x128xbf16, #tpu.memory_space<vmem>>, vector<128x128xbf16>
    %c0_8 = arith.constant 0 : index
    %c0_9 = arith.constant 0 : index
    %9 = vector.load %arg5[%c0_8, %c0_9] : memref<1x128xf32, #tpu.memory_space<vmem>>, vector<1x128xf32>
    %10 = arith.truncf %7 : vector<64x128xf32> to vector<64x128xbf16>
    %cst_10 = arith.constant dense<0.000000e+00> : vector<64x128xf32>
    %11 = tpu.matmul %10, %8, %cst_10 {dimension_numbers = #tpu.dot_dimension_numbers<[1], [0], [0], [1], [0, 0, 1, 1], [], []>} : vector<64x128xbf16>, vector<128x128xbf16>, vector<64x128xf32> -> vector<64x128xf32>
    %12 = vector.broadcast %9 : vector<1x128xf32> to vector<64x128xf32>
    %13 = arith.addf %11, %12 : vector<64x128xf32>
    %cst_11 = arith.constant 0.000000e+00 : f32
    %14 = vector.broadcast %cst_11 : f32 to vector<64x128xf32>
    %15 = arith.maximumf %13, %14 : vector<64x128xf32>
    %c0_12 = arith.constant 0 : index
    %c0_13 = arith.constant 0 : index
    %16 = vector.load %arg6[%c0_12, %c0_13] : memref<128x256xbf16, #tpu.memory_space<vmem>>, vector<128x256xbf16>
    %c0_14 = arith.constant 0 : index
    %c0_15 = arith.constant 0 : index
    %17 = vector.load %arg7[%c0_14, %c0_15] : memref<1x256xf32, #tpu.memory_space<vmem>>, vector<1x256xf32>
    %18 = arith.truncf %15 : vector<64x128xf32> to vector<64x128xbf16>
    %cst_16 = arith.constant dense<0.000000e+00> : vector<64x256xf32>
    %19 = tpu.matmul %18, %16, %cst_16 {dimension_numbers = #tpu.dot_dimension_numbers<[1], [0], [0], [1], [0, 0, 1, 1], [], []>} : vector<64x128xbf16>, vector<128x256xbf16>, vector<64x256xf32> -> vector<64x256xf32>
    %20 = vector.broadcast %17 : vector<1x256xf32> to vector<64x256xf32>
    %21 = arith.addf %19, %20 : vector<64x256xf32>
    %cst_17 = arith.constant 0.000000e+00 : f32
    %22 = vector.broadcast %cst_17 : f32 to vector<64x256xf32>
    %23 = arith.maximumf %21, %22 : vector<64x256xf32>
    %24 = vector.shape_cast %23 : vector<64x256xf32> to vector<8x8x256xf32>
    %cst_18 = arith.constant dense<0xFF800000> : vector<8x256xf32>
    %25 = vector.multi_reduction <maximumf>, %24, %cst_18 [1] : vector<8x8x256xf32> to vector<8x256xf32>
    %c0_19 = arith.constant 0 : index
    %c0_20 = arith.constant 0 : index
    %26 = vector.load %arg8[%c0_19, %c0_20] : memref<8x256xf32, #tpu.memory_space<vmem>>, vector<8x256xf32>
    tpu.vector_store %arg8[%c0_19, %c0_20], %25 {strides = array<i32>} : memref<8x256xf32, #tpu.memory_space<vmem>>, vector<8x256xf32>,
    return
  }
  func.func @transform_0(%arg0: i32) -> (i32, i32) {
    %c0_i32 = arith.constant 0 : i32
    %c0_i32_0 = arith.constant 0 : i32
    return %arg0, %c0_i32 : i32, i32
  }
  func.func @transform_1(%arg0: i32) -> (i32, i32) {
    %c0_i32 = arith.constant 0 : i32
    %c0_i32_0 = arith.constant 0 : i32
    %c0_i32_1 = arith.constant 0 : i32
    return %c0_i32, %c0_i32_0 : i32, i32
  }
  func.func @transform_2(%arg0: i32) -> (i32, i32) {
    %c0_i32 = arith.constant 0 : i32
    %c0_i32_0 = arith.constant 0 : i32
    %c0_i32_1 = arith.constant 0 : i32
    return %c0_i32, %c0_i32_0 : i32, i32
  }
  func.func @transform_3(%arg0: i32) -> (i32, i32) {
    %c0_i32 = arith.constant 0 : i32
    %c0_i32_0 = arith.constant 0 : i32
    %c0_i32_1 = arith.constant 0 : i32
    return %c0_i32, %c0_i32_0 : i32, i32
  }
  func.func @transform_4(%arg0: i32) -> (i32, i32) {
    %c0_i32 = arith.constant 0 : i32
    %c0_i32_0 = arith.constant 0 : i32
    %c0_i32_1 = arith.constant 0 : i32
    return %c0_i32, %c0_i32_0 : i32, i32
  }
  func.func @transform_5(%arg0: i32) -> (i32, i32) {
    %c0_i32 = arith.constant 0 : i32
    %c0_i32_0 = arith.constant 0 : i32
    %c0_i32_1 = arith.constant 0 : i32
    return %c0_i32, %c0_i32_0 : i32, i32
  }
  func.func @transform_6(%arg0: i32) -> (i32, i32) {
    %c0_i32 = arith.constant 0 : i32
    %c0_i32_0 = arith.constant 0 : i32
    %c0_i32_1 = arith.constant 0 : i32
    return %c0_i32, %c0_i32_0 : i32, i32
  }
  func.func @transform_7(%arg0: i32) -> (i32, i32) {
    %c0_i32 = arith.constant 0 : i32
    %c0_i32_0 = arith.constant 0 : i32
    return %arg0, %c0_i32 : i32, i32
  }
}

module attributes {stable_mosaic.version = 11 : i64} {
  func.func @_mlp_kernel(%arg0: i32, %arg1: memref<16x512xbf16, #tpu.memory_space<vmem>>, %arg2: memref<512x256xbf16, #tpu.memory_space<vmem>>, %arg3: memref<1x256xf32, #tpu.memory_space<vmem>>, %arg4: memref<256x256xbf16, #tpu.memory_space<vmem>>, %arg5: memref<1x256xf32, #tpu.memory_space<vmem>>, %arg6: memref<16x256xf32, #tpu.memory_space<vmem>>) attributes {dimension_semantics = [#tpu.dimension_semantics<parallel>], iteration_bounds = array<i64: 2>, scalar_prefetch = 0 : i64, scratch_operands = 0 : i64, tpu.core_type = #tpu.core_type<tc>, window_params = [{transform_indices = @transform_0, window_bounds = array<i64: 16, 512>}, {pipeline_mode = #tpu.pipeline_mode<synchronous>, transform_indices = @transform_1, window_bounds = array<i64: 512, 256>}, {pipeline_mode = #tpu.pipeline_mode<synchronous>, transform_indices = @transform_2, window_bounds = array<i64: 1, 256>}, {pipeline_mode = #tpu.pipeline_mode<synchronous>, transform_indices = @transform_3, window_bounds = array<i64: 256, 256>}, {pipeline_mode = #tpu.pipeline_mode<synchronous>, transform_indices = @transform_4, window_bounds = array<i64: 1, 256>}, {transform_indices = @transform_5, window_bounds = array<i64: 16, 256>}]} {
    %c0 = arith.constant 0 : index
    %c0_0 = arith.constant 0 : index
    %0 = vector.load %arg1[%c0, %c0_0] : memref<16x512xbf16, #tpu.memory_space<vmem>>, vector<16x512xbf16>
    %c0_1 = arith.constant 0 : index
    %c0_2 = arith.constant 0 : index
    %1 = vector.load %arg2[%c0_1, %c0_2] : memref<512x256xbf16, #tpu.memory_space<vmem>>, vector<512x256xbf16>
    %c0_3 = arith.constant 0 : index
    %c0_4 = arith.constant 0 : index
    %2 = vector.load %arg3[%c0_3, %c0_4] : memref<1x256xf32, #tpu.memory_space<vmem>>, vector<1x256xf32>
    %cst = arith.constant dense<0.000000e+00> : vector<16x256xf32>
    %3 = tpu.matmul %0, %1, %cst {dimension_numbers = #tpu.dot_dimension_numbers<[1], [0], [0], [1], [0, 0, 1, 1], [], []>} : vector<16x512xbf16>, vector<512x256xbf16>, vector<16x256xf32> -> vector<16x256xf32>
    %4 = vector.broadcast %2 : vector<1x256xf32> to vector<16x256xf32>
    %5 = arith.addf %3, %4 : vector<16x256xf32>
    %cst_5 = arith.constant 0.000000e+00 : f32
    %6 = vector.broadcast %cst_5 : f32 to vector<16x256xf32>
    %7 = arith.maximumf %5, %6 : vector<16x256xf32>
    %c0_6 = arith.constant 0 : index
    %c0_7 = arith.constant 0 : index
    %8 = vector.load %arg4[%c0_6, %c0_7] : memref<256x256xbf16, #tpu.memory_space<vmem>>, vector<256x256xbf16>
    %c0_8 = arith.constant 0 : index
    %c0_9 = arith.constant 0 : index
    %9 = vector.load %arg5[%c0_8, %c0_9] : memref<1x256xf32, #tpu.memory_space<vmem>>, vector<1x256xf32>
    %10 = arith.truncf %7 : vector<16x256xf32> to vector<16x256xbf16>
    %cst_10 = arith.constant dense<0.000000e+00> : vector<16x256xf32>
    %11 = tpu.matmul %10, %8, %cst_10 {dimension_numbers = #tpu.dot_dimension_numbers<[1], [0], [0], [1], [0, 0, 1, 1], [], []>} : vector<16x256xbf16>, vector<256x256xbf16>, vector<16x256xf32> -> vector<16x256xf32>
    %12 = vector.broadcast %9 : vector<1x256xf32> to vector<16x256xf32>
    %13 = arith.addf %11, %12 : vector<16x256xf32>
    %cst_11 = arith.constant 0.000000e+00 : f32
    %14 = vector.broadcast %cst_11 : f32 to vector<16x256xf32>
    %15 = arith.maximumf %13, %14 : vector<16x256xf32>
    %c0_12 = arith.constant 0 : index
    %c0_13 = arith.constant 0 : index
    %16 = vector.load %arg6[%c0_12, %c0_13] : memref<16x256xf32, #tpu.memory_space<vmem>>, vector<16x256xf32>
    tpu.vector_store %arg6[%c0_12, %c0_13], %15 {strides = array<i32>} : memref<16x256xf32, #tpu.memory_space<vmem>>, vector<16x256xf32>,
    return
  }
  func.func @transform_0(%arg0: i32) -> (i32, i32) {
    %c0_i32 = arith.constant 0 : i32
    %c0_i32_0 = arith.constant 0 : i32
    return %arg0, %c0_i32 : i32, i32
  }
  func.func @transform_1(%arg0: i32) -> (i32, i32) {
    %c0_i32 = arith.constant 0 : i32
    %c0_i32_0 = arith.constant 0 : i32
    %c0_i32_1 = arith.constant 0 : i32
    return %c0_i32, %c0_i32_0 : i32, i32
  }
  func.func @transform_2(%arg0: i32) -> (i32, i32) {
    %c0_i32 = arith.constant 0 : i32
    %c0_i32_0 = arith.constant 0 : i32
    %c0_i32_1 = arith.constant 0 : i32
    return %c0_i32, %c0_i32_0 : i32, i32
  }
  func.func @transform_3(%arg0: i32) -> (i32, i32) {
    %c0_i32 = arith.constant 0 : i32
    %c0_i32_0 = arith.constant 0 : i32
    %c0_i32_1 = arith.constant 0 : i32
    return %c0_i32, %c0_i32_0 : i32, i32
  }
  func.func @transform_4(%arg0: i32) -> (i32, i32) {
    %c0_i32 = arith.constant 0 : i32
    %c0_i32_0 = arith.constant 0 : i32
    %c0_i32_1 = arith.constant 0 : i32
    return %c0_i32, %c0_i32_0 : i32, i32
  }
  func.func @transform_5(%arg0: i32) -> (i32, i32) {
    %c0_i32 = arith.constant 0 : i32
    %c0_i32_0 = arith.constant 0 : i32
    return %arg0, %c0_i32 : i32, i32
  }
}

module attributes {stable_mosaic.version = 11 : i64} {
  func.func @_mlp_kernel(%arg0: i32, %arg1: memref<32x512xbf16, #tpu.memory_space<vmem>>, %arg2: memref<512x256xbf16, #tpu.memory_space<vmem>>, %arg3: memref<1x256xf32, #tpu.memory_space<vmem>>, %arg4: memref<256x384xbf16, #tpu.memory_space<vmem>>, %arg5: memref<1x384xf32, #tpu.memory_space<vmem>>, %arg6: memref<32x384xf32, #tpu.memory_space<vmem>>) attributes {dimension_semantics = [#tpu.dimension_semantics<parallel>], iteration_bounds = array<i64: 2>, scalar_prefetch = 0 : i64, scratch_operands = 0 : i64, tpu.core_type = #tpu.core_type<tc>, window_params = [{transform_indices = @transform_0, window_bounds = array<i64: 32, 512>}, {pipeline_mode = #tpu.pipeline_mode<synchronous>, transform_indices = @transform_1, window_bounds = array<i64: 512, 256>}, {pipeline_mode = #tpu.pipeline_mode<synchronous>, transform_indices = @transform_2, window_bounds = array<i64: 1, 256>}, {pipeline_mode = #tpu.pipeline_mode<synchronous>, transform_indices = @transform_3, window_bounds = array<i64: 256, 384>}, {pipeline_mode = #tpu.pipeline_mode<synchronous>, transform_indices = @transform_4, window_bounds = array<i64: 1, 384>}, {transform_indices = @transform_5, window_bounds = array<i64: 32, 384>}]} {
    %c0 = arith.constant 0 : index
    %c0_0 = arith.constant 0 : index
    %0 = vector.load %arg1[%c0, %c0_0] : memref<32x512xbf16, #tpu.memory_space<vmem>>, vector<32x512xbf16>
    %c0_1 = arith.constant 0 : index
    %c0_2 = arith.constant 0 : index
    %1 = vector.load %arg2[%c0_1, %c0_2] : memref<512x256xbf16, #tpu.memory_space<vmem>>, vector<512x256xbf16>
    %c0_3 = arith.constant 0 : index
    %c0_4 = arith.constant 0 : index
    %2 = vector.load %arg3[%c0_3, %c0_4] : memref<1x256xf32, #tpu.memory_space<vmem>>, vector<1x256xf32>
    %cst = arith.constant dense<0.000000e+00> : vector<32x256xf32>
    %3 = tpu.matmul %0, %1, %cst {dimension_numbers = #tpu.dot_dimension_numbers<[1], [0], [0], [1], [0, 0, 1, 1], [], []>} : vector<32x512xbf16>, vector<512x256xbf16>, vector<32x256xf32> -> vector<32x256xf32>
    %4 = vector.broadcast %2 : vector<1x256xf32> to vector<32x256xf32>
    %5 = arith.addf %3, %4 : vector<32x256xf32>
    %cst_5 = arith.constant 0.000000e+00 : f32
    %6 = vector.broadcast %cst_5 : f32 to vector<32x256xf32>
    %7 = arith.maximumf %5, %6 : vector<32x256xf32>
    %c0_6 = arith.constant 0 : index
    %c0_7 = arith.constant 0 : index
    %8 = vector.load %arg4[%c0_6, %c0_7] : memref<256x384xbf16, #tpu.memory_space<vmem>>, vector<256x384xbf16>
    %c0_8 = arith.constant 0 : index
    %c0_9 = arith.constant 0 : index
    %9 = vector.load %arg5[%c0_8, %c0_9] : memref<1x384xf32, #tpu.memory_space<vmem>>, vector<1x384xf32>
    %10 = arith.truncf %7 : vector<32x256xf32> to vector<32x256xbf16>
    %cst_10 = arith.constant dense<0.000000e+00> : vector<32x384xf32>
    %11 = tpu.matmul %10, %8, %cst_10 {dimension_numbers = #tpu.dot_dimension_numbers<[1], [0], [0], [1], [0, 0, 1, 1], [], []>} : vector<32x256xbf16>, vector<256x384xbf16>, vector<32x384xf32> -> vector<32x384xf32>
    %12 = vector.broadcast %9 : vector<1x384xf32> to vector<32x384xf32>
    %13 = arith.addf %11, %12 : vector<32x384xf32>
    %cst_11 = arith.constant 0.000000e+00 : f32
    %14 = vector.broadcast %cst_11 : f32 to vector<32x384xf32>
    %15 = arith.maximumf %13, %14 : vector<32x384xf32>
    %c0_12 = arith.constant 0 : index
    %c0_13 = arith.constant 0 : index
    %16 = vector.load %arg6[%c0_12, %c0_13] : memref<32x384xf32, #tpu.memory_space<vmem>>, vector<32x384xf32>
    tpu.vector_store %arg6[%c0_12, %c0_13], %15 {strides = array<i32>} : memref<32x384xf32, #tpu.memory_space<vmem>>, vector<32x384xf32>,
    return
  }
  func.func @transform_0(%arg0: i32) -> (i32, i32) {
    %c0_i32 = arith.constant 0 : i32
    %c0_i32_0 = arith.constant 0 : i32
    return %arg0, %c0_i32 : i32, i32
  }
  func.func @transform_1(%arg0: i32) -> (i32, i32) {
    %c0_i32 = arith.constant 0 : i32
    %c0_i32_0 = arith.constant 0 : i32
    %c0_i32_1 = arith.constant 0 : i32
    return %c0_i32, %c0_i32_0 : i32, i32
  }
  func.func @transform_2(%arg0: i32) -> (i32, i32) {
    %c0_i32 = arith.constant 0 : i32
    %c0_i32_0 = arith.constant 0 : i32
    %c0_i32_1 = arith.constant 0 : i32
    return %c0_i32, %c0_i32_0 : i32, i32
  }
  func.func @transform_3(%arg0: i32) -> (i32, i32) {
    %c0_i32 = arith.constant 0 : i32
    %c0_i32_0 = arith.constant 0 : i32
    %c0_i32_1 = arith.constant 0 : i32
    return %c0_i32, %c0_i32_0 : i32, i32
  }
  func.func @transform_4(%arg0: i32) -> (i32, i32) {
    %c0_i32 = arith.constant 0 : i32
    %c0_i32_0 = arith.constant 0 : i32
    %c0_i32_1 = arith.constant 0 : i32
    return %c0_i32, %c0_i32_0 : i32, i32
  }
  func.func @transform_5(%arg0: i32) -> (i32, i32) {
    %c0_i32 = arith.constant 0 : i32
    %c0_i32_0 = arith.constant 0 : i32
    return %arg0, %c0_i32 : i32, i32
  }
}

</mosaic_0001>

<bundles_post_ra>
// kernel: backbone_forward.10
= control target key start
LH: loop header
LB: loop body
LE: loop exit
PB: predicated region body
PF: predicated region fallthrough
CT: control target
= control target key end

     0   :  { %s310_s6 = smov 0   ;;  %s362_s0 = inlined_call_operand.vmem [shape: f32[2,3,128], index: 0, kind: input, shape index: {}]   ;;  %s363_s1 = inlined_call_operand.vmem [shape: s32[2,1,64], index: 1, kind: output, shape index: {}]  }
   0x1 LB: > { %s238_s7 = sadd.s32 4294967295, %s288_s6   ;;  %p242_p0 = scmp.ge.s32.totalorder %s288_s6, 1  ;;  %s288_s6 = sphi %s310_s6, %s11_s6  }
   0x2   : > { %p86_p1 = scmp.lt.s32.totalorder %s288_s6, 3 }
   0x4   : > { %p87_p2 = pnand %p242_p0, %p86_p1 }
   0x5   : > { %p103_p3 = scmp.lt.s32.totalorder (!%p87_p2), %s238_s7, 1  ;;  %v111_v0 = vlaneseq (!%p87_p2)  ;;  %vm114_vm0 = vcmask (!%p87_p2), 516096   ;;  %v298_v1 = vmov (!%p87_p2), 1e+10   ;;  %v299_v2 = vmov (!%p87_p2), 0   ;;  %s333_s15 = smov (!%p87_p2), 0  }
   0x6   : > { %90 = sbr.rel (%p87_p2) target bundleno = 695 (0x2b7), region = 24  ;;  %113 = vst [vmem:[#allocation2] sm:$0x1] (!%p87_p2), %v298_v1  ;;  %115 = vst.msk [vmem:[#allocation3] sm:$0x1] (!%p87_p2), %vm114_vm0, %v299_v2  ;;  %s335_s16 = smov (!%p87_p2), 1  }
   0x7   : > { %v321_v3 = vand.u32 (!%p87_p2), 127, %v111_v0 }
   0xd   : > { %s365_s7 = smov (!%p103_p3, %s238_s7), 1 }
   0xe   : > { %s243_s8 = sshll.u32 %s365_s7, 2  ;;  %s109_s11 = scalar_lea.vmem %s363_s1, %s365_s7 }
   0xf   : > { %s106_s14 = scalar_lea.vmem %s362_s0, %s243_s8 }
  0x10   : > { %v331_v4 = vld [vmem:[%s106_s14] sm:$0x7] }
  0x11 LB: >> { %v123_v5 = vstv %s292_s15  ;;  %vm128_vm1 = vcmask 1042432   ;;  %v141_v17 = vld [vmem:[#allocation2] sm:$0x1]  ;;  %vm144_vm3 = vcmask 1040384   ;;  %v175_v41 = vstv %s296_s16  ;;  %v177_v42 = vld [vmem:[#allocation3] sm:$0x1]  ;;  %s296_s16 = sphi %s335_s16, %s121_s16   ;;  %s292_s15 = sphi %s333_s15, %s247_s15  }
  0x12   : >> { %vm124_vm2 = vcmp.eq.s32.totalorder %v321_v3, %v123_v5  ;;  %vm176_vm9 = vcmp.eq.s32.totalorder %v321_v3, %v175_v41  ;;  %s121_s16 = sadd.s32 1, %s296_s16  }
  0x13   : >> { %v127_v6 = vsel %vm124_vm2, %v331_v4, 0.0  ;;  %p118_p4 = scmp.ge.s32.totalorder %s121_s16, 64  }
  0x14   : >> { %v129_v7 = vsel %vm128_vm1, %v127_v6, 0.0 }
  0x15   : >> { %130 = vadd.xlane.f32.xlu0 %v129_v7 }
  0xa2   : >> { %v131_v8 = vpop.xlane.xlu0 %130 }
  0xa3   : >> { %v132_v9 = vsub.f32 %v331_v4, %v131_v8 }
  0xa5   : >> { %v133_v10 = vmul.f32 %v132_v9, %v132_v9 }
  0xa7   : >> { %v134_v11 = vsel %vm128_vm1, %v133_v10, 0.0 }
  0xa8   : >> { %v135_v12 = vrot.slane %v134_v11, 4 }
  0xaa   : >> { %v136_v13 = vadd.f32 %v135_v12, %v134_v11 }
  0xac   : >> { %v137_v14 = vrot.slane %v136_v13, 2 }
  0xae   : >> { %v138_v15 = vadd.f32 %v137_v14, %v136_v13 }
  0xb0   : >> { %v139_v16 = vrot.slane %v138_v15, 1 }
  0xb2   : >> { %v140_v18 = vadd.f32 %v139_v16, %v138_v15 }
  0xb4   : >> { %v142_v19 = vmin.f32 %v141_v17, %v140_v18 }
  0xb6   : >> { %v145_v20 = vsel %vm144_vm3, %v142_v19, -inf  ;;  %143 = vst [vmem:[#allocation2] sm:$0x1] %v142_v19 }
  0xb7   : >> { %146 = vmax.xlane.f32.xlu0 %v145_v20 }
 0x144   : >> { %v147_v21 = vpop.xlane.xlu0 %146 }
 0x145   : >> { %vm148_vm4 = vcmp.ge.f32.partialorder %v142_v19, %v147_v21 }
 0x146   : >> { %v149_v22 = vsel %vm148_vm4, %v321_v3, 128 }
 0x147   : >> { %v150_v23 = vsel %vm144_vm3, %v149_v22, 2147483647 }
 0x148   : >> { %v152_v24 = vshra.s32 %v150_v23, 16  ;;  %v151_v26 = vand.u32 65535, %v150_v23 }
 0x14a   : >> { %v154_v25 = vcvt.s32.f32 %v152_v24  ;;  %v153_v28 = vcvt.s32.f32 %v151_v26 }
 0x14c   : >> { %155 = vmin.xlane.f32.xlu1 %v154_v25 }
 0x1d9   : >> { %v156_v27 = vpop.xlane.xlu1 %155 }
 0x1da   : >> { %vm157_vm5 = vcmp.eq.f32.partialorder %v154_v25, %v156_v27  ;;  %v162_v30 = vcvt.f32.s32 %v156_v27 }
 0x1db   : >> { %v158_v29 = vsel %vm157_vm5, %v153_v28, inf }
 0x1dc   : >> { %159 = vmin.xlane.f32.xlu1 %v158_v29  ;;  %v163_v32 = vshll.u32 %v162_v30, 16 }
 0x269   : >> { %v160_v31 = vpop.xlane.xlu1 %159 }
 0x26a   : >> { %v161_v33 = vcvt.f32.s32 %v160_v31 }
 0x26c   : >> { %v164_v34 = vadd.s32 %v163_v32, %v161_v33 }
 0x26e   : >> { %v165_v35 = vrot.slane %v164_v34, 4 }
 0x270   : >> { %vm166_vm6 = vcmp.lt.s32.totalorder %v164_v34, %v165_v35 }
 0x271   : >> { %v167_v36 = vsel %vm166_vm6, %v164_v34, %v165_v35 }
 0x272   : >> { %v168_v37 = vrot.slane %v167_v36, 2 }
 0x274   : >> { %vm169_vm7 = vcmp.lt.s32.totalorder %v167_v36, %v168_v37 }
 0x275   : >> { %v170_v38 = vsel %vm169_vm7, %v167_v36, %v168_v37 }
 0x276   : >> { %v171_v39 = vrot.slane %v170_v38, 1 }
 0x278   : >> { %vm172_vm8 = vcmp.lt.s32.totalorder %v170_v38, %v171_v39 }
 0x279   : >> { %v173_v40 = vsel %vm172_vm8, %v170_v38, %v171_v39 }
 0x27a   : >> { %246 = vpush %v173_v40 }
 0x2a8   : > { %120 = sbr.rel (!%p118_p4) target bundleno = 17 (0x11), region = 61 }
 0x2ab   : >> { %s247_s15 = spop %246  }
 0x2ac   : >> { %v178_v43 = vstv %s247_s15 }
 0x2ad   : >> { %v179_v44 = vsel %vm176_vm9, %v178_v43, %v177_v42 }
 0x2ae   : >> { %180 = vst.msk [vmem:[#allocation3] sm:$0x1] %vm114_vm0, %v179_v44 }
 0x2b5   : > { %v181_v45 = vld [vmem:[#allocation3] sm:$0x1] }
 0x2b6   : > { %182 = vst.msk [vmem:[%s109_s11] sm:$0x1] %vm114_vm0, %v181_v45 }
 0x2b7 PF: > { %s11_s6 = sadd.s32 1, %s288_s6  }
 0x2b8   : > { %p8_p5 = scmp.ge.s32.totalorder %s11_s6, 4  }
 0x2ba   :  { %10 = sbr.rel (!%p8_p5) target bundleno = 1 (0x1), region = 72 }

// kernel: backbone_forward.12
= control target key start
LH: loop header
LB: loop body
LE: loop exit
PB: predicated region body
PF: predicated region fallthrough
CT: control target
= control target key end

     0   :  { %s310_s6 = smov 0   ;;  %s366_s0 = inlined_call_operand.vmem [shape: f32[2,3,64], index: 0, kind: input, shape index: {}]   ;;  %s367_s1 = inlined_call_operand.vmem [shape: s32[2,1,32], index: 1, kind: output, shape index: {}]  }
   0x1 LB: > { %s238_s7 = sadd.s32 4294967295, %s288_s6   ;;  %p242_p0 = scmp.ge.s32.totalorder %s288_s6, 1  ;;  %s288_s6 = sphi %s310_s6, %s11_s6  }
   0x2   : > { %p86_p1 = scmp.lt.s32.totalorder %s288_s6, 3 }
   0x4   : > { %p87_p2 = pnand %p242_p0, %p86_p1 }
   0x5   : > { %p103_p3 = scmp.lt.s32.totalorder (!%p87_p2), %s238_s7, 1  ;;  %v111_v0 = vlaneseq (!%p87_p2)  ;;  %vm113_vm0 = vcmask (!%p87_p2), 516096   ;;  %vm115_vm1 = vcmask (!%p87_p2), 253952   ;;  %v298_v1 = vmov (!%p87_p2), 1e+10   ;;  %s334_s15 = smov (!%p87_p2), 0  }
   0x6   : > { %90 = sbr.rel (%p87_p2) target bundleno = 695 (0x2b7), region = 24  ;;  %114 = vst.msk [vmem:[#allocation2] sm:$0x1] (!%p87_p2), %vm113_vm0, %v298_v1  ;;  %v299_v3 = vmov (!%p87_p2), 0   ;;  %s336_s16 = smov (!%p87_p2), 1  }
   0x7   : > { %v321_v2 = vand.u32 (!%p87_p2), 127, %v111_v0  ;;  %116 = vst.msk [vmem:[#allocation3] sm:$0x1] (!%p87_p2), %vm115_vm1, %v299_v3 }
   0xd   : > { %s369_s7 = smov (!%p103_p3, %s238_s7), 1 }
   0xe   : > { %s243_s8 = sshll.u32 %s369_s7, 2  ;;  %s109_s11 = scalar_lea.vmem %s367_s1, %s369_s7 }
   0xf   : > { %s106_s14 = scalar_lea.vmem %s366_s0, %s243_s8 }
  0x10   : > { %v332_v4 = vld [vmem:[%s106_s14] sm:$0x7] }
  0x11 LB: >> { %v124_v5 = vstv %s292_s15  ;;  %vm129_vm2 = vcmask 518144   ;;  %v142_v17 = vld [vmem:[#allocation2] sm:$0x1]  ;;  %v175_v41 = vstv %s296_s16  ;;  %v177_v42 = vld [vmem:[#allocation3] sm:$0x1]  ;;  %s122_s16 = sadd.s32 1, %s296_s16   ;;  %s296_s16 = sphi %s336_s16, %s122_s16   ;;  %s292_s15 = sphi %s334_s15, %s247_s15  }
  0x12   : >> { %vm125_vm3 = vcmp.eq.s32.totalorder %v321_v2, %v124_v5  ;;  %vm176_vm9 = vcmp.eq.s32.totalorder %v321_v2, %v175_v41  ;;  %p119_p4 = scmp.ge.s32.totalorder %s122_s16, 32  }
  0x13   : >> { %v128_v6 = vsel %vm125_vm3, %v332_v4, 0.0 }
  0x14   : >> { %v130_v7 = vsel %vm129_vm2, %v128_v6, 0.0 }
  0x15   : >> { %131 = vadd.xlane.f32.xlu0 %v130_v7 }
  0xa2   : >> { %v132_v8 = vpop.xlane.xlu0 %131 }
  0xa3   : >> { %v133_v9 = vsub.f32 %v332_v4, %v132_v8 }
  0xa5   : >> { %v134_v10 = vmul.f32 %v133_v9, %v133_v9 }
  0xa7   : >> { %v135_v11 = vsel %vm129_vm2, %v134_v10, 0.0 }
  0xa8   : >> { %v136_v12 = vrot.slane %v135_v11, 4 }
  0xaa   : >> { %v137_v13 = vadd.f32 %v136_v12, %v135_v11 }
  0xac   : >> { %v138_v14 = vrot.slane %v137_v13, 2 }
  0xae   : >> { %v139_v15 = vadd.f32 %v138_v14, %v137_v13 }
  0xb0   : >> { %v140_v16 = vrot.slane %v139_v15, 1 }
  0xb2   : >> { %v141_v18 = vadd.f32 %v140_v16, %v139_v15 }
  0xb4   : >> { %v143_v19 = vmin.f32 %v142_v17, %v141_v18 }
  0xb6   : >> { %v145_v20 = vsel %vm113_vm0, %v143_v19, -inf  ;;  %144 = vst.msk [vmem:[#allocation2] sm:$0x1] %vm113_vm0, %v143_v19 }
  0xb7   : >> { %146 = vmax.xlane.f32.xlu0 %v145_v20 }
 0x144   : >> { %v147_v21 = vpop.xlane.xlu0 %146 }
 0x145   : >> { %vm148_vm4 = vcmp.ge.f32.partialorder %v143_v19, %v147_v21 }
 0x146   : >> { %v149_v22 = vsel %vm148_vm4, %v321_v2, 64 }
 0x147   : >> { %v150_v23 = vsel %vm113_vm0, %v149_v22, 2147483647 }
 0x148   : >> { %v152_v24 = vshra.s32 %v150_v23, 16  ;;  %v151_v26 = vand.u32 65535, %v150_v23 }
 0x14a   : >> { %v154_v25 = vcvt.s32.f32 %v152_v24  ;;  %v153_v28 = vcvt.s32.f32 %v151_v26 }
 0x14c   : >> { %155 = vmin.xlane.f32.xlu1 %v154_v25 }
 0x1d9   : >> { %v156_v27 = vpop.xlane.xlu1 %155 }
 0x1da   : >> { %vm157_vm5 = vcmp.eq.f32.partialorder %v154_v25, %v156_v27  ;;  %v162_v30 = vcvt.f32.s32 %v156_v27 }
 0x1db   : >> { %v158_v29 = vsel %vm157_vm5, %v153_v28, inf }
 0x1dc   : >> { %159 = vmin.xlane.f32.xlu1 %v158_v29  ;;  %v163_v32 = vshll.u32 %v162_v30, 16 }
 0x269   : >> { %v160_v31 = vpop.xlane.xlu1 %159 }
 0x26a   : >> { %v161_v33 = vcvt.f32.s32 %v160_v31 }
 0x26c   : >> { %v164_v34 = vadd.s32 %v163_v32, %v161_v33 }
 0x26e   : >> { %v165_v35 = vrot.slane %v164_v34, 4 }
 0x270   : >> { %vm166_vm6 = vcmp.lt.s32.totalorder %v164_v34, %v165_v35 }
 0x271   : >> { %v167_v36 = vsel %vm166_vm6, %v164_v34, %v165_v35 }
 0x272   : >> { %v168_v37 = vrot.slane %v167_v36, 2 }
 0x274   : >> { %vm169_vm7 = vcmp.lt.s32.totalorder %v167_v36, %v168_v37 }
 0x275   : >> { %v170_v38 = vsel %vm169_vm7, %v167_v36, %v168_v37 }
 0x276   : >> { %v171_v39 = vrot.slane %v170_v38, 1 }
 0x278   : >> { %vm172_vm8 = vcmp.lt.s32.totalorder %v170_v38, %v171_v39 }
 0x279   : >> { %v173_v40 = vsel %vm172_vm8, %v170_v38, %v171_v39 }
 0x27a   : >> { %246 = vpush %v173_v40 }
 0x2a8   : > { %121 = sbr.rel (!%p119_p4) target bundleno = 17 (0x11), region = 61 }
 0x2ab   : >> { %s247_s15 = spop %246  }
 0x2ac   : >> { %v178_v43 = vstv %s247_s15 }
 0x2ad   : >> { %v179_v44 = vsel %vm176_vm9, %v178_v43, %v177_v42 }
 0x2ae   : >> { %180 = vst.msk [vmem:[#allocation3] sm:$0x1] %vm115_vm1, %v179_v44 }
 0x2b5   : > { %v181_v45 = vld [vmem:[#allocation3] sm:$0x1] }
 0x2b6   : > { %182 = vst.msk [vmem:[%s109_s11] sm:$0x1] %vm115_vm1, %v181_v45 }
 0x2b7 PF: > { %s11_s6 = sadd.s32 1, %s288_s6  }
 0x2b8   : > { %p8_p5 = scmp.ge.s32.totalorder %s11_s6, 4  }
 0x2ba   :  { %10 = sbr.rel (!%p8_p5) target bundleno = 1 (0x1), region = 72 }

// kernel: backbone_forward.14
= control target key start
LH: loop header
LB: loop body
LE: loop exit
PB: predicated region body
PF: predicated region fallthrough
CT: control target
= control target key end

     0   :  { %s310_s6 = smov 0   ;;  %s366_s0 = inlined_call_operand.vmem [shape: f32[2,3,32], index: 0, kind: input, shape index: {}]   ;;  %s367_s1 = inlined_call_operand.vmem [shape: s32[2,1,16], index: 1, kind: output, shape index: {}]  }
   0x1 LB: > { %s238_s7 = sadd.s32 4294967295, %s288_s6   ;;  %p242_p0 = scmp.ge.s32.totalorder %s288_s6, 1  ;;  %s288_s6 = sphi %s310_s6, %s11_s6  }
   0x2   : > { %p86_p1 = scmp.lt.s32.totalorder %s288_s6, 3 }
   0x4   : > { %p87_p2 = pnand %p242_p0, %p86_p1 }
   0x5   : > { %p103_p3 = scmp.lt.s32.totalorder (!%p87_p2), %s238_s7, 1  ;;  %v111_v0 = vlaneseq (!%p87_p2)  ;;  %vm113_vm0 = vcmask (!%p87_p2), 253952   ;;  %vm115_vm1 = vcmask (!%p87_p2), 122880   ;;  %v298_v1 = vmov (!%p87_p2), 1e+10   ;;  %s334_s15 = smov (!%p87_p2), 0  }
   0x6   : > { %90 = sbr.rel (%p87_p2) target bundleno = 695 (0x2b7), region = 24  ;;  %114 = vst.msk [vmem:[#allocation2] sm:$0x1] (!%p87_p2), %vm113_vm0, %v298_v1  ;;  %v299_v3 = vmov (!%p87_p2), 0   ;;  %s336_s16 = smov (!%p87_p2), 1  }
   0x7   : > { %v321_v2 = vand.u32 (!%p87_p2), 127, %v111_v0  ;;  %116 = vst.msk [vmem:[#allocation3] sm:$0x1] (!%p87_p2), %vm115_vm1, %v299_v3 }
   0xd   : > { %s369_s7 = smov (!%p103_p3, %s238_s7), 1 }
   0xe   : > { %s243_s8 = sshll.u32 %s369_s7, 2  ;;  %s109_s11 = scalar_lea.vmem %s367_s1, %s369_s7 }
   0xf   : > { %s106_s14 = scalar_lea.vmem %s366_s0, %s243_s8 }
  0x10   : > { %v332_v4 = vld [vmem:[%s106_s14] sm:$0x7] }
  0x11 LB: >> { %v124_v5 = vstv %s292_s15  ;;  %vm129_vm2 = vcmask 256000   ;;  %v142_v17 = vld [vmem:[#allocation2] sm:$0x1]  ;;  %v175_v41 = vstv %s296_s16  ;;  %v177_v42 = vld [vmem:[#allocation3] sm:$0x1]  ;;  %s122_s16 = sadd.s32 1, %s296_s16   ;;  %s296_s16 = sphi %s336_s16, %s122_s16   ;;  %s292_s15 = sphi %s334_s15, %s247_s15  }
  0x12   : >> { %vm125_vm3 = vcmp.eq.s32.totalorder %v321_v2, %v124_v5  ;;  %vm176_vm9 = vcmp.eq.s32.totalorder %v321_v2, %v175_v41  ;;  %p119_p4 = scmp.ge.s32.totalorder %s122_s16, 16  }
  0x13   : >> { %v128_v6 = vsel %vm125_vm3, %v332_v4, 0.0 }
  0x14   : >> { %v130_v7 = vsel %vm129_vm2, %v128_v6, 0.0 }
  0x15   : >> { %131 = vadd.xlane.f32.xlu0 %v130_v7 }
  0xa2   : >> { %v132_v8 = vpop.xlane.xlu0 %131 }
  0xa3   : >> { %v133_v9 = vsub.f32 %v332_v4, %v132_v8 }
  0xa5   : >> { %v134_v10 = vmul.f32 %v133_v9, %v133_v9 }
  0xa7   : >> { %v135_v11 = vsel %vm129_vm2, %v134_v10, 0.0 }
  0xa8   : >> { %v136_v12 = vrot.slane %v135_v11, 4 }
  0xaa   : >> { %v137_v13 = vadd.f32 %v136_v12, %v135_v11 }
  0xac   : >> { %v138_v14 = vrot.slane %v137_v13, 2 }
  0xae   : >> { %v139_v15 = vadd.f32 %v138_v14, %v137_v13 }
  0xb0   : >> { %v140_v16 = vrot.slane %v139_v15, 1 }
  0xb2   : >> { %v141_v18 = vadd.f32 %v140_v16, %v139_v15 }
  0xb4   : >> { %v143_v19 = vmin.f32 %v142_v17, %v141_v18 }
  0xb6   : >> { %v145_v20 = vsel %vm113_vm0, %v143_v19, -inf  ;;  %144 = vst.msk [vmem:[#allocation2] sm:$0x1] %vm113_vm0, %v143_v19 }
  0xb7   : >> { %146 = vmax.xlane.f32.xlu0 %v145_v20 }
 0x144   : >> { %v147_v21 = vpop.xlane.xlu0 %146 }
 0x145   : >> { %vm148_vm4 = vcmp.ge.f32.partialorder %v143_v19, %v147_v21 }
 0x146   : >> { %v149_v22 = vsel %vm148_vm4, %v321_v2, 32 }
 0x147   : >> { %v150_v23 = vsel %vm113_vm0, %v149_v22, 2147483647 }
 0x148   : >> { %v152_v24 = vshra.s32 %v150_v23, 16  ;;  %v151_v26 = vand.u32 65535, %v150_v23 }
 0x14a   : >> { %v154_v25 = vcvt.s32.f32 %v152_v24  ;;  %v153_v28 = vcvt.s32.f32 %v151_v26 }
 0x14c   : >> { %155 = vmin.xlane.f32.xlu1 %v154_v25 }
 0x1d9   : >> { %v156_v27 = vpop.xlane.xlu1 %155 }
 0x1da   : >> { %vm157_vm5 = vcmp.eq.f32.partialorder %v154_v25, %v156_v27  ;;  %v162_v30 = vcvt.f32.s32 %v156_v27 }
 0x1db   : >> { %v158_v29 = vsel %vm157_vm5, %v153_v28, inf }
 0x1dc   : >> { %159 = vmin.xlane.f32.xlu1 %v158_v29  ;;  %v163_v32 = vshll.u32 %v162_v30, 16 }
 0x269   : >> { %v160_v31 = vpop.xlane.xlu1 %159 }
 0x26a   : >> { %v161_v33 = vcvt.f32.s32 %v160_v31 }
 0x26c   : >> { %v164_v34 = vadd.s32 %v163_v32, %v161_v33 }
 0x26e   : >> { %v165_v35 = vrot.slane %v164_v34, 4 }
 0x270   : >> { %vm166_vm6 = vcmp.lt.s32.totalorder %v164_v34, %v165_v35 }
 0x271   : >> { %v167_v36 = vsel %vm166_vm6, %v164_v34, %v165_v35 }
 0x272   : >> { %v168_v37 = vrot.slane %v167_v36, 2 }
 0x274   : >> { %vm169_vm7 = vcmp.lt.s32.totalorder %v167_v36, %v168_v37 }
 0x275   : >> { %v170_v38 = vsel %vm169_vm7, %v167_v36, %v168_v37 }
 0x276   : >> { %v171_v39 = vrot.slane %v170_v38, 1 }
 0x278   : >> { %vm172_vm8 = vcmp.lt.s32.totalorder %v170_v38, %v171_v39 }
 0x279   : >> { %v173_v40 = vsel %vm172_vm8, %v170_v38, %v171_v39 }
 0x27a   : >> { %246 = vpush %v173_v40 }
 0x2a8   : > { %121 = sbr.rel (!%p119_p4) target bundleno = 17 (0x11), region = 61 }
 0x2ab   : >> { %s247_s15 = spop %246  }
 0x2ac   : >> { %v178_v43 = vstv %s247_s15 }
 0x2ad   : >> { %v179_v44 = vsel %vm176_vm9, %v178_v43, %v177_v42 }
 0x2ae   : >> { %180 = vst.msk [vmem:[#allocation3] sm:$0x1] %vm115_vm1, %v179_v44 }
 0x2b5   : > { %v181_v45 = vld [vmem:[#allocation3] sm:$0x1] }
 0x2b6   : > { %182 = vst.msk [vmem:[%s109_s11] sm:$0x1] %vm115_vm1, %v181_v45 }
 0x2b7 PF: > { %s11_s6 = sadd.s32 1, %s288_s6  }
 0x2b8   : > { %p8_p5 = scmp.ge.s32.totalorder %s11_s6, 4  }
 0x2ba   :  { %10 = sbr.rel (!%p8_p5) target bundleno = 1 (0x1), region = 72 }

// kernel: neg.20
= control target key start
LH: loop header
LB: loop body
LE: loop exit
PB: predicated region body
PF: predicated region fallthrough
CT: control target
= control target key end

     0   :  { %s40_s0 = inlined_call_operand.vmem [shape: f32[2,16,8], index: 0, kind: input, shape index: {}]   ;;  %s41_s1 = inlined_call_operand.vmem [shape: f32[2,16,8], index: 1, kind: output, shape index: {}]  }
   0x1   :  { %v2_v0 = vld [vmem:[%s40_s0] sm:$0xff]  ;;  %v16_v1 = vld [vmem:[%s40_s0 + $0x8] sm:$0xff] }
   0x2   :  { %v5_v2 = vxor.u32 2147483648, %v2_v0  ;;  %v12_v3 = vxor.u32 2147483648, %v16_v1 }
   0x4   :  { %7 = vst [vmem:[%s41_s1] sm:$0xff] %v5_v2  ;;  %17 = vst [vmem:[%s41_s1 + $0x8] sm:$0xff] %v12_v3 }

// kernel: backbone_forward.16
= control target key start
LH: loop header
LB: loop body
LE: loop exit
PB: predicated region body
PF: predicated region fallthrough
CT: control target
= control target key end

     0   :  { %s310_s6 = smov 0   ;;  %s366_s0 = inlined_call_operand.vmem [shape: f32[2,3,16], index: 0, kind: input, shape index: {}]   ;;  %s367_s1 = inlined_call_operand.vmem [shape: s32[2,1,8], index: 1, kind: output, shape index: {}]  }
   0x1 LB: > { %s238_s7 = sadd.s32 4294967295, %s288_s6   ;;  %p242_p0 = scmp.ge.s32.totalorder %s288_s6, 1  ;;  %s288_s6 = sphi %s310_s6, %s11_s6  }
   0x2   : > { %p86_p1 = scmp.lt.s32.totalorder %s288_s6, 3 }
   0x4   : > { %p87_p2 = pnand %p242_p0, %p86_p1 }
   0x5   : > { %p103_p3 = scmp.lt.s32.totalorder (!%p87_p2), %s238_s7, 1  ;;  %v111_v0 = vlaneseq (!%p87_p2)  ;;  %vm113_vm0 = vcmask (!%p87_p2), 122880   ;;  %vm115_vm1 = vcmask (!%p87_p2), 57344   ;;  %v298_v1 = vmov (!%p87_p2), 1e+10   ;;  %s334_s15 = smov (!%p87_p2), 0  }
   0x6   : > { %90 = sbr.rel (%p87_p2) target bundleno = 695 (0x2b7), region = 24  ;;  %114 = vst.msk [vmem:[#allocation2] sm:$0x1] (!%p87_p2), %vm113_vm0, %v298_v1  ;;  %v299_v3 = vmov (!%p87_p2), 0   ;;  %s336_s16 = smov (!%p87_p2), 1  }
   0x7   : > { %v321_v2 = vand.u32 (!%p87_p2), 127, %v111_v0  ;;  %116 = vst.msk [vmem:[#allocation3] sm:$0x1] (!%p87_p2), %vm115_vm1, %v299_v3 }
   0xd   : > { %s369_s7 = smov (!%p103_p3, %s238_s7), 1 }
   0xe   : > { %s243_s8 = sshll.u32 %s369_s7, 2  ;;  %s109_s11 = scalar_lea.vmem %s367_s1, %s369_s7 }
   0xf   : > { %s106_s14 = scalar_lea.vmem %s366_s0, %s243_s8 }
  0x10   : > { %v332_v4 = vld [vmem:[%s106_s14] sm:$0x7] }
  0x11 LB: >> { %v124_v5 = vstv %s292_s15  ;;  %vm129_vm2 = vcmask 124928   ;;  %v142_v17 = vld [vmem:[#allocation2] sm:$0x1]  ;;  %v175_v41 = vstv %s296_s16  ;;  %v177_v42 = vld [vmem:[#allocation3] sm:$0x1]  ;;  %s122_s16 = sadd.s32 1, %s296_s16   ;;  %s296_s16 = sphi %s336_s16, %s122_s16   ;;  %s292_s15 = sphi %s334_s15, %s247_s15  }
  0x12   : >> { %vm125_vm3 = vcmp.eq.s32.totalorder %v321_v2, %v124_v5  ;;  %vm176_vm9 = vcmp.eq.s32.totalorder %v321_v2, %v175_v41  ;;  %p119_p4 = scmp.ge.s32.totalorder %s122_s16, 8  }
  0x13   : >> { %v128_v6 = vsel %vm125_vm3, %v332_v4, 0.0 }
  0x14   : >> { %v130_v7 = vsel %vm129_vm2, %v128_v6, 0.0 }
  0x15   : >> { %131 = vadd.xlane.f32.xlu0 %v130_v7 }
  0xa2   : >> { %v132_v8 = vpop.xlane.xlu0 %131 }
  0xa3   : >> { %v133_v9 = vsub.f32 %v332_v4, %v132_v8 }
  0xa5   : >> { %v134_v10 = vmul.f32 %v133_v9, %v133_v9 }
  0xa7   : >> { %v135_v11 = vsel %vm129_vm2, %v134_v10, 0.0 }
  0xa8   : >> { %v136_v12 = vrot.slane %v135_v11, 4 }
  0xaa   : >> { %v137_v13 = vadd.f32 %v136_v12, %v135_v11 }
  0xac   : >> { %v138_v14 = vrot.slane %v137_v13, 2 }
  0xae   : >> { %v139_v15 = vadd.f32 %v138_v14, %v137_v13 }
  0xb0   : >> { %v140_v16 = vrot.slane %v139_v15, 1 }
  0xb2   : >> { %v141_v18 = vadd.f32 %v140_v16, %v139_v15 }
  0xb4   : >> { %v143_v19 = vmin.f32 %v142_v17, %v141_v18 }
  0xb6   : >> { %v145_v20 = vsel %vm113_vm0, %v143_v19, -inf  ;;  %144 = vst.msk [vmem:[#allocation2] sm:$0x1] %vm113_vm0, %v143_v19 }
  0xb7   : >> { %146 = vmax.xlane.f32.xlu0 %v145_v20 }
 0x144   : >> { %v147_v21 = vpop.xlane.xlu0 %146 }
 0x145   : >> { %vm148_vm4 = vcmp.ge.f32.partialorder %v143_v19, %v147_v21 }
 0x146   : >> { %v149_v22 = vsel %vm148_vm4, %v321_v2, 16 }
 0x147   : >> { %v150_v23 = vsel %vm113_vm0, %v149_v22, 2147483647 }
 0x148   : >> { %v152_v24 = vshra.s32 %v150_v23, 16  ;;  %v151_v26 = vand.u32 65535, %v150_v23 }
 0x14a   : >> { %v154_v25 = vcvt.s32.f32 %v152_v24  ;;  %v153_v28 = vcvt.s32.f32 %v151_v26 }
 0x14c   : >> { %155 = vmin.xlane.f32.xlu1 %v154_v25 }
 0x1d9   : >> { %v156_v27 = vpop.xlane.xlu1 %155 }
 0x1da   : >> { %vm157_vm5 = vcmp.eq.f32.partialorder %v154_v25, %v156_v27  ;;  %v162_v30 = vcvt.f32.s32 %v156_v27 }
 0x1db   : >> { %v158_v29 = vsel %vm157_vm5, %v153_v28, inf }
 0x1dc   : >> { %159 = vmin.xlane.f32.xlu1 %v158_v29  ;;  %v163_v32 = vshll.u32 %v162_v30, 16 }
 0x269   : >> { %v160_v31 = vpop.xlane.xlu1 %159 }
 0x26a   : >> { %v161_v33 = vcvt.f32.s32 %v160_v31 }
 0x26c   : >> { %v164_v34 = vadd.s32 %v163_v32, %v161_v33 }
 0x26e   : >> { %v165_v35 = vrot.slane %v164_v34, 4 }
 0x270   : >> { %vm166_vm6 = vcmp.lt.s32.totalorder %v164_v34, %v165_v35 }
 0x271   : >> { %v167_v36 = vsel %vm166_vm6, %v164_v34, %v165_v35 }
 0x272   : >> { %v168_v37 = vrot.slane %v167_v36, 2 }
 0x274   : >> { %vm169_vm7 = vcmp.lt.s32.totalorder %v167_v36, %v168_v37 }
 0x275   : >> { %v170_v38 = vsel %vm169_vm7, %v167_v36, %v168_v37 }
 0x276   : >> { %v171_v39 = vrot.slane %v170_v38, 1 }
 0x278   : >> { %vm172_vm8 = vcmp.lt.s32.totalorder %v170_v38, %v171_v39 }
 0x279   : >> { %v173_v40 = vsel %vm172_vm8, %v170_v38, %v171_v39 }
 0x27a   : >> { %246 = vpush %v173_v40 }
 0x2a8   : > { %121 = sbr.rel (!%p119_p4) target bundleno = 17 (0x11), region = 61 }
 0x2ab   : >> { %s247_s15 = spop %246  }
 0x2ac   : >> { %v178_v43 = vstv %s247_s15 }
 0x2ad   : >> { %v179_v44 = vsel %vm176_vm9, %v178_v43, %v177_v42 }
 0x2ae   : >> { %180 = vst.msk [vmem:[#allocation3] sm:$0x1] %vm115_vm1, %v179_v44 }
 0x2b5   : > { %v181_v45 = vld [vmem:[#allocation3] sm:$0x1] }
 0x2b6   : > { %182 = vst.msk [vmem:[%s109_s11] sm:$0x1] %vm115_vm1, %v181_v45 }
 0x2b7 PF: > { %s11_s6 = sadd.s32 1, %s288_s6  }
 0x2b8   : > { %p8_p5 = scmp.ge.s32.totalorder %s11_s6, 4  }
 0x2ba   :  { %10 = sbr.rel (!%p8_p5) target bundleno = 1 (0x1), region = 72 }

// kernel: sub.104
= control target key start
LH: loop header
LB: loop body
LE: loop exit
PB: predicated region body
PF: predicated region fallthrough
CT: control target
= control target key end

     0   :  { %s436_s0 = inlined_call_operand.vmem [shape: f32[2,16,3], index: 0, kind: input, shape index: {}]   ;;  %s437_s1 = inlined_call_operand.vmem [shape: f32[2,16,8,3], index: 1, kind: output, shape index: {}]  }
   0x1   :  { %v4_v0 = vld [vmem:[%s436_s0] ss:$0 sm:$0xff]  ;;  %v172_v1 = vld [vmem:[%s436_s0 + $0x10] ss:$0 sm:$0xff]  ;;  %v174_v2 = vld [vmem:[%s436_s0 + $0x1] ss:$0 sm:$0xff] }
   0x2   :  { %5 = vst [vmem:[%s437_s1] sm:$0xff] %v4_v0  ;;  %173 = vst [vmem:[%s437_s1 + $0x80] sm:$0xff] %v172_v1  ;;  %v176_v3 = vld [vmem:[%s436_s0 + $0x11] ss:$0 sm:$0xff]  ;;  %v178_v4 = vld [vmem:[%s436_s0 + $0x2] ss:$0 sm:$0xff] }
   0x3   :  { %175 = vst [vmem:[%s437_s1 + $0x8] sm:$0xff] %v174_v2  ;;  %v180_v5 = vld [vmem:[%s436_s0 + $0x12] ss:$0 sm:$0xff]  ;;  %177 = vst [vmem:[%s437_s1 + $0x88] sm:$0xff] %v176_v3  ;;  %v182_v6 = vld [vmem:[%s436_s0 + $0x3] ss:$0 sm:$0xff] }
   0x4   :  { %179 = vst [vmem:[%s437_s1 + $0x10] sm:$0xff] %v178_v4  ;;  %181 = vst [vmem:[%s437_s1 + $0x90] sm:$0xff] %v180_v5  ;;  %v184_v7 = vld [vmem:[%s436_s0 + $0x13] ss:$0 sm:$0xff]  ;;  %v186_v8 = vld [vmem:[%s436_s0 + $0x4] ss:$0 sm:$0xff] }
   0x5   :  { %183 = vst [vmem:[%s437_s1 + $0x18] sm:$0xff] %v182_v6  ;;  %185 = vst [vmem:[%s437_s1 + $0x98] sm:$0xff] %v184_v7  ;;  %v188_v9 = vld [vmem:[%s436_s0 + $0x14] ss:$0 sm:$0xff]  ;;  %v190_v10 = vld [vmem:[%s436_s0 + $0x5] ss:$0 sm:$0xff] }
   0x6   :  { %187 = vst [vmem:[%s437_s1 + $0x20] sm:$0xff] %v186_v8  ;;  %v192_v11 = vld [vmem:[%s436_s0 + $0x15] ss:$0 sm:$0xff]  ;;  %189 = vst [vmem:[%s437_s1 + $0xa0] sm:$0xff] %v188_v9  ;;  %v194_v12 = vld [vmem:[%s436_s0 + $0x6] ss:$0 sm:$0xff] }
   0x7   :  { %191 = vst [vmem:[%s437_s1 + $0x28] sm:$0xff] %v190_v10  ;;  %193 = vst [vmem:[%s437_s1 + $0xa8] sm:$0xff] %v192_v11  ;;  %v196_v13 = vld [vmem:[%s436_s0 + $0x16] ss:$0 sm:$0xff]  ;;  %v198_v14 = vld [vmem:[%s436_s0 + $0x7] ss:$0 sm:$0xff] }
   0x8   :  { %195 = vst [vmem:[%s437_s1 + $0x30] sm:$0xff] %v194_v12  ;;  %197 = vst [vmem:[%s437_s1 + $0xb0] sm:$0xff] %v196_v13  ;;  %v200_v15 = vld [vmem:[%s436_s0 + $0x17] ss:$0 sm:$0xff]  ;;  %v202_v16 = vld [vmem:[%s436_s0 + $0x8] ss:$0 sm:$0xff] }
   0x9   :  { %199 = vst [vmem:[%s437_s1 + $0x38] sm:$0xff] %v198_v14  ;;  %v204_v17 = vld [vmem:[%s436_s0 + $0x18] ss:$0 sm:$0xff]  ;;  %201 = vst [vmem:[%s437_s1 + $0xb8] sm:$0xff] %v200_v15  ;;  %v206_v18 = vld [vmem:[%s436_s0 + $0x9] ss:$0 sm:$0xff] }
   0xa   :  { %203 = vst [vmem:[%s437_s1 + $0x40] sm:$0xff] %v202_v16  ;;  %205 = vst [vmem:[%s437_s1 + $0xc0] sm:$0xff] %v204_v17  ;;  %v208_v19 = vld [vmem:[%s436_s0 + $0x19] ss:$0 sm:$0xff]  ;;  %v210_v20 = vld [vmem:[%s436_s0 + $0xa] ss:$0 sm:$0xff] }
   0xb   :  { %207 = vst [vmem:[%s437_s1 + $0x48] sm:$0xff] %v206_v18  ;;  %209 = vst [vmem:[%s437_s1 + $0xc8] sm:$0xff] %v208_v19  ;;  %v212_v21 = vld [vmem:[%s436_s0 + $0x1a] ss:$0 sm:$0xff]  ;;  %v214_v22 = vld [vmem:[%s436_s0 + $0xb] ss:$0 sm:$0xff] }
   0xc   :  { %211 = vst [vmem:[%s437_s1 + $0x50] sm:$0xff] %v210_v20  ;;  %v216_v23 = vld [vmem:[%s436_s0 + $0x1b] ss:$0 sm:$0xff]  ;;  %213 = vst [vmem:[%s437_s1 + $0xd0] sm:$0xff] %v212_v21  ;;  %v218_v24 = vld [vmem:[%s436_s0 + $0xc] ss:$0 sm:$0xff] }
   0xd   :  { %215 = vst [vmem:[%s437_s1 + $0x58] sm:$0xff] %v214_v22  ;;  %217 = vst [vmem:[%s437_s1 + $0xd8] sm:$0xff] %v216_v23  ;;  %v220_v25 = vld [vmem:[%s436_s0 + $0x1c] ss:$0 sm:$0xff]  ;;  %v222_v26 = vld [vmem:[%s436_s0 + $0xd] ss:$0 sm:$0xff] }
   0xe   :  { %219 = vst [vmem:[%s437_s1 + $0x60] sm:$0xff] %v218_v24  ;;  %221 = vst [vmem:[%s437_s1 + $0xe0] sm:$0xff] %v220_v25  ;;  %v224_v27 = vld [vmem:[%s436_s0 + $0x1d] ss:$0 sm:$0xff]  ;;  %v226_v28 = vld [vmem:[%s436_s0 + $0xe] ss:$0 sm:$0xff] }
   0xf   :  { %223 = vst [vmem:[%s437_s1 + $0x68] sm:$0xff] %v222_v26  ;;  %v228_v29 = vld [vmem:[%s436_s0 + $0x1e] ss:$0 sm:$0xff]  ;;  %225 = vst [vmem:[%s437_s1 + $0xe8] sm:$0xff] %v224_v27  ;;  %v230_v30 = vld [vmem:[%s436_s0 + $0xf] ss:$0 sm:$0xff] }
  0x10   :  { %227 = vst [vmem:[%s437_s1 + $0x70] sm:$0xff] %v226_v28  ;;  %229 = vst [vmem:[%s437_s1 + $0xf0] sm:$0xff] %v228_v29  ;;  %v232_v31 = vld [vmem:[%s436_s0 + $0x1f] ss:$0 sm:$0xff] }
  0x11   :  { %231 = vst [vmem:[%s437_s1 + $0x78] sm:$0xff] %v230_v30  ;;  %233 = vst [vmem:[%s437_s1 + $0xf8] sm:$0xff] %v232_v31 }

// kernel: backbone_forward.11
= control target key start
LH: loop header
LB: loop body
LE: loop exit
PB: predicated region body
PF: predicated region fallthrough
CT: control target
= control target key end

     0   :  { %s5208_s24 = smov 0   ;;  %s6094_s0 = inlined_call_operand.vmem [shape: bf16[2048,4], index: 0, kind: input, shape index: {}]   ;;  %s6095_s1 = inlined_call_operand.vmem [shape: bf16[4,64], index: 1, kind: input, shape index: {}]   ;;  %s6096_s2 = inlined_call_operand.vmem [shape: f32[1,64], index: 2, kind: input, shape index: {}]   ;;  %s6097_s3 = inlined_call_operand.vmem [shape: bf16[64,64], index: 3, kind: input, shape index: {}]   ;;  %s6098_s4 = inlined_call_operand.vmem [shape: f32[1,64], index: 4, kind: input, shape index: {}]   ;;  %s6099_s5 = inlined_call_operand.vmem [shape: bf16[64,128], index: 5, kind: input, shape index: {}]   ;;  %s6100_s6 = inlined_call_operand.vmem [shape: f32[1,128], index: 6, kind: input, shape index: {}]   ;;  %s6101_s7 = inlined_call_operand.vmem [shape: f32[128,128], index: 7, kind: output, shape index: {}]  }
   0x1 LB: > { %s4193_s25 = sadd.s32 4294967295, %s5166_s24   ;;  %p4197_p0 = scmp.ge.s32.totalorder %s5166_s24, 1  ;;  %s5166_s24 = sphi %s5208_s24, %s17_s24  }
   0x2   : > { %p238_p1 = scmp.lt.s32.totalorder %s5166_s24, 3 }
   0x4   : > { %p239_p2 = pnand %p4197_p0, %p238_p1 }
   0x5   : > { %v411_v0 = vld [vmem:[%s6095_s1] sm:$0x3] (!%p239_p2)  ;;  %vm932_vm0 = vcmask (!%p239_p2), 1041408   ;;  %s4198_s28 = sshll.u32 (!%p239_p2), %s4193_s25, 7  ;;  %vm739_vm1 = vcmask (!%p239_p2), 31744   ;;  %v5129_v12 = vld [vmem:[%s6097_s3 + $0x8] sm:$0xff] (!%p239_p2)  }
   0x6   : > { %242 = sbr.rel (%p239_p2) target bundleno = 948 (0x3b4), region = 48  ;;  %v5112_v1 = vld [vmem:[%s6097_s3] sm:$0xff] (!%p239_p2)   ;;  %5076 = vmatprep.subr.msk.bf16.mxu0 (!%p239_p2), %vm932_vm0, %v411_v0  ;;  %v934_v2 = vsel (!%p239_p2), %vm932_vm0, %v411_v0, 0  ;;  %p271_p3 = scmp.lt.s32.totalorder (!%p239_p2), %s4198_s28, 255  ;;  %5077 = vmatprep.subr.msk.bf16.mxu1 (!%p239_p2), %vm932_vm0, %v411_v0  ;;  %v5138_v15 = vld [vmem:[%s6097_s3 + $0x10] sm:$0xff] (!%p239_p2)   ;;  %v5147_v21 = vld [vmem:[%s6097_s3 + $0x18] sm:$0xff] (!%p239_p2)  }
   0x7   : > { %4673 = vmatpush3.bf16.msra.mxu0 (!%p239_p2), %v934_v2  ;;  %5075 = vmatpush3.bf16.msra.mxu1 (!%p239_p2), %v934_v2  ;;  %vm1712_vm2 = vcmask (!%p239_p2), 523264   ;;  %vm4058_vm3 = vcmask (!%p239_p2), 1041409   ;;  %vm4060_vm4 = vcmask (!%p239_p2), 1042434   ;;  %vm4062_vm5 = vcmask (!%p239_p2), 1043459   ;;  %s5897_s13 = sshll.u32 (!%p239_p2), %s4193_s25, 3 }
   0x8   : > { %4802 = vmatprep.subr.bf16.mxu1 (!%p239_p2), %v5112_v1  ;;  %vm4064_vm6 = vcmask (!%p239_p2), 1044484   ;;  %p277_p4 = scmp.lt.s32.totalorder (!%p239_p2), %s5897_s13, 15  ;;  %vm4066_vm7 = vcmask (!%p239_p2), 1045509   ;;  %vm4068_vm8 = vcmask (!%p239_p2), 1046534   ;;  %vm4070_vm9 = vcmask (!%p239_p2), 1047559  }
   0xd   : > { %s6103_s28 = smov (!%p271_p3, %s4198_s28), 255  ;;  %s6105_s13 = smov (!%p277_p4, %s5897_s13), 15 }
   0xe   : > { %s4199_s8 = sshll.u32 %s6103_s28, 2  ;;  %s4201_s25 = sshll.u32 %s6105_s13, 3 }
   0xf   : > { %s5227_s11 = scalar_lea.vmem %s6094_s0, %s4199_s8  ;;  %s5921_s16 = scalar_lea.vmem %s6101_s7, %s4201_s25 }
  0x10   : > { %v5086_v3 = vld [vmem:[%s5227_s11] sm:$0xff]   ;;  %v5087_v4 = vld [vmem:[%s5227_s11 + $0x8] sm:$0xff]   ;;  %v5088_v5 = vld [vmem:[%s5227_s11 + $0x10] sm:$0xff]  }
  0x11   : > { %4674 = vmatprep.mubr.msk.bf16.mxu0 %vm739_vm1, %v5086_v3  ;;  %v5089_v6 = vld [vmem:[%s5227_s11 + $0x18] sm:$0xff]   ;;  %v5090_v7 = vld [vmem:[%s5227_s11 + $0x20] sm:$0xff]   ;;  %v5091_v8 = vld [vmem:[%s5227_s11 + $0x28] sm:$0xff]  }
  0x12   : > { %4675 = vmatmul.mubr.msk.bf16.vlgmr.msra.gmra.mrb[0].mxu0 %vm739_vm1, %v5087_v4  ;;  %v5092_v9 = vld [vmem:[%s5227_s11 + $0x30] sm:$0xff]   ;;  %v5093_v10 = vld [vmem:[%s5227_s11 + $0x38] sm:$0xff]   ;;  %v5094_v11 = vld [vmem:[%s5227_s11 + $0x40] sm:$0xff]  }
  0x13   : > { %4678 = vmatprep.mubr.msk.bf16.mxu0 %vm739_vm1, %v5088_v5  ;;  %v5110_v13 = vld [vmem:[%s5227_s11 + $0x100] sm:$0xff]   ;;  %v5111_v14 = vld [vmem:[%s5227_s11 + $0x108] sm:$0xff]   ;;  %v5115_v16 = vld [vmem:[%s5227_s11 + $0x110] sm:$0xff]  }
  0x14   : > { %4738 = vmatprep.mubr.msk.bf16.mxu1 %vm739_vm1, %v5110_v13  ;;  %v5095_v17 = vld [vmem:[%s5227_s11 + $0x48] sm:$0xff]   ;;  %v5096_v18 = vld [vmem:[%s5227_s11 + $0x50] sm:$0xff]   ;;  %v5116_v19 = vld [vmem:[%s5227_s11 + $0x118] sm:$0xff]  }
  0x15   : > { %4739 = vmatmul.mubr.msk.bf16.vlgmr.msra.gmra.mrb[0].mxu1 %vm739_vm1, %v5111_v14  ;;  %v5119_v20 = vld [vmem:[%s5227_s11 + $0x120] sm:$0xff]   ;;  %v5097_v22 = vld [vmem:[%s5227_s11 + $0x58] sm:$0xff]   ;;  %v5120_v24 = vld [vmem:[%s5227_s11 + $0x128] sm:$0xff]  }
  0x16   : > { %4803 = vmatpush3.bf16.msra.mxu1 %v5112_v1  ;;  %4742 = vmatprep.mubr.msk.bf16.mxu1 %vm739_vm1, %v5115_v16  ;;  %v5098_v23 = vld [vmem:[%s5227_s11 + $0x60] sm:$0xff]   ;;  %v5123_v25 = vld [vmem:[%s5227_s11 + $0x130] sm:$0xff]   ;;  %v5099_v26 = vld [vmem:[%s5227_s11 + $0x68] sm:$0xff]  }
  0x17   : > { %4804 = vmatprep.subr.bf16.mxu1 %v5129_v12  ;;  %v5100_v27 = vld [vmem:[%s5227_s11 + $0x70] sm:$0xff]   ;;  %v5124_v28 = vld [vmem:[%s5227_s11 + $0x138] sm:$0xff]   ;;  %v5127_v29 = vld [vmem:[%s5227_s11 + $0x140] sm:$0xff]  }
  0x18   : > { %v5101_v30 = vld [vmem:[%s5227_s11 + $0x78] sm:$0xff]   ;;  %v5102_v31 = vld [vmem:[%s5227_s11 + $0x80] sm:$0xff]   ;;  %v5128_v32 = vld [vmem:[%s5227_s11 + $0x148] sm:$0xff]  }
  0x19   : > { %v5130_v33 = vld [vmem:[%s5227_s11 + $0x150] sm:$0xff]   ;;  %v5103_v34 = vld [vmem:[%s5227_s11 + $0x88] sm:$0xff]   ;;  %v5131_v36 = vld [vmem:[%s5227_s11 + $0x158] sm:$0xff]  }
  0x1a   : > { %4679 = vmatmul.mubr.msk.bf16.gmra.mrb[4].mxu0 %vm739_vm1, %v5089_v6  ;;  %4805 = vmatpush3.bf16.msra.mxu1 %v5129_v12  ;;  %v5104_v35 = vld [vmem:[%s5227_s11 + $0x90] sm:$0xff]   ;;  %v5132_v37 = vld [vmem:[%s5227_s11 + $0x160] sm:$0xff]   ;;  %v5105_v38 = vld [vmem:[%s5227_s11 + $0x98] sm:$0xff]  }
  0x1b   : > { %4682 = vmatprep.mubr.msk.bf16.mxu0 %vm739_vm1, %v5090_v7  ;;  %4806 = vmatprep.subr.bf16.mxu1 %v5138_v15  ;;  %v5133_v39 = vld [vmem:[%s5227_s11 + $0x168] sm:$0xff]   ;;  %v5106_v40 = vld [vmem:[%s5227_s11 + $0xa0] sm:$0xff]   ;;  %v5134_v41 = vld [vmem:[%s5227_s11 + $0x170] sm:$0xff]  }
  0x1c   : > { %v5107_v42 = vld [vmem:[%s5227_s11 + $0xa8] sm:$0xff]   ;;  %v5135_v43 = vld [vmem:[%s5227_s11 + $0x178] sm:$0xff]   ;;  %v5108_v44 = vld [vmem:[%s5227_s11 + $0xb0] sm:$0xff]  }
  0x1d   : > { %4743 = vmatmul.mubr.msk.bf16.gmra.mrb[4].mxu1 %vm739_vm1, %v5116_v19  ;;  %v5136_v45 = vld [vmem:[%s5227_s11 + $0x180] sm:$0xff]   ;;  %v5109_v46 = vld [vmem:[%s5227_s11 + $0xb8] sm:$0xff]   ;;  %v5137_v47 = vld [vmem:[%s5227_s11 + $0x188] sm:$0xff]  }
  0x1e   : > { %4746 = vmatprep.mubr.msk.bf16.mxu1 %vm739_vm1, %v5119_v20  ;;  %4807 = vmatpush3.bf16.msra.mxu1 %v5138_v15  ;;  %v5113_v48 = vld [vmem:[%s5227_s11 + $0xc0] sm:$0xff]   ;;  %v5139_v49 = vld [vmem:[%s5227_s11 + $0x190] sm:$0xff]   ;;  %v5114_v50 = vld [vmem:[%s5227_s11 + $0xc8] sm:$0xff]  }
  0x1f   : > { %4808 = vmatprep.subr.bf16.mxu1 %v5147_v21  ;;  %v5140_v51 = vld [vmem:[%s5227_s11 + $0x198] sm:$0xff]   ;;  %v5117_v52 = vld [vmem:[%s5227_s11 + $0xd0] sm:$0xff]   ;;  %v5141_v53 = vld [vmem:[%s5227_s11 + $0x1a0] sm:$0xff]  }
  0x20   : > { %v5118_v54 = vld [vmem:[%s5227_s11 + $0xd8] sm:$0xff]   ;;  %v5142_v55 = vld [vmem:[%s5227_s11 + $0x1a8] sm:$0xff]   ;;  %v5121_v56 = vld [vmem:[%s5227_s11 + $0xe0] sm:$0xff]  }
  0x21   : > { %v5143_v57 = vld [vmem:[%s5227_s11 + $0x1b0] sm:$0xff]   ;;  %v5122_v58 = vld [vmem:[%s5227_s11 + $0xe8] sm:$0xff]   ;;  %v5144_v59 = vld [vmem:[%s5227_s11 + $0x1b8] sm:$0xff]  }
  0x22   : > { %4683 = vmatmul.mubr.msk.bf16.gmra.mrb[8].mxu0 %vm739_vm1, %v5091_v8  ;;  %4809 = vmatpush3.bf16.msra.mxu1 %v5147_v21  ;;  %v5125_v60 = vld [vmem:[%s5227_s11 + $0xf0] sm:$0xff]   ;;  %v5145_v61 = vld [vmem:[%s5227_s11 + $0x1c0] sm:$0xff]   ;;  %v5126_v62 = vld [vmem:[%s5227_s11 + $0xf8] sm:$0xff]  }
  0x23   : > { %4686 = vmatprep.mubr.msk.bf16.mxu0 %vm739_vm1, %v5092_v9  ;;  %v5146_v63 = vld [vmem:[%s5227_s11 + $0x1c8] sm:$0xff]   ;;  %v5148_v0 = vld [vmem:[%s5227_s11 + $0x1d0] sm:$0xff]   ;;  %v5149_v1 = vld [vmem:[%s5227_s11 + $0x1d8] sm:$0xff]  }
  0x24   : > { %v5150_v2 = vld [vmem:[%s5227_s11 + $0x1e0] sm:$0xff]   ;;  %v5151_v3 = vld [vmem:[%s5227_s11 + $0x1e8] sm:$0xff]   ;;  %v5152_v4 = vld [vmem:[%s5227_s11 + $0x1f0] sm:$0xff]  }
  0x25   : > { %4747 = vmatmul.mubr.msk.bf16.gmra.mrb[8].mxu1 %vm739_vm1, %v5120_v24  ;;  %v5153_v5 = vld [vmem:[%s5227_s11 + $0x1f8] sm:$0xff]   ;;  %v5154_v6 = vld [vmem:[%s6099_s5] sm:$0xff]   ;;  %v5155_v16 = vld [vmem:[%s6099_s5 + $0x8] sm:$0xff]  }
  0x26   : > { %4750 = vmatprep.mubr.msk.bf16.mxu1 %vm739_vm1, %v5123_v25  ;;  %4938 = vmatprep.subr.bf16.mxu0 %v5154_v6  ;;  %v5372_v7 = vld [vmem:[%s6096_s2] ss:$0 sm:$0xff] }
  0x27   : > { %4939 = vmatpush3.bf16.msra.mxu0 %v5154_v6 }
  0x28   : > { %4940 = vmatprep.subr.bf16.mxu0 %v5155_v16 }
  0x2a   : > { %4687 = vmatmul.mubr.msk.bf16.gmra.mrb[12].mxu0 %vm739_vm1, %v5093_v10 }
  0x2b   : > { %4690 = vmatprep.mubr.msk.bf16.mxu0 %vm739_vm1, %v5094_v11  ;;  %4941 = vmatpush3.bf16.msra.mxu0 %v5155_v16 }
  0x2d   : > { %4751 = vmatmul.mubr.msk.bf16.gmra.mrb[12].mxu1 %vm739_vm1, %v5124_v28 }
  0x2e   : > { %4754 = vmatprep.mubr.msk.bf16.mxu1 %vm739_vm1, %v5127_v29 }
  0x32   : > { %4691 = vmatmul.mubr.msk.bf16.gmra.mrb[16].mxu0 %vm739_vm1, %v5095_v17 }
  0x33   : > { %4694 = vmatprep.mubr.msk.bf16.mxu0 %vm739_vm1, %v5096_v18 }
  0x35   : > { %4755 = vmatmul.mubr.msk.bf16.gmra.mrb[16].mxu1 %vm739_vm1, %v5128_v32 }
  0x36   : > { %4758 = vmatprep.mubr.msk.bf16.mxu1 %vm739_vm1, %v5130_v33 }
  0x3a   : > { %4695 = vmatmul.mubr.msk.bf16.gmra.mrb[20].mxu0 %vm739_vm1, %v5097_v22 }
  0x3b   : > { %4698 = vmatprep.mubr.msk.bf16.mxu0 %vm739_vm1, %v5098_v23 }
  0x3d   : > { %4759 = vmatmul.mubr.msk.bf16.gmra.mrb[20].mxu1 %vm739_vm1, %v5131_v36 }
  0x3e   : > { %4762 = vmatprep.mubr.msk.bf16.mxu1 %vm739_vm1, %v5132_v37 }
  0x42   : > { %4699 = vmatmul.mubr.msk.bf16.gmra.mrb[24].mxu0 %vm739_vm1, %v5099_v26 }
  0x43   : > { %4702 = vmatprep.mubr.msk.bf16.mxu0 %vm739_vm1, %v5100_v27 }
  0x45   : > { %4763 = vmatmul.mubr.msk.bf16.gmra.mrb[24].mxu1 %vm739_vm1, %v5133_v39 }
  0x46   : > { %4766 = vmatprep.mubr.msk.bf16.mxu1 %vm739_vm1, %v5134_v41 }
  0x4a   : > { %4703 = vmatmul.mubr.msk.bf16.gmra.mrb[28].mxu0 %vm739_vm1, %v5101_v30 }
  0x4b   : > { %4706 = vmatprep.mubr.msk.bf16.mxu0 %vm739_vm1, %v5102_v31 }
  0x4d   : > { %4767 = vmatmul.mubr.msk.bf16.gmra.mrb[28].mxu1 %vm739_vm1, %v5135_v43 }
  0x4e   : > { %4770 = vmatprep.mubr.msk.bf16.mxu1 %vm739_vm1, %v5136_v45 }
  0x52   : > { %4707 = vmatmul.mubr.msk.bf16.gmra.mrb[32].mxu0 %vm739_vm1, %v5103_v34 }
  0x53   : > { %4710 = vmatprep.mubr.msk.bf16.mxu0 %vm739_vm1, %v5104_v35 }
  0x55   : > { %4771 = vmatmul.mubr.msk.bf16.gmra.mrb[32].mxu1 %vm739_vm1, %v5137_v47 }
  0x56   : > { %4774 = vmatprep.mubr.msk.bf16.mxu1 %vm739_vm1, %v5139_v49 }
  0x5a   : > { %4711 = vmatmul.mubr.msk.bf16.gmra.mrb[36].mxu0 %vm739_vm1, %v5105_v38 }
  0x5b   : > { %4714 = vmatprep.mubr.msk.bf16.mxu0 %vm739_vm1, %v5106_v40 }
  0x5d   : > { %4775 = vmatmul.mubr.msk.bf16.gmra.mrb[36].mxu1 %vm739_vm1, %v5140_v51 }
  0x5e   : > { %4778 = vmatprep.mubr.msk.bf16.mxu1 %vm739_vm1, %v5141_v53 }
  0x62   : > { %4715 = vmatmul.mubr.msk.bf16.gmra.mrb[40].mxu0 %vm739_vm1, %v5107_v42 }
  0x63   : > { %4718 = vmatprep.mubr.msk.bf16.mxu0 %vm739_vm1, %v5108_v44 }
  0x65   : > { %4779 = vmatmul.mubr.msk.bf16.gmra.mrb[40].mxu1 %vm739_vm1, %v5142_v55 }
  0x66   : > { %4782 = vmatprep.mubr.msk.bf16.mxu1 %vm739_vm1, %v5143_v57 }
  0x6a   : > { %4719 = vmatmul.mubr.msk.bf16.gmra.mrb[44].mxu0 %vm739_vm1, %v5109_v46 }
  0x6b   : > { %4722 = vmatprep.mubr.msk.bf16.mxu0 %vm739_vm1, %v5113_v48 }
  0x6d   : > { %4783 = vmatmul.mubr.msk.bf16.gmra.mrb[44].mxu1 %vm739_vm1, %v5144_v59 }
  0x6e   : > { %4786 = vmatprep.mubr.msk.bf16.mxu1 %vm739_vm1, %v5145_v61 }
  0x72   : > { %4723 = vmatmul.mubr.msk.bf16.gmra.mrb[48].mxu0 %vm739_vm1, %v5114_v50 }
  0x73   : > { %4726 = vmatprep.mubr.msk.bf16.mxu0 %vm739_vm1, %v5117_v52 }
  0x75   : > { %4787 = vmatmul.mubr.msk.bf16.gmra.mrb[48].mxu1 %vm739_vm1, %v5146_v63 }
  0x76   : > { %4790 = vmatprep.mubr.msk.bf16.mxu1 %vm739_vm1, %v5148_v0 }
  0x7a   : > { %4727 = vmatmul.mubr.msk.bf16.gmra.mrb[52].mxu0 %vm739_vm1, %v5118_v54 }
  0x7b   : > { %4730 = vmatprep.mubr.msk.bf16.mxu0 %vm739_vm1, %v5121_v56 }
  0x7d   : > { %4791 = vmatmul.mubr.msk.bf16.gmra.mrb[52].mxu1 %vm739_vm1, %v5149_v1 }
  0x7e   : > { %4794 = vmatprep.mubr.msk.bf16.mxu1 %vm739_vm1, %v5150_v2 }
  0x82   : > { %4731 = vmatmul.mubr.msk.bf16.gmra.mrb[56].mxu0 %vm739_vm1, %v5122_v58 }
  0x83   : > { %4734 = vmatprep.mubr.msk.bf16.mxu0 %vm739_vm1, %v5125_v60 }
  0x85   : > { %4795 = vmatmul.mubr.msk.bf16.gmra.mrb[56].mxu1 %vm739_vm1, %v5151_v3 }
  0x86   : > { %4798 = vmatprep.mubr.msk.bf16.mxu1 %vm739_vm1, %v5152_v4 }
  0x8a   : > { %4735 = vmatmul.mubr.msk.bf16.gmra.mrb[60].mxu0 %vm739_vm1, %v5126_v62 }
  0x8d   : > { %4799 = vmatmul.mubr.msk.bf16.gmra.mrb[60].mxu1 %vm739_vm1, %v5153_v5 }
  0xe5   : > { %v4676_v8 = vpop.f32.mrb[0].mxu0 }
  0xe6   : > { %v979_v9 = vadd.f32 %v4676_v8, %v5372_v7  ;;  %v970_v10 = vpop.f32.mrb[1].mxu0 }
  0xe7   : > { %v971_v11 = vadd.f32 %v5372_v7, %v970_v10  ;;  %v4677_v12 = vpop.f32.mrb[2].mxu0 }
  0xe8   : > { %v982_v13 = vadd.f32 %v4677_v12, %v5372_v7  ;;  %v973_v14 = vpop.f32.mrb[3].mxu0  ;;  %v1483_v17 = vmax.f32 %v979_v9, 0.0  ;;  %v4740_v52 = vpop.f32.mrb[0].mxu1 }
  0xe9   : > { %v974_v15 = vadd.f32 %v5372_v7, %v973_v14  ;;  %v1481_v19 = vmax.f32 %v971_v11, 0.0  ;;  %v1235_v55 = vadd.f32 %v4740_v52, %v5372_v7  ;;  %v1226_v56 = vpop.f32.mrb[1].mxu1 }
  0xea   : > { %v1484_v18 = vmax.f32 %v982_v13, 0.0  ;;  %v1227_v59 = vadd.f32 %v5372_v7, %v1226_v56  ;;  %v4741_v60 = vpop.f32.mrb[2].mxu1 }
  0xeb   : > { %v1482_v20 = vmax.f32 %v974_v15, 0.0  ;;  %v1547_v63 = vmax.f32 %v1235_v55, 0.0  ;;  %v1238_v0 = vadd.f32 %v4741_v60, %v5372_v7  ;;  %v1229_v1 = vpop.f32.mrb[3].mxu1 }
  0xec   : > { %v1619_v21 = vpack.c.bf16 %v1484_v18, %v1483_v17  ;;  %v1545_v3 = vmax.f32 %v1227_v59, 0.0  ;;  %v1230_v4 = vadd.f32 %v5372_v7, %v1229_v1 }
  0xed   : > { %v1618_v22 = vpack.c.bf16 %v1482_v20, %v1481_v19  ;;  %v4680_v23 = vpop.f32.mrb[4].mxu0  ;;  %v1548_v8 = vmax.f32 %v1238_v0, 0.0 }
  0xee   : > { %v995_v24 = vadd.f32 %v4680_v23, %v5372_v7  ;;  %v986_v25 = vpop.f32.mrb[5].mxu0  ;;  %v1546_v11 = vmax.f32 %v1230_v4, 0.0 }
  0xef   : > { %v987_v26 = vadd.f32 %v5372_v7, %v986_v25  ;;  %v4681_v27 = vpop.f32.mrb[6].mxu0  ;;  %4810 = vmatprep.mubr.msk.bf16.mxu1 %vm1712_vm2, %v1618_v22  ;;  %v5403_v13 = vpack.c.bf16 %v1548_v8, %v1547_v63 }
  0xf0   : > { %v998_v28 = vadd.f32 %v4681_v27, %v5372_v7  ;;  %v989_v29 = vpop.f32.mrb[7].mxu0  ;;  %4811 = vmatmul.mubr.msk.bf16.vlgmr.msra.gmra.mrb[64].mxu1 %vm1712_vm2, %v1619_v21  ;;  %v1487_v31 = vmax.f32 %v995_v24, 0.0  ;;  %v5405_v16 = vpack.c.bf16 %v1546_v11, %v1545_v3  ;;  %v4744_v17 = vpop.f32.mrb[4].mxu1 }
  0xf1   : > { %v990_v30 = vadd.f32 %v5372_v7, %v989_v29  ;;  %v1485_v33 = vmax.f32 %v987_v26, 0.0  ;;  %v1251_v20 = vadd.f32 %v4744_v17, %v5372_v7  ;;  %v1242_v21 = vpop.f32.mrb[5].mxu1 }
  0xf2   : > { %v1488_v32 = vmax.f32 %v998_v28, 0.0  ;;  %v1243_v24 = vadd.f32 %v5372_v7, %v1242_v21  ;;  %v4745_v25 = vpop.f32.mrb[6].mxu1 }
  0xf3   : > { %v1486_v34 = vmax.f32 %v990_v30, 0.0  ;;  %v1551_v28 = vmax.f32 %v1251_v20, 0.0  ;;  %v1254_v29 = vadd.f32 %v4745_v25, %v5372_v7  ;;  %v1245_v30 = vpop.f32.mrb[7].mxu1 }
  0xf4   : > { %v1621_v35 = vpack.c.bf16 %v1488_v32, %v1487_v31  ;;  %v1549_v32 = vmax.f32 %v1243_v24, 0.0 }
  0xf5   : > { %v1620_v36 = vpack.c.bf16 %v1486_v34, %v1485_v33  ;;  %v4684_v37 = vpop.f32.mrb[8].mxu0  ;;  %v1246_v33 = vadd.f32 %v5372_v7, %v1245_v30  ;;  %v5156_v34 = vld [vmem:[%s6099_s5 + $0x10] sm:$0xff]  }
  0xf6   : > { %v1011_v38 = vadd.f32 %v4684_v37, %v5372_v7  ;;  %v1002_v39 = vpop.f32.mrb[9].mxu0  ;;  %v1552_v37 = vmax.f32 %v1254_v29, 0.0  ;;  %4942 = vmatprep.subr.bf16.mxu0 %v5156_v34 }
  0xf7   : > { %v1003_v40 = vadd.f32 %v5372_v7, %v1002_v39  ;;  %v4685_v41 = vpop.f32.mrb[10].mxu0  ;;  %4814 = vmatprep.mubr.msk.bf16.mxu1 %vm1712_vm2, %v1620_v36  ;;  %4943 = vmatpush3.bf16.msra.mxu0 %v5156_v34 }
  0xf8   : > { %v1014_v42 = vadd.f32 %v4685_v41, %v5372_v7  ;;  %v1005_v43 = vpop.f32.mrb[11].mxu0  ;;  %4815 = vmatmul.mubr.msk.bf16.gmra.mrb[68].mxu1 %vm1712_vm2, %v1621_v35  ;;  %v1491_v45 = vmax.f32 %v1011_v38, 0.0 }
  0xf9   : > { %v1006_v44 = vadd.f32 %v5372_v7, %v1005_v43  ;;  %v1489_v47 = vmax.f32 %v1003_v40, 0.0  ;;  %v1550_v40 = vmax.f32 %v1246_v33, 0.0 }
  0xfa   : > { %v1492_v46 = vmax.f32 %v1014_v42, 0.0  ;;  %v5420_v42 = vpack.c.bf16 %v1552_v37, %v1551_v28 }
  0xfb   : > { %v1490_v48 = vmax.f32 %v1006_v44, 0.0 }
  0xfc   : > { %v1623_v49 = vpack.c.bf16 %v1492_v46, %v1491_v45  ;;  %v5422_v45 = vpack.c.bf16 %v1550_v40, %v1549_v32  ;;  %v4748_v46 = vpop.f32.mrb[8].mxu1 }
  0xfd   : > { %v1622_v50 = vpack.c.bf16 %v1490_v48, %v1489_v47  ;;  %v4688_v51 = vpop.f32.mrb[12].mxu0 }
  0xfe   : > { %v1027_v53 = vadd.f32 %v4688_v51, %v5372_v7  ;;  %v1018_v54 = vpop.f32.mrb[13].mxu0 }
  0xff   : > { %v1019_v57 = vadd.f32 %v5372_v7, %v1018_v54  ;;  %v4689_v58 = vpop.f32.mrb[14].mxu0  ;;  %4818 = vmatprep.mubr.msk.bf16.mxu1 %vm1712_vm2, %v1622_v50  ;;  %v1258_v50 = vpop.f32.mrb[9].mxu1 }
 0x100   : > { %v1030_v61 = vadd.f32 %v4689_v58, %v5372_v7  ;;  %v1021_v62 = vpop.f32.mrb[15].mxu0  ;;  %4819 = vmatmul.mubr.msk.bf16.gmra.mrb[72].mxu1 %vm1712_vm2, %v1623_v49  ;;  %v1495_v5 = vmax.f32 %v1027_v53, 0.0  ;;  %v1267_v49 = vadd.f32 %v4748_v46, %v5372_v7  ;;  %v1259_v53 = vadd.f32 %v5372_v7, %v1258_v50  ;;  %v4749_v54 = vpop.f32.mrb[10].mxu1 }
 0x101   : > { %v1022_v2 = vadd.f32 %v5372_v7, %v1021_v62  ;;  %v1493_v9 = vmax.f32 %v1019_v57, 0.0  ;;  %v1270_v58 = vadd.f32 %v4749_v54, %v5372_v7  ;;  %v1261_v59 = vpop.f32.mrb[11].mxu1 }
 0x102   : > { %v1496_v6 = vmax.f32 %v1030_v61, 0.0  ;;  %v1555_v57 = vmax.f32 %v1267_v49, 0.0  ;;  %v1553_v61 = vmax.f32 %v1259_v53, 0.0  ;;  %v1262_v62 = vadd.f32 %v5372_v7, %v1261_v59  ;;  %v4752_v11 = vpop.f32.mrb[12].mxu1 }
 0x103   : > { %v1494_v10 = vmax.f32 %v1022_v2, 0.0  ;;  %v1556_v1 = vmax.f32 %v1270_v58, 0.0  ;;  %v1274_v17 = vpop.f32.mrb[13].mxu1 }
 0x104   : > { %v1625_v12 = vpack.c.bf16 %v1496_v6, %v1495_v5  ;;  %v1554_v4 = vmax.f32 %v1262_v62, 0.0  ;;  %v1275_v20 = vadd.f32 %v5372_v7, %v1274_v17  ;;  %v4753_v21 = vpop.f32.mrb[14].mxu1 }
 0x105   : > { %v1624_v14 = vpack.c.bf16 %v1494_v10, %v1493_v9  ;;  %v4692_v15 = vpop.f32.mrb[16].mxu0  ;;  %v5434_v6 = vpack.c.bf16 %v1556_v1, %v1555_v57  ;;  %v1286_v25 = vadd.f32 %v4753_v21, %v5372_v7 }
 0x106   : > { %v1043_v18 = vadd.f32 %v4692_v15, %v5372_v7  ;;  %v1034_v19 = vpop.f32.mrb[17].mxu0  ;;  %v5436_v10 = vpack.c.bf16 %v1554_v4, %v1553_v61  ;;  %v1283_v15 = vadd.f32 %v4752_v11, %v5372_v7  ;;  %v1557_v28 = vmax.f32 %v1275_v20, 0.0 }
 0x107   : > { %v1035_v22 = vadd.f32 %v5372_v7, %v1034_v19  ;;  %v4693_v23 = vpop.f32.mrb[18].mxu0  ;;  %4822 = vmatprep.mubr.msk.bf16.mxu1 %vm1712_vm2, %v1624_v14  ;;  %v1560_v32 = vmax.f32 %v1286_v25, 0.0 }
 0x108   : > { %v1046_v26 = vadd.f32 %v4693_v23, %v5372_v7  ;;  %v1037_v27 = vpop.f32.mrb[19].mxu0  ;;  %4823 = vmatmul.mubr.msk.bf16.gmra.mrb[76].mxu1 %vm1712_vm2, %v1625_v12  ;;  %v1499_v35 = vmax.f32 %v1043_v18, 0.0  ;;  %v1559_v24 = vmax.f32 %v1283_v15, 0.0 }
 0x109   : > { %v1038_v31 = vadd.f32 %v5372_v7, %v1037_v27  ;;  %v1497_v38 = vmax.f32 %v1035_v22, 0.0 }
 0x10a   : > { %v1500_v36 = vmax.f32 %v1046_v26, 0.0  ;;  %v1277_v26 = vpop.f32.mrb[15].mxu1  ;;  %v5448_v37 = vpack.c.bf16 %v1560_v32, %v1559_v24 }
 0x10b   : > { %v1498_v39 = vmax.f32 %v1038_v31, 0.0  ;;  %v1278_v29 = vadd.f32 %v5372_v7, %v1277_v26 }
 0x10c   : > { %v1627_v41 = vpack.c.bf16 %v1500_v36, %v1499_v35 }
 0x10d   : > { %v1626_v43 = vpack.c.bf16 %v1498_v39, %v1497_v38  ;;  %v4696_v44 = vpop.f32.mrb[20].mxu0  ;;  %v1558_v35 = vmax.f32 %v1278_v29, 0.0  ;;  %v5157_v29 = vld [vmem:[%s6099_s5 + $0x18] sm:$0xff]  }
 0x10e   : > { %v1059_v47 = vadd.f32 %v4696_v44, %v5372_v7  ;;  %v1050_v48 = vpop.f32.mrb[21].mxu0  ;;  %4944 = vmatprep.subr.bf16.mxu0 %v5157_v29 }
 0x10f   : > { %v1051_v51 = vadd.f32 %v5372_v7, %v1050_v48  ;;  %v4697_v52 = vpop.f32.mrb[22].mxu0  ;;  %4826 = vmatprep.mubr.msk.bf16.mxu1 %vm1712_vm2, %v1626_v43  ;;  %v5450_v40 = vpack.c.bf16 %v1558_v35, %v1557_v28  ;;  %4945 = vmatpush3.bf16.msra.mxu0 %v5157_v29 }
 0x110   : > { %v1062_v55 = vadd.f32 %v4697_v52, %v5372_v7  ;;  %v1053_v56 = vpop.f32.mrb[23].mxu0  ;;  %4827 = vmatmul.mubr.msk.bf16.gmra.mrb[80].mxu1 %vm1712_vm2, %v1627_v41  ;;  %v1503_v63 = vmax.f32 %v1059_v47, 0.0  ;;  %v4756_v41 = vpop.f32.mrb[16].mxu1 }
 0x111   : > { %v1054_v60 = vadd.f32 %v5372_v7, %v1053_v56  ;;  %v1501_v2 = vmax.f32 %v1051_v51, 0.0  ;;  %v1299_v46 = vadd.f32 %v4756_v41, %v5372_v7  ;;  %v1290_v47 = vpop.f32.mrb[17].mxu1 }
 0x112   : > { %v1504_v0 = vmax.f32 %v1062_v55, 0.0  ;;  %v1291_v50 = vadd.f32 %v5372_v7, %v1290_v47  ;;  %v4757_v51 = vpop.f32.mrb[18].mxu1 }
 0x113   : > { %v1502_v3 = vmax.f32 %v1054_v60, 0.0  ;;  %v1563_v54 = vmax.f32 %v1299_v46, 0.0  ;;  %v1302_v55 = vadd.f32 %v4757_v51, %v5372_v7  ;;  %v1293_v56 = vpop.f32.mrb[19].mxu1 }
 0x114   : > { %v1629_v5 = vpack.c.bf16 %v1504_v0, %v1503_v63  ;;  %v1561_v58 = vmax.f32 %v1291_v50, 0.0  ;;  %v1294_v59 = vadd.f32 %v5372_v7, %v1293_v56 }
 0x115   : > { %v1628_v8 = vpack.c.bf16 %v1502_v3, %v1501_v2  ;;  %v4700_v9 = vpop.f32.mrb[24].mxu0  ;;  %v1564_v62 = vmax.f32 %v1302_v55, 0.0 }
 0x116   : > { %v1075_v12 = vadd.f32 %v4700_v9, %v5372_v7  ;;  %v1066_v14 = vpop.f32.mrb[25].mxu0  ;;  %v1562_v1 = vmax.f32 %v1294_v59, 0.0  ;;  %v4760_v9 = vpop.f32.mrb[20].mxu1 }
 0x117   : > { %v1067_v18 = vadd.f32 %v5372_v7, %v1066_v14  ;;  %v4701_v19 = vpop.f32.mrb[26].mxu0  ;;  %4830 = vmatprep.mubr.msk.bf16.mxu1 %vm1712_vm2, %v1628_v8  ;;  %v5462_v3 = vpack.c.bf16 %v1564_v62, %v1563_v54  ;;  %v1315_v14 = vadd.f32 %v4760_v9, %v5372_v7  ;;  %v1306_v15 = vpop.f32.mrb[21].mxu1 }
 0x118   : > { %v1078_v22 = vadd.f32 %v4701_v19, %v5372_v7  ;;  %v1069_v23 = vpop.f32.mrb[27].mxu0  ;;  %4831 = vmatmul.mubr.msk.bf16.gmra.mrb[84].mxu1 %vm1712_vm2, %v1629_v5  ;;  %v1507_v30 = vmax.f32 %v1075_v12, 0.0  ;;  %v5464_v8 = vpack.c.bf16 %v1562_v1, %v1561_v58  ;;  %v1307_v19 = vadd.f32 %v5372_v7, %v1306_v15  ;;  %v4761_v20 = vpop.f32.mrb[22].mxu1 }
 0x119   : > { %v1070_v27 = vadd.f32 %v5372_v7, %v1069_v23  ;;  %v1505_v33 = vmax.f32 %v1067_v18, 0.0  ;;  %v1567_v23 = vmax.f32 %v1315_v14, 0.0  ;;  %v1318_v24 = vadd.f32 %v4761_v20, %v5372_v7  ;;  %v1309_v25 = vpop.f32.mrb[23].mxu1 }
 0x11a   : > { %v1508_v31 = vmax.f32 %v1078_v22, 0.0  ;;  %v1310_v28 = vadd.f32 %v5372_v7, %v1309_v25 }
 0x11b   : > { %v1506_v34 = vmax.f32 %v1070_v27, 0.0  ;;  %v1565_v27 = vmax.f32 %v1307_v19, 0.0  ;;  %v1568_v32 = vmax.f32 %v1318_v24, 0.0 }
 0x11c   : > { %v1631_v36 = vpack.c.bf16 %v1508_v31, %v1507_v30  ;;  %v1566_v35 = vmax.f32 %v1310_v28, 0.0 }
 0x11d   : > { %v1630_v38 = vpack.c.bf16 %v1506_v34, %v1505_v33  ;;  %v4704_v39 = vpop.f32.mrb[28].mxu0 }
 0x11e   : > { %v1091_v43 = vadd.f32 %v4704_v39, %v5372_v7  ;;  %v1082_v44 = vpop.f32.mrb[29].mxu0 }
 0x11f   : > { %v1083_v48 = vadd.f32 %v5372_v7, %v1082_v44  ;;  %v4705_v49 = vpop.f32.mrb[30].mxu0  ;;  %4834 = vmatprep.mubr.msk.bf16.mxu1 %vm1712_vm2, %v1630_v38  ;;  %v5479_v38 = vpack.c.bf16 %v1568_v32, %v1567_v23  ;;  %v4764_v44 = vpop.f32.mrb[24].mxu1 }
 0x120   : > { %v1094_v52 = vadd.f32 %v4705_v49, %v5372_v7  ;;  %v1085_v53 = vpop.f32.mrb[31].mxu0  ;;  %4835 = vmatmul.mubr.msk.bf16.gmra.mrb[88].mxu1 %vm1712_vm2, %v1631_v36  ;;  %v1511_v60 = vmax.f32 %v1091_v43, 0.0  ;;  %v5481_v43 = vpack.c.bf16 %v1566_v35, %v1565_v27  ;;  %v1322_v49 = vpop.f32.mrb[25].mxu1 }
 0x121   : > { %v1086_v57 = vadd.f32 %v5372_v7, %v1085_v53  ;;  %v1509_v63 = vmax.f32 %v1083_v48, 0.0  ;;  %v1331_v48 = vadd.f32 %v4764_v44, %v5372_v7  ;;  %v4765_v53 = vpop.f32.mrb[26].mxu1 }
 0x122   : > { %v1512_v61 = vmax.f32 %v1094_v52, 0.0  ;;  %v1323_v52 = vadd.f32 %v5372_v7, %v1322_v49  ;;  %v1325_v58 = vpop.f32.mrb[27].mxu1 }
 0x123   : > { %v1510_v0 = vmax.f32 %v1086_v57, 0.0  ;;  %v1571_v56 = vmax.f32 %v1331_v48, 0.0  ;;  %v1334_v57 = vadd.f32 %v4765_v53, %v5372_v7  ;;  %v4768_v15 = vpop.f32.mrb[28].mxu1 }
 0x124   : > { %v1633_v2 = vpack.c.bf16 %v1512_v61, %v1511_v60  ;;  %v1569_v60 = vmax.f32 %v1323_v52, 0.0  ;;  %v1326_v61 = vadd.f32 %v5372_v7, %v1325_v58  ;;  %v1347_v19 = vadd.f32 %v4768_v15, %v5372_v7  ;;  %v1338_v20 = vpop.f32.mrb[29].mxu1 }
 0x125   : > { %v1632_v4 = vpack.c.bf16 %v1510_v0, %v1509_v63  ;;  %v4708_v5 = vpop.f32.mrb[32].mxu0  ;;  %v1572_v0 = vmax.f32 %v1334_v57, 0.0  ;;  %v1339_v23 = vadd.f32 %v5372_v7, %v1338_v20  ;;  %v4769_v24 = vpop.f32.mrb[30].mxu1 }
 0x126   : > { %v1107_v11 = vadd.f32 %v4708_v5, %v5372_v7  ;;  %v1098_v12 = vpop.f32.mrb[33].mxu0  ;;  %v1575_v27 = vmax.f32 %v1347_v19, 0.0  ;;  %v1350_v28 = vadd.f32 %v4769_v24, %v5372_v7  ;;  %v1341_v29 = vpop.f32.mrb[31].mxu1 }
 0x127   : > { %v1099_v17 = vadd.f32 %v5372_v7, %v1098_v12  ;;  %v4709_v18 = vpop.f32.mrb[34].mxu0  ;;  %4838 = vmatprep.mubr.msk.bf16.mxu1 %vm1712_vm2, %v1632_v4  ;;  %v1570_v4 = vmax.f32 %v1326_v61, 0.0  ;;  %v5493_v9 = vpack.c.bf16 %v1572_v0, %v1571_v56  ;;  %v1342_v32 = vadd.f32 %v5372_v7, %v1341_v29 }
 0x128   : > { %v1110_v21 = vadd.f32 %v4709_v18, %v5372_v7  ;;  %v1101_v22 = vpop.f32.mrb[35].mxu0  ;;  %4839 = vmatmul.mubr.msk.bf16.gmra.mrb[92].mxu1 %vm1712_vm2, %v1633_v2  ;;  %v1515_v30 = vmax.f32 %v1107_v11, 0.0  ;;  %v1576_v35 = vmax.f32 %v1350_v28, 0.0 }
 0x129   : > { %v1102_v26 = vadd.f32 %v5372_v7, %v1101_v22  ;;  %v1513_v33 = vmax.f32 %v1099_v17, 0.0  ;;  %v5495_v14 = vpack.c.bf16 %v1570_v4, %v1569_v60 }
 0x12a   : > { %v1516_v31 = vmax.f32 %v1110_v21, 0.0 }
 0x12b   : > { %v1514_v34 = vmax.f32 %v1102_v26, 0.0 }
 0x12c   : > { %v1635_v36 = vpack.c.bf16 %v1516_v31, %v1515_v30  ;;  %v1573_v31 = vmax.f32 %v1339_v23, 0.0 }
 0x12d   : > { %v1634_v39 = vpack.c.bf16 %v1514_v34, %v1513_v33  ;;  %v4712_v41 = vpop.f32.mrb[36].mxu0 }
 0x12e   : > { %v1123_v46 = vadd.f32 %v4712_v41, %v5372_v7  ;;  %v1114_v47 = vpop.f32.mrb[37].mxu0  ;;  %v1574_v41 = vmax.f32 %v1342_v32, 0.0 }
 0x12f   : > { %v1115_v50 = vadd.f32 %v5372_v7, %v1114_v47  ;;  %v4713_v51 = vpop.f32.mrb[38].mxu0  ;;  %4842 = vmatprep.mubr.msk.bf16.mxu1 %vm1712_vm2, %v1634_v39 }
 0x130   : > { %v1126_v54 = vadd.f32 %v4713_v51, %v5372_v7  ;;  %v1117_v55 = vpop.f32.mrb[39].mxu0  ;;  %4843 = vmatmul.mubr.msk.bf16.gmra.mrb[96].mxu1 %vm1712_vm2, %v1635_v36  ;;  %v1519_v62 = vmax.f32 %v1123_v46, 0.0  ;;  %v5507_v46 = vpack.c.bf16 %v1576_v35, %v1575_v27  ;;  %v5509_v49 = vpack.c.bf16 %v1574_v41, %v1573_v31 }
 0x131   : > { %v1118_v59 = vadd.f32 %v5372_v7, %v1117_v55  ;;  %v1517_v1 = vmax.f32 %v1115_v50, 0.0  ;;  %v4772_v50 = vpop.f32.mrb[32].mxu1 }
 0x132   : > { %v1520_v63 = vmax.f32 %v1126_v54, 0.0  ;;  %v1363_v53 = vadd.f32 %v4772_v50, %v5372_v7  ;;  %v1354_v54 = vpop.f32.mrb[33].mxu1 }
 0x133   : > { %v1518_v2 = vmax.f32 %v1118_v59, 0.0  ;;  %v1355_v57 = vadd.f32 %v5372_v7, %v1354_v54  ;;  %v4773_v58 = vpop.f32.mrb[34].mxu1 }
 0x134   : > { %v1637_v5 = vpack.c.bf16 %v1520_v63, %v1519_v62  ;;  %v1579_v61 = vmax.f32 %v1363_v53, 0.0  ;;  %v1366_v62 = vadd.f32 %v4773_v58, %v5372_v7  ;;  %v1357_v63 = vpop.f32.mrb[35].mxu1 }
 0x135   : > { %v1636_v11 = vpack.c.bf16 %v1518_v2, %v1517_v1  ;;  %v4716_v12 = vpop.f32.mrb[40].mxu0  ;;  %v1577_v1 = vmax.f32 %v1355_v57, 0.0  ;;  %v1358_v2 = vadd.f32 %v5372_v7, %v1357_v63  ;;  %v4776_v23 = vpop.f32.mrb[36].mxu1 }
 0x136   : > { %v1139_v17 = vadd.f32 %v4716_v12, %v5372_v7  ;;  %v1130_v18 = vpop.f32.mrb[41].mxu0  ;;  %v1370_v27 = vpop.f32.mrb[37].mxu1 }
 0x137   : > { %v1131_v21 = vadd.f32 %v5372_v7, %v1130_v18  ;;  %v4717_v22 = vpop.f32.mrb[42].mxu0  ;;  %4846 = vmatprep.mubr.msk.bf16.mxu1 %vm1712_vm2, %v1636_v11  ;;  %v1580_v11 = vmax.f32 %v1366_v62, 0.0  ;;  %v4777_v31 = vpop.f32.mrb[38].mxu1 }
 0x138   : > { %v1142_v25 = vadd.f32 %v4717_v22, %v5372_v7  ;;  %v1133_v26 = vpop.f32.mrb[43].mxu0  ;;  %4847 = vmatmul.mubr.msk.bf16.gmra.mrb[100].mxu1 %vm1712_vm2, %v1637_v5  ;;  %v1523_v33 = vmax.f32 %v1139_v17, 0.0  ;;  %v1578_v17 = vmax.f32 %v1358_v2, 0.0  ;;  %v1382_v35 = vadd.f32 %v4777_v31, %v5372_v7 }
 0x139   : > { %v1134_v30 = vadd.f32 %v5372_v7, %v1133_v26  ;;  %v1521_v36 = vmax.f32 %v1131_v21, 0.0  ;;  %v5521_v19 = vpack.c.bf16 %v1580_v11, %v1579_v61  ;;  %v1379_v26 = vadd.f32 %v4776_v23, %v5372_v7 }
 0x13a   : > { %v1524_v34 = vmax.f32 %v1142_v25, 0.0  ;;  %v5523_v22 = vpack.c.bf16 %v1578_v17, %v1577_v1  ;;  %v1584_v50 = vmax.f32 %v1382_v35, 0.0 }
 0x13b   : > { %v1522_v39 = vmax.f32 %v1134_v30, 0.0  ;;  %v1371_v30 = vadd.f32 %v5372_v7, %v1370_v27 }
 0x13c   : > { %v1639_v44 = vpack.c.bf16 %v1524_v34, %v1523_v33  ;;  %v1583_v34 = vmax.f32 %v1379_v26, 0.0 }
 0x13d   : > { %v1638_v47 = vpack.c.bf16 %v1522_v39, %v1521_v36  ;;  %v4720_v48 = vpop.f32.mrb[44].mxu0  ;;  %v1373_v36 = vpop.f32.mrb[39].mxu1  ;;  %v1581_v41 = vmax.f32 %v1371_v30, 0.0 }
 0x13e   : > { %v1155_v51 = vadd.f32 %v4720_v48, %v5372_v7  ;;  %v1146_v52 = vpop.f32.mrb[45].mxu0 }
 0x13f   : > { %v1147_v55 = vadd.f32 %v5372_v7, %v1146_v52  ;;  %v4721_v56 = vpop.f32.mrb[46].mxu0  ;;  %4850 = vmatprep.mubr.msk.bf16.mxu1 %vm1712_vm2, %v1638_v47 }
 0x140   : > { %v1158_v59 = vadd.f32 %v4721_v56, %v5372_v7  ;;  %v1149_v60 = vpop.f32.mrb[47].mxu0  ;;  %4851 = vmatmul.mubr.msk.bf16.gmra.mrb[104].mxu1 %vm1712_vm2, %v1639_v44  ;;  %v1527_v4 = vmax.f32 %v1155_v51, 0.0  ;;  %v1374_v44 = vadd.f32 %v5372_v7, %v1373_v36 }
 0x141   : > { %v1150_v0 = vadd.f32 %v5372_v7, %v1149_v60  ;;  %v1525_v12 = vmax.f32 %v1147_v55, 0.0  ;;  %v5535_v55 = vpack.c.bf16 %v1584_v50, %v1583_v34 }
 0x142   : > { %v1528_v5 = vmax.f32 %v1158_v59, 0.0  ;;  %v1582_v53 = vmax.f32 %v1374_v44, 0.0  ;;  %v4780_v59 = vpop.f32.mrb[40].mxu1 }
 0x143   : > { %v1526_v15 = vmax.f32 %v1150_v0, 0.0  ;;  %v1395_v62 = vadd.f32 %v4780_v59, %v5372_v7  ;;  %v1386_v63 = vpop.f32.mrb[41].mxu1 }
 0x144   : > { %v1641_v18 = vpack.c.bf16 %v1528_v5, %v1527_v4  ;;  %v5537_v58 = vpack.c.bf16 %v1582_v53, %v1581_v41  ;;  %v1387_v2 = vadd.f32 %v5372_v7, %v1386_v63  ;;  %v4781_v4 = vpop.f32.mrb[42].mxu1 }
 0x145   : > { %v1640_v20 = vpack.c.bf16 %v1526_v15, %v1525_v12  ;;  %v4724_v21 = vpop.f32.mrb[48].mxu0  ;;  %v1587_v12 = vmax.f32 %v1395_v62, 0.0  ;;  %v1398_v15 = vadd.f32 %v4781_v4, %v5372_v7  ;;  %v1389_v17 = vpop.f32.mrb[43].mxu1 }
 0x146   : > { %v1171_v24 = vadd.f32 %v4724_v21, %v5372_v7  ;;  %v1162_v25 = vpop.f32.mrb[49].mxu0  ;;  %v1390_v21 = vadd.f32 %v5372_v7, %v1389_v17  ;;  %v4784_v34 = vpop.f32.mrb[44].mxu1 }
 0x147   : > { %v1163_v28 = vadd.f32 %v5372_v7, %v1162_v25  ;;  %v4725_v29 = vpop.f32.mrb[50].mxu0  ;;  %4854 = vmatprep.mubr.msk.bf16.mxu1 %vm1712_vm2, %v1640_v20  ;;  %v1585_v20 = vmax.f32 %v1387_v2, 0.0  ;;  %v1588_v25 = vmax.f32 %v1398_v15, 0.0  ;;  %v1402_v41 = vpop.f32.mrb[45].mxu1 }
 0x148   : > { %v1174_v32 = vadd.f32 %v4725_v29, %v5372_v7  ;;  %v1165_v33 = vpop.f32.mrb[51].mxu0  ;;  %4855 = vmatmul.mubr.msk.bf16.gmra.mrb[108].mxu1 %vm1712_vm2, %v1641_v18  ;;  %v1531_v47 = vmax.f32 %v1171_v24, 0.0  ;;  %v4785_v50 = vpop.f32.mrb[46].mxu1 }
 0x149   : > { %v1166_v39 = vadd.f32 %v5372_v7, %v1165_v33  ;;  %v1529_v51 = vmax.f32 %v1163_v28, 0.0  ;;  %v1586_v28 = vmax.f32 %v1390_v21, 0.0  ;;  %v5549_v30 = vpack.c.bf16 %v1588_v25, %v1587_v12 }
 0x14a   : > { %v1532_v48 = vmax.f32 %v1174_v32, 0.0 }
 0x14b   : > { %v1530_v52 = vmax.f32 %v1166_v39, 0.0  ;;  %v5551_v33 = vpack.c.bf16 %v1586_v28, %v1585_v20  ;;  %v1411_v39 = vadd.f32 %v4784_v34, %v5372_v7 }
 0x14c   : > { %v1643_v54 = vpack.c.bf16 %v1532_v48, %v1531_v47  ;;  %v1403_v48 = vadd.f32 %v5372_v7, %v1402_v41 }
 0x14d   : > { %v1642_v56 = vpack.c.bf16 %v1530_v52, %v1529_v51  ;;  %v4728_v57 = vpop.f32.mrb[52].mxu0  ;;  %v1591_v53 = vmax.f32 %v1411_v39, 0.0 }
 0x14e   : > { %v1187_v60 = vadd.f32 %v4728_v57, %v5372_v7  ;;  %v1178_v61 = vpop.f32.mrb[53].mxu0  ;;  %v1589_v59 = vmax.f32 %v1403_v48, 0.0 }
 0x14f   : > { %v1179_v0 = vadd.f32 %v5372_v7, %v1178_v61  ;;  %v4729_v1 = vpop.f32.mrb[54].mxu0  ;;  %4858 = vmatprep.mubr.msk.bf16.mxu1 %vm1712_vm2, %v1642_v56  ;;  %v1405_v56 = vpop.f32.mrb[47].mxu1 }
 0x150   : > { %v1190_v5 = vadd.f32 %v4729_v1, %v5372_v7  ;;  %v1181_v11 = vpop.f32.mrb[55].mxu0  ;;  %4859 = vmatmul.mubr.msk.bf16.gmra.mrb[112].mxu1 %vm1712_vm2, %v1643_v54  ;;  %v1535_v23 = vmax.f32 %v1187_v60, 0.0  ;;  %v1414_v54 = vadd.f32 %v4785_v50, %v5372_v7  ;;  %v1406_v60 = vadd.f32 %v5372_v7, %v1405_v56  ;;  %v4788_v17 = vpop.f32.mrb[48].mxu1 }
 0x151   : > { %v1182_v18 = vadd.f32 %v5372_v7, %v1181_v11  ;;  %v1533_v26 = vmax.f32 %v1179_v0, 0.0  ;;  %v1427_v21 = vadd.f32 %v4788_v17, %v5372_v7 }
 0x152   : > { %v1536_v24 = vmax.f32 %v1190_v5, 0.0  ;;  %v1592_v63 = vmax.f32 %v1414_v54, 0.0  ;;  %v1590_v2 = vmax.f32 %v1406_v60, 0.0 }
 0x153   : > { %v1534_v27 = vmax.f32 %v1182_v18, 0.0 }
 0x154   : > { %v1645_v29 = vpack.c.bf16 %v1536_v24, %v1535_v23  ;;  %v5563_v5 = vpack.c.bf16 %v1592_v63, %v1591_v53  ;;  %v5565_v15 = vpack.c.bf16 %v1590_v2, %v1589_v59  ;;  %v1418_v23 = vpop.f32.mrb[49].mxu1 }
 0x155   : > { %v1644_v31 = vpack.c.bf16 %v1534_v27, %v1533_v26  ;;  %v4732_v32 = vpop.f32.mrb[56].mxu0  ;;  %v1419_v26 = vadd.f32 %v5372_v7, %v1418_v23  ;;  %v4789_v27 = vpop.f32.mrb[50].mxu1 }
 0x156   : > { %v1203_v35 = vadd.f32 %v4732_v32, %v5372_v7  ;;  %v1194_v36 = vpop.f32.mrb[57].mxu0  ;;  %v1430_v32 = vadd.f32 %v4789_v27, %v5372_v7  ;;  %v1421_v34 = vpop.f32.mrb[51].mxu1 }
 0x157   : > { %v1195_v44 = vadd.f32 %v5372_v7, %v1194_v36  ;;  %v4733_v47 = vpop.f32.mrb[58].mxu0  ;;  %4862 = vmatprep.mubr.msk.bf16.mxu1 %vm1712_vm2, %v1644_v31  ;;  %v1595_v31 = vmax.f32 %v1427_v21, 0.0  ;;  %v1593_v36 = vmax.f32 %v1419_v26, 0.0  ;;  %v1422_v39 = vadd.f32 %v5372_v7, %v1421_v34 }
 0x158   : > { %v1206_v51 = vadd.f32 %v4733_v47, %v5372_v7  ;;  %v1197_v52 = vpop.f32.mrb[59].mxu0  ;;  %4863 = vmatmul.mubr.msk.bf16.gmra.mrb[116].mxu1 %vm1712_vm2, %v1645_v29  ;;  %v1539_v61 = vmax.f32 %v1203_v35, 0.0  ;;  %v1596_v47 = vmax.f32 %v1430_v32, 0.0 }
 0x159   : > { %v1198_v57 = vadd.f32 %v5372_v7, %v1197_v52  ;;  %v1537_v0 = vmax.f32 %v1195_v44, 0.0 }
 0x15a   : > { %v1540_v62 = vmax.f32 %v1206_v51, 0.0  ;;  %v1594_v51 = vmax.f32 %v1422_v39, 0.0  ;;  %v5577_v53 = vpack.c.bf16 %v1596_v47, %v1595_v31 }
 0x15b   : > { %v1538_v1 = vmax.f32 %v1198_v57, 0.0  ;;  %v4792_v57 = vpop.f32.mrb[52].mxu1 }
 0x15c   : > { %v1647_v4 = vpack.c.bf16 %v1540_v62, %v1539_v61  ;;  %v5579_v56 = vpack.c.bf16 %v1594_v51, %v1593_v36  ;;  %v1443_v59 = vadd.f32 %v4792_v57, %v5372_v7  ;;  %v1434_v60 = vpop.f32.mrb[53].mxu1 }
 0x15d   : > { %v1646_v11 = vpack.c.bf16 %v1538_v1, %v1537_v0  ;;  %v4736_v12 = vpop.f32.mrb[60].mxu0  ;;  %v1435_v61 = vadd.f32 %v5372_v7, %v1434_v60  ;;  %v4793_v62 = vpop.f32.mrb[54].mxu1 }
 0x15e   : > { %v1219_v18 = vadd.f32 %v4736_v12, %v5372_v7  ;;  %v1210_v20 = vpop.f32.mrb[61].mxu0  ;;  %v1599_v63 = vmax.f32 %v1443_v59, 0.0  ;;  %v1446_v0 = vadd.f32 %v4793_v62, %v5372_v7  ;;  %v1437_v1 = vpop.f32.mrb[55].mxu1 }
 0x15f   : > { %v1211_v24 = vadd.f32 %v5372_v7, %v1210_v20  ;;  %v4737_v25 = vpop.f32.mrb[62].mxu0  ;;  %4866 = vmatprep.mubr.msk.bf16.mxu1 %vm1712_vm2, %v1646_v11  ;;  %v1597_v2 = vmax.f32 %v1435_v61, 0.0  ;;  %v4796_v20 = vpop.f32.mrb[56].mxu1 }
 0x160   : > { %v1222_v28 = vadd.f32 %v4737_v25, %v5372_v7  ;;  %v1213_v29 = vpop.f32.mrb[63].mxu0  ;;  %4867 = vmatmul.mubr.msk.bf16.gmra.mrb[120].mxu1 %vm1712_vm2, %v1647_v4  ;;  %v1543_v41 = vmax.f32 %v1219_v18, 0.0  ;;  %v1438_v4 = vadd.f32 %v5372_v7, %v1437_v1  ;;  %v1600_v11 = vmax.f32 %v1446_v0, 0.0  ;;  %v1450_v23 = vpop.f32.mrb[57].mxu1 }
 0x161   : > { %v1214_v35 = vadd.f32 %v5372_v7, %v1213_v29  ;;  %v1541_v48 = vmax.f32 %v1211_v24, 0.0  ;;  %v1459_v21 = vadd.f32 %v4796_v20, %v5372_v7  ;;  %v1451_v24 = vadd.f32 %v5372_v7, %v1450_v23  ;;  %v4797_v25 = vpop.f32.mrb[58].mxu1 }
 0x162   : > { %v1544_v44 = vmax.f32 %v1222_v28, 0.0  ;;  %v1598_v12 = vmax.f32 %v1438_v4, 0.0  ;;  %v5589_v17 = vpack.c.bf16 %v1600_v11, %v1599_v63  ;;  %v1462_v26 = vadd.f32 %v4797_v25, %v5372_v7  ;;  %v1453_v27 = vpop.f32.mrb[59].mxu1 }
 0x163   : > { %v1542_v50 = vmax.f32 %v1214_v35, 0.0  ;;  %v1601_v28 = vmax.f32 %v1451_v24, 0.0  ;;  %v1454_v29 = vadd.f32 %v5372_v7, %v1453_v27  ;;  %v4800_v36 = vpop.f32.mrb[60].mxu1 }
 0x164   : > { %v1649_v52 = vpack.c.bf16 %v1544_v44, %v1543_v41  ;;  %v5591_v18 = vpack.c.bf16 %v1598_v12, %v1597_v2  ;;  %v1604_v31 = vmax.f32 %v1462_v26, 0.0  ;;  %v1475_v39 = vadd.f32 %v4800_v36, %v5372_v7 }
 0x165   : > { %v1648_v54 = vpack.c.bf16 %v1542_v50, %v1541_v48  ;;  %v1602_v32 = vmax.f32 %v1454_v29, 0.0 }
 0x167   : > { %4870 = vmatprep.mubr.msk.bf16.mxu1 %vm1712_vm2, %v1648_v54  ;;  %v5603_v35 = vpack.c.bf16 %v1602_v32, %v1601_v28 }
 0x168   : > { %4871 = vmatmul.mubr.msk.bf16.gmra.mrb[124].mxu1 %vm1712_vm2, %v1649_v52 }
 0x169   : > { %4874 = vmatprep.mubr.msk.bf16.mxu1 %vm1712_vm2, %v5405_v16  ;;  %v1603_v16 = vmax.f32 %v1459_v21, 0.0 }
 0x16b   : > { %v5601_v34 = vpack.c.bf16 %v1604_v31, %v1603_v16 }
 0x170   : > { %4875 = vmatmul.mubr.msk.bf16.gmra.mrb[128].mxu1 %vm1712_vm2, %v5403_v13  ;;  %v1466_v13 = vpop.f32.mrb[61].mxu1 }
 0x171   : > { %4878 = vmatprep.mubr.msk.bf16.mxu1 %vm1712_vm2, %v5422_v45  ;;  %v1467_v41 = vadd.f32 %v5372_v7, %v1466_v13  ;;  %v4801_v44 = vpop.f32.mrb[62].mxu1  ;;  %v1607_v45 = vmax.f32 %v1475_v39, 0.0 }
 0x172   : > { %v1478_v47 = vadd.f32 %v4801_v44, %v5372_v7  ;;  %v1469_v48 = vpop.f32.mrb[63].mxu1 }
 0x173   : > { %v1605_v50 = vmax.f32 %v1467_v41, 0.0  ;;  %v1470_v51 = vadd.f32 %v5372_v7, %v1469_v48  ;;  %v5656_v7 = vld [vmem:[%s6098_s4] ss:$0 sm:$0xff] }
 0x174   : > { %v1608_v52 = vmax.f32 %v1478_v47, 0.0 }
 0x175   : > { %v1606_v54 = vmax.f32 %v1470_v51, 0.0 }
 0x176   : > { %v5613_v57 = vpack.c.bf16 %v1608_v52, %v1607_v45 }
 0x177   : > { %v5615_v59 = vpack.c.bf16 %v1606_v54, %v1605_v50 }
 0x178   : > { %4879 = vmatmul.mubr.msk.bf16.gmra.mrb[132].mxu1 %vm1712_vm2, %v5420_v42 }
 0x179   : > { %4882 = vmatprep.mubr.msk.bf16.mxu1 %vm1712_vm2, %v5436_v10 }
 0x180   : > { %4883 = vmatmul.mubr.msk.bf16.gmra.mrb[136].mxu1 %vm1712_vm2, %v5434_v6 }
 0x181   : > { %4886 = vmatprep.mubr.msk.bf16.mxu1 %vm1712_vm2, %v5450_v40 }
 0x188   : > { %4887 = vmatmul.mubr.msk.bf16.gmra.mrb[140].mxu1 %vm1712_vm2, %v5448_v37 }
 0x189   : > { %4890 = vmatprep.mubr.msk.bf16.mxu1 %vm1712_vm2, %v5464_v8 }
 0x190   : > { %4891 = vmatmul.mubr.msk.bf16.gmra.mrb[144].mxu1 %vm1712_vm2, %v5462_v3 }
 0x191   : > { %4894 = vmatprep.mubr.msk.bf16.mxu1 %vm1712_vm2, %v5481_v43 }
 0x198   : > { %4895 = vmatmul.mubr.msk.bf16.gmra.mrb[148].mxu1 %vm1712_vm2, %v5479_v38 }
 0x199   : > { %4898 = vmatprep.mubr.msk.bf16.mxu1 %vm1712_vm2, %v5495_v14 }
 0x1a0   : > { %4899 = vmatmul.mubr.msk.bf16.gmra.mrb[152].mxu1 %vm1712_vm2, %v5493_v9 }
 0x1a1   : > { %4902 = vmatprep.mubr.msk.bf16.mxu1 %vm1712_vm2, %v5509_v49 }
 0x1a8   : > { %4903 = vmatmul.mubr.msk.bf16.gmra.mrb[156].mxu1 %vm1712_vm2, %v5507_v46 }
 0x1a9   : > { %4906 = vmatprep.mubr.msk.bf16.mxu1 %vm1712_vm2, %v5523_v22 }
 0x1b0   : > { %4907 = vmatmul.mubr.msk.bf16.gmra.mrb[160].mxu1 %vm1712_vm2, %v5521_v19 }
 0x1b1   : > { %4910 = vmatprep.mubr.msk.bf16.mxu1 %vm1712_vm2, %v5537_v58 }
 0x1b8   : > { %4911 = vmatmul.mubr.msk.bf16.gmra.mrb[164].mxu1 %vm1712_vm2, %v5535_v55 }
 0x1b9   : > { %4914 = vmatprep.mubr.msk.bf16.mxu1 %vm1712_vm2, %v5551_v33 }
 0x1c0   : > { %4915 = vmatmul.mubr.msk.bf16.gmra.mrb[168].mxu1 %vm1712_vm2, %v5549_v30 }
 0x1c1   : > { %4918 = vmatprep.mubr.msk.bf16.mxu1 %vm1712_vm2, %v5565_v15 }
 0x1c3   : > { %v4812_v42 = vpop.f32.mrb[64].mxu1 }
 0x1c4   : > { %v1948_v6 = vadd.f32 %v4812_v42, %v5656_v7  ;;  %v1939_v10 = vpop.f32.mrb[65].mxu1 }
 0x1c5   : > { %v1940_v37 = vadd.f32 %v5656_v7, %v1939_v10  ;;  %v4813_v40 = vpop.f32.mrb[66].mxu1 }
 0x1c6   : > { %v1951_v3 = vadd.f32 %v4813_v40, %v5656_v7  ;;  %v1942_v8 = vpop.f32.mrb[67].mxu1  ;;  %v2452_v43 = vmax.f32 %v1948_v6, 0.0 }
 0x1c7   : > { %v1943_v38 = vadd.f32 %v5656_v7, %v1942_v8  ;;  %v2450_v14 = vmax.f32 %v1940_v37, 0.0 }
 0x1c8   : > { %v2453_v9 = vmax.f32 %v1951_v3, 0.0  ;;  %4919 = vmatmul.mubr.msk.bf16.gmra.mrb[172].mxu1 %vm1712_vm2, %v5563_v5 }
 0x1c9   : > { %v2451_v46 = vmax.f32 %v1943_v38, 0.0  ;;  %4922 = vmatprep.mubr.msk.bf16.mxu1 %vm1712_vm2, %v5579_v56 }
 0x1ca   : > { %v2588_v49 = vpack.c.bf16 %v2453_v9, %v2452_v43 }
 0x1cb   : > { %v2587_v19 = vpack.c.bf16 %v2451_v46, %v2450_v14  ;;  %v4816_v22 = vpop.f32.mrb[68].mxu1 }
 0x1cc   : > { %v1964_v55 = vadd.f32 %v4816_v22, %v5656_v7  ;;  %v1955_v58 = vpop.f32.mrb[69].mxu1 }
 0x1cd   : > { %v1956_v30 = vadd.f32 %v5656_v7, %v1955_v58  ;;  %v4817_v33 = vpop.f32.mrb[70].mxu1  ;;  %4946 = vmatprep.mubr.msk.bf16.mxu0 %vm1712_vm2, %v2587_v19 }
 0x1ce   : > { %v1967_v15 = vadd.f32 %v4817_v33, %v5656_v7  ;;  %v1958_v60 = vpop.f32.mrb[71].mxu1  ;;  %4947 = vmatmul.mubr.msk.bf16.vlgmr.msra.gmra.mrb[64].mxu0 %vm1712_vm2, %v2588_v49  ;;  %v2456_v61 = vmax.f32 %v1964_v55, 0.0 }
 0x1cf   : > { %v1959_v5 = vadd.f32 %v5656_v7, %v1958_v60  ;;  %v2454_v62 = vmax.f32 %v1956_v30, 0.0 }
 0x1d0   : > { %v2457_v56 = vmax.f32 %v1967_v15, 0.0  ;;  %4923 = vmatmul.mubr.msk.bf16.gmra.mrb[176].mxu1 %vm1712_vm2, %v5577_v53 }
 0x1d1   : > { %v2455_v63 = vmax.f32 %v1959_v5, 0.0  ;;  %4926 = vmatprep.mubr.msk.bf16.mxu1 %vm1712_vm2, %v5591_v18 }
 0x1d2   : > { %v2590_v0 = vpack.c.bf16 %v2457_v56, %v2456_v61 }
 0x1d3   : > { %v2589_v1 = vpack.c.bf16 %v2455_v63, %v2454_v62  ;;  %v4820_v2 = vpop.f32.mrb[72].mxu1 }
 0x1d4   : > { %v1980_v4 = vadd.f32 %v4820_v2, %v5656_v7  ;;  %v1971_v11 = vpop.f32.mrb[73].mxu1 }
 0x1d5   : > { %v1972_v12 = vadd.f32 %v5656_v7, %v1971_v11  ;;  %v4821_v20 = vpop.f32.mrb[74].mxu1  ;;  %4950 = vmatprep.mubr.msk.bf16.mxu0 %vm1712_vm2, %v2589_v1 }
 0x1d6   : > { %v1983_v21 = vadd.f32 %v4821_v20, %v5656_v7  ;;  %v1974_v23 = vpop.f32.mrb[75].mxu1  ;;  %4951 = vmatmul.mubr.msk.bf16.gmra.mrb[68].mxu0 %vm1712_vm2, %v2590_v0  ;;  %v2460_v24 = vmax.f32 %v1980_v4, 0.0 }
 0x1d7   : > { %v1975_v53 = vadd.f32 %v5656_v7, %v1974_v23  ;;  %v2458_v25 = vmax.f32 %v1972_v12, 0.0 }
 0x1d8   : > { %v2461_v18 = vmax.f32 %v1983_v21, 0.0  ;;  %4927 = vmatmul.mubr.msk.bf16.gmra.mrb[180].mxu1 %vm1712_vm2, %v5589_v17 }
 0x1d9   : > { %v2459_v16 = vmax.f32 %v1975_v53, 0.0  ;;  %4930 = vmatprep.mubr.msk.bf16.mxu1 %vm1712_vm2, %v5603_v35 }
 0x1da   : > { %v2592_v26 = vpack.c.bf16 %v2461_v18, %v2460_v24 }
 0x1db   : > { %v2591_v27 = vpack.c.bf16 %v2459_v16, %v2458_v25  ;;  %v4824_v28 = vpop.f32.mrb[76].mxu1 }
 0x1dc   : > { %v1996_v29 = vadd.f32 %v4824_v28, %v5656_v7  ;;  %v1987_v31 = vpop.f32.mrb[77].mxu1 }
 0x1dd   : > { %v1988_v32 = vadd.f32 %v5656_v7, %v1987_v31  ;;  %v4825_v36 = vpop.f32.mrb[78].mxu1  ;;  %4954 = vmatprep.mubr.msk.bf16.mxu0 %vm1712_vm2, %v2591_v27 }
 0x1de   : > { %v1999_v39 = vadd.f32 %v4825_v36, %v5656_v7  ;;  %v1990_v13 = vpop.f32.mrb[79].mxu1  ;;  %4955 = vmatmul.mubr.msk.bf16.gmra.mrb[72].mxu0 %vm1712_vm2, %v2592_v26  ;;  %v2464_v41 = vmax.f32 %v1996_v29, 0.0 }
 0x1df   : > { %v1991_v17 = vadd.f32 %v5656_v7, %v1990_v13  ;;  %v2462_v44 = vmax.f32 %v1988_v32, 0.0 }
 0x1e0   : > { %v2465_v35 = vmax.f32 %v1999_v39, 0.0  ;;  %4931 = vmatmul.mubr.msk.bf16.gmra.mrb[184].mxu1 %vm1712_vm2, %v5601_v34 }
 0x1e1   : > { %v2463_v45 = vmax.f32 %v1991_v17, 0.0  ;;  %4934 = vmatprep.mubr.msk.bf16.mxu1 %vm1712_vm2, %v5615_v59 }
 0x1e2   : > { %v2594_v47 = vpack.c.bf16 %v2465_v35, %v2464_v41 }
 0x1e3   : > { %v2593_v48 = vpack.c.bf16 %v2463_v45, %v2462_v44  ;;  %v4828_v50 = vpop.f32.mrb[80].mxu1 }
 0x1e4   : > { %v2012_v51 = vadd.f32 %v4828_v50, %v5656_v7  ;;  %v2003_v52 = vpop.f32.mrb[81].mxu1 }
 0x1e5   : > { %v2004_v54 = vadd.f32 %v5656_v7, %v2003_v52  ;;  %v4829_v42 = vpop.f32.mrb[82].mxu1  ;;  %4958 = vmatprep.mubr.msk.bf16.mxu0 %vm1712_vm2, %v2593_v48 }
 0x1e6   : > { %v2015_v6 = vadd.f32 %v4829_v42, %v5656_v7  ;;  %v2006_v10 = vpop.f32.mrb[83].mxu1  ;;  %4959 = vmatmul.mubr.msk.bf16.gmra.mrb[76].mxu0 %vm1712_vm2, %v2594_v47  ;;  %v2468_v37 = vmax.f32 %v2012_v51, 0.0 }
 0x1e7   : > { %v2007_v34 = vadd.f32 %v5656_v7, %v2006_v10  ;;  %v2466_v40 = vmax.f32 %v2004_v54, 0.0 }
 0x1e8   : > { %v2469_v59 = vmax.f32 %v2015_v6, 0.0  ;;  %4935 = vmatmul.mubr.msk.bf16.gmra.mrb[188].mxu1 %vm1712_vm2, %v5613_v57 }
 0x1e9   : > { %v2467_v3 = vmax.f32 %v2007_v34, 0.0 }
 0x1ea   : > { %v2596_v8 = vpack.c.bf16 %v2469_v59, %v2468_v37 }
 0x1eb   : > { %v2595_v38 = vpack.c.bf16 %v2467_v3, %v2466_v40  ;;  %v4832_v43 = vpop.f32.mrb[84].mxu1 }
 0x1ec   : > { %v2028_v9 = vadd.f32 %v4832_v43, %v5656_v7  ;;  %v2019_v14 = vpop.f32.mrb[85].mxu1 }
 0x1ed   : > { %v2020_v46 = vadd.f32 %v5656_v7, %v2019_v14  ;;  %v4833_v49 = vpop.f32.mrb[86].mxu1  ;;  %4962 = vmatprep.mubr.msk.bf16.mxu0 %vm1712_vm2, %v2595_v38 }
 0x1ee   : > { %v2031_v19 = vadd.f32 %v4833_v49, %v5656_v7  ;;  %v2022_v22 = vpop.f32.mrb[87].mxu1  ;;  %4963 = vmatmul.mubr.msk.bf16.gmra.mrb[80].mxu0 %vm1712_vm2, %v2596_v8  ;;  %v2472_v55 = vmax.f32 %v2028_v9, 0.0 }
 0x1ef   : > { %v2023_v57 = vadd.f32 %v5656_v7, %v2022_v22  ;;  %v2470_v30 = vmax.f32 %v2020_v46, 0.0 }
 0x1f0   : > { %v2473_v58 = vmax.f32 %v2031_v19, 0.0 }
 0x1f1   : > { %v2471_v33 = vmax.f32 %v2023_v57, 0.0 }
 0x1f2   : > { %v2598_v15 = vpack.c.bf16 %v2473_v58, %v2472_v55 }
 0x1f3   : > { %v2597_v60 = vpack.c.bf16 %v2471_v33, %v2470_v30  ;;  %v4836_v5 = vpop.f32.mrb[88].mxu1 }
 0x1f4   : > { %v2044_v61 = vadd.f32 %v4836_v5, %v5656_v7  ;;  %v2035_v56 = vpop.f32.mrb[89].mxu1 }
 0x1f5   : > { %v2036_v62 = vadd.f32 %v5656_v7, %v2035_v56  ;;  %v4837_v63 = vpop.f32.mrb[90].mxu1  ;;  %4966 = vmatprep.mubr.msk.bf16.mxu0 %vm1712_vm2, %v2597_v60 }
 0x1f6   : > { %v2047_v0 = vadd.f32 %v4837_v63, %v5656_v7  ;;  %v2038_v1 = vpop.f32.mrb[91].mxu1  ;;  %4967 = vmatmul.mubr.msk.bf16.gmra.mrb[84].mxu0 %vm1712_vm2, %v2598_v15  ;;  %v2476_v4 = vmax.f32 %v2044_v61, 0.0 }
 0x1f7   : > { %v2039_v2 = vadd.f32 %v5656_v7, %v2038_v1  ;;  %v2474_v12 = vmax.f32 %v2036_v62, 0.0 }
 0x1f8   : > { %v2477_v11 = vmax.f32 %v2047_v0, 0.0 }
 0x1f9   : > { %v2475_v20 = vmax.f32 %v2039_v2, 0.0 }
 0x1fa   : > { %v2600_v21 = vpack.c.bf16 %v2477_v11, %v2476_v4 }
 0x1fb   : > { %v2599_v23 = vpack.c.bf16 %v2475_v20, %v2474_v12  ;;  %v4840_v53 = vpop.f32.mrb[92].mxu1 }
 0x1fc   : > { %v2060_v24 = vadd.f32 %v4840_v53, %v5656_v7  ;;  %v2051_v18 = vpop.f32.mrb[93].mxu1 }
 0x1fd   : > { %v2052_v25 = vadd.f32 %v5656_v7, %v2051_v18  ;;  %v4841_v16 = vpop.f32.mrb[94].mxu1  ;;  %4970 = vmatprep.mubr.msk.bf16.mxu0 %vm1712_vm2, %v2599_v23 }
 0x1fe   : > { %v2063_v26 = vadd.f32 %v4841_v16, %v5656_v7  ;;  %v2054_v27 = vpop.f32.mrb[95].mxu1  ;;  %4971 = vmatmul.mubr.msk.bf16.gmra.mrb[88].mxu0 %vm1712_vm2, %v2600_v21  ;;  %v2480_v29 = vmax.f32 %v2060_v24, 0.0 }
 0x1ff   : > { %v2055_v28 = vadd.f32 %v5656_v7, %v2054_v27  ;;  %v2478_v32 = vmax.f32 %v2052_v25, 0.0 }
 0x200   : > { %v2481_v31 = vmax.f32 %v2063_v26, 0.0 }
 0x201   : > { %v2479_v36 = vmax.f32 %v2055_v28, 0.0 }
 0x202   : > { %v2602_v39 = vpack.c.bf16 %v2481_v31, %v2480_v29 }
 0x203   : > { %v2601_v13 = vpack.c.bf16 %v2479_v36, %v2478_v32  ;;  %v4844_v17 = vpop.f32.mrb[96].mxu1 }
 0x204   : > { %v2076_v41 = vadd.f32 %v4844_v17, %v5656_v7  ;;  %v2067_v35 = vpop.f32.mrb[97].mxu1 }
 0x205   : > { %v2068_v44 = vadd.f32 %v5656_v7, %v2067_v35  ;;  %v4845_v45 = vpop.f32.mrb[98].mxu1  ;;  %4974 = vmatprep.mubr.msk.bf16.mxu0 %vm1712_vm2, %v2601_v13 }
 0x206   : > { %v2079_v47 = vadd.f32 %v4845_v45, %v5656_v7  ;;  %v2070_v48 = vpop.f32.mrb[99].mxu1  ;;  %4975 = vmatmul.mubr.msk.bf16.gmra.mrb[92].mxu0 %vm1712_vm2, %v2602_v39  ;;  %v2484_v51 = vmax.f32 %v2076_v41, 0.0 }
 0x207   : > { %v2071_v50 = vadd.f32 %v5656_v7, %v2070_v48  ;;  %v2482_v54 = vmax.f32 %v2068_v44, 0.0 }
 0x208   : > { %v2485_v52 = vmax.f32 %v2079_v47, 0.0 }
 0x209   : > { %v2483_v42 = vmax.f32 %v2071_v50, 0.0 }
 0x20a   : > { %v2604_v6 = vpack.c.bf16 %v2485_v52, %v2484_v51 }
 0x20b   : > { %v2603_v10 = vpack.c.bf16 %v2483_v42, %v2482_v54  ;;  %v4848_v34 = vpop.f32.mrb[100].mxu1 }
 0x20c   : > { %v2092_v37 = vadd.f32 %v4848_v34, %v5656_v7  ;;  %v2083_v59 = vpop.f32.mrb[101].mxu1 }
 0x20d   : > { %v2084_v40 = vadd.f32 %v5656_v7, %v2083_v59  ;;  %v4849_v3 = vpop.f32.mrb[102].mxu1  ;;  %4978 = vmatprep.mubr.msk.bf16.mxu0 %vm1712_vm2, %v2603_v10 }
 0x20e   : > { %v2095_v8 = vadd.f32 %v4849_v3, %v5656_v7  ;;  %v2086_v38 = vpop.f32.mrb[103].mxu1  ;;  %4979 = vmatmul.mubr.msk.bf16.gmra.mrb[96].mxu0 %vm1712_vm2, %v2604_v6  ;;  %v2488_v9 = vmax.f32 %v2092_v37, 0.0 }
 0x20f   : > { %v2087_v43 = vadd.f32 %v5656_v7, %v2086_v38  ;;  %v2486_v46 = vmax.f32 %v2084_v40, 0.0 }
 0x210   : > { %v2489_v14 = vmax.f32 %v2095_v8, 0.0 }
 0x211   : > { %v2487_v49 = vmax.f32 %v2087_v43, 0.0 }
 0x212   : > { %v2606_v19 = vpack.c.bf16 %v2489_v14, %v2488_v9 }
 0x213   : > { %v2605_v22 = vpack.c.bf16 %v2487_v49, %v2486_v46  ;;  %v4852_v57 = vpop.f32.mrb[104].mxu1 }
 0x214   : > { %v2108_v55 = vadd.f32 %v4852_v57, %v5656_v7  ;;  %v2099_v58 = vpop.f32.mrb[105].mxu1 }
 0x215   : > { %v2100_v30 = vadd.f32 %v5656_v7, %v2099_v58  ;;  %v4853_v33 = vpop.f32.mrb[106].mxu1  ;;  %4982 = vmatprep.mubr.msk.bf16.mxu0 %vm1712_vm2, %v2605_v22 }
 0x216   : > { %v2111_v15 = vadd.f32 %v4853_v33, %v5656_v7  ;;  %v2102_v60 = vpop.f32.mrb[107].mxu1  ;;  %4983 = vmatmul.mubr.msk.bf16.gmra.mrb[100].mxu0 %vm1712_vm2, %v2606_v19  ;;  %v2492_v61 = vmax.f32 %v2108_v55, 0.0 }
 0x217   : > { %v2103_v5 = vadd.f32 %v5656_v7, %v2102_v60  ;;  %v2490_v62 = vmax.f32 %v2100_v30, 0.0 }
 0x218   : > { %v2493_v56 = vmax.f32 %v2111_v15, 0.0 }
 0x219   : > { %v2491_v63 = vmax.f32 %v2103_v5, 0.0 }
 0x21a   : > { %v2608_v0 = vpack.c.bf16 %v2493_v56, %v2492_v61 }
 0x21b   : > { %v2607_v1 = vpack.c.bf16 %v2491_v63, %v2490_v62  ;;  %v4856_v2 = vpop.f32.mrb[108].mxu1 }
 0x21c   : > { %v2124_v4 = vadd.f32 %v4856_v2, %v5656_v7  ;;  %v2115_v11 = vpop.f32.mrb[109].mxu1 }
 0x21d   : > { %v2116_v12 = vadd.f32 %v5656_v7, %v2115_v11  ;;  %v4857_v20 = vpop.f32.mrb[110].mxu1  ;;  %4986 = vmatprep.mubr.msk.bf16.mxu0 %vm1712_vm2, %v2607_v1 }
 0x21e   : > { %v2127_v21 = vadd.f32 %v4857_v20, %v5656_v7  ;;  %v2118_v23 = vpop.f32.mrb[111].mxu1  ;;  %4987 = vmatmul.mubr.msk.bf16.gmra.mrb[104].mxu0 %vm1712_vm2, %v2608_v0  ;;  %v2496_v24 = vmax.f32 %v2124_v4, 0.0 }
 0x21f   : > { %v2119_v53 = vadd.f32 %v5656_v7, %v2118_v23  ;;  %v2494_v25 = vmax.f32 %v2116_v12, 0.0 }
 0x220   : > { %v2497_v18 = vmax.f32 %v2127_v21, 0.0 }
 0x221   : > { %v2495_v16 = vmax.f32 %v2119_v53, 0.0 }
 0x222   : > { %v2610_v26 = vpack.c.bf16 %v2497_v18, %v2496_v24 }
 0x223   : > { %v2609_v27 = vpack.c.bf16 %v2495_v16, %v2494_v25  ;;  %v4860_v28 = vpop.f32.mrb[112].mxu1 }
 0x224   : > { %v2140_v29 = vadd.f32 %v4860_v28, %v5656_v7  ;;  %v2131_v31 = vpop.f32.mrb[113].mxu1 }
 0x225   : > { %v2132_v32 = vadd.f32 %v5656_v7, %v2131_v31  ;;  %v4861_v36 = vpop.f32.mrb[114].mxu1  ;;  %4990 = vmatprep.mubr.msk.bf16.mxu0 %vm1712_vm2, %v2609_v27 }
 0x226   : > { %v2143_v39 = vadd.f32 %v4861_v36, %v5656_v7  ;;  %v2134_v13 = vpop.f32.mrb[115].mxu1  ;;  %4991 = vmatmul.mubr.msk.bf16.gmra.mrb[108].mxu0 %vm1712_vm2, %v2610_v26  ;;  %v2500_v41 = vmax.f32 %v2140_v29, 0.0 }
 0x227   : > { %v2135_v17 = vadd.f32 %v5656_v7, %v2134_v13  ;;  %v2498_v44 = vmax.f32 %v2132_v32, 0.0 }
 0x228   : > { %v2501_v35 = vmax.f32 %v2143_v39, 0.0 }
 0x229   : > { %v2499_v45 = vmax.f32 %v2135_v17, 0.0 }
 0x22a   : > { %v2612_v47 = vpack.c.bf16 %v2501_v35, %v2500_v41 }
 0x22b   : > { %v2611_v48 = vpack.c.bf16 %v2499_v45, %v2498_v44  ;;  %v4864_v50 = vpop.f32.mrb[116].mxu1 }
 0x22c   : > { %v2156_v51 = vadd.f32 %v4864_v50, %v5656_v7  ;;  %v2147_v52 = vpop.f32.mrb[117].mxu1 }
 0x22d   : > { %v2148_v54 = vadd.f32 %v5656_v7, %v2147_v52  ;;  %v4865_v42 = vpop.f32.mrb[118].mxu1  ;;  %4994 = vmatprep.mubr.msk.bf16.mxu0 %vm1712_vm2, %v2611_v48 }
 0x22e   : > { %v2159_v6 = vadd.f32 %v4865_v42, %v5656_v7  ;;  %v2150_v10 = vpop.f32.mrb[119].mxu1  ;;  %4995 = vmatmul.mubr.msk.bf16.gmra.mrb[112].mxu0 %vm1712_vm2, %v2612_v47  ;;  %v2504_v37 = vmax.f32 %v2156_v51, 0.0 }
 0x22f   : > { %v2151_v34 = vadd.f32 %v5656_v7, %v2150_v10  ;;  %v2502_v40 = vmax.f32 %v2148_v54, 0.0 }
 0x230   : > { %v2505_v59 = vmax.f32 %v2159_v6, 0.0 }
 0x231   : > { %v2503_v3 = vmax.f32 %v2151_v34, 0.0 }
 0x232   : > { %v2614_v8 = vpack.c.bf16 %v2505_v59, %v2504_v37 }
 0x233   : > { %v2613_v38 = vpack.c.bf16 %v2503_v3, %v2502_v40  ;;  %v4868_v43 = vpop.f32.mrb[120].mxu1 }
 0x234   : > { %v2172_v9 = vadd.f32 %v4868_v43, %v5656_v7  ;;  %v2163_v14 = vpop.f32.mrb[121].mxu1 }
 0x235   : > { %v2164_v46 = vadd.f32 %v5656_v7, %v2163_v14  ;;  %v4869_v49 = vpop.f32.mrb[122].mxu1  ;;  %4998 = vmatprep.mubr.msk.bf16.mxu0 %vm1712_vm2, %v2613_v38 }
 0x236   : > { %v2175_v19 = vadd.f32 %v4869_v49, %v5656_v7  ;;  %v2166_v22 = vpop.f32.mrb[123].mxu1  ;;  %4999 = vmatmul.mubr.msk.bf16.gmra.mrb[116].mxu0 %vm1712_vm2, %v2614_v8  ;;  %v2508_v55 = vmax.f32 %v2172_v9, 0.0 }
 0x237   : > { %v2167_v57 = vadd.f32 %v5656_v7, %v2166_v22  ;;  %v2506_v30 = vmax.f32 %v2164_v46, 0.0 }
 0x238   : > { %v2509_v58 = vmax.f32 %v2175_v19, 0.0 }
 0x239   : > { %v2507_v33 = vmax.f32 %v2167_v57, 0.0 }
 0x23a   : > { %v2616_v15 = vpack.c.bf16 %v2509_v58, %v2508_v55 }
 0x23b   : > { %v2615_v60 = vpack.c.bf16 %v2507_v33, %v2506_v30  ;;  %v4872_v5 = vpop.f32.mrb[124].mxu1 }
 0x23c   : > { %v2188_v61 = vadd.f32 %v4872_v5, %v5656_v7  ;;  %v2179_v56 = vpop.f32.mrb[125].mxu1 }
 0x23d   : > { %v2180_v62 = vadd.f32 %v5656_v7, %v2179_v56  ;;  %v4873_v63 = vpop.f32.mrb[126].mxu1  ;;  %5002 = vmatprep.mubr.msk.bf16.mxu0 %vm1712_vm2, %v2615_v60 }
 0x23e   : > { %v2191_v0 = vadd.f32 %v4873_v63, %v5656_v7  ;;  %v2182_v1 = vpop.f32.mrb[127].mxu1  ;;  %5003 = vmatmul.mubr.msk.bf16.gmra.mrb[120].mxu0 %vm1712_vm2, %v2616_v15  ;;  %v2512_v4 = vmax.f32 %v2188_v61, 0.0 }
 0x23f   : > { %v2183_v2 = vadd.f32 %v5656_v7, %v2182_v1  ;;  %v2510_v12 = vmax.f32 %v2180_v62, 0.0 }
 0x240   : > { %v2513_v11 = vmax.f32 %v2191_v0, 0.0 }
 0x241   : > { %v2511_v20 = vmax.f32 %v2183_v2, 0.0 }
 0x242   : > { %v2618_v21 = vpack.c.bf16 %v2513_v11, %v2512_v4 }
 0x243   : > { %v2617_v23 = vpack.c.bf16 %v2511_v20, %v2510_v12  ;;  %v4876_v53 = vpop.f32.mrb[128].mxu1 }
 0x244   : > { %v2204_v24 = vadd.f32 %v4876_v53, %v5656_v7  ;;  %v2195_v18 = vpop.f32.mrb[129].mxu1 }
 0x245   : > { %v2196_v25 = vadd.f32 %v5656_v7, %v2195_v18  ;;  %v4877_v16 = vpop.f32.mrb[130].mxu1  ;;  %5006 = vmatprep.mubr.msk.bf16.mxu0 %vm1712_vm2, %v2617_v23 }
 0x246   : > { %v2207_v26 = vadd.f32 %v4877_v16, %v5656_v7  ;;  %v2198_v27 = vpop.f32.mrb[131].mxu1  ;;  %5007 = vmatmul.mubr.msk.bf16.gmra.mrb[124].mxu0 %vm1712_vm2, %v2618_v21  ;;  %v2516_v29 = vmax.f32 %v2204_v24, 0.0 }
 0x247   : > { %v2199_v28 = vadd.f32 %v5656_v7, %v2198_v27  ;;  %v2514_v32 = vmax.f32 %v2196_v25, 0.0 }
 0x248   : > { %v2517_v31 = vmax.f32 %v2207_v26, 0.0 }
 0x249   : > { %v2515_v36 = vmax.f32 %v2199_v28, 0.0 }
 0x24a   : > { %v2620_v39 = vpack.c.bf16 %v2517_v31, %v2516_v29 }
 0x24b   : > { %v2619_v13 = vpack.c.bf16 %v2515_v36, %v2514_v32  ;;  %v4880_v17 = vpop.f32.mrb[132].mxu1 }
 0x24c   : > { %v2220_v41 = vadd.f32 %v4880_v17, %v5656_v7  ;;  %v2211_v35 = vpop.f32.mrb[133].mxu1 }
 0x24d   : > { %v2212_v44 = vadd.f32 %v5656_v7, %v2211_v35  ;;  %v4881_v45 = vpop.f32.mrb[134].mxu1  ;;  %5010 = vmatprep.mubr.msk.bf16.mxu0 %vm1712_vm2, %v2619_v13 }
 0x24e   : > { %v2223_v47 = vadd.f32 %v4881_v45, %v5656_v7  ;;  %v2214_v48 = vpop.f32.mrb[135].mxu1  ;;  %5011 = vmatmul.mubr.msk.bf16.gmra.mrb[128].mxu0 %vm1712_vm2, %v2620_v39  ;;  %v2520_v51 = vmax.f32 %v2220_v41, 0.0 }
 0x24f   : > { %v2215_v50 = vadd.f32 %v5656_v7, %v2214_v48  ;;  %v2518_v54 = vmax.f32 %v2212_v44, 0.0 }
 0x250   : > { %v2521_v52 = vmax.f32 %v2223_v47, 0.0 }
 0x251   : > { %v2519_v42 = vmax.f32 %v2215_v50, 0.0 }
 0x252   : > { %v2622_v6 = vpack.c.bf16 %v2521_v52, %v2520_v51 }
 0x253   : > { %v2621_v10 = vpack.c.bf16 %v2519_v42, %v2518_v54  ;;  %v4884_v34 = vpop.f32.mrb[136].mxu1 }
 0x254   : > { %v2236_v37 = vadd.f32 %v4884_v34, %v5656_v7  ;;  %v2227_v59 = vpop.f32.mrb[137].mxu1 }
 0x255   : > { %v2228_v40 = vadd.f32 %v5656_v7, %v2227_v59  ;;  %v4885_v3 = vpop.f32.mrb[138].mxu1  ;;  %5014 = vmatprep.mubr.msk.bf16.mxu0 %vm1712_vm2, %v2621_v10 }
 0x256   : > { %v2239_v8 = vadd.f32 %v4885_v3, %v5656_v7  ;;  %v2230_v38 = vpop.f32.mrb[139].mxu1  ;;  %5015 = vmatmul.mubr.msk.bf16.gmra.mrb[132].mxu0 %vm1712_vm2, %v2622_v6  ;;  %v2524_v9 = vmax.f32 %v2236_v37, 0.0 }
 0x257   : > { %v2231_v43 = vadd.f32 %v5656_v7, %v2230_v38  ;;  %v2522_v46 = vmax.f32 %v2228_v40, 0.0 }
 0x258   : > { %v2525_v14 = vmax.f32 %v2239_v8, 0.0 }
 0x259   : > { %v2523_v49 = vmax.f32 %v2231_v43, 0.0 }
 0x25a   : > { %v2624_v19 = vpack.c.bf16 %v2525_v14, %v2524_v9 }
 0x25b   : > { %v2623_v22 = vpack.c.bf16 %v2523_v49, %v2522_v46  ;;  %v4888_v57 = vpop.f32.mrb[140].mxu1 }
 0x25c   : > { %v2252_v55 = vadd.f32 %v4888_v57, %v5656_v7  ;;  %v2243_v58 = vpop.f32.mrb[141].mxu1 }
 0x25d   : > { %v2244_v30 = vadd.f32 %v5656_v7, %v2243_v58  ;;  %v4889_v33 = vpop.f32.mrb[142].mxu1  ;;  %5018 = vmatprep.mubr.msk.bf16.mxu0 %vm1712_vm2, %v2623_v22 }
 0x25e   : > { %v2255_v15 = vadd.f32 %v4889_v33, %v5656_v7  ;;  %v2246_v60 = vpop.f32.mrb[143].mxu1  ;;  %5019 = vmatmul.mubr.msk.bf16.gmra.mrb[136].mxu0 %vm1712_vm2, %v2624_v19  ;;  %v2528_v61 = vmax.f32 %v2252_v55, 0.0 }
 0x25f   : > { %v2247_v5 = vadd.f32 %v5656_v7, %v2246_v60  ;;  %v2526_v62 = vmax.f32 %v2244_v30, 0.0 }
 0x260   : > { %v2529_v56 = vmax.f32 %v2255_v15, 0.0 }
 0x261   : > { %v2527_v63 = vmax.f32 %v2247_v5, 0.0 }
 0x262   : > { %v2626_v0 = vpack.c.bf16 %v2529_v56, %v2528_v61 }
 0x263   : > { %v2625_v1 = vpack.c.bf16 %v2527_v63, %v2526_v62  ;;  %v4892_v2 = vpop.f32.mrb[144].mxu1 }
 0x264   : > { %v2268_v4 = vadd.f32 %v4892_v2, %v5656_v7  ;;  %v2259_v11 = vpop.f32.mrb[145].mxu1 }
 0x265   : > { %v2260_v12 = vadd.f32 %v5656_v7, %v2259_v11  ;;  %v4893_v20 = vpop.f32.mrb[146].mxu1  ;;  %5022 = vmatprep.mubr.msk.bf16.mxu0 %vm1712_vm2, %v2625_v1 }
 0x266   : > { %v2271_v21 = vadd.f32 %v4893_v20, %v5656_v7  ;;  %v2262_v23 = vpop.f32.mrb[147].mxu1  ;;  %5023 = vmatmul.mubr.msk.bf16.gmra.mrb[140].mxu0 %vm1712_vm2, %v2626_v0  ;;  %v2532_v24 = vmax.f32 %v2268_v4, 0.0 }
 0x267   : > { %v2263_v53 = vadd.f32 %v5656_v7, %v2262_v23  ;;  %v2530_v25 = vmax.f32 %v2260_v12, 0.0 }
 0x268   : > { %v2533_v18 = vmax.f32 %v2271_v21, 0.0 }
 0x269   : > { %v2531_v16 = vmax.f32 %v2263_v53, 0.0 }
 0x26a   : > { %v2628_v26 = vpack.c.bf16 %v2533_v18, %v2532_v24 }
 0x26b   : > { %v2627_v27 = vpack.c.bf16 %v2531_v16, %v2530_v25  ;;  %v4896_v28 = vpop.f32.mrb[148].mxu1 }
 0x26c   : > { %v2284_v29 = vadd.f32 %v4896_v28, %v5656_v7  ;;  %v2275_v31 = vpop.f32.mrb[149].mxu1 }
 0x26d   : > { %v2276_v32 = vadd.f32 %v5656_v7, %v2275_v31  ;;  %v4897_v36 = vpop.f32.mrb[150].mxu1  ;;  %5026 = vmatprep.mubr.msk.bf16.mxu0 %vm1712_vm2, %v2627_v27 }
 0x26e   : > { %v2287_v39 = vadd.f32 %v4897_v36, %v5656_v7  ;;  %v2278_v13 = vpop.f32.mrb[151].mxu1  ;;  %5027 = vmatmul.mubr.msk.bf16.gmra.mrb[144].mxu0 %vm1712_vm2, %v2628_v26  ;;  %v2536_v41 = vmax.f32 %v2284_v29, 0.0 }
 0x26f   : > { %v2279_v17 = vadd.f32 %v5656_v7, %v2278_v13  ;;  %v2534_v44 = vmax.f32 %v2276_v32, 0.0 }
 0x270   : > { %v2537_v35 = vmax.f32 %v2287_v39, 0.0 }
 0x271   : > { %v2535_v45 = vmax.f32 %v2279_v17, 0.0 }
 0x272   : > { %v2630_v47 = vpack.c.bf16 %v2537_v35, %v2536_v41 }
 0x273   : > { %v2629_v48 = vpack.c.bf16 %v2535_v45, %v2534_v44  ;;  %v4900_v50 = vpop.f32.mrb[152].mxu1 }
 0x274   : > { %v2300_v51 = vadd.f32 %v4900_v50, %v5656_v7  ;;  %v2291_v52 = vpop.f32.mrb[153].mxu1 }
 0x275   : > { %v2292_v54 = vadd.f32 %v5656_v7, %v2291_v52  ;;  %v4901_v42 = vpop.f32.mrb[154].mxu1  ;;  %5030 = vmatprep.mubr.msk.bf16.mxu0 %vm1712_vm2, %v2629_v48 }
 0x276   : > { %v2303_v6 = vadd.f32 %v4901_v42, %v5656_v7  ;;  %v2294_v10 = vpop.f32.mrb[155].mxu1  ;;  %5031 = vmatmul.mubr.msk.bf16.gmra.mrb[148].mxu0 %vm1712_vm2, %v2630_v47  ;;  %v2540_v37 = vmax.f32 %v2300_v51, 0.0 }
 0x277   : > { %v2295_v34 = vadd.f32 %v5656_v7, %v2294_v10  ;;  %v2538_v40 = vmax.f32 %v2292_v54, 0.0 }
 0x278   : > { %v2541_v59 = vmax.f32 %v2303_v6, 0.0 }
 0x279   : > { %v2539_v3 = vmax.f32 %v2295_v34, 0.0 }
 0x27a   : > { %v2632_v8 = vpack.c.bf16 %v2541_v59, %v2540_v37 }
 0x27b   : > { %v2631_v38 = vpack.c.bf16 %v2539_v3, %v2538_v40  ;;  %v4904_v43 = vpop.f32.mrb[156].mxu1 }
 0x27c   : > { %v2316_v9 = vadd.f32 %v4904_v43, %v5656_v7  ;;  %v2307_v14 = vpop.f32.mrb[157].mxu1 }
 0x27d   : > { %v2308_v46 = vadd.f32 %v5656_v7, %v2307_v14  ;;  %v4905_v49 = vpop.f32.mrb[158].mxu1  ;;  %5034 = vmatprep.mubr.msk.bf16.mxu0 %vm1712_vm2, %v2631_v38 }
 0x27e   : > { %v2319_v19 = vadd.f32 %v4905_v49, %v5656_v7  ;;  %v2310_v22 = vpop.f32.mrb[159].mxu1  ;;  %5035 = vmatmul.mubr.msk.bf16.gmra.mrb[152].mxu0 %vm1712_vm2, %v2632_v8  ;;  %v2544_v55 = vmax.f32 %v2316_v9, 0.0  ;;  %v5845_v9 = vld [vmem:[%s6100_s6] ss:$0 sm:$0xff] }
 0x27f   : > { %v2311_v57 = vadd.f32 %v5656_v7, %v2310_v22  ;;  %v2542_v30 = vmax.f32 %v2308_v46, 0.0 }
 0x280   : > { %v2545_v58 = vmax.f32 %v2319_v19, 0.0 }
 0x281   : > { %v2543_v33 = vmax.f32 %v2311_v57, 0.0 }
 0x282   : > { %v2634_v15 = vpack.c.bf16 %v2545_v58, %v2544_v55 }
 0x283   : > { %v2633_v60 = vpack.c.bf16 %v2543_v33, %v2542_v30  ;;  %v4908_v5 = vpop.f32.mrb[160].mxu1 }
 0x284   : > { %v2332_v61 = vadd.f32 %v4908_v5, %v5656_v7  ;;  %v2323_v56 = vpop.f32.mrb[161].mxu1 }
 0x285   : > { %v2324_v62 = vadd.f32 %v5656_v7, %v2323_v56  ;;  %v4909_v63 = vpop.f32.mrb[162].mxu1  ;;  %5038 = vmatprep.mubr.msk.bf16.mxu0 %vm1712_vm2, %v2633_v60 }
 0x286   : > { %v2335_v0 = vadd.f32 %v4909_v63, %v5656_v7  ;;  %v2326_v1 = vpop.f32.mrb[163].mxu1  ;;  %5039 = vmatmul.mubr.msk.bf16.gmra.mrb[156].mxu0 %vm1712_vm2, %v2634_v15  ;;  %v2548_v4 = vmax.f32 %v2332_v61, 0.0 }
 0x287   : > { %v2327_v2 = vadd.f32 %v5656_v7, %v2326_v1  ;;  %v2546_v12 = vmax.f32 %v2324_v62, 0.0 }
 0x288   : > { %v2549_v11 = vmax.f32 %v2335_v0, 0.0 }
 0x289   : > { %v2547_v20 = vmax.f32 %v2327_v2, 0.0 }
 0x28a   : > { %v2636_v21 = vpack.c.bf16 %v2549_v11, %v2548_v4 }
 0x28b   : > { %v2635_v23 = vpack.c.bf16 %v2547_v20, %v2546_v12  ;;  %v4912_v53 = vpop.f32.mrb[164].mxu1 }
 0x28c   : > { %v2348_v24 = vadd.f32 %v4912_v53, %v5656_v7  ;;  %v2339_v18 = vpop.f32.mrb[165].mxu1 }
 0x28d   : > { %v2340_v25 = vadd.f32 %v5656_v7, %v2339_v18  ;;  %v4913_v16 = vpop.f32.mrb[166].mxu1  ;;  %5042 = vmatprep.mubr.msk.bf16.mxu0 %vm1712_vm2, %v2635_v23 }
 0x28e   : > { %v2351_v26 = vadd.f32 %v4913_v16, %v5656_v7  ;;  %v2342_v27 = vpop.f32.mrb[167].mxu1  ;;  %5043 = vmatmul.mubr.msk.bf16.gmra.mrb[160].mxu0 %vm1712_vm2, %v2636_v21  ;;  %v2552_v29 = vmax.f32 %v2348_v24, 0.0 }
 0x28f   : > { %v2343_v28 = vadd.f32 %v5656_v7, %v2342_v27  ;;  %v2550_v32 = vmax.f32 %v2340_v25, 0.0 }
 0x290   : > { %v2553_v31 = vmax.f32 %v2351_v26, 0.0 }
 0x291   : > { %v2551_v36 = vmax.f32 %v2343_v28, 0.0 }
 0x292   : > { %v2638_v39 = vpack.c.bf16 %v2553_v31, %v2552_v29 }
 0x293   : > { %v2637_v13 = vpack.c.bf16 %v2551_v36, %v2550_v32  ;;  %v4916_v17 = vpop.f32.mrb[168].mxu1 }
 0x294   : > { %v2364_v41 = vadd.f32 %v4916_v17, %v5656_v7  ;;  %v2355_v35 = vpop.f32.mrb[169].mxu1 }
 0x295   : > { %v2356_v44 = vadd.f32 %v5656_v7, %v2355_v35  ;;  %v4917_v45 = vpop.f32.mrb[170].mxu1  ;;  %5046 = vmatprep.mubr.msk.bf16.mxu0 %vm1712_vm2, %v2637_v13 }
 0x296   : > { %v2367_v47 = vadd.f32 %v4917_v45, %v5656_v7  ;;  %v2358_v48 = vpop.f32.mrb[171].mxu1  ;;  %5047 = vmatmul.mubr.msk.bf16.gmra.mrb[164].mxu0 %vm1712_vm2, %v2638_v39  ;;  %v2556_v51 = vmax.f32 %v2364_v41, 0.0 }
 0x297   : > { %v2359_v50 = vadd.f32 %v5656_v7, %v2358_v48  ;;  %v2554_v54 = vmax.f32 %v2356_v44, 0.0 }
 0x298   : > { %v2557_v52 = vmax.f32 %v2367_v47, 0.0 }
 0x299   : > { %v2555_v42 = vmax.f32 %v2359_v50, 0.0 }
 0x29a   : > { %v2640_v6 = vpack.c.bf16 %v2557_v52, %v2556_v51 }
 0x29b   : > { %v2639_v10 = vpack.c.bf16 %v2555_v42, %v2554_v54  ;;  %v4920_v34 = vpop.f32.mrb[172].mxu1 }
 0x29c   : > { %v2380_v37 = vadd.f32 %v4920_v34, %v5656_v7  ;;  %v2371_v59 = vpop.f32.mrb[173].mxu1 }
 0x29d   : > { %v2372_v40 = vadd.f32 %v5656_v7, %v2371_v59  ;;  %v4921_v3 = vpop.f32.mrb[174].mxu1  ;;  %5050 = vmatprep.mubr.msk.bf16.mxu0 %vm1712_vm2, %v2639_v10 }
 0x29e   : > { %v2383_v8 = vadd.f32 %v4921_v3, %v5656_v7  ;;  %v2374_v38 = vpop.f32.mrb[175].mxu1  ;;  %5051 = vmatmul.mubr.msk.bf16.gmra.mrb[168].mxu0 %vm1712_vm2, %v2640_v6  ;;  %v2560_v14 = vmax.f32 %v2380_v37, 0.0 }
 0x29f   : > { %v2375_v43 = vadd.f32 %v5656_v7, %v2374_v38  ;;  %v2558_v49 = vmax.f32 %v2372_v40, 0.0 }
 0x2a0   : > { %v2561_v46 = vmax.f32 %v2383_v8, 0.0  ;;  %v5869_v8 = vld [vmem:[%s6098_s4] ss:$0 sm:$0xff] }
 0x2a1   : > { %v2559_v19 = vmax.f32 %v2375_v43, 0.0  ;;  %v4948_v22 = vpop.f32.mrb[64].mxu0 }
 0x2a2   : > { %v2642_v57 = vpack.c.bf16 %v2561_v46, %v2560_v14  ;;  %v2916_v55 = vadd.f32 %v4948_v22, %v5845_v9  ;;  %v2907_v58 = vpop.f32.mrb[65].mxu0 }
 0x2a3   : > { %v2641_v30 = vpack.c.bf16 %v2559_v19, %v2558_v49  ;;  %v2908_v33 = vadd.f32 %v5845_v9, %v2907_v58  ;;  %v4924_v15 = vpop.f32.mrb[176].mxu1  ;;  %v4949_v60 = vpop.f32.mrb[66].mxu0 }
 0x2a4   : > { %v2396_v5 = vadd.f32 %v4924_v15, %v5656_v7  ;;  %v2919_v61 = vadd.f32 %v4949_v60, %v5845_v9  ;;  %v2387_v56 = vpop.f32.mrb[177].mxu1  ;;  %v2910_v62 = vpop.f32.mrb[67].mxu0  ;;  %v3420_v2 = vmax.f32 %v2916_v55, 0.0 }
 0x2a5   : > { %v2388_v63 = vadd.f32 %v5656_v7, %v2387_v56  ;;  %v2911_v0 = vadd.f32 %v5845_v9, %v2910_v62  ;;  %v4925_v1 = vpop.f32.mrb[178].mxu1  ;;  %5054 = vmatprep.mubr.msk.bf16.mxu0 %vm1712_vm2, %v2641_v30  ;;  %v3418_v20 = vmax.f32 %v2908_v33, 0.0 }
 0x2a6   : > { %v3421_v4 = vmax.f32 %v2919_v61, 0.0  ;;  %v2399_v11 = vadd.f32 %v4925_v1, %v5656_v7  ;;  %v2390_v12 = vpop.f32.mrb[179].mxu1  ;;  %5055 = vmatmul.mubr.msk.bf16.gmra.mrb[172].mxu0 %vm1712_vm2, %v2642_v57  ;;  %v2564_v53 = vmax.f32 %v2396_v5, 0.0 }
 0x2a7   : > { %v3419_v21 = vmax.f32 %v2911_v0, 0.0  ;;  %v2391_v23 = vadd.f32 %v5656_v7, %v2390_v12  ;;  %v2562_v25 = vmax.f32 %v2388_v63, 0.0 }
 0x2a8   : > { %v3553_v24 = vmax.f32 %v3420_v2, %v3421_v4  ;;  %v2565_v18 = vmax.f32 %v2399_v11, 0.0 }
 0x2a9   : > { %v3546_v16 = vmax.f32 %v3418_v20, %v3419_v21  ;;  %v2563_v26 = vmax.f32 %v2391_v23, 0.0  ;;  %v4952_v27 = vpop.f32.mrb[68].mxu0 }
 0x2aa   : > { %v3554_v28 = vrot.slane %v3553_v24, 4  ;;  %v2644_v29 = vpack.c.bf16 %v2565_v18, %v2564_v53  ;;  %v2932_v31 = vadd.f32 %v4952_v27, %v5845_v9  ;;  %v2923_v32 = vpop.f32.mrb[69].mxu0 }
 0x2ab   : > { %v3547_v36 = vrot.slane %v3546_v16, 4  ;;  %v2643_v39 = vpack.c.bf16 %v2563_v26, %v2562_v25  ;;  %v2924_v13 = vadd.f32 %v5845_v9, %v2923_v32  ;;  %v4928_v17 = vpop.f32.mrb[180].mxu1  ;;  %v4953_v41 = vpop.f32.mrb[70].mxu0 }
 0x2ac   : > { %v3555_v35 = vmax.f32 %v3553_v24, %v3554_v28  ;;  %v2412_v44 = vadd.f32 %v4928_v17, %v5656_v7  ;;  %v2935_v45 = vadd.f32 %v4953_v41, %v5845_v9  ;;  %v2403_v47 = vpop.f32.mrb[181].mxu1  ;;  %v2926_v48 = vpop.f32.mrb[71].mxu0  ;;  %v3424_v6 = vmax.f32 %v2932_v31, 0.0 }
 0x2ad   : > { %v3548_v50 = vmax.f32 %v3546_v16, %v3547_v36  ;;  %v2404_v51 = vadd.f32 %v5656_v7, %v2403_v47  ;;  %v2927_v52 = vadd.f32 %v5845_v9, %v2926_v48  ;;  %v4929_v54 = vpop.f32.mrb[182].mxu1  ;;  %5058 = vmatprep.mubr.msk.bf16.mxu0 %vm1712_vm2, %v2643_v39  ;;  %v3422_v40 = vmax.f32 %v2924_v13, 0.0 }
 0x2ae   : > { %v3556_v42 = vrot.slane %v3555_v35, 2  ;;  %v3425_v10 = vmax.f32 %v2935_v45, 0.0  ;;  %v2415_v34 = vadd.f32 %v4929_v54, %v5656_v7  ;;  %v2406_v37 = vpop.f32.mrb[183].mxu1  ;;  %5059 = vmatmul.mubr.msk.bf16.gmra.mrb[176].mxu0 %vm1712_vm2, %v2644_v29  ;;  %v2568_v14 = vmax.f32 %v2412_v44, 0.0 }
 0x2af   : > { %v3549_v59 = vrot.slane %v3548_v50, 2  ;;  %v3423_v3 = vmax.f32 %v2927_v52, 0.0  ;;  %v2407_v38 = vadd.f32 %v5869_v8, %v2406_v37  ;;  %v2566_v22 = vmax.f32 %v2404_v51, 0.0 }
 0x2b0   : > { %v3557_v43 = vmax.f32 %v3555_v35, %v3556_v42  ;;  %v3567_v46 = vmax.f32 %v3424_v6, %v3425_v10  ;;  %v2569_v49 = vmax.f32 %v2415_v34, 0.0 }
 0x2b1   : > { %v3550_v19 = vmax.f32 %v3548_v50, %v3549_v59  ;;  %v3560_v7 = vmax.f32 %v3422_v40, %v3423_v3  ;;  %v2567_v57 = vmax.f32 %v2407_v38, 0.0  ;;  %v4956_v55 = vpop.f32.mrb[72].mxu0 }
 0x2b2   : > { %v3558_v58 = vrot.slane %v3557_v43, 1  ;;  %v3568_v30 = vrot.slane %v3567_v46, 4  ;;  %v2646_v33 = vpack.c.bf16 %v2569_v49, %v2568_v14  ;;  %v2948_v15 = vadd.f32 %v4956_v55, %v5845_v9  ;;  %v2939_v60 = vpop.f32.mrb[73].mxu0 }
 0x2b3   : > { %v3551_v5 = vrot.slane %v3550_v19, 1  ;;  %v3561_v61 = vrot.slane %v3560_v7, 4  ;;  %v2645_v56 = vpack.c.bf16 %v2567_v57, %v2566_v22  ;;  %v2940_v62 = vadd.f32 %v5845_v9, %v2939_v60  ;;  %v4932_v63 = vpop.f32.mrb[184].mxu1  ;;  %v4957_v0 = vpop.f32.mrb[74].mxu0 }
 0x2b4   : > { %v3559_v1 = vmax.f32 %v3557_v43, %v3558_v58  ;;  %v3569_v2 = vmax.f32 %v3567_v46, %v3568_v30  ;;  %v2428_v4 = vadd.f32 %v5869_v8, %v4932_v63  ;;  %v2419_v11 = vpop.f32.mrb[185].mxu1  ;;  %v2942_v12 = vpop.f32.mrb[75].mxu0  ;;  %v3428_v23 = vmax.f32 %v2948_v15, 0.0 }
 0x2b5   : > { %v3552_v20 = vmax.f32 %v3550_v19, %v3551_v5  ;;  %v3562_v21 = vmax.f32 %v3560_v7, %v3561_v61  ;;  %v2951_v53 = vadd.f32 %v4957_v0, %v5845_v9  ;;  %v4933_v24 = vpop.f32.mrb[186].mxu1  ;;  %5062 = vmatprep.mubr.msk.bf16.mxu0 %vm1712_vm2, %v2645_v56  ;;  %v3426_v25 = vmax.f32 %v2940_v62, 0.0 }
 0x2b6   : > { %v3570_v18 = vrot.slane %v3569_v2, 2  ;;  %v2420_v16 = vadd.f32 %v5869_v8, %v2419_v11  ;;  %v2943_v26 = vadd.f32 %v5845_v9, %v2942_v12  ;;  %v2422_v27 = vpop.f32.mrb[187].mxu1  ;;  %5063 = vmatmul.mubr.msk.bf16.gmra.mrb[180].mxu0 %vm1712_vm2, %v2646_v33  ;;  %v2431_v32 = vadd.f32 %v5869_v8, %v4933_v24 }
 0x2b7   : > { %v4059_v28 = vsel %vm4058_vm3, %v3559_v1, %v3552_v20  ;;  %v3563_v29 = vrot.slane %v3562_v21, 2  ;;  %v3429_v31 = vmax.f32 %v2951_v53, 0.0  ;;  %v2572_v39 = vmax.f32 %v2428_v4, 0.0 }
 0x2b8   : > { %v3571_v36 = vmax.f32 %v3569_v2, %v3570_v18  ;;  %v3427_v13 = vmax.f32 %v2943_v26, 0.0  ;;  %v2423_v17 = vadd.f32 %v5869_v8, %v2422_v27  ;;  %v2570_v44 = vmax.f32 %v2420_v16, 0.0 }
 0x2b9   : > { %v3564_v41 = vmax.f32 %v3562_v21, %v3563_v29  ;;  %v3581_v35 = vmax.f32 %v3428_v23, %v3429_v31  ;;  %v2573_v45 = vmax.f32 %v2431_v32, 0.0  ;;  %v4960_v47 = vpop.f32.mrb[76].mxu0 }
 0x2ba   : > { %v3572_v48 = vrot.slane %v3571_v36, 1  ;;  %v3574_v50 = vmax.f32 %v3426_v25, %v3427_v13  ;;  %v2571_v51 = vmax.f32 %v2423_v17, 0.0  ;;  %v2964_v52 = vadd.f32 %v4960_v47, %v5845_v9  ;;  %v2955_v54 = vpop.f32.mrb[77].mxu0 }
 0x2bb   : > { %v3565_v42 = vrot.slane %v3564_v41, 1  ;;  %v3582_v6 = vrot.slane %v3581_v35, 4  ;;  %v2648_v10 = vpack.c.bf16 %v2573_v45, %v2572_v39  ;;  %v2956_v34 = vadd.f32 %v5845_v9, %v2955_v54  ;;  %v4936_v37 = vpop.f32.mrb[188].mxu1  ;;  %v4961_v59 = vpop.f32.mrb[78].mxu0 }
 0x2bc   : > { %v3573_v40 = vmax.f32 %v3571_v36, %v3572_v48  ;;  %v3575_v3 = vrot.slane %v3574_v50, 4  ;;  %v2647_v38 = vpack.c.bf16 %v2571_v51, %v2570_v44  ;;  %v2435_v43 = vpop.f32.mrb[189].mxu1  ;;  %v2958_v14 = vpop.f32.mrb[79].mxu0  ;;  %v3432_v19 = vmax.f32 %v2964_v52, 0.0 }
 0x2bd   : > { %v3566_v46 = vmax.f32 %v3564_v41, %v3565_v42  ;;  %v3583_v49 = vmax.f32 %v3581_v35, %v3582_v6  ;;  %v2444_v22 = vadd.f32 %v5869_v8, %v4936_v37  ;;  %v4937_v7 = vpop.f32.mrb[190].mxu1  ;;  %v2967_v55 = vadd.f32 %v4961_v59, %v5845_v9 }
 0x2be   : > { %v3576_v57 = vmax.f32 %v3574_v50, %v3575_v3  ;;  %v2436_v58 = vadd.f32 %v5869_v8, %v2435_v43  ;;  %v2959_v30 = vadd.f32 %v5845_v9, %v2958_v14  ;;  %5066 = vmatprep.mubr.msk.bf16.mxu0 %vm1712_vm2, %v2647_v38  ;;  %v2438_v33 = vpop.f32.mrb[191].mxu1  ;;  %v3430_v5 = vmax.f32 %v2956_v34, 0.0 }
 0x2bf   : > { %v4061_v15 = vsel %vm4060_vm4, %v3566_v46, %v4059_v28  ;;  %v3584_v60 = vrot.slane %v3583_v49, 2  ;;  %v2447_v61 = vadd.f32 %v5869_v8, %v4937_v7  ;;  %5067 = vmatmul.mubr.msk.bf16.gmra.mrb[184].mxu0 %vm1712_vm2, %v2648_v10  ;;  %v2576_v63 = vmax.f32 %v2444_v22, 0.0 }
 0x2c0   : > { %v3577_v56 = vrot.slane %v3576_v57, 2  ;;  %v4063_v62 = vsel %vm4062_vm5, %v3573_v40, %v4061_v15  ;;  %v3433_v0 = vmax.f32 %v2967_v55, 0.0  ;;  %v3431_v2 = vmax.f32 %v2959_v30, 0.0 }
 0x2c1   : > { %v3585_v1 = vmax.f32 %v3583_v49, %v3584_v60  ;;  %v2577_v4 = vmax.f32 %v2447_v61, 0.0  ;;  %v2439_v11 = vadd.f32 %v5869_v8, %v2438_v33  ;;  %v4964_v12 = vpop.f32.mrb[80].mxu0  ;;  %v2574_v23 = vmax.f32 %v2436_v58, 0.0 }
 0x2c2   : > { %v3578_v20 = vmax.f32 %v3576_v57, %v3577_v56  ;;  %v3595_v21 = vmax.f32 %v3432_v19, %v3433_v0  ;;  %v2980_v53 = vadd.f32 %v4964_v12, %v5845_v9  ;;  %v2971_v24 = vpop.f32.mrb[81].mxu0  ;;  %v3588_v25 = vmax.f32 %v3430_v5, %v3431_v2 }
 0x2c3   : > { %v3586_v18 = vrot.slane %v3585_v1, 1  ;;  %v2650_v16 = vpack.c.bf16 %v2577_v4, %v2576_v63  ;;  %v2575_v26 = vmax.f32 %v2439_v11, 0.0  ;;  %v4965_v27 = vpop.f32.mrb[82].mxu0  ;;  %v2972_v8 = vadd.f32 %v5845_v9, %v2971_v24 }
 0x2c4   : > { %v3579_v28 = vrot.slane %v3578_v20, 1  ;;  %v3596_v29 = vrot.slane %v3595_v21, 4  ;;  %v2974_v31 = vpop.f32.mrb[83].mxu0  ;;  %v3589_v32 = vrot.slane %v3588_v25, 4  ;;  %v2983_v39 = vadd.f32 %v4965_v27, %v5845_v9 }
 0x2c5   : > { %v2649_v36 = vpack.c.bf16 %v2575_v26, %v2574_v23  ;;  %v2975_v41 = vadd.f32 %v5845_v9, %v2974_v31  ;;  %v3587_v35 = vmax.f32 %v3585_v1, %v3586_v18  ;;  %v3436_v45 = vmax.f32 %v2980_v53, 0.0 }
 0x2c6   : > { %v3580_v13 = vmax.f32 %v3578_v20, %v3579_v28  ;;  %v3597_v17 = vmax.f32 %v3595_v21, %v3596_v29  ;;  %v3590_v44 = vmax.f32 %v3588_v25, %v3589_v32  ;;  %v3437_v47 = vmax.f32 %v2983_v39, 0.0 }
 0x2c7   : > { %5070 = vmatprep.mubr.msk.bf16.mxu0 %vm1712_vm2, %v2649_v36  ;;  %v3434_v51 = vmax.f32 %v2972_v8, 0.0  ;;  %v3435_v52 = vmax.f32 %v2975_v41, 0.0 }
 0x2c8   : > { %v4065_v48 = vsel %vm4064_vm6, %v3580_v13, %v4063_v62  ;;  %v3598_v50 = vrot.slane %v3597_v17, 2  ;;  %5071 = vmatmul.mubr.msk.bf16.gmra.mrb[188].mxu0 %vm1712_vm2, %v2650_v16  ;;  %v3591_v54 = vrot.slane %v3590_v44, 2  ;;  %v3609_v6 = vmax.f32 %v3436_v45, %v3437_v47 }
 0x2c9   : > { %v4067_v42 = vsel %vm4066_vm7, %v3587_v35, %v4065_v48  ;;  %v4968_v10 = vpop.f32.mrb[84].mxu0  ;;  %v3602_v37 = vmax.f32 %v3434_v51, %v3435_v52 }
 0x2ca   : > { %v3599_v34 = vmax.f32 %v3597_v17, %v3598_v50  ;;  %v2996_v59 = vadd.f32 %v4968_v10, %v5845_v9  ;;  %v2987_v40 = vpop.f32.mrb[85].mxu0  ;;  %v3592_v3 = vmax.f32 %v3590_v44, %v3591_v54  ;;  %v3610_v38 = vrot.slane %v3609_v6, 4 }
 0x2cb   : > { %v2988_v43 = vadd.f32 %v5845_v9, %v2987_v40  ;;  %v4969_v14 = vpop.f32.mrb[86].mxu0  ;;  %v3603_v49 = vrot.slane %v3602_v37, 4 }
 0x2cc   : > { %v3600_v46 = vrot.slane %v3599_v34, 1  ;;  %v2999_v19 = vadd.f32 %v4969_v14, %v5845_v9  ;;  %v2990_v22 = vpop.f32.mrb[87].mxu0  ;;  %v3593_v7 = vrot.slane %v3592_v3, 1  ;;  %v3611_v57 = vmax.f32 %v3609_v6, %v3610_v38 }
 0x2cd   : > { %v2991_v55 = vadd.f32 %v5845_v9, %v2990_v22  ;;  %v3604_v58 = vmax.f32 %v3602_v37, %v3603_v49  ;;  %v3440_v30 = vmax.f32 %v2996_v59, 0.0  ;;  %v3438_v5 = vmax.f32 %v2988_v43, 0.0 }
 0x2ce   : > { %v3441_v33 = vmax.f32 %v2999_v19, 0.0  ;;  %v3594_v15 = vmax.f32 %v3592_v3, %v3593_v7  ;;  %v3612_v60 = vrot.slane %v3611_v57, 2  ;;  %v3601_v56 = vmax.f32 %v3599_v34, %v3600_v46 }
 0x2cf   : > { %v3439_v61 = vmax.f32 %v2991_v55, 0.0  ;;  %v3605_v62 = vrot.slane %v3604_v58, 2 }
 0x2d0   : > { %v3623_v63 = vmax.f32 %v3440_v30, %v3441_v33  ;;  %v4069_v0 = vsel %vm4068_vm8, %v3594_v15, %v4067_v42  ;;  %v3613_v1 = vmax.f32 %v3611_v57, %v3612_v60 }
 0x2d1   : > { %v3616_v2 = vmax.f32 %v3438_v5, %v3439_v61  ;;  %v4972_v4 = vpop.f32.mrb[88].mxu0  ;;  %v4071_v11 = vsel %vm4070_vm9, %v3601_v56, %v4069_v0  ;;  %v3606_v12 = vmax.f32 %v3604_v58, %v3605_v62 }
 0x2d2   : > { %v3624_v20 = vrot.slane %v3623_v63, 4  ;;  %v3012_v21 = vadd.f32 %v4972_v4, %v5845_v9  ;;  %v3003_v23 = vpop.f32.mrb[89].mxu0  ;;  %4129 = vst [vmem:[%s5921_s16] sm:$0xff] %v4071_v11  ;;  %v3614_v53 = vrot.slane %v3613_v1, 1 }
 0x2d3   : > { %v3617_v24 = vrot.slane %v3616_v2, 4  ;;  %v3004_v18 = vadd.f32 %v5845_v9, %v3003_v23  ;;  %v4973_v25 = vpop.f32.mrb[90].mxu0  ;;  %v3607_v16 = vrot.slane %v3606_v12, 1 }
 0x2d4   : > { %v3625_v26 = vmax.f32 %v3623_v63, %v3624_v20  ;;  %v3015_v27 = vadd.f32 %v4973_v25, %v5845_v9  ;;  %v3006_v28 = vpop.f32.mrb[91].mxu0  ;;  %v3615_v29 = vmax.f32 %v3613_v1, %v3614_v53  ;;  %v3444_v39 = vmax.f32 %v3012_v21, 0.0 }
 0x2d5   : > { %v3618_v8 = vmax.f32 %v3616_v2, %v3617_v24  ;;  %v3007_v31 = vadd.f32 %v5845_v9, %v3006_v28  ;;  %v3608_v32 = vmax.f32 %v3606_v12, %v3607_v16  ;;  %v3442_v41 = vmax.f32 %v3004_v18, 0.0 }
 0x2d6   : > { %v3626_v36 = vrot.slane %v3625_v26, 2  ;;  %v3445_v13 = vmax.f32 %v3015_v27, 0.0 }
 0x2d7   : > { %v3619_v17 = vrot.slane %v3618_v8, 2  ;;  %v3443_v35 = vmax.f32 %v3007_v31, 0.0  ;;  %v4072_v44 = vsel %vm4058_vm3, %v3615_v29, %v3608_v32 }
 0x2d8   : > { %v3627_v45 = vmax.f32 %v3625_v26, %v3626_v36  ;;  %v3637_v47 = vmax.f32 %v3444_v39, %v3445_v13 }
 0x2d9   : > { %v3620_v48 = vmax.f32 %v3618_v8, %v3619_v17  ;;  %v3630_v50 = vmax.f32 %v3442_v41, %v3443_v35  ;;  %v4976_v51 = vpop.f32.mrb[92].mxu0 }
 0x2da   : > { %v3628_v52 = vrot.slane %v3627_v45, 1  ;;  %v3638_v54 = vrot.slane %v3637_v47, 4  ;;  %v3028_v42 = vadd.f32 %v4976_v51, %v5845_v9  ;;  %v3019_v6 = vpop.f32.mrb[93].mxu0 }
 0x2db   : > { %v3621_v10 = vrot.slane %v3620_v48, 1  ;;  %v3631_v34 = vrot.slane %v3630_v50, 4  ;;  %v3020_v37 = vadd.f32 %v5845_v9, %v3019_v6  ;;  %v4977_v59 = vpop.f32.mrb[94].mxu0 }
 0x2dc   : > { %v3639_v40 = vmax.f32 %v3637_v47, %v3638_v54  ;;  %v3031_v3 = vadd.f32 %v4977_v59, %v5845_v9  ;;  %v3022_v38 = vpop.f32.mrb[95].mxu0  ;;  %v3629_v49 = vmax.f32 %v3627_v45, %v3628_v52  ;;  %v3448_v22 = vmax.f32 %v3028_v42, 0.0 }
 0x2dd   : > { %v3622_v43 = vmax.f32 %v3620_v48, %v3621_v10  ;;  %v3632_v14 = vmax.f32 %v3630_v50, %v3631_v34  ;;  %v3023_v46 = vadd.f32 %v5845_v9, %v3022_v38  ;;  %v3446_v58 = vmax.f32 %v3020_v37, 0.0 }
 0x2de   : > { %v3640_v19 = vrot.slane %v3639_v40, 2  ;;  %v3449_v7 = vmax.f32 %v3031_v3, 0.0 }
 0x2df   : > { %v4073_v57 = vsel %vm4060_vm4, %v3622_v43, %v4072_v44  ;;  %v3633_v55 = vrot.slane %v3632_v14, 2  ;;  %v3447_v30 = vmax.f32 %v3023_v46, 0.0 }
 0x2e0   : > { %v3641_v33 = vmax.f32 %v3639_v40, %v3640_v19  ;;  %v4074_v15 = vsel %vm4062_vm5, %v3629_v49, %v4073_v57  ;;  %v3651_v60 = vmax.f32 %v3448_v22, %v3449_v7 }
 0x2e1   : > { %v3634_v5 = vmax.f32 %v3632_v14, %v3633_v55  ;;  %v3644_v61 = vmax.f32 %v3446_v58, %v3447_v30  ;;  %v4980_v56 = vpop.f32.mrb[96].mxu0 }
 0x2e2   : > { %v3642_v62 = vrot.slane %v3641_v33, 1  ;;  %v3652_v63 = vrot.slane %v3651_v60, 4  ;;  %v3044_v0 = vadd.f32 %v4980_v56, %v5845_v9  ;;  %v3035_v1 = vpop.f32.mrb[97].mxu0 }
 0x2e3   : > { %v3635_v2 = vrot.slane %v3634_v5, 1  ;;  %v3645_v4 = vrot.slane %v3644_v61, 4  ;;  %v3036_v11 = vadd.f32 %v5845_v9, %v3035_v1  ;;  %v4981_v12 = vpop.f32.mrb[98].mxu0 }
 0x2e4   : > { %v3653_v20 = vmax.f32 %v3651_v60, %v3652_v63  ;;  %v3047_v21 = vadd.f32 %v4981_v12, %v5845_v9  ;;  %v3038_v23 = vpop.f32.mrb[99].mxu0  ;;  %v3643_v25 = vmax.f32 %v3641_v33, %v3642_v62  ;;  %v3452_v26 = vmax.f32 %v3044_v0, 0.0 }
 0x2e5   : > { %v3636_v53 = vmax.f32 %v3634_v5, %v3635_v2  ;;  %v3646_v24 = vmax.f32 %v3644_v61, %v3645_v4  ;;  %v3039_v18 = vadd.f32 %v5845_v9, %v3038_v23  ;;  %v3450_v8 = vmax.f32 %v3036_v11, 0.0 }
 0x2e6   : > { %v3654_v16 = vrot.slane %v3653_v20, 2  ;;  %v3453_v27 = vmax.f32 %v3047_v21, 0.0 }
 0x2e7   : > { %v4075_v28 = vsel %vm4064_vm6, %v3636_v53, %v4074_v15  ;;  %v3647_v29 = vrot.slane %v3646_v24, 2  ;;  %v3451_v31 = vmax.f32 %v3039_v18, 0.0 }
 0x2e8   : > { %v3655_v32 = vmax.f32 %v3653_v20, %v3654_v16  ;;  %v4076_v36 = vsel %vm4066_vm7, %v3643_v25, %v4075_v28  ;;  %v3665_v39 = vmax.f32 %v3452_v26, %v3453_v27 }
 0x2e9   : > { %v3648_v13 = vmax.f32 %v3646_v24, %v3647_v29  ;;  %v3658_v17 = vmax.f32 %v3450_v8, %v3451_v31  ;;  %v4984_v41 = vpop.f32.mrb[100].mxu0 }
 0x2ea   : > { %v3656_v35 = vrot.slane %v3655_v32, 1  ;;  %v3666_v44 = vrot.slane %v3665_v39, 4  ;;  %v3060_v45 = vadd.f32 %v4984_v41, %v5845_v9  ;;  %v3051_v47 = vpop.f32.mrb[101].mxu0 }
 0x2eb   : > { %v3649_v48 = vrot.slane %v3648_v13, 1  ;;  %v3659_v50 = vrot.slane %v3658_v17, 4  ;;  %v3052_v51 = vadd.f32 %v5845_v9, %v3051_v47  ;;  %v4985_v52 = vpop.f32.mrb[102].mxu0 }
 0x2ec   : > { %v3667_v54 = vmax.f32 %v3665_v39, %v3666_v44  ;;  %v3063_v42 = vadd.f32 %v4985_v52, %v5845_v9  ;;  %v3054_v6 = vpop.f32.mrb[103].mxu0  ;;  %v3657_v59 = vmax.f32 %v3655_v32, %v3656_v35  ;;  %v3456_v3 = vmax.f32 %v3060_v45, 0.0 }
 0x2ed   : > { %v3650_v10 = vmax.f32 %v3648_v13, %v3649_v48  ;;  %v3660_v34 = vmax.f32 %v3658_v17, %v3659_v50  ;;  %v3055_v37 = vadd.f32 %v5845_v9, %v3054_v6  ;;  %v3454_v46 = vmax.f32 %v3052_v51, 0.0 }
 0x2ee   : > { %v3668_v40 = vrot.slane %v3667_v54, 2  ;;  %v3457_v38 = vmax.f32 %v3063_v42, 0.0 }
 0x2ef   : > { %v4077_v43 = vsel %vm4068_vm8, %v3650_v10, %v4076_v36  ;;  %v3661_v14 = vrot.slane %v3660_v34, 2  ;;  %v3455_v49 = vmax.f32 %v3055_v37, 0.0 }
 0x2f0   : > { %v4078_v19 = vsel %vm4070_vm9, %v3657_v59, %v4077_v43  ;;  %v3669_v22 = vmax.f32 %v3667_v54, %v3668_v40  ;;  %v3679_v7 = vmax.f32 %v3456_v3, %v3457_v38 }
 0x2f1   : > { %4130 = vst [vmem:[%s5921_s16 + $0x8] sm:$0xff] %v4078_v19  ;;  %v3662_v57 = vmax.f32 %v3660_v34, %v3661_v14  ;;  %v3672_v55 = vmax.f32 %v3454_v46, %v3455_v49  ;;  %v4988_v58 = vpop.f32.mrb[104].mxu0 }
 0x2f2   : > { %v3670_v30 = vrot.slane %v3669_v22, 1  ;;  %v3680_v33 = vrot.slane %v3679_v7, 4  ;;  %v3076_v15 = vadd.f32 %v4988_v58, %v5845_v9  ;;  %v3067_v60 = vpop.f32.mrb[105].mxu0 }
 0x2f3   : > { %v3663_v5 = vrot.slane %v3662_v57, 1  ;;  %v3673_v61 = vrot.slane %v3672_v55, 4  ;;  %v3068_v56 = vadd.f32 %v5845_v9, %v3067_v60  ;;  %v4989_v62 = vpop.f32.mrb[106].mxu0 }
 0x2f4   : > { %v3671_v63 = vmax.f32 %v3669_v22, %v3670_v30  ;;  %v3681_v0 = vmax.f32 %v3679_v7, %v3680_v33  ;;  %v3079_v1 = vadd.f32 %v4989_v62, %v5845_v9  ;;  %v3070_v2 = vpop.f32.mrb[107].mxu0  ;;  %v3460_v21 = vmax.f32 %v3076_v15, 0.0 }
 0x2f5   : > { %v3664_v4 = vmax.f32 %v3662_v57, %v3663_v5  ;;  %v3674_v11 = vmax.f32 %v3672_v55, %v3673_v61  ;;  %v3071_v12 = vadd.f32 %v5845_v9, %v3070_v2  ;;  %v3458_v18 = vmax.f32 %v3068_v56, 0.0 }
 0x2f6   : > { %v3682_v20 = vrot.slane %v3681_v0, 2  ;;  %v3461_v23 = vmax.f32 %v3079_v1, 0.0 }
 0x2f7   : > { %v4079_v53 = vsel %vm4058_vm3, %v3671_v63, %v3664_v4  ;;  %v3675_v24 = vrot.slane %v3674_v11, 2  ;;  %v3459_v25 = vmax.f32 %v3071_v12, 0.0 }
 0x2f8   : > { %v3683_v16 = vmax.f32 %v3681_v0, %v3682_v20  ;;  %v3693_v26 = vmax.f32 %v3460_v21, %v3461_v23 }
 0x2f9   : > { %v3676_v27 = vmax.f32 %v3674_v11, %v3675_v24  ;;  %v3686_v28 = vmax.f32 %v3458_v18, %v3459_v25  ;;  %v4992_v29 = vpop.f32.mrb[108].mxu0 }
 0x2fa   : > { %v3684_v8 = vrot.slane %v3683_v16, 1  ;;  %v3694_v31 = vrot.slane %v3693_v26, 4  ;;  %v3092_v32 = vadd.f32 %v4992_v29, %v5845_v9  ;;  %v3083_v36 = vpop.f32.mrb[109].mxu0 }
 0x2fb   : > { %v3677_v39 = vrot.slane %v3676_v27, 1  ;;  %v3687_v13 = vrot.slane %v3686_v28, 4  ;;  %v3084_v17 = vadd.f32 %v5845_v9, %v3083_v36  ;;  %v4993_v41 = vpop.f32.mrb[110].mxu0 }
 0x2fc   : > { %v3695_v35 = vmax.f32 %v3693_v26, %v3694_v31  ;;  %v3095_v44 = vadd.f32 %v4993_v41, %v5845_v9  ;;  %v3086_v45 = vpop.f32.mrb[111].mxu0  ;;  %v3685_v51 = vmax.f32 %v3683_v16, %v3684_v8  ;;  %v3464_v54 = vmax.f32 %v3092_v32, 0.0 }
 0x2fd   : > { %v3678_v47 = vmax.f32 %v3676_v27, %v3677_v39  ;;  %v3688_v48 = vmax.f32 %v3686_v28, %v3687_v13  ;;  %v3087_v50 = vadd.f32 %v5845_v9, %v3086_v45  ;;  %v3462_v34 = vmax.f32 %v3084_v17, 0.0 }
 0x2fe   : > { %v3696_v52 = vrot.slane %v3695_v35, 2  ;;  %v3465_v42 = vmax.f32 %v3095_v44, 0.0 }
 0x2ff   : > { %v4080_v6 = vsel %vm4060_vm4, %v3678_v47, %v4079_v53  ;;  %v3689_v10 = vrot.slane %v3688_v48, 2  ;;  %v3463_v37 = vmax.f32 %v3087_v50, 0.0 }
 0x300   : > { %v3697_v59 = vmax.f32 %v3695_v35, %v3696_v52  ;;  %v4081_v40 = vsel %vm4062_vm5, %v3685_v51, %v4080_v6  ;;  %v3707_v3 = vmax.f32 %v3464_v54, %v3465_v42 }
 0x301   : > { %v3690_v38 = vmax.f32 %v3688_v48, %v3689_v10  ;;  %v3700_v43 = vmax.f32 %v3462_v34, %v3463_v37  ;;  %v4996_v14 = vpop.f32.mrb[112].mxu0 }
 0x302   : > { %v3698_v46 = vrot.slane %v3697_v59, 1  ;;  %v3708_v49 = vrot.slane %v3707_v3, 4  ;;  %v3108_v19 = vadd.f32 %v4996_v14, %v5845_v9  ;;  %v3099_v22 = vpop.f32.mrb[113].mxu0 }
 0x303   : > { %v3691_v7 = vrot.slane %v3690_v38, 1  ;;  %v3701_v57 = vrot.slane %v3700_v43, 4  ;;  %v3100_v55 = vadd.f32 %v5845_v9, %v3099_v22  ;;  %v4997_v58 = vpop.f32.mrb[114].mxu0 }
 0x304   : > { %v3709_v30 = vmax.f32 %v3707_v3, %v3708_v49  ;;  %v3111_v33 = vadd.f32 %v4997_v58, %v5845_v9  ;;  %v3102_v15 = vpop.f32.mrb[115].mxu0  ;;  %v3699_v56 = vmax.f32 %v3697_v59, %v3698_v46  ;;  %v3468_v63 = vmax.f32 %v3108_v19, 0.0 }
 0x305   : > { %v3692_v60 = vmax.f32 %v3690_v38, %v3691_v7  ;;  %v3702_v5 = vmax.f32 %v3700_v43, %v3701_v57  ;;  %v3103_v61 = vadd.f32 %v5845_v9, %v3102_v15  ;;  %v3466_v4 = vmax.f32 %v3100_v55, 0.0 }
 0x306   : > { %v3710_v62 = vrot.slane %v3709_v30, 2  ;;  %v3469_v0 = vmax.f32 %v3111_v33, 0.0 }
 0x307   : > { %v4082_v1 = vsel %vm4064_vm6, %v3692_v60, %v4081_v40  ;;  %v3703_v2 = vrot.slane %v3702_v5, 2  ;;  %v3467_v11 = vmax.f32 %v3103_v61, 0.0 }
 0x308   : > { %v3711_v12 = vmax.f32 %v3709_v30, %v3710_v62  ;;  %v4083_v20 = vsel %vm4066_vm7, %v3699_v56, %v4082_v1  ;;  %v3721_v21 = vmax.f32 %v3468_v63, %v3469_v0 }
 0x309   : > { %v3704_v23 = vmax.f32 %v3702_v5, %v3703_v2  ;;  %v3714_v53 = vmax.f32 %v3466_v4, %v3467_v11  ;;  %v5000_v24 = vpop.f32.mrb[116].mxu0 }
 0x30a   : > { %v3712_v18 = vrot.slane %v3711_v12, 1  ;;  %v3722_v25 = vrot.slane %v3721_v21, 4  ;;  %v3124_v16 = vadd.f32 %v5000_v24, %v5845_v9  ;;  %v3115_v26 = vpop.f32.mrb[117].mxu0 }
 0x30b   : > { %v3705_v27 = vrot.slane %v3704_v23, 1  ;;  %v3715_v28 = vrot.slane %v3714_v53, 4  ;;  %v3116_v29 = vadd.f32 %v5845_v9, %v3115_v26  ;;  %v5001_v8 = vpop.f32.mrb[118].mxu0 }
 0x30c   : > { %v3723_v31 = vmax.f32 %v3721_v21, %v3722_v25  ;;  %v3127_v32 = vadd.f32 %v5001_v8, %v5845_v9  ;;  %v3118_v36 = vpop.f32.mrb[119].mxu0  ;;  %v3713_v41 = vmax.f32 %v3711_v12, %v3712_v18  ;;  %v3472_v44 = vmax.f32 %v3124_v16, 0.0 }
 0x30d   : > { %v3706_v39 = vmax.f32 %v3704_v23, %v3705_v27  ;;  %v3716_v13 = vmax.f32 %v3714_v53, %v3715_v28  ;;  %v3119_v17 = vadd.f32 %v5845_v9, %v3118_v36  ;;  %v3470_v50 = vmax.f32 %v3116_v29, 0.0 }
 0x30e   : > { %v3724_v35 = vrot.slane %v3723_v31, 2  ;;  %v3473_v45 = vmax.f32 %v3127_v32, 0.0 }
 0x30f   : > { %v4084_v47 = vsel %vm4068_vm8, %v3706_v39, %v4083_v20  ;;  %v3717_v48 = vrot.slane %v3716_v13, 2  ;;  %v3471_v51 = vmax.f32 %v3119_v17, 0.0 }
 0x310   : > { %v4085_v52 = vsel %vm4070_vm9, %v3713_v41, %v4084_v47  ;;  %v3725_v54 = vmax.f32 %v3723_v31, %v3724_v35  ;;  %v3735_v42 = vmax.f32 %v3472_v44, %v3473_v45 }
 0x311   : > { %4131 = vst [vmem:[%s5921_s16 + $0x10] sm:$0xff] %v4085_v52  ;;  %v3718_v6 = vmax.f32 %v3716_v13, %v3717_v48  ;;  %v3728_v10 = vmax.f32 %v3470_v50, %v3471_v51  ;;  %v5004_v34 = vpop.f32.mrb[120].mxu0 }
 0x312   : > { %v3726_v37 = vrot.slane %v3725_v54, 1  ;;  %v3736_v59 = vrot.slane %v3735_v42, 4  ;;  %v3140_v40 = vadd.f32 %v5004_v34, %v5845_v9  ;;  %v3131_v3 = vpop.f32.mrb[121].mxu0 }
 0x313   : > { %v3719_v38 = vrot.slane %v3718_v6, 1  ;;  %v3729_v43 = vrot.slane %v3728_v10, 4  ;;  %v3132_v14 = vadd.f32 %v5845_v9, %v3131_v3  ;;  %v5005_v46 = vpop.f32.mrb[122].mxu0 }
 0x314   : > { %v3727_v49 = vmax.f32 %v3725_v54, %v3726_v37  ;;  %v3737_v19 = vmax.f32 %v3735_v42, %v3736_v59  ;;  %v3143_v22 = vadd.f32 %v5005_v46, %v5845_v9  ;;  %v3134_v7 = vpop.f32.mrb[123].mxu0  ;;  %v3476_v33 = vmax.f32 %v3140_v40, 0.0 }
 0x315   : > { %v3720_v57 = vmax.f32 %v3718_v6, %v3719_v38  ;;  %v3730_v55 = vmax.f32 %v3728_v10, %v3729_v43  ;;  %v3135_v58 = vadd.f32 %v5845_v9, %v3134_v7  ;;  %v3474_v61 = vmax.f32 %v3132_v14, 0.0 }
 0x316   : > { %v3738_v30 = vrot.slane %v3737_v19, 2  ;;  %v3477_v15 = vmax.f32 %v3143_v22, 0.0 }
 0x317   : > { %v4086_v60 = vsel %vm4058_vm3, %v3727_v49, %v3720_v57  ;;  %v3731_v5 = vrot.slane %v3730_v55, 2  ;;  %v3475_v56 = vmax.f32 %v3135_v58, 0.0 }
 0x318   : > { %v3739_v62 = vmax.f32 %v3737_v19, %v3738_v30  ;;  %v3749_v63 = vmax.f32 %v3476_v33, %v3477_v15 }
 0x319   : > { %v3732_v0 = vmax.f32 %v3730_v55, %v3731_v5  ;;  %v3742_v1 = vmax.f32 %v3474_v61, %v3475_v56  ;;  %v5008_v2 = vpop.f32.mrb[124].mxu0 }
 0x31a   : > { %v3740_v4 = vrot.slane %v3739_v62, 1  ;;  %v3750_v11 = vrot.slane %v3749_v63, 4  ;;  %v3156_v12 = vadd.f32 %v5008_v2, %v5845_v9  ;;  %v3147_v20 = vpop.f32.mrb[125].mxu0 }
 0x31b   : > { %v3733_v21 = vrot.slane %v3732_v0, 1  ;;  %v3743_v23 = vrot.slane %v3742_v1, 4  ;;  %v3148_v53 = vadd.f32 %v5845_v9, %v3147_v20  ;;  %v5009_v24 = vpop.f32.mrb[126].mxu0 }
 0x31c   : > { %v3751_v18 = vmax.f32 %v3749_v63, %v3750_v11  ;;  %v3159_v25 = vadd.f32 %v5009_v24, %v5845_v9  ;;  %v3150_v16 = vpop.f32.mrb[127].mxu0  ;;  %v3741_v29 = vmax.f32 %v3739_v62, %v3740_v4  ;;  %v3480_v31 = vmax.f32 %v3156_v12, 0.0 }
 0x31d   : > { %v3734_v26 = vmax.f32 %v3732_v0, %v3733_v21  ;;  %v3744_v27 = vmax.f32 %v3742_v1, %v3743_v23  ;;  %v3151_v28 = vadd.f32 %v5845_v9, %v3150_v16  ;;  %v3478_v13 = vmax.f32 %v3148_v53, 0.0  ;;  %v5988_v9 = vld [vmem:[%s6100_s6] ss:$0 sm:$0xff] }
 0x31e   : > { %v3752_v8 = vrot.slane %v3751_v18, 2  ;;  %v3481_v32 = vmax.f32 %v3159_v25, 0.0 }
 0x31f   : > { %v4087_v36 = vsel %vm4060_vm4, %v3734_v26, %v4086_v60  ;;  %v3745_v39 = vrot.slane %v3744_v27, 2  ;;  %v3479_v17 = vmax.f32 %v3151_v28, 0.0 }
 0x320   : > { %v3753_v41 = vmax.f32 %v3751_v18, %v3752_v8  ;;  %v4088_v35 = vsel %vm4062_vm5, %v3741_v29, %v4087_v36  ;;  %v3763_v44 = vmax.f32 %v3480_v31, %v3481_v32 }
 0x321   : > { %v3746_v45 = vmax.f32 %v3744_v27, %v3745_v39  ;;  %v3756_v47 = vmax.f32 %v3478_v13, %v3479_v17  ;;  %v5012_v48 = vpop.f32.mrb[128].mxu0 }
 0x322   : > { %v3754_v50 = vrot.slane %v3753_v41, 1  ;;  %v3764_v51 = vrot.slane %v3763_v44, 4  ;;  %v3172_v52 = vadd.f32 %v5988_v9, %v5012_v48  ;;  %v3163_v54 = vpop.f32.mrb[129].mxu0 }
 0x323   : > { %v3747_v42 = vrot.slane %v3746_v45, 1  ;;  %v3757_v6 = vrot.slane %v3756_v47, 4  ;;  %v3164_v10 = vadd.f32 %v5988_v9, %v3163_v54  ;;  %v5013_v34 = vpop.f32.mrb[130].mxu0 }
 0x324   : > { %v3765_v37 = vmax.f32 %v3763_v44, %v3764_v51  ;;  %v3175_v59 = vadd.f32 %v5988_v9, %v5013_v34  ;;  %v3166_v40 = vpop.f32.mrb[131].mxu0  ;;  %v3755_v14 = vmax.f32 %v3753_v41, %v3754_v50  ;;  %v3484_v49 = vmax.f32 %v3172_v52, 0.0 }
 0x325   : > { %v3748_v3 = vmax.f32 %v3746_v45, %v3747_v42  ;;  %v3758_v38 = vmax.f32 %v3756_v47, %v3757_v6  ;;  %v3167_v43 = vadd.f32 %v5988_v9, %v3166_v40  ;;  %v3482_v57 = vmax.f32 %v3164_v10, 0.0 }
 0x326   : > { %v3766_v46 = vrot.slane %v3765_v37, 2  ;;  %v3485_v19 = vmax.f32 %v3175_v59, 0.0 }
 0x327   : > { %v4089_v22 = vsel %vm4064_vm6, %v3748_v3, %v4088_v35  ;;  %v3759_v7 = vrot.slane %v3758_v38, 2  ;;  %v3483_v55 = vmax.f32 %v3167_v43, 0.0 }
 0x328   : > { %v3767_v58 = vmax.f32 %v3765_v37, %v3766_v46  ;;  %v4090_v30 = vsel %vm4066_vm7, %v3755_v14, %v4089_v22  ;;  %v3777_v33 = vmax.f32 %v3484_v49, %v3485_v19 }
 0x329   : > { %v3760_v15 = vmax.f32 %v3758_v38, %v3759_v7  ;;  %v3770_v60 = vmax.f32 %v3482_v57, %v3483_v55  ;;  %v5016_v5 = vpop.f32.mrb[132].mxu0 }
 0x32a   : > { %v3768_v61 = vrot.slane %v3767_v58, 1  ;;  %v3778_v56 = vrot.slane %v3777_v33, 4  ;;  %v3188_v62 = vadd.f32 %v5988_v9, %v5016_v5  ;;  %v3179_v63 = vpop.f32.mrb[133].mxu0 }
 0x32b   : > { %v3761_v0 = vrot.slane %v3760_v15, 1  ;;  %v3771_v1 = vrot.slane %v3770_v60, 4  ;;  %v3180_v2 = vadd.f32 %v5988_v9, %v3179_v63  ;;  %v5017_v4 = vpop.f32.mrb[134].mxu0 }
 0x32c   : > { %v3779_v11 = vmax.f32 %v3777_v33, %v3778_v56  ;;  %v3191_v12 = vadd.f32 %v5988_v9, %v5017_v4  ;;  %v3182_v20 = vpop.f32.mrb[135].mxu0  ;;  %v3769_v24 = vmax.f32 %v3767_v58, %v3768_v61  ;;  %v3488_v25 = vmax.f32 %v3188_v62, 0.0 }
 0x32d   : > { %v3762_v21 = vmax.f32 %v3760_v15, %v3761_v0  ;;  %v3772_v23 = vmax.f32 %v3770_v60, %v3771_v1  ;;  %v3183_v53 = vadd.f32 %v5988_v9, %v3182_v20  ;;  %v3486_v28 = vmax.f32 %v3180_v2, 0.0 }
 0x32e   : > { %v3780_v18 = vrot.slane %v3779_v11, 2  ;;  %v3489_v16 = vmax.f32 %v3191_v12, 0.0 }
 0x32f   : > { %v4091_v26 = vsel %vm4068_vm8, %v3762_v21, %v4090_v30  ;;  %v3773_v27 = vrot.slane %v3772_v23, 2  ;;  %v3487_v29 = vmax.f32 %v3183_v53, 0.0 }
 0x330   : > { %v4092_v8 = vsel %vm4070_vm9, %v3769_v24, %v4091_v26  ;;  %v3781_v31 = vmax.f32 %v3779_v11, %v3780_v18  ;;  %v3791_v32 = vmax.f32 %v3488_v25, %v3489_v16 }
 0x331   : > { %4132 = vst [vmem:[%s5921_s16 + $0x18] sm:$0xff] %v4092_v8  ;;  %v3774_v36 = vmax.f32 %v3772_v23, %v3773_v27  ;;  %v3784_v39 = vmax.f32 %v3486_v28, %v3487_v29  ;;  %v5020_v13 = vpop.f32.mrb[136].mxu0 }
 0x332   : > { %v3782_v17 = vrot.slane %v3781_v31, 1  ;;  %v3792_v41 = vrot.slane %v3791_v32, 4  ;;  %v3204_v35 = vadd.f32 %v5988_v9, %v5020_v13  ;;  %v3195_v44 = vpop.f32.mrb[137].mxu0 }
 0x333   : > { %v3775_v45 = vrot.slane %v3774_v36, 1  ;;  %v3785_v47 = vrot.slane %v3784_v39, 4  ;;  %v3196_v48 = vadd.f32 %v5988_v9, %v3195_v44  ;;  %v5021_v50 = vpop.f32.mrb[138].mxu0 }
 0x334   : > { %v3783_v51 = vmax.f32 %v3781_v31, %v3782_v17  ;;  %v3793_v52 = vmax.f32 %v3791_v32, %v3792_v41  ;;  %v3207_v54 = vadd.f32 %v5988_v9, %v5021_v50  ;;  %v3198_v42 = vpop.f32.mrb[139].mxu0  ;;  %v3492_v59 = vmax.f32 %v3204_v35, 0.0 }
 0x335   : > { %v3776_v6 = vmax.f32 %v3774_v36, %v3775_v45  ;;  %v3786_v10 = vmax.f32 %v3784_v39, %v3785_v47  ;;  %v3199_v34 = vadd.f32 %v5988_v9, %v3198_v42  ;;  %v3490_v43 = vmax.f32 %v3196_v48, 0.0 }
 0x336   : > { %v3794_v37 = vrot.slane %v3793_v52, 2  ;;  %v3493_v40 = vmax.f32 %v3207_v54, 0.0 }
 0x337   : > { %v4093_v3 = vsel %vm4058_vm3, %v3783_v51, %v3776_v6  ;;  %v3787_v38 = vrot.slane %v3786_v10, 2  ;;  %v3491_v14 = vmax.f32 %v3199_v34, 0.0 }
 0x338   : > { %v3795_v46 = vmax.f32 %v3793_v52, %v3794_v37  ;;  %v3805_v49 = vmax.f32 %v3492_v59, %v3493_v40 }
 0x339   : > { %v3788_v19 = vmax.f32 %v3786_v10, %v3787_v38  ;;  %v3798_v22 = vmax.f32 %v3490_v43, %v3491_v14  ;;  %v5024_v7 = vpop.f32.mrb[140].mxu0 }
 0x33a   : > { %v3796_v57 = vrot.slane %v3795_v46, 1  ;;  %v3806_v55 = vrot.slane %v3805_v49, 4  ;;  %v3220_v58 = vadd.f32 %v5988_v9, %v5024_v7  ;;  %v3211_v30 = vpop.f32.mrb[141].mxu0 }
 0x33b   : > { %v3789_v33 = vrot.slane %v3788_v19, 1  ;;  %v3799_v15 = vrot.slane %v3798_v22, 4  ;;  %v3212_v60 = vadd.f32 %v5988_v9, %v3211_v30  ;;  %v5025_v5 = vpop.f32.mrb[142].mxu0 }
 0x33c   : > { %v3807_v61 = vmax.f32 %v3805_v49, %v3806_v55  ;;  %v3223_v56 = vadd.f32 %v5988_v9, %v5025_v5  ;;  %v3214_v62 = vpop.f32.mrb[143].mxu0  ;;  %v3797_v2 = vmax.f32 %v3795_v46, %v3796_v57  ;;  %v3496_v11 = vmax.f32 %v3220_v58, 0.0 }
 0x33d   : > { %v3790_v63 = vmax.f32 %v3788_v19, %v3789_v33  ;;  %v3800_v0 = vmax.f32 %v3798_v22, %v3799_v15  ;;  %v3215_v1 = vadd.f32 %v5988_v9, %v3214_v62  ;;  %v3494_v23 = vmax.f32 %v3212_v60, 0.0 }
 0x33e   : > { %v3808_v4 = vrot.slane %v3807_v61, 2  ;;  %v3497_v12 = vmax.f32 %v3223_v56, 0.0 }
 0x33f   : > { %v4094_v20 = vsel %vm4060_vm4, %v3790_v63, %v4093_v3  ;;  %v3801_v21 = vrot.slane %v3800_v0, 2  ;;  %v3495_v53 = vmax.f32 %v3215_v1, 0.0 }
 0x340   : > { %v3809_v24 = vmax.f32 %v3807_v61, %v3808_v4  ;;  %v4095_v18 = vsel %vm4062_vm5, %v3797_v2, %v4094_v20  ;;  %v3819_v25 = vmax.f32 %v3496_v11, %v3497_v12 }
 0x341   : > { %v3802_v16 = vmax.f32 %v3800_v0, %v3801_v21  ;;  %v3812_v26 = vmax.f32 %v3494_v23, %v3495_v53  ;;  %v5028_v27 = vpop.f32.mrb[144].mxu0 }
 0x342   : > { %v3810_v28 = vrot.slane %v3809_v24, 1  ;;  %v3820_v29 = vrot.slane %v3819_v25, 4  ;;  %v3236_v8 = vadd.f32 %v5988_v9, %v5028_v27  ;;  %v3227_v31 = vpop.f32.mrb[145].mxu0 }
 0x343   : > { %v3803_v32 = vrot.slane %v3802_v16, 1  ;;  %v3813_v36 = vrot.slane %v3812_v26, 4  ;;  %v3228_v39 = vadd.f32 %v5988_v9, %v3227_v31  ;;  %v5029_v13 = vpop.f32.mrb[146].mxu0 }
 0x344   : > { %v3821_v17 = vmax.f32 %v3819_v25, %v3820_v29  ;;  %v3239_v41 = vadd.f32 %v5988_v9, %v5029_v13  ;;  %v3230_v35 = vpop.f32.mrb[147].mxu0  ;;  %v3811_v48 = vmax.f32 %v3809_v24, %v3810_v28  ;;  %v3500_v51 = vmax.f32 %v3236_v8, 0.0 }
 0x345   : > { %v3804_v44 = vmax.f32 %v3802_v16, %v3803_v32  ;;  %v3814_v45 = vmax.f32 %v3812_v26, %v3813_v36  ;;  %v3231_v47 = vadd.f32 %v5988_v9, %v3230_v35  ;;  %v3498_v6 = vmax.f32 %v3228_v39, 0.0 }
 0x346   : > { %v3822_v50 = vrot.slane %v3821_v17, 2  ;;  %v3501_v52 = vmax.f32 %v3239_v41, 0.0 }
 0x347   : > { %v4096_v54 = vsel %vm4064_vm6, %v3804_v44, %v4095_v18  ;;  %v3815_v42 = vrot.slane %v3814_v45, 2  ;;  %v3499_v10 = vmax.f32 %v3231_v47, 0.0 }
 0x348   : > { %v3823_v34 = vmax.f32 %v3821_v17, %v3822_v50  ;;  %v4097_v37 = vsel %vm4066_vm7, %v3811_v48, %v4096_v54  ;;  %v3833_v59 = vmax.f32 %v3500_v51, %v3501_v52 }
 0x349   : > { %v3816_v40 = vmax.f32 %v3814_v45, %v3815_v42  ;;  %v3826_v3 = vmax.f32 %v3498_v6, %v3499_v10  ;;  %v5032_v38 = vpop.f32.mrb[148].mxu0 }
 0x34a   : > { %v3824_v43 = vrot.slane %v3823_v34, 1  ;;  %v3834_v14 = vrot.slane %v3833_v59, 4  ;;  %v3252_v46 = vadd.f32 %v5988_v9, %v5032_v38  ;;  %v3243_v49 = vpop.f32.mrb[149].mxu0 }
 0x34b   : > { %v3817_v19 = vrot.slane %v3816_v40, 1  ;;  %v3827_v22 = vrot.slane %v3826_v3, 4  ;;  %v3244_v7 = vadd.f32 %v5988_v9, %v3243_v49  ;;  %v5033_v57 = vpop.f32.mrb[150].mxu0 }
 0x34c   : > { %v3835_v55 = vmax.f32 %v3833_v59, %v3834_v14  ;;  %v3255_v58 = vadd.f32 %v5988_v9, %v5033_v57  ;;  %v3246_v30 = vpop.f32.mrb[151].mxu0  ;;  %v3825_v5 = vmax.f32 %v3823_v34, %v3824_v43  ;;  %v3504_v56 = vmax.f32 %v3252_v46, 0.0 }
 0x34d   : > { %v3818_v33 = vmax.f32 %v3816_v40, %v3817_v19  ;;  %v3828_v15 = vmax.f32 %v3826_v3, %v3827_v22  ;;  %v3247_v60 = vadd.f32 %v5988_v9, %v3246_v30  ;;  %v3502_v1 = vmax.f32 %v3244_v7, 0.0 }
 0x34e   : > { %v3836_v61 = vrot.slane %v3835_v55, 2  ;;  %v3505_v62 = vmax.f32 %v3255_v58, 0.0 }
 0x34f   : > { %v4098_v63 = vsel %vm4068_vm8, %v3818_v33, %v4097_v37  ;;  %v3829_v0 = vrot.slane %v3828_v15, 2  ;;  %v3503_v2 = vmax.f32 %v3247_v60, 0.0 }
 0x350   : > { %v4099_v4 = vsel %vm4070_vm9, %v3825_v5, %v4098_v63  ;;  %v3837_v11 = vmax.f32 %v3835_v55, %v3836_v61  ;;  %v3847_v12 = vmax.f32 %v3504_v56, %v3505_v62 }
 0x351   : > { %4133 = vst [vmem:[%s5921_s16 + $0x20] sm:$0xff] %v4099_v4  ;;  %v3830_v20 = vmax.f32 %v3828_v15, %v3829_v0  ;;  %v3840_v21 = vmax.f32 %v3502_v1, %v3503_v2  ;;  %v5036_v23 = vpop.f32.mrb[152].mxu0 }
 0x352   : > { %v3838_v53 = vrot.slane %v3837_v11, 1  ;;  %v3848_v24 = vrot.slane %v3847_v12, 4  ;;  %v3268_v18 = vadd.f32 %v5988_v9, %v5036_v23  ;;  %v3259_v25 = vpop.f32.mrb[153].mxu0 }
 0x353   : > { %v3831_v16 = vrot.slane %v3830_v20, 1  ;;  %v3841_v26 = vrot.slane %v3840_v21, 4  ;;  %v3260_v27 = vadd.f32 %v5988_v9, %v3259_v25  ;;  %v5037_v28 = vpop.f32.mrb[154].mxu0 }
 0x354   : > { %v3839_v29 = vmax.f32 %v3837_v11, %v3838_v53  ;;  %v3849_v8 = vmax.f32 %v3847_v12, %v3848_v24  ;;  %v3271_v31 = vadd.f32 %v5988_v9, %v5037_v28  ;;  %v3262_v32 = vpop.f32.mrb[155].mxu0  ;;  %v3508_v41 = vmax.f32 %v3268_v18, 0.0 }
 0x355   : > { %v3832_v36 = vmax.f32 %v3830_v20, %v3831_v16  ;;  %v3842_v39 = vmax.f32 %v3840_v21, %v3841_v26  ;;  %v3263_v13 = vadd.f32 %v5988_v9, %v3262_v32  ;;  %v3506_v47 = vmax.f32 %v3260_v27, 0.0 }
 0x356   : > { %v3850_v17 = vrot.slane %v3849_v8, 2  ;;  %v3509_v35 = vmax.f32 %v3271_v31, 0.0 }
 0x357   : > { %v4100_v44 = vsel %vm4058_vm3, %v3839_v29, %v3832_v36  ;;  %v3843_v45 = vrot.slane %v3842_v39, 2  ;;  %v3507_v48 = vmax.f32 %v3263_v13, 0.0 }
 0x358   : > { %v3851_v50 = vmax.f32 %v3849_v8, %v3850_v17  ;;  %v3861_v51 = vmax.f32 %v3508_v41, %v3509_v35 }
 0x359   : > { %v3844_v52 = vmax.f32 %v3842_v39, %v3843_v45  ;;  %v3854_v54 = vmax.f32 %v3506_v47, %v3507_v48  ;;  %v5040_v42 = vpop.f32.mrb[156].mxu0 }
 0x35a   : > { %v3852_v6 = vrot.slane %v3851_v50, 1  ;;  %v3862_v10 = vrot.slane %v3861_v51, 4  ;;  %v3284_v34 = vadd.f32 %v5988_v9, %v5040_v42  ;;  %v3275_v37 = vpop.f32.mrb[157].mxu0 }
 0x35b   : > { %v3845_v59 = vrot.slane %v3844_v52, 1  ;;  %v3855_v40 = vrot.slane %v3854_v54, 4  ;;  %v3276_v3 = vadd.f32 %v5988_v9, %v3275_v37  ;;  %v5041_v38 = vpop.f32.mrb[158].mxu0 }
 0x35c   : > { %v3863_v43 = vmax.f32 %v3861_v51, %v3862_v10  ;;  %v3287_v14 = vadd.f32 %v5988_v9, %v5041_v38  ;;  %v3278_v46 = vpop.f32.mrb[159].mxu0  ;;  %v3853_v7 = vmax.f32 %v3851_v50, %v3852_v6  ;;  %v3512_v55 = vmax.f32 %v3284_v34, 0.0 }
 0x35d   : > { %v3846_v49 = vmax.f32 %v3844_v52, %v3845_v59  ;;  %v3856_v19 = vmax.f32 %v3854_v54, %v3855_v40  ;;  %v3279_v22 = vadd.f32 %v5988_v9, %v3278_v46  ;;  %v3510_v15 = vmax.f32 %v3276_v3, 0.0 }
 0x35e   : > { %v3864_v57 = vrot.slane %v3863_v43, 2  ;;  %v3513_v58 = vmax.f32 %v3287_v14, 0.0 }
 0x35f   : > { %v4101_v30 = vsel %vm4060_vm4, %v3846_v49, %v4100_v44  ;;  %v3857_v33 = vrot.slane %v3856_v19, 2  ;;  %v3511_v60 = vmax.f32 %v3279_v22, 0.0 }
 0x360   : > { %v3865_v5 = vmax.f32 %v3863_v43, %v3864_v57  ;;  %v4102_v61 = vsel %vm4062_vm5, %v3853_v7, %v4101_v30  ;;  %v3875_v56 = vmax.f32 %v3512_v55, %v3513_v58 }
 0x361   : > { %v3858_v62 = vmax.f32 %v3856_v19, %v3857_v33  ;;  %v3868_v63 = vmax.f32 %v3510_v15, %v3511_v60  ;;  %v5044_v0 = vpop.f32.mrb[160].mxu0 }
 0x362   : > { %v3866_v1 = vrot.slane %v3865_v5, 1  ;;  %v3876_v2 = vrot.slane %v3875_v56, 4  ;;  %v3300_v4 = vadd.f32 %v5988_v9, %v5044_v0  ;;  %v3291_v11 = vpop.f32.mrb[161].mxu0 }
 0x363   : > { %v3859_v12 = vrot.slane %v3858_v62, 1  ;;  %v3869_v20 = vrot.slane %v3868_v63, 4  ;;  %v3292_v21 = vadd.f32 %v5988_v9, %v3291_v11  ;;  %v5045_v23 = vpop.f32.mrb[162].mxu0 }
 0x364   : > { %v3877_v53 = vmax.f32 %v3875_v56, %v3876_v2  ;;  %v3303_v24 = vadd.f32 %v5988_v9, %v5045_v23  ;;  %v3294_v18 = vpop.f32.mrb[163].mxu0  ;;  %v3867_v27 = vmax.f32 %v3865_v5, %v3866_v1  ;;  %v3516_v29 = vmax.f32 %v3300_v4, 0.0 }
 0x365   : > { %v3860_v25 = vmax.f32 %v3858_v62, %v3859_v12  ;;  %v3870_v16 = vmax.f32 %v3868_v63, %v3869_v20  ;;  %v3295_v26 = vadd.f32 %v5988_v9, %v3294_v18  ;;  %v3514_v36 = vmax.f32 %v3292_v21, 0.0 }
 0x366   : > { %v3878_v28 = vrot.slane %v3877_v53, 2  ;;  %v3517_v8 = vmax.f32 %v3303_v24, 0.0 }
 0x367   : > { %v4103_v31 = vsel %vm4064_vm6, %v3860_v25, %v4102_v61  ;;  %v3871_v32 = vrot.slane %v3870_v16, 2  ;;  %v3515_v39 = vmax.f32 %v3295_v26, 0.0 }
 0x368   : > { %v3879_v13 = vmax.f32 %v3877_v53, %v3878_v28  ;;  %v4104_v17 = vsel %vm4066_vm7, %v3867_v27, %v4103_v31  ;;  %v3889_v41 = vmax.f32 %v3516_v29, %v3517_v8 }
 0x369   : > { %v3872_v35 = vmax.f32 %v3870_v16, %v3871_v32  ;;  %v3882_v44 = vmax.f32 %v3514_v36, %v3515_v39  ;;  %v5048_v45 = vpop.f32.mrb[164].mxu0 }
 0x36a   : > { %v3880_v47 = vrot.slane %v3879_v13, 1  ;;  %v3890_v48 = vrot.slane %v3889_v41, 4  ;;  %v3316_v50 = vadd.f32 %v5988_v9, %v5048_v45  ;;  %v3307_v51 = vpop.f32.mrb[165].mxu0 }
 0x36b   : > { %v3873_v52 = vrot.slane %v3872_v35, 1  ;;  %v3883_v54 = vrot.slane %v3882_v44, 4  ;;  %v3308_v42 = vadd.f32 %v5988_v9, %v3307_v51  ;;  %v5049_v6 = vpop.f32.mrb[166].mxu0 }
 0x36c   : > { %v3891_v10 = vmax.f32 %v3889_v41, %v3890_v48  ;;  %v3319_v34 = vadd.f32 %v5988_v9, %v5049_v6  ;;  %v3310_v37 = vpop.f32.mrb[167].mxu0  ;;  %v3881_v38 = vmax.f32 %v3879_v13, %v3880_v47  ;;  %v3520_v14 = vmax.f32 %v3316_v50, 0.0 }
 0x36d   : > { %v3874_v59 = vmax.f32 %v3872_v35, %v3873_v52  ;;  %v3884_v40 = vmax.f32 %v3882_v44, %v3883_v54  ;;  %v3311_v3 = vadd.f32 %v5988_v9, %v3310_v37  ;;  %v3518_v22 = vmax.f32 %v3308_v42, 0.0 }
 0x36e   : > { %v3892_v43 = vrot.slane %v3891_v10, 2  ;;  %v3521_v46 = vmax.f32 %v3319_v34, 0.0 }
 0x36f   : > { %v4105_v49 = vsel %vm4068_vm8, %v3874_v59, %v4104_v17  ;;  %v3885_v19 = vrot.slane %v3884_v40, 2  ;;  %v3519_v7 = vmax.f32 %v3311_v3, 0.0 }
 0x370   : > { %v4106_v57 = vsel %vm4070_vm9, %v3881_v38, %v4105_v49  ;;  %v3893_v55 = vmax.f32 %v3891_v10, %v3892_v43  ;;  %v3903_v58 = vmax.f32 %v3520_v14, %v3521_v46 }
 0x371   : > { %4134 = vst [vmem:[%s5921_s16 + $0x28] sm:$0xff] %v4106_v57  ;;  %v3886_v30 = vmax.f32 %v3884_v40, %v3885_v19  ;;  %v3896_v33 = vmax.f32 %v3518_v22, %v3519_v7  ;;  %v5052_v15 = vpop.f32.mrb[168].mxu0 }
 0x372   : > { %v3894_v60 = vrot.slane %v3893_v55, 1  ;;  %v3904_v5 = vrot.slane %v3903_v58, 4  ;;  %v3332_v61 = vadd.f32 %v5988_v9, %v5052_v15  ;;  %v3323_v56 = vpop.f32.mrb[169].mxu0 }
 0x373   : > { %v3887_v62 = vrot.slane %v3886_v30, 1  ;;  %v3897_v63 = vrot.slane %v3896_v33, 4  ;;  %v3324_v0 = vadd.f32 %v5988_v9, %v3323_v56  ;;  %v5053_v1 = vpop.f32.mrb[170].mxu0 }
 0x374   : > { %v3895_v2 = vmax.f32 %v3893_v55, %v3894_v60  ;;  %v3905_v4 = vmax.f32 %v3903_v58, %v3904_v5  ;;  %v3335_v11 = vadd.f32 %v5988_v9, %v5053_v1  ;;  %v3326_v12 = vpop.f32.mrb[171].mxu0  ;;  %v3524_v24 = vmax.f32 %v3332_v61, 0.0 }
 0x375   : > { %v3888_v20 = vmax.f32 %v3886_v30, %v3887_v62  ;;  %v3898_v21 = vmax.f32 %v3896_v33, %v3897_v63  ;;  %v3327_v23 = vadd.f32 %v5988_v9, %v3326_v12  ;;  %v3522_v26 = vmax.f32 %v3324_v0, 0.0 }
 0x376   : > { %v3906_v53 = vrot.slane %v3905_v4, 2  ;;  %v3525_v18 = vmax.f32 %v3335_v11, 0.0 }
 0x377   : > { %v4107_v25 = vsel %vm4058_vm3, %v3895_v2, %v3888_v20  ;;  %v3899_v16 = vrot.slane %v3898_v21, 2  ;;  %v3523_v27 = vmax.f32 %v3327_v23, 0.0 }
 0x378   : > { %v3907_v28 = vmax.f32 %v3905_v4, %v3906_v53  ;;  %v3917_v29 = vmax.f32 %v3524_v24, %v3525_v18 }
 0x379   : > { %v3900_v8 = vmax.f32 %v3898_v21, %v3899_v16  ;;  %v3910_v31 = vmax.f32 %v3522_v26, %v3523_v27  ;;  %v5056_v32 = vpop.f32.mrb[172].mxu0 }
 0x37a   : > { %v3908_v36 = vrot.slane %v3907_v28, 1  ;;  %v3918_v39 = vrot.slane %v3917_v29, 4  ;;  %v3348_v13 = vadd.f32 %v5988_v9, %v5056_v32  ;;  %v3339_v17 = vpop.f32.mrb[173].mxu0 }
 0x37b   : > { %v3901_v41 = vrot.slane %v3900_v8, 1  ;;  %v3911_v35 = vrot.slane %v3910_v31, 4  ;;  %v3340_v44 = vadd.f32 %v5988_v9, %v3339_v17  ;;  %v5057_v45 = vpop.f32.mrb[174].mxu0 }
 0x37c   : > { %v3919_v47 = vmax.f32 %v3917_v29, %v3918_v39  ;;  %v3351_v48 = vadd.f32 %v5988_v9, %v5057_v45  ;;  %v3342_v50 = vpop.f32.mrb[175].mxu0  ;;  %v3909_v42 = vmax.f32 %v3907_v28, %v3908_v36  ;;  %v3528_v10 = vmax.f32 %v3348_v13, 0.0 }
 0x37d   : > { %v3902_v51 = vmax.f32 %v3900_v8, %v3901_v41  ;;  %v3912_v52 = vmax.f32 %v3910_v31, %v3911_v35  ;;  %v3343_v54 = vadd.f32 %v5988_v9, %v3342_v50  ;;  %v3526_v40 = vmax.f32 %v3340_v44, 0.0 }
 0x37e   : > { %v3920_v6 = vrot.slane %v3919_v47, 2  ;;  %v3529_v34 = vmax.f32 %v3351_v48, 0.0 }
 0x37f   : > { %v4108_v37 = vsel %vm4060_vm4, %v3902_v51, %v4107_v25  ;;  %v3913_v59 = vrot.slane %v3912_v52, 2  ;;  %v3527_v3 = vmax.f32 %v3343_v54, 0.0 }
 0x380   : > { %v3921_v38 = vmax.f32 %v3919_v47, %v3920_v6  ;;  %v4109_v43 = vsel %vm4062_vm5, %v3909_v42, %v4108_v37  ;;  %v3931_v14 = vmax.f32 %v3528_v10, %v3529_v34 }
 0x381   : > { %v3914_v46 = vmax.f32 %v3912_v52, %v3913_v59  ;;  %v3924_v49 = vmax.f32 %v3526_v40, %v3527_v3  ;;  %v5060_v19 = vpop.f32.mrb[176].mxu0 }
 0x382   : > { %v3922_v22 = vrot.slane %v3921_v38, 1  ;;  %v3932_v7 = vrot.slane %v3931_v14, 4  ;;  %v3364_v57 = vadd.f32 %v5988_v9, %v5060_v19  ;;  %v3355_v55 = vpop.f32.mrb[177].mxu0 }
 0x383   : > { %v3915_v58 = vrot.slane %v3914_v46, 1  ;;  %v3925_v30 = vrot.slane %v3924_v49, 4  ;;  %v3356_v33 = vadd.f32 %v5988_v9, %v3355_v55  ;;  %v5061_v15 = vpop.f32.mrb[178].mxu0 }
 0x384   : > { %v3933_v60 = vmax.f32 %v3931_v14, %v3932_v7  ;;  %v3367_v5 = vadd.f32 %v5988_v9, %v5061_v15  ;;  %v3358_v61 = vpop.f32.mrb[179].mxu0  ;;  %v3923_v0 = vmax.f32 %v3921_v38, %v3922_v22  ;;  %v3532_v2 = vmax.f32 %v3364_v57, 0.0 }
 0x385   : > { %v3916_v56 = vmax.f32 %v3914_v46, %v3915_v58  ;;  %v3926_v62 = vmax.f32 %v3924_v49, %v3925_v30  ;;  %v3359_v63 = vadd.f32 %v5988_v9, %v3358_v61  ;;  %v3530_v20 = vmax.f32 %v3356_v33, 0.0 }
 0x386   : > { %v3934_v1 = vrot.slane %v3933_v60, 2  ;;  %v3533_v4 = vmax.f32 %v3367_v5, 0.0 }
 0x387   : > { %v4110_v11 = vsel %vm4064_vm6, %v3916_v56, %v4109_v43  ;;  %v3927_v12 = vrot.slane %v3926_v62, 2  ;;  %v3531_v21 = vmax.f32 %v3359_v63, 0.0 }
 0x388   : > { %v3935_v23 = vmax.f32 %v3933_v60, %v3934_v1  ;;  %v4111_v53 = vsel %vm4066_vm7, %v3923_v0, %v4110_v11  ;;  %v3945_v24 = vmax.f32 %v3532_v2, %v3533_v4 }
 0x389   : > { %v3928_v18 = vmax.f32 %v3926_v62, %v3927_v12  ;;  %v3938_v25 = vmax.f32 %v3530_v20, %v3531_v21  ;;  %v5064_v16 = vpop.f32.mrb[180].mxu0 }
 0x38a   : > { %v3936_v26 = vrot.slane %v3935_v23, 1  ;;  %v3946_v27 = vrot.slane %v3945_v24, 4  ;;  %v3380_v28 = vadd.f32 %v5988_v9, %v5064_v16  ;;  %v3371_v29 = vpop.f32.mrb[181].mxu0 }
 0x38b   : > { %v3929_v8 = vrot.slane %v3928_v18, 1  ;;  %v3939_v31 = vrot.slane %v3938_v25, 4  ;;  %v3372_v32 = vadd.f32 %v5988_v9, %v3371_v29  ;;  %v5065_v36 = vpop.f32.mrb[182].mxu0 }
 0x38c   : > { %v3947_v39 = vmax.f32 %v3945_v24, %v3946_v27  ;;  %v3383_v13 = vadd.f32 %v5988_v9, %v5065_v36  ;;  %v3374_v17 = vpop.f32.mrb[183].mxu0  ;;  %v3937_v45 = vmax.f32 %v3935_v23, %v3936_v26  ;;  %v3536_v48 = vmax.f32 %v3380_v28, 0.0 }
 0x38d   : > { %v3930_v41 = vmax.f32 %v3928_v18, %v3929_v8  ;;  %v3940_v35 = vmax.f32 %v3938_v25, %v3939_v31  ;;  %v3375_v44 = vadd.f32 %v5988_v9, %v3374_v17  ;;  %v3534_v54 = vmax.f32 %v3372_v32, 0.0 }
 0x38e   : > { %v3948_v47 = vrot.slane %v3947_v39, 2  ;;  %v3537_v50 = vmax.f32 %v3383_v13, 0.0 }
 0x38f   : > { %v4112_v51 = vsel %vm4068_vm8, %v3930_v41, %v4111_v53  ;;  %v3941_v52 = vrot.slane %v3940_v35, 2  ;;  %v3535_v42 = vmax.f32 %v3375_v44, 0.0 }
 0x390   : > { %v4113_v6 = vsel %vm4070_vm9, %v3937_v45, %v4112_v51  ;;  %v3949_v10 = vmax.f32 %v3947_v39, %v3948_v47  ;;  %v3959_v34 = vmax.f32 %v3536_v48, %v3537_v50 }
 0x391   : > { %4135 = vst [vmem:[%s5921_s16 + $0x30] sm:$0xff] %v4113_v6  ;;  %v3942_v37 = vmax.f32 %v3940_v35, %v3941_v52  ;;  %v3952_v59 = vmax.f32 %v3534_v54, %v3535_v42 }
 0x392   : > { %v3950_v40 = vrot.slane %v3949_v10, 1  ;;  %v3960_v3 = vrot.slane %v3959_v34, 4  ;;  %v5068_v38 = vpop.f32.mrb[184].mxu0 }
 0x393   : > { %v3943_v43 = vrot.slane %v3942_v37, 1  ;;  %v3953_v14 = vrot.slane %v3952_v59, 4  ;;  %v3396_v46 = vadd.f32 %v5988_v9, %v5068_v38  ;;  %v3387_v49 = vpop.f32.mrb[185].mxu0 }
 0x394   : > { %v3951_v19 = vmax.f32 %v3949_v10, %v3950_v40  ;;  %v3961_v22 = vmax.f32 %v3959_v34, %v3960_v3  ;;  %v3388_v7 = vadd.f32 %v5988_v9, %v3387_v49  ;;  %v5069_v57 = vpop.f32.mrb[186].mxu0 }
 0x395   : > { %v3944_v55 = vmax.f32 %v3942_v37, %v3943_v43  ;;  %v3954_v58 = vmax.f32 %v3952_v59, %v3953_v14  ;;  %v3399_v30 = vadd.f32 %v5988_v9, %v5069_v57  ;;  %v3390_v33 = vpop.f32.mrb[187].mxu0  ;;  %v3540_v56 = vmax.f32 %v3396_v46, 0.0 }
 0x396   : > { %v3962_v15 = vrot.slane %v3961_v22, 2  ;;  %v3391_v60 = vadd.f32 %v5988_v9, %v3390_v33  ;;  %v3538_v0 = vmax.f32 %v3388_v7, 0.0 }
 0x397   : > { %v4114_v5 = vsel %vm4058_vm3, %v3951_v19, %v3944_v55  ;;  %v3955_v61 = vrot.slane %v3954_v58, 2  ;;  %v3541_v62 = vmax.f32 %v3399_v30, 0.0 }
 0x398   : > { %v3963_v63 = vmax.f32 %v3961_v22, %v3962_v15  ;;  %v3539_v1 = vmax.f32 %v3391_v60, 0.0 }
 0x399   : > { %v3956_v2 = vmax.f32 %v3954_v58, %v3955_v61  ;;  %v3973_v4 = vmax.f32 %v3540_v56, %v3541_v62 }
 0x39a   : > { %v3964_v11 = vrot.slane %v3963_v63, 1  ;;  %v3966_v12 = vmax.f32 %v3538_v0, %v3539_v1 }
 0x39b   : > { %v3957_v20 = vrot.slane %v3956_v2, 1  ;;  %v3974_v21 = vrot.slane %v3973_v4, 4  ;;  %v5072_v23 = vpop.f32.mrb[188].mxu0 }
 0x39c   : > { %v3967_v53 = vrot.slane %v3966_v12, 4  ;;  %v3412_v24 = vadd.f32 %v5988_v9, %v5072_v23  ;;  %v3403_v18 = vpop.f32.mrb[189].mxu0  ;;  %v3965_v28 = vmax.f32 %v3963_v63, %v3964_v11 }
 0x39d   : > { %v3958_v25 = vmax.f32 %v3956_v2, %v3957_v20  ;;  %v3975_v16 = vmax.f32 %v3973_v4, %v3974_v21  ;;  %v3404_v26 = vadd.f32 %v5988_v9, %v3403_v18  ;;  %v5073_v27 = vpop.f32.mrb[190].mxu0 }
 0x39e   : > { %v3968_v29 = vmax.f32 %v3966_v12, %v3967_v53  ;;  %v3415_v8 = vadd.f32 %v5988_v9, %v5073_v27  ;;  %v3406_v31 = vpop.f32.mrb[191].mxu0  ;;  %v3544_v41 = vmax.f32 %v3412_v24, 0.0 }
 0x39f   : > { %v4115_v32 = vsel %vm4060_vm4, %v3958_v25, %v4114_v5  ;;  %v3976_v36 = vrot.slane %v3975_v16, 2  ;;  %v3407_v39 = vadd.f32 %v5988_v9, %v3406_v31  ;;  %v3542_v45 = vmax.f32 %v3404_v26, 0.0 }
 0x3a0   : > { %v3969_v13 = vrot.slane %v3968_v29, 2  ;;  %v4116_v17 = vsel %vm4062_vm5, %v3965_v28, %v4115_v32  ;;  %v3545_v35 = vmax.f32 %v3415_v8, 0.0 }
 0x3a1   : > { %v3977_v44 = vmax.f32 %v3975_v16, %v3976_v36  ;;  %v3543_v47 = vmax.f32 %v3407_v39, 0.0 }
 0x3a2   : > { %v3970_v48 = vmax.f32 %v3968_v29, %v3969_v13  ;;  %v3987_v50 = vmax.f32 %v3544_v41, %v3545_v35 }
 0x3a3   : > { %v3978_v51 = vrot.slane %v3977_v44, 1  ;;  %v3980_v52 = vmax.f32 %v3542_v45, %v3543_v47 }
 0x3a4   : > { %v3971_v54 = vrot.slane %v3970_v48, 1  ;;  %v3988_v42 = vrot.slane %v3987_v50, 4 }
 0x3a5   : > { %v3981_v6 = vrot.slane %v3980_v52, 4  ;;  %v3979_v37 = vmax.f32 %v3977_v44, %v3978_v51 }
 0x3a6   : > { %v3972_v10 = vmax.f32 %v3970_v48, %v3971_v54  ;;  %v3989_v34 = vmax.f32 %v3987_v50, %v3988_v42 }
 0x3a7   : > { %v3982_v9 = vmax.f32 %v3980_v52, %v3981_v6 }
 0x3a8   : > { %v4117_v59 = vsel %vm4064_vm6, %v3972_v10, %v4116_v17  ;;  %v3990_v40 = vrot.slane %v3989_v34, 2 }
 0x3a9   : > { %v3983_v3 = vrot.slane %v3982_v9, 2  ;;  %v4118_v38 = vsel %vm4066_vm7, %v3979_v37, %v4117_v59 }
 0x3aa   : > { %v3991_v43 = vmax.f32 %v3989_v34, %v3990_v40 }
 0x3ab   : > { %v3984_v14 = vmax.f32 %v3982_v9, %v3983_v3 }
 0x3ac   : > { %v3992_v46 = vrot.slane %v3991_v43, 1 }
 0x3ad   : > { %v3985_v49 = vrot.slane %v3984_v14, 1 }
 0x3ae   : > { %v3993_v22 = vmax.f32 %v3991_v43, %v3992_v46 }
 0x3af   : > { %v3986_v19 = vmax.f32 %v3984_v14, %v3985_v49 }
 0x3b1   : > { %v4119_v7 = vsel %vm4068_vm8, %v3986_v19, %v4118_v38 }
 0x3b2   : > { %v4120_v57 = vsel %vm4070_vm9, %v3993_v22, %v4119_v7 }
 0x3b3   : > { %4136 = vst [vmem:[%s5921_s16 + $0x38] sm:$0xff] %v4120_v57 }
 0x3b4 PF: > { %s17_s24 = sadd.s32 1, %s5166_s24  }
 0x3b5   : > { %p14_p5 = scmp.ge.s32.totalorder %s17_s24, 4  }
 0x3b7   :  { %16 = sbr.rel (!%p14_p5) target bundleno = 1 (0x1), region = 78 }

// kernel: backbone_forward.13
= control target key start
LH: loop header
LB: loop body
LE: loop exit
PB: predicated region body
PF: predicated region fallthrough
CT: control target
= control target key end

     0   :  { %s2369_s24 = smov 0   ;;  %s2793_s0 = inlined_call_operand.vmem [shape: bf16[512,131], index: 0, kind: input, shape index: {}]   ;;  %s2794_s1 = inlined_call_operand.vmem [shape: bf16[131,128], index: 1, kind: input, shape index: {}]   ;;  %s2795_s2 = inlined_call_operand.vmem [shape: f32[1,128], index: 2, kind: input, shape index: {}]   ;;  %s2796_s3 = inlined_call_operand.vmem [shape: bf16[128,128], index: 3, kind: input, shape index: {}]   ;;  %s2797_s4 = inlined_call_operand.vmem [shape: f32[1,128], index: 4, kind: input, shape index: {}]   ;;  %s2798_s5 = inlined_call_operand.vmem [shape: bf16[128,256], index: 5, kind: input, shape index: {}]   ;;  %s2799_s6 = inlined_call_operand.vmem [shape: f32[1,256], index: 6, kind: input, shape index: {}]   ;;  %s2800_s7 = inlined_call_operand.vmem [shape: f32[64,256], index: 7, kind: output, shape index: {}]  }
   0x1 LB: > { %s2034_s25 = sadd.s32 4294967295, %s2325_s24   ;;  %p2038_p0 = scmp.ge.s32.totalorder %s2325_s24, 1  ;;  %s2325_s24 = sphi %s2369_s24, %s17_s24  }
   0x2   : > { %p239_p1 = scmp.lt.s32.totalorder %s2325_s24, 3 }
   0x4   : > { %p240_p2 = pnand %p2038_p0, %p239_p1 }
   0x5   : > { %v2230_v0 = vld [vmem:[%s2794_s1] sm:$0xff] (!%p240_p2)   ;;  %v2327_v1 = vmov (!%p240_p2), 0   ;;  %v2231_v2 = vld [vmem:[%s2794_s1 + $0x8] sm:$0xff] (!%p240_p2)   ;;  %v2232_v3 = vld [vmem:[%s2794_s1 + $0x10] sm:$0xff] (!%p240_p2)   ;;  %s2039_s9 = sshll.u32 (!%p240_p2), %s2034_s25, 5  ;;  %vm539_vm0 = vcmask (!%p240_p2), 23552  }
   0x6   : > { %243 = sbr.rel (%p240_p2) target bundleno = 857 (0x359), region = 48  ;;  %595 = vmatprep.subr.bf16.mxu0 (!%p240_p2), %v2327_v1  ;;  %p274_p3 = scmp.lt.s32.totalorder (!%p240_p2), %s2039_s9, 63  ;;  %v2233_v4 = vld [vmem:[%s2794_s1 + $0x18] sm:$0xff] (!%p240_p2)   ;;  %v2278_v5 = vld [vmem:[%s2796_s3] sm:$0xff] (!%p240_p2)   ;;  %v2235_v8 = vld [vmem:[%s2794_s1 + $0x28] sm:$0xff] (!%p240_p2)   ;;  %vm588_vm1 = vcmask (!%p240_p2), 1040384  }
   0x7   : > { %596 = vmatpush1.bf16.msra.mxu0 (!%p240_p2), %v2230_v0  ;;  %2204 = vmatprep.subr.bf16.mxu1 (!%p240_p2), %v2278_v5  ;;  %v2234_v6 = vld [vmem:[%s2794_s1 + $0x20] sm:$0xff] (!%p240_p2)   ;;  %v2236_v9 = vld [vmem:[%s2794_s1 + $0x30] sm:$0xff] (!%p240_p2)   ;;  %vm589_vm2 = vcmask (!%p240_p2), 1041408   ;;  %v2328_v10 = vmov (!%p240_p2), 65535   ;;  %v2237_v12 = vld [vmem:[%s2794_s1 + $0x38] sm:$0xff] (!%p240_p2)   ;;  %vm1897_vm3 = vcmask (!%p240_p2), 1041409  }
   0x8   : > { %597 = vmatprep.subr.bf16.mxu0 (!%p240_p2), %v2327_v1  ;;  %2212 = vmatpush3.bf16.msra.mxu1 (!%p240_p2), %v2278_v5  ;;  %v590_v11 = vsel (!%p240_p2), %vm588_vm1, 4294967295, %v2328_v10  ;;  %v2238_v13 = vld [vmem:[%s2794_s1 + $0x40] ss:$0 sps:$4 sm:$0x33] (!%p240_p2)   ;;  %v2285_v17 = vld [vmem:[%s2796_s3 + $0x8] sm:$0xff] (!%p240_p2)   ;;  %v2289_v19 = vld [vmem:[%s2796_s3 + $0x10] sm:$0xff] (!%p240_p2)  }
   0x9   : > { %v591_v14 = vsel (!%p240_p2), %vm589_vm2, %v590_v11, 0  ;;  %2205 = vmatprep.subr.bf16.mxu1 (!%p240_p2), %v2285_v17  ;;  %v2290_v20 = vld [vmem:[%s2796_s3 + $0x18] sm:$0xff] (!%p240_p2)   ;;  %v2291_v23 = vld [vmem:[%s2796_s3 + $0x20] sm:$0xff] (!%p240_p2)   ;;  %v2292_v24 = vld [vmem:[%s2796_s3 + $0x28] sm:$0xff] (!%p240_p2)   ;;  %vm1899_vm4 = vcmask (!%p240_p2), 1042434   ;;  %vm1901_vm5 = vcmask (!%p240_p2), 1043459  }
   0xa   : > { %v593_v15 = vand.u32 (!%p240_p2), %v2238_v13, %v591_v14  ;;  %v2293_v27 = vld [vmem:[%s2796_s3 + $0x30] sm:$0xff] (!%p240_p2)   ;;  %v2294_v46 = vld [vmem:[%s2796_s3 + $0x38] sm:$0xff] (!%p240_p2)   ;;  %v2495_v54 = vld [vmem:[%s2795_s2] ss:$0 sm:$0xff] (!%p240_p2)  ;;  %vm1903_vm6 = vcmask (!%p240_p2), 1044484   ;;  %vm1905_vm7 = vcmask (!%p240_p2), 1045509  }
   0xb   : > { %598 = vmatpush1.bf16.msra.mxu0 (!%p240_p2), %v2231_v2  ;;  %v2297_v58 = vld [vmem:[%s2798_s5 + $0x4] ss:$8 sps:$4 sm:$0xff] (!%p240_p2)   ;;  %s2659_s18 = sshll.u32 (!%p240_p2), %s2034_s25, 2  ;;  %vm1907_vm8 = vcmask (!%p240_p2), 1046534   ;;  %vm1909_vm9 = vcmask (!%p240_p2), 1047559  }
   0xc   : > { %599 = vmatprep.subr.bf16.mxu0 (!%p240_p2), %v2327_v1  ;;  %2213 = vmatpush3.bf16.msra.mxu1 (!%p240_p2), %v2285_v17  ;;  %p281_p4 = scmp.lt.s32.totalorder (!%p240_p2), %s2659_s18, 7 }
   0xd   : > { %s2802_s9 = smov (!%p274_p3, %s2039_s9), 63  ;;  %2206 = vmatprep.subr.bf16.mxu1 %v2289_v19 }
   0xe   : > { %s2130_s14 = sshll.u32 %s2802_s9, 3  ;;  %s2804_s18 = smov (!%p281_p4, %s2659_s18), 7 }
   0xf   : > { %600 = vmatpush1.bf16.msra.mxu0 %v2232_v3  ;;  %s2401_s17 = scalar_lea.vmem %s2793_s0, %s2130_s14  ;;  %s2131_s25 = sshll.u32 %s2804_s18, 4 }
  0x10   : > { %601 = vmatprep.subr.bf16.mxu0 %v2327_v1  ;;  %v2241_v7 = vld [vmem:[%s2401_s17 + $0x4] ss:$8 sps:$4 sm:$0xff]   ;;  %v2239_v16 = vld [vmem:[%s2401_s17] ss:$8 sps:$4 sm:$0xff]   ;;  %v2242_v18 = vld [vmem:[%s2401_s17 + $0x14] ss:$8 sps:$4 sm:$0xff]   ;;  %2214 = vmatpush3.bf16.msra.mxu1 %v2289_v19  ;;  %s2682_s21 = scalar_lea.vmem %s2800_s7, %s2131_s25 }
  0x11   : > { %2087 = vmatprep.mubr.msk.bf16.mxu0 %vm539_vm0, %v2241_v7  ;;  %v2244_v21 = vld [vmem:[%s2401_s17 + $0x10] ss:$8 sps:$4 sm:$0xff]   ;;  %v2245_v22 = vld [vmem:[%s2401_s17 + $0x24] ss:$8 sps:$4 sm:$0xff]   ;;  %2207 = vmatprep.subr.bf16.mxu1 %v2290_v20  ;;  %v2247_v25 = vld [vmem:[%s2401_s17 + $0x20] ss:$8 sps:$4 sm:$0xff]  }
  0x12   : > { %v2248_v26 = vld [vmem:[%s2401_s17 + $0x34] ss:$8 sps:$4 sm:$0xff]   ;;  %v2250_v28 = vld [vmem:[%s2401_s17 + $0x30] ss:$8 sps:$4 sm:$0xff]   ;;  %v2251_v29 = vld [vmem:[%s2401_s17 + $0x44] ss:$8 sps:$4 sm:$0xff]  }
  0x13   : > { %602 = vmatpush1.bf16.msra.mxu0 %v2233_v4  ;;  %v2253_v30 = vld [vmem:[%s2401_s17 + $0x40] ss:$8 sps:$4 sm:$0xff]   ;;  %v2254_v31 = vld [vmem:[%s2401_s17 + $0x54] ss:$8 sps:$4 sm:$0xff]   ;;  %v2256_v32 = vld [vmem:[%s2401_s17 + $0x50] ss:$8 sps:$4 sm:$0xff]  }
  0x14   : > { %603 = vmatprep.subr.bf16.mxu0 %v2327_v1  ;;  %2215 = vmatpush3.bf16.msra.mxu1 %v2290_v20  ;;  %v2257_v33 = vld [vmem:[%s2401_s17 + $0x64] ss:$8 sps:$4 sm:$0xff]   ;;  %v2259_v34 = vld [vmem:[%s2401_s17 + $0x60] ss:$8 sps:$4 sm:$0xff]   ;;  %v2260_v35 = vld [vmem:[%s2401_s17 + $0x74] ss:$8 sps:$4 sm:$0xff]  }
  0x15   : > { %2208 = vmatprep.subr.bf16.mxu1 %v2291_v23  ;;  %v2262_v36 = vld [vmem:[%s2401_s17 + $0x70] ss:$8 sps:$4 sm:$0xff]   ;;  %v2263_v37 = vld [vmem:[%s2401_s17 + $0x84] ss:$8 sps:$4 sm:$0xff]   ;;  %v2265_v38 = vld [vmem:[%s2401_s17 + $0x80] ss:$8 sps:$4 sm:$0xff]  }
  0x16   : > { %v2266_v39 = vld [vmem:[%s2401_s17 + $0x94] ss:$8 sps:$4 sm:$0xff]   ;;  %v2268_v40 = vld [vmem:[%s2401_s17 + $0x90] ss:$8 sps:$4 sm:$0xff]   ;;  %v2269_v41 = vld [vmem:[%s2401_s17 + $0xa4] ss:$8 sps:$4 sm:$0xff]  }
  0x17   : > { %604 = vmatpush1.bf16.msra.mxu0 %v2234_v6  ;;  %v2271_v42 = vld [vmem:[%s2401_s17 + $0xa0] ss:$8 sps:$4 sm:$0xff]   ;;  %v2272_v43 = vld [vmem:[%s2401_s17 + $0xb4] ss:$8 sps:$4 sm:$0xff]   ;;  %v2274_v44 = vld [vmem:[%s2401_s17 + $0xb0] ss:$8 sps:$4 sm:$0xff]  }
  0x18   : > { %605 = vmatprep.subr.bf16.mxu0 %v2327_v1  ;;  %2216 = vmatpush3.bf16.msra.mxu1 %v2291_v23  ;;  %v2275_v45 = vld [vmem:[%s2401_s17 + $0xc4] ss:$8 sps:$4 sm:$0xff]   ;;  %v2277_v47 = vld [vmem:[%s2401_s17 + $0xc0] ss:$8 sps:$4 sm:$0xff]   ;;  %v2279_v48 = vld [vmem:[%s2401_s17 + $0xd4] ss:$8 sps:$4 sm:$0xff]  }
  0x19   : > { %2209 = vmatprep.subr.bf16.mxu1 %v2292_v24  ;;  %v2281_v49 = vld [vmem:[%s2401_s17 + $0xd0] ss:$8 sps:$4 sm:$0xff]   ;;  %v2282_v50 = vld [vmem:[%s2401_s17 + $0xe4] ss:$8 sps:$4 sm:$0xff]   ;;  %v2284_v51 = vld [vmem:[%s2401_s17 + $0xe0] ss:$8 sps:$4 sm:$0xff]  }
  0x1a   : > { %v2286_v52 = vld [vmem:[%s2401_s17 + $0xf4] ss:$8 sps:$4 sm:$0xff]   ;;  %v2288_v53 = vld [vmem:[%s2401_s17 + $0xf0] ss:$8 sps:$4 sm:$0xff]  }
  0x1b   : > { %606 = vmatpush1.bf16.msra.mxu0 %v2235_v8 }
  0x1c   : > { %607 = vmatprep.subr.bf16.mxu0 %v2327_v1  ;;  %2217 = vmatpush3.bf16.msra.mxu1 %v2292_v24 }
  0x1d   : > { %2210 = vmatprep.subr.bf16.mxu1 %v2293_v27 }
  0x1f   : > { %608 = vmatpush1.bf16.msra.mxu0 %v2236_v9 }
  0x20   : > { %609 = vmatprep.subr.bf16.mxu0 %v2327_v1  ;;  %2218 = vmatpush3.bf16.msra.mxu1 %v2293_v27 }
  0x21   : > { %2211 = vmatprep.subr.bf16.mxu1 %v2294_v46 }
  0x23   : > { %610 = vmatpush1.bf16.msra.mxu0 %v2237_v12 }
  0x24   : > { %611 = vmatprep.subr.bf16.mxu0 %v2327_v1  ;;  %2219 = vmatpush3.bf16.msra.mxu1 %v2294_v46 }
  0x25   : > { %1192 = vmatprep.subr.bf16.mxu1 %v2297_v58 }
  0x27   : > { %612 = vmatpush1.bf16.msra.mxu0 %v593_v15 }
  0x28   : > { %2156 = vmatprep.subr.bf16.mxu0 %v2278_v5 }
  0x2a   : > { %628 = vmatmul.mubr.bf16.vlgmr.msra.gmra.mrb[0].mxu0 %v2239_v16 }
  0x2b   : > { %2088 = vmatprep.mubr.msk.bf16.mxu0 %vm539_vm0, %v2242_v18  ;;  %2157 = vmatpush3.bf16.msra.mxu0 %v2278_v5 }
  0x2c   : > { %2158 = vmatprep.subr.bf16.mxu0 %v2285_v17 }
  0x2f   : > { %2159 = vmatpush3.bf16.msra.mxu0 %v2285_v17 }
  0x30   : > { %2160 = vmatprep.subr.bf16.mxu0 %v2289_v19 }
  0x32   : > { %636 = vmatmul.mubr.bf16.gmra.mrb[4].mxu0 %v2244_v21 }
  0x33   : > { %2089 = vmatprep.mubr.msk.bf16.mxu0 %vm539_vm0, %v2245_v22  ;;  %2161 = vmatpush3.bf16.msra.mxu0 %v2289_v19 }
  0x34   : > { %2162 = vmatprep.subr.bf16.mxu0 %v2290_v20 }
  0x37   : > { %2163 = vmatpush3.bf16.msra.mxu0 %v2290_v20 }
  0x38   : > { %2164 = vmatprep.subr.bf16.mxu0 %v2291_v23 }
  0x3a   : > { %644 = vmatmul.mubr.bf16.gmra.mrb[8].mxu0 %v2247_v25 }
  0x3b   : > { %2090 = vmatprep.mubr.msk.bf16.mxu0 %vm539_vm0, %v2248_v26  ;;  %2165 = vmatpush3.bf16.msra.mxu0 %v2291_v23 }
  0x3c   : > { %2166 = vmatprep.subr.bf16.mxu0 %v2292_v24 }
  0x3f   : > { %2167 = vmatpush3.bf16.msra.mxu0 %v2292_v24 }
  0x40   : > { %2168 = vmatprep.subr.bf16.mxu0 %v2293_v27 }
  0x42   : > { %652 = vmatmul.mubr.bf16.gmra.mrb[12].mxu0 %v2250_v28 }
  0x43   : > { %2091 = vmatprep.mubr.msk.bf16.mxu0 %vm539_vm0, %v2251_v29  ;;  %2169 = vmatpush3.bf16.msra.mxu0 %v2293_v27 }
  0x44   : > { %2170 = vmatprep.subr.bf16.mxu0 %v2294_v46 }
  0x47   : > { %2171 = vmatpush3.bf16.msra.mxu0 %v2294_v46 }
  0x4a   : > { %660 = vmatmul.mubr.bf16.gmra.mrb[16].mxu0 %v2253_v30 }
  0x4b   : > { %2092 = vmatprep.mubr.msk.bf16.mxu0 %vm539_vm0, %v2254_v31 }
  0x52   : > { %668 = vmatmul.mubr.bf16.gmra.mrb[20].mxu0 %v2256_v32 }
  0x53   : > { %2093 = vmatprep.mubr.msk.bf16.mxu0 %vm539_vm0, %v2257_v33 }
  0x5a   : > { %676 = vmatmul.mubr.bf16.gmra.mrb[24].mxu0 %v2259_v34 }
  0x5b   : > { %2094 = vmatprep.mubr.msk.bf16.mxu0 %vm539_vm0, %v2260_v35 }
  0x62   : > { %684 = vmatmul.mubr.bf16.gmra.mrb[28].mxu0 %v2262_v36 }
  0x63   : > { %2095 = vmatprep.mubr.msk.bf16.mxu0 %vm539_vm0, %v2263_v37 }
  0x6a   : > { %692 = vmatmul.mubr.bf16.gmra.mrb[32].mxu0 %v2265_v38 }
  0x6b   : > { %2096 = vmatprep.mubr.msk.bf16.mxu0 %vm539_vm0, %v2266_v39 }
  0x72   : > { %700 = vmatmul.mubr.bf16.gmra.mrb[36].mxu0 %v2268_v40 }
  0x73   : > { %2097 = vmatprep.mubr.msk.bf16.mxu0 %vm539_vm0, %v2269_v41 }
  0x7a   : > { %708 = vmatmul.mubr.bf16.gmra.mrb[40].mxu0 %v2271_v42 }
  0x7b   : > { %2098 = vmatprep.mubr.msk.bf16.mxu0 %vm539_vm0, %v2272_v43 }
  0x82   : > { %716 = vmatmul.mubr.bf16.gmra.mrb[44].mxu0 %v2274_v44 }
  0x83   : > { %2099 = vmatprep.mubr.msk.bf16.mxu0 %vm539_vm0, %v2275_v45 }
  0x8a   : > { %724 = vmatmul.mubr.bf16.gmra.mrb[48].mxu0 %v2277_v47 }
  0x8b   : > { %2100 = vmatprep.mubr.msk.bf16.mxu0 %vm539_vm0, %v2279_v48 }
  0x92   : > { %732 = vmatmul.mubr.bf16.gmra.mrb[52].mxu0 %v2281_v49 }
  0x93   : > { %2101 = vmatprep.mubr.msk.bf16.mxu0 %vm539_vm0, %v2282_v50 }
  0x9a   : > { %740 = vmatmul.mubr.bf16.gmra.mrb[56].mxu0 %v2284_v51 }
  0x9b   : > { %2102 = vmatprep.mubr.msk.bf16.mxu0 %vm539_vm0, %v2286_v52 }
  0xa2   : > { %748 = vmatmul.mubr.bf16.gmra.mrb[60].mxu0 %v2288_v53 }
  0xfd   : > { %v629_v55 = vpop.f32.mrb[0].mxu0 }
  0xfe   : > { %v630_v56 = vadd.f32 %v2495_v54, %v629_v55  ;;  %v631_v57 = vpop.f32.mrb[1].mxu0 }
  0xff   : > { %v632_v59 = vpop.f32.mrb[2].mxu0 }
 0x100   : > { %v633_v60 = vadd.f32 %v2495_v54, %v632_v59  ;;  %v634_v61 = vpop.f32.mrb[3].mxu0  ;;  %v756_v62 = vmax.f32 %v630_v56, 0.0 }
 0x102   : > { %v757_v63 = vmax.f32 %v633_v60, 0.0 }
 0x104   : > { %v805_v0 = vpack.c.bf16 %v757_v63, %v756_v62 }
 0x105   : > { %v637_v2 = vpop.f32.mrb[4].mxu0 }
 0x106   : > { %v638_v3 = vadd.f32 %v2495_v54, %v637_v2  ;;  %v639_v4 = vpop.f32.mrb[5].mxu0  ;;  %2172 = vmatprep.mubr.bf16.mxu0 %v805_v0 }
 0x107   : > { %v640_v5 = vpop.f32.mrb[6].mxu0 }
 0x108   : > { %v641_v6 = vadd.f32 %v2495_v54, %v640_v5  ;;  %v642_v7 = vpop.f32.mrb[7].mxu0  ;;  %v758_v8 = vmax.f32 %v638_v3, 0.0 }
 0x10a   : > { %v759_v9 = vmax.f32 %v641_v6, 0.0 }
 0x10c   : > { %v806_v10 = vpack.c.bf16 %v759_v9, %v758_v8 }
 0x10d   : > { %v645_v11 = vpop.f32.mrb[8].mxu0 }
 0x10e   : > { %v646_v12 = vadd.f32 %v2495_v54, %v645_v11  ;;  %v647_v13 = vpop.f32.mrb[9].mxu0  ;;  %2173 = vmatmul.mubr.bf16.vlgmr.msra.gmra.mrb[64].mxu0 %v806_v10 }
 0x10f   : > { %v648_v14 = vpop.f32.mrb[10].mxu0 }
 0x110   : > { %v649_v15 = vadd.f32 %v2495_v54, %v648_v14  ;;  %v650_v16 = vpop.f32.mrb[11].mxu0  ;;  %v760_v17 = vmax.f32 %v646_v12, 0.0 }
 0x112   : > { %v761_v18 = vmax.f32 %v649_v15, 0.0 }
 0x114   : > { %v807_v19 = vpack.c.bf16 %v761_v18, %v760_v17 }
 0x115   : > { %v653_v20 = vpop.f32.mrb[12].mxu0 }
 0x116   : > { %v654_v21 = vadd.f32 %v2495_v54, %v653_v20  ;;  %v655_v22 = vpop.f32.mrb[13].mxu0  ;;  %2176 = vmatprep.mubr.bf16.mxu0 %v807_v19  ;;  %v2295_v20 = vld [vmem:[%s2798_s5] ss:$8 sps:$4 sm:$0xff]  }
 0x117   : > { %v656_v23 = vpop.f32.mrb[14].mxu0  ;;  %v2300_v22 = vld [vmem:[%s2798_s5 + $0x14] ss:$8 sps:$4 sm:$0xff]  }
 0x118   : > { %v657_v24 = vadd.f32 %v2495_v54, %v656_v23  ;;  %v658_v25 = vpop.f32.mrb[15].mxu0  ;;  %v762_v26 = vmax.f32 %v654_v21, 0.0 }
 0x11a   : > { %v763_v27 = vmax.f32 %v657_v24, 0.0 }
 0x11c   : > { %v808_v28 = vpack.c.bf16 %v763_v27, %v762_v26  ;;  %v2298_v27 = vld [vmem:[%s2798_s5 + $0x10] ss:$8 sps:$4 sm:$0xff]  }
 0x11d   : > { %v661_v29 = vpop.f32.mrb[16].mxu0 }
 0x11e   : > { %v662_v30 = vadd.f32 %v2495_v54, %v661_v29  ;;  %v663_v31 = vpop.f32.mrb[17].mxu0  ;;  %2177 = vmatmul.mubr.bf16.gmra.mrb[68].mxu0 %v808_v28 }
 0x11f   : > { %v664_v32 = vpop.f32.mrb[18].mxu0 }
 0x120   : > { %v665_v33 = vadd.f32 %v2495_v54, %v664_v32  ;;  %v666_v34 = vpop.f32.mrb[19].mxu0  ;;  %v764_v35 = vmax.f32 %v662_v30, 0.0  ;;  %v2303_v30 = vld [vmem:[%s2798_s5 + $0x24] ss:$8 sps:$4 sm:$0xff]  }
 0x122   : > { %v765_v36 = vmax.f32 %v665_v33, 0.0  ;;  %v2301_v33 = vld [vmem:[%s2798_s5 + $0x20] ss:$8 sps:$4 sm:$0xff]  }
 0x124   : > { %v809_v37 = vpack.c.bf16 %v765_v36, %v764_v35  ;;  %v2306_v35 = vld [vmem:[%s2798_s5 + $0x34] ss:$8 sps:$4 sm:$0xff]  }
 0x125   : > { %v669_v38 = vpop.f32.mrb[20].mxu0 }
 0x126   : > { %v670_v39 = vadd.f32 %v2495_v54, %v669_v38  ;;  %v671_v40 = vpop.f32.mrb[21].mxu0  ;;  %2180 = vmatprep.mubr.bf16.mxu0 %v809_v37 }
 0x127   : > { %v672_v41 = vpop.f32.mrb[22].mxu0  ;;  %v2304_v40 = vld [vmem:[%s2798_s5 + $0x30] ss:$8 sps:$4 sm:$0xff]  }
 0x128   : > { %v673_v42 = vadd.f32 %v2495_v54, %v672_v41  ;;  %v674_v43 = vpop.f32.mrb[23].mxu0  ;;  %v766_v44 = vmax.f32 %v670_v39, 0.0 }
 0x129   : > { %v2309_v43 = vld [vmem:[%s2798_s5 + $0x44] ss:$8 sps:$4 sm:$0xff]  }
 0x12a   : > { %v767_v45 = vmax.f32 %v673_v42, 0.0 }
 0x12c   : > { %v810_v46 = vpack.c.bf16 %v767_v45, %v766_v44 }
 0x12d   : > { %v677_v47 = vpop.f32.mrb[24].mxu0 }
 0x12e   : > { %v678_v48 = vadd.f32 %v2495_v54, %v677_v47  ;;  %v679_v49 = vpop.f32.mrb[25].mxu0  ;;  %2181 = vmatmul.mubr.bf16.gmra.mrb[72].mxu0 %v810_v46  ;;  %v2307_v46 = vld [vmem:[%s2798_s5 + $0x40] ss:$8 sps:$4 sm:$0xff]  }
 0x12f   : > { %v680_v50 = vpop.f32.mrb[26].mxu0 }
 0x130   : > { %v681_v51 = vadd.f32 %v2495_v54, %v680_v50  ;;  %v682_v52 = vpop.f32.mrb[27].mxu0  ;;  %v768_v53 = vmax.f32 %v678_v48, 0.0  ;;  %v2312_v48 = vld [vmem:[%s2798_s5 + $0x54] ss:$8 sps:$4 sm:$0xff]  }
 0x132   : > { %v769_v55 = vmax.f32 %v681_v51, 0.0 }
 0x134   : > { %v811_v56 = vpack.c.bf16 %v769_v55, %v768_v53  ;;  %v2310_v53 = vld [vmem:[%s2798_s5 + $0x50] ss:$8 sps:$4 sm:$0xff]  }
 0x135   : > { %v685_v57 = vpop.f32.mrb[28].mxu0 }
 0x136   : > { %v686_v58 = vadd.f32 %v2495_v54, %v685_v57  ;;  %v687_v59 = vpop.f32.mrb[29].mxu0  ;;  %2184 = vmatprep.mubr.bf16.mxu0 %v811_v56  ;;  %v2315_v57 = vld [vmem:[%s2798_s5 + $0x64] ss:$8 sps:$4 sm:$0xff]  }
 0x137   : > { %v688_v60 = vpop.f32.mrb[30].mxu0 }
 0x138   : > { %v689_v61 = vadd.f32 %v2495_v54, %v688_v60  ;;  %v690_v62 = vpop.f32.mrb[31].mxu0  ;;  %v770_v63 = vmax.f32 %v686_v58, 0.0  ;;  %v2313_v60 = vld [vmem:[%s2798_s5 + $0x60] ss:$8 sps:$4 sm:$0xff]  }
 0x13a   : > { %v771_v0 = vmax.f32 %v689_v61, 0.0 }
 0x13c   : > { %v812_v2 = vpack.c.bf16 %v771_v0, %v770_v63  ;;  %v2318_v63 = vld [vmem:[%s2798_s5 + $0x74] ss:$8 sps:$4 sm:$0xff]  }
 0x13d   : > { %v693_v3 = vpop.f32.mrb[32].mxu0 }
 0x13e   : > { %v694_v4 = vadd.f32 %v2495_v54, %v693_v3  ;;  %v695_v5 = vpop.f32.mrb[33].mxu0  ;;  %2185 = vmatmul.mubr.bf16.gmra.mrb[76].mxu0 %v812_v2 }
 0x13f   : > { %v696_v6 = vpop.f32.mrb[34].mxu0 }
 0x140   : > { %v697_v7 = vadd.f32 %v2495_v54, %v696_v6  ;;  %v698_v8 = vpop.f32.mrb[35].mxu0  ;;  %v772_v9 = vmax.f32 %v694_v4, 0.0  ;;  %v2316_v4 = vld [vmem:[%s2798_s5 + $0x70] ss:$8 sps:$4 sm:$0xff]  }
 0x142   : > { %v773_v10 = vmax.f32 %v697_v7, 0.0 }
 0x144   : > { %v813_v11 = vpack.c.bf16 %v773_v10, %v772_v9 }
 0x145   : > { %v701_v12 = vpop.f32.mrb[36].mxu0 }
 0x146   : > { %v702_v13 = vadd.f32 %v2495_v54, %v701_v12  ;;  %v703_v14 = vpop.f32.mrb[37].mxu0  ;;  %2188 = vmatprep.mubr.bf16.mxu1 %v813_v11 }
 0x147   : > { %v704_v15 = vpop.f32.mrb[38].mxu0 }
 0x148   : > { %v705_v16 = vadd.f32 %v2495_v54, %v704_v15  ;;  %v706_v17 = vpop.f32.mrb[39].mxu0  ;;  %v774_v18 = vmax.f32 %v702_v13, 0.0 }
 0x14a   : > { %v775_v19 = vmax.f32 %v705_v16, 0.0 }
 0x14c   : > { %v814_v21 = vpack.c.bf16 %v775_v19, %v774_v18 }
 0x14d   : > { %v709_v23 = vpop.f32.mrb[40].mxu0 }
 0x14e   : > { %v710_v24 = vadd.f32 %v2495_v54, %v709_v23  ;;  %v711_v25 = vpop.f32.mrb[41].mxu0  ;;  %2189 = vmatmul.mubr.bf16.vlgmr.msra.gmra.mrb[0].mxu1 %v814_v21 }
 0x14f   : > { %v712_v26 = vpop.f32.mrb[42].mxu0  ;;  %1193 = vmatpush1.bf16.msra.mxu1 %v2295_v20 }
 0x150   : > { %v713_v28 = vadd.f32 %v2495_v54, %v712_v26  ;;  %v714_v29 = vpop.f32.mrb[43].mxu0  ;;  %1194 = vmatprep.subr.bf16.mxu1 %v2300_v22  ;;  %v776_v31 = vmax.f32 %v710_v24, 0.0 }
 0x152   : > { %v777_v32 = vmax.f32 %v713_v28, 0.0  ;;  %v2581_v28 = vld [vmem:[%s2797_s4] ss:$0 sm:$0xff] }
 0x153   : > { %1195 = vmatpush1.bf16.msra.mxu1 %v2298_v27 }
 0x154   : > { %v815_v34 = vpack.c.bf16 %v777_v32, %v776_v31  ;;  %1196 = vmatprep.subr.bf16.mxu1 %v2303_v30 }
 0x155   : > { %v717_v36 = vpop.f32.mrb[44].mxu0 }
 0x156   : > { %v718_v37 = vadd.f32 %v2495_v54, %v717_v36  ;;  %v719_v38 = vpop.f32.mrb[45].mxu0  ;;  %2192 = vmatprep.mubr.bf16.mxu1 %v815_v34 }
 0x157   : > { %v720_v39 = vpop.f32.mrb[46].mxu0  ;;  %1197 = vmatpush1.bf16.msra.mxu1 %v2301_v33 }
 0x158   : > { %v721_v41 = vadd.f32 %v2495_v54, %v720_v39  ;;  %v722_v42 = vpop.f32.mrb[47].mxu0  ;;  %1198 = vmatprep.subr.bf16.mxu1 %v2306_v35  ;;  %v778_v44 = vmax.f32 %v718_v37, 0.0 }
 0x15a   : > { %v779_v45 = vmax.f32 %v721_v41, 0.0 }
 0x15b   : > { %1199 = vmatpush1.bf16.msra.mxu1 %v2304_v40 }
 0x15c   : > { %v816_v47 = vpack.c.bf16 %v779_v45, %v778_v44  ;;  %1200 = vmatprep.subr.bf16.mxu1 %v2309_v43 }
 0x15d   : > { %v725_v49 = vpop.f32.mrb[48].mxu0 }
 0x15e   : > { %v726_v50 = vadd.f32 %v2495_v54, %v725_v49  ;;  %v727_v51 = vpop.f32.mrb[49].mxu0  ;;  %2193 = vmatmul.mubr.bf16.gmra.mrb[4].mxu1 %v816_v47 }
 0x15f   : > { %v728_v52 = vpop.f32.mrb[50].mxu0  ;;  %1201 = vmatpush1.bf16.msra.mxu1 %v2307_v46 }
 0x160   : > { %v729_v55 = vadd.f32 %v2495_v54, %v728_v52  ;;  %v730_v56 = vpop.f32.mrb[51].mxu0  ;;  %1202 = vmatprep.subr.bf16.mxu1 %v2312_v48  ;;  %v780_v58 = vmax.f32 %v726_v50, 0.0 }
 0x162   : > { %v781_v59 = vmax.f32 %v729_v55, 0.0 }
 0x163   : > { %1203 = vmatpush1.bf16.msra.mxu1 %v2310_v53 }
 0x164   : > { %v817_v61 = vpack.c.bf16 %v781_v59, %v780_v58  ;;  %1204 = vmatprep.subr.bf16.mxu1 %v2315_v57 }
 0x165   : > { %v733_v62 = vpop.f32.mrb[52].mxu0 }
 0x166   : > { %v734_v0 = vadd.f32 %v2495_v54, %v733_v62  ;;  %v735_v2 = vpop.f32.mrb[53].mxu0  ;;  %2196 = vmatprep.mubr.bf16.mxu1 %v817_v61 }
 0x167   : > { %v736_v3 = vpop.f32.mrb[54].mxu0  ;;  %1205 = vmatpush1.bf16.msra.mxu1 %v2313_v60 }
 0x168   : > { %v737_v5 = vadd.f32 %v2495_v54, %v736_v3  ;;  %v738_v6 = vpop.f32.mrb[55].mxu0  ;;  %1206 = vmatprep.subr.bf16.mxu1 %v2318_v63  ;;  %v782_v7 = vmax.f32 %v734_v0, 0.0 }
 0x16a   : > { %v783_v8 = vmax.f32 %v737_v5, 0.0 }
 0x16b   : > { %1207 = vmatpush1.bf16.msra.mxu1 %v2316_v4 }
 0x16c   : > { %v818_v9 = vpack.c.bf16 %v783_v8, %v782_v7 }
 0x16d   : > { %v741_v10 = vpop.f32.mrb[56].mxu0 }
 0x16e   : > { %v742_v11 = vadd.f32 %v2495_v54, %v741_v10  ;;  %v743_v12 = vpop.f32.mrb[57].mxu0  ;;  %2197 = vmatmul.mubr.bf16.gmra.mrb[8].mxu1 %v818_v9 }
 0x16f   : > { %v744_v13 = vpop.f32.mrb[58].mxu0 }
 0x170   : > { %v745_v14 = vadd.f32 %v2495_v54, %v744_v13  ;;  %v746_v15 = vpop.f32.mrb[59].mxu0  ;;  %v784_v16 = vmax.f32 %v742_v11, 0.0 }
 0x172   : > { %v785_v17 = vmax.f32 %v745_v14, 0.0 }
 0x174   : > { %v819_v18 = vpack.c.bf16 %v785_v17, %v784_v16 }
 0x175   : > { %v749_v19 = vpop.f32.mrb[60].mxu0 }
 0x176   : > { %v750_v20 = vadd.f32 %v2495_v54, %v749_v19  ;;  %v751_v21 = vpop.f32.mrb[61].mxu0  ;;  %2200 = vmatprep.mubr.bf16.mxu1 %v819_v18 }
 0x177   : > { %v752_v22 = vpop.f32.mrb[62].mxu0 }
 0x178   : > { %v753_v23 = vadd.f32 %v2495_v54, %v752_v22  ;;  %v754_v24 = vpop.f32.mrb[63].mxu0  ;;  %v786_v25 = vmax.f32 %v750_v20, 0.0 }
 0x17a   : > { %v787_v26 = vmax.f32 %v753_v23, 0.0 }
 0x17c   : > { %v820_v27 = vpack.c.bf16 %v787_v26, %v786_v25 }
 0x17e   : > { %2201 = vmatmul.mubr.bf16.gmra.mrb[12].mxu1 %v820_v27 }
 0x17f   : > { %1224 = vmatprep.mubr.bf16.mxu1 %v2327_v1 }
 0x1e1   : > { %v2174_v29 = vpop.f32.mrb[64].mxu0 }
 0x1e2   : > { %v918_v30 = vadd.f32 %v2174_v29, %v2581_v28  ;;  %v909_v31 = vpop.f32.mrb[65].mxu0 }
 0x1e3   : > { %v910_v32 = vadd.f32 %v2581_v28, %v909_v31  ;;  %v2175_v33 = vpop.f32.mrb[66].mxu0 }
 0x1e4   : > { %v921_v54 = vadd.f32 %v2175_v33, %v2581_v28  ;;  %v912_v34 = vpop.f32.mrb[67].mxu0  ;;  %v1038_v36 = vmax.f32 %v918_v30, 0.0 }
 0x1e5   : > { %v913_v35 = vadd.f32 %v2581_v28, %v912_v34  ;;  %v1036_v38 = vmax.f32 %v910_v32, 0.0 }
 0x1e6   : > { %v1039_v37 = vmax.f32 %v921_v54, 0.0 }
 0x1e7   : > { %v1037_v39 = vmax.f32 %v913_v35, 0.0 }
 0x1e8   : > { %v1086_v40 = vpack.c.bf16 %v1039_v37, %v1038_v36 }
 0x1e9   : > { %v1085_v41 = vpack.c.bf16 %v1037_v39, %v1036_v38 }
 0x1eb   : > { %1225 = vmatmul.mubr.bf16.vlgmr.msra.gmra.mrb[16].mxu1 %v1085_v41 }
 0x1ec   : > { %1234 = vmatprep.mubr.bf16.mxu1 %v2327_v1 }
 0x1f1   : > { %v2178_v42 = vpop.f32.mrb[68].mxu0 }
 0x1f2   : > { %v934_v43 = vadd.f32 %v2178_v42, %v2581_v28  ;;  %v925_v44 = vpop.f32.mrb[69].mxu0 }
 0x1f3   : > { %v926_v45 = vadd.f32 %v2581_v28, %v925_v44  ;;  %v2179_v46 = vpop.f32.mrb[70].mxu0  ;;  %1235 = vmatmul.mubr.bf16.gmra.mrb[20].mxu1 %v1086_v40 }
 0x1f4   : > { %v937_v47 = vadd.f32 %v2179_v46, %v2581_v28  ;;  %v928_v48 = vpop.f32.mrb[71].mxu0  ;;  %1244 = vmatprep.mubr.bf16.mxu1 %v2327_v1  ;;  %v1042_v50 = vmax.f32 %v934_v43, 0.0 }
 0x1f5   : > { %v929_v49 = vadd.f32 %v2581_v28, %v928_v48  ;;  %v1040_v52 = vmax.f32 %v926_v45, 0.0 }
 0x1f6   : > { %v1043_v51 = vmax.f32 %v937_v47, 0.0 }
 0x1f7   : > { %v1041_v53 = vmax.f32 %v929_v49, 0.0 }
 0x1f8   : > { %v1088_v55 = vpack.c.bf16 %v1043_v51, %v1042_v50 }
 0x1f9   : > { %v1087_v56 = vpack.c.bf16 %v1041_v53, %v1040_v52 }
 0x1fb   : > { %1245 = vmatmul.mubr.bf16.gmra.mrb[24].mxu1 %v1087_v56 }
 0x1fc   : > { %1254 = vmatprep.mubr.bf16.mxu1 %v2327_v1 }
 0x201   : > { %v2182_v57 = vpop.f32.mrb[72].mxu0 }
 0x202   : > { %v950_v58 = vadd.f32 %v2182_v57, %v2581_v28  ;;  %v941_v59 = vpop.f32.mrb[73].mxu0 }
 0x203   : > { %v942_v60 = vadd.f32 %v2581_v28, %v941_v59  ;;  %v2183_v61 = vpop.f32.mrb[74].mxu0  ;;  %1255 = vmatmul.mubr.bf16.gmra.mrb[28].mxu1 %v1088_v55 }
 0x204   : > { %v953_v62 = vadd.f32 %v2183_v61, %v2581_v28  ;;  %v944_v63 = vpop.f32.mrb[75].mxu0  ;;  %1264 = vmatprep.mubr.bf16.mxu1 %v2327_v1  ;;  %v1046_v2 = vmax.f32 %v950_v58, 0.0 }
 0x205   : > { %v945_v0 = vadd.f32 %v2581_v28, %v944_v63  ;;  %v1044_v4 = vmax.f32 %v942_v60, 0.0 }
 0x206   : > { %v1047_v3 = vmax.f32 %v953_v62, 0.0 }
 0x207   : > { %v1045_v5 = vmax.f32 %v945_v0, 0.0 }
 0x208   : > { %v1090_v6 = vpack.c.bf16 %v1047_v3, %v1046_v2 }
 0x209   : > { %v1089_v7 = vpack.c.bf16 %v1045_v5, %v1044_v4 }
 0x20b   : > { %1265 = vmatmul.mubr.bf16.gmra.mrb[32].mxu1 %v1089_v7 }
 0x20c   : > { %1274 = vmatprep.mubr.bf16.mxu1 %v2327_v1 }
 0x211   : > { %v2186_v8 = vpop.f32.mrb[76].mxu0 }
 0x212   : > { %v966_v9 = vadd.f32 %v2186_v8, %v2581_v28  ;;  %v957_v10 = vpop.f32.mrb[77].mxu0 }
 0x213   : > { %v958_v11 = vadd.f32 %v2581_v28, %v957_v10  ;;  %v2187_v12 = vpop.f32.mrb[78].mxu0  ;;  %1275 = vmatmul.mubr.bf16.gmra.mrb[36].mxu1 %v1090_v6 }
 0x214   : > { %v969_v13 = vadd.f32 %v2187_v12, %v2581_v28  ;;  %v960_v14 = vpop.f32.mrb[79].mxu0  ;;  %1284 = vmatprep.mubr.bf16.mxu1 %v2327_v1  ;;  %v1050_v16 = vmax.f32 %v966_v9, 0.0 }
 0x215   : > { %v961_v15 = vadd.f32 %v2581_v28, %v960_v14  ;;  %v1048_v18 = vmax.f32 %v958_v11, 0.0 }
 0x216   : > { %v1051_v17 = vmax.f32 %v969_v13, 0.0 }
 0x217   : > { %v1049_v19 = vmax.f32 %v961_v15, 0.0 }
 0x218   : > { %v1092_v20 = vpack.c.bf16 %v1051_v17, %v1050_v16  ;;  %v1102_v16 = vlaneseq }
 0x219   : > { %v1091_v21 = vpack.c.bf16 %v1049_v19, %v1048_v18  ;;  %v1084_v19 = vld [vmem:[%s2799_s6] sm:$0x3] }
 0x21a   : > { %v1103_v17 = vshrl.u32 %v1102_v16, 7 }
 0x21b   : > { %1285 = vmatmul.mubr.bf16.gmra.mrb[40].mxu1 %v1091_v21 }
 0x21c   : > { %1294 = vmatprep.mubr.bf16.mxu1 %v2327_v1  ;;  %v1104_v18 = vsub.s32 0, %v1103_v17 }
 0x21e   : > { %v2633_v21 = vrot.slane %v1084_v19, %v1104_v18 }
 0x221   : > { %v2190_v22 = vpop.f32.mrb[0].mxu1 }
 0x222   : > { %v982_v23 = vadd.f32 %v2190_v22, %v2581_v28  ;;  %v973_v24 = vpop.f32.mrb[1].mxu1 }
 0x223   : > { %v974_v25 = vadd.f32 %v2581_v28, %v973_v24  ;;  %v2191_v26 = vpop.f32.mrb[2].mxu1  ;;  %1295 = vmatmul.mubr.bf16.gmra.mrb[44].mxu1 %v1092_v20  ;;  %v1108_v20 = vsub.s32 1, %v1103_v17 }
 0x224   : > { %v985_v27 = vadd.f32 %v2191_v26, %v2581_v28  ;;  %v976_v29 = vpop.f32.mrb[3].mxu1  ;;  %1304 = vmatprep.mubr.bf16.mxu1 %v2327_v1  ;;  %v1054_v31 = vmax.f32 %v982_v23, 0.0 }
 0x225   : > { %v977_v30 = vadd.f32 %v2581_v28, %v976_v29  ;;  %v1052_v33 = vmax.f32 %v974_v25, 0.0 }
 0x226   : > { %v1055_v32 = vmax.f32 %v985_v27, 0.0 }
 0x227   : > { %v1053_v54 = vmax.f32 %v977_v30, 0.0 }
 0x228   : > { %v1094_v34 = vpack.c.bf16 %v1055_v32, %v1054_v31 }
 0x229   : > { %v1093_v35 = vpack.c.bf16 %v1053_v54, %v1052_v33 }
 0x22b   : > { %1305 = vmatmul.mubr.bf16.gmra.mrb[48].mxu1 %v1093_v35 }
 0x22c   : > { %1314 = vmatprep.mubr.bf16.mxu1 %v2327_v1 }
 0x231   : > { %v2194_v36 = vpop.f32.mrb[4].mxu1 }
 0x232   : > { %v998_v37 = vadd.f32 %v2194_v36, %v2581_v28  ;;  %v989_v38 = vpop.f32.mrb[5].mxu1 }
 0x233   : > { %v990_v39 = vadd.f32 %v2581_v28, %v989_v38  ;;  %v2195_v40 = vpop.f32.mrb[6].mxu1  ;;  %1315 = vmatmul.mubr.bf16.gmra.mrb[52].mxu1 %v1094_v34 }
 0x234   : > { %v1001_v41 = vadd.f32 %v2195_v40, %v2581_v28  ;;  %v992_v42 = vpop.f32.mrb[7].mxu1  ;;  %1324 = vmatprep.mubr.bf16.mxu1 %v2327_v1  ;;  %v1058_v44 = vmax.f32 %v998_v37, 0.0 }
 0x235   : > { %v993_v43 = vadd.f32 %v2581_v28, %v992_v42  ;;  %v1056_v46 = vmax.f32 %v990_v39, 0.0 }
 0x236   : > { %v1059_v45 = vmax.f32 %v1001_v41, 0.0 }
 0x237   : > { %v1057_v47 = vmax.f32 %v993_v43, 0.0 }
 0x238   : > { %v1096_v48 = vpack.c.bf16 %v1059_v45, %v1058_v44 }
 0x239   : > { %v1095_v49 = vpack.c.bf16 %v1057_v47, %v1056_v46 }
 0x23b   : > { %1325 = vmatmul.mubr.bf16.gmra.mrb[56].mxu1 %v1095_v49 }
 0x23c   : > { %1334 = vmatprep.mubr.bf16.mxu1 %v2327_v1 }
 0x241   : > { %v2198_v50 = vpop.f32.mrb[8].mxu1 }
 0x242   : > { %v1014_v51 = vadd.f32 %v2198_v50, %v2581_v28  ;;  %v1005_v52 = vpop.f32.mrb[9].mxu1 }
 0x243   : > { %v1006_v53 = vadd.f32 %v2581_v28, %v1005_v52  ;;  %v2199_v55 = vpop.f32.mrb[10].mxu1  ;;  %1335 = vmatmul.mubr.bf16.gmra.mrb[60].mxu1 %v1096_v48 }
 0x244   : > { %v1017_v56 = vadd.f32 %v2199_v55, %v2581_v28  ;;  %v1008_v57 = vpop.f32.mrb[11].mxu1  ;;  %1344 = vmatprep.mubr.bf16.mxu1 %v2327_v1  ;;  %v1062_v59 = vmax.f32 %v1014_v51, 0.0 }
 0x245   : > { %v1009_v58 = vadd.f32 %v2581_v28, %v1008_v57  ;;  %v1060_v61 = vmax.f32 %v1006_v53, 0.0 }
 0x246   : > { %v1063_v60 = vmax.f32 %v1017_v56, 0.0 }
 0x247   : > { %v1061_v62 = vmax.f32 %v1009_v58, 0.0 }
 0x248   : > { %v1098_v63 = vpack.c.bf16 %v1063_v60, %v1062_v59 }
 0x249   : > { %v1097_v0 = vpack.c.bf16 %v1061_v62, %v1060_v61 }
 0x24b   : > { %1345 = vmatmul.mubr.bf16.gmra.mrb[64].mxu1 %v1097_v0 }
 0x24c   : > { %1354 = vmatprep.mubr.bf16.mxu1 %v2327_v1 }
 0x251   : > { %v2202_v2 = vpop.f32.mrb[12].mxu1 }
 0x252   : > { %v1030_v3 = vadd.f32 %v2202_v2, %v2581_v28  ;;  %v1021_v4 = vpop.f32.mrb[13].mxu1 }
 0x253   : > { %v1022_v5 = vadd.f32 %v2581_v28, %v1021_v4  ;;  %v2203_v6 = vpop.f32.mrb[14].mxu1  ;;  %1355 = vmatmul.mubr.bf16.gmra.mrb[68].mxu1 %v1098_v63 }
 0x254   : > { %v1033_v7 = vadd.f32 %v2203_v6, %v2581_v28  ;;  %v1024_v8 = vpop.f32.mrb[15].mxu1  ;;  %1364 = vmatprep.mubr.bf16.mxu1 %v2327_v1  ;;  %v1066_v10 = vmax.f32 %v1030_v3, 0.0 }
 0x255   : > { %v1025_v9 = vadd.f32 %v2581_v28, %v1024_v8  ;;  %v1064_v12 = vmax.f32 %v1022_v5, 0.0  ;;  %v2635_v28 = vrot.slane %v1084_v19, %v1108_v20 }
 0x256   : > { %v1067_v11 = vmax.f32 %v1033_v7, 0.0 }
 0x257   : > { %v1065_v13 = vmax.f32 %v1025_v9, 0.0 }
 0x258   : > { %v1100_v14 = vpack.c.bf16 %v1067_v11, %v1066_v10 }
 0x259   : > { %v1099_v15 = vpack.c.bf16 %v1065_v13, %v1064_v12 }
 0x25b   : > { %1365 = vmatmul.mubr.bf16.gmra.mrb[72].mxu1 %v1099_v15 }
 0x25c   : > { %1374 = vmatprep.mubr.bf16.mxu1 %v2327_v1 }
 0x263   : > { %1375 = vmatmul.mubr.bf16.gmra.mrb[76].mxu1 %v1100_v14 }
 0x2be   : > { %v1226_v22 = vpop.f32.mrb[16].mxu1 }
 0x2bf   : > { %v1227_v23 = vadd.f32 %v1226_v22, %v2633_v21  ;;  %v1228_v24 = vpop.f32.mrb[17].mxu1 }
 0x2c0   : > { %v1229_v25 = vadd.f32 %v1228_v24, %v2635_v28  ;;  %v1230_v1 = vpop.f32.mrb[18].mxu1 }
 0x2c1   : > { %v1385_v26 = vmax.f32 %v1227_v23, 0.0  ;;  %v1231_v27 = vadd.f32 %v1230_v1, %v2633_v21  ;;  %v1232_v29 = vpop.f32.mrb[19].mxu1 }
 0x2c2   : > { %v1386_v30 = vmax.f32 %v1229_v25, 0.0  ;;  %v1233_v31 = vadd.f32 %v1232_v29, %v2635_v28 }
 0x2c3   : > { %v1449_v32 = vrot.slane %v1385_v26, 4  ;;  %v1387_v33 = vmax.f32 %v1231_v27, 0.0 }
 0x2c4   : > { %v1455_v54 = vrot.slane %v1386_v30, 4  ;;  %v1388_v34 = vmax.f32 %v1233_v31, 0.0 }
 0x2c5   : > { %v1450_v35 = vmax.f32 %v1385_v26, %v1449_v32  ;;  %v1461_v36 = vrot.slane %v1387_v33, 4 }
 0x2c6   : > { %v1456_v37 = vmax.f32 %v1386_v30, %v1455_v54  ;;  %v1467_v38 = vrot.slane %v1388_v34, 4  ;;  %v1236_v39 = vpop.f32.mrb[20].mxu1 }
 0x2c7   : > { %v1451_v40 = vrot.slane %v1450_v35, 2  ;;  %v1462_v41 = vmax.f32 %v1387_v33, %v1461_v36  ;;  %v1237_v42 = vadd.f32 %v1236_v39, %v2633_v21  ;;  %v1238_v43 = vpop.f32.mrb[21].mxu1 }
 0x2c8   : > { %v1457_v44 = vrot.slane %v1456_v37, 2  ;;  %v1468_v45 = vmax.f32 %v1388_v34, %v1467_v38  ;;  %v1239_v46 = vadd.f32 %v1238_v43, %v2635_v28  ;;  %v1240_v47 = vpop.f32.mrb[22].mxu1 }
 0x2c9   : > { %v1452_v48 = vmax.f32 %v1450_v35, %v1451_v40  ;;  %v1463_v49 = vrot.slane %v1462_v41, 2  ;;  %v1389_v50 = vmax.f32 %v1237_v42, 0.0  ;;  %v1241_v51 = vadd.f32 %v1240_v47, %v2633_v21  ;;  %v1242_v52 = vpop.f32.mrb[23].mxu1 }
 0x2ca   : > { %v1458_v53 = vmax.f32 %v1456_v37, %v1457_v44  ;;  %v1469_v55 = vrot.slane %v1468_v45, 2  ;;  %v1390_v56 = vmax.f32 %v1239_v46, 0.0  ;;  %v1243_v57 = vadd.f32 %v1242_v52, %v2635_v28 }
 0x2cb   : > { %v1453_v58 = vrot.slane %v1452_v48, 1  ;;  %v1464_v59 = vmax.f32 %v1462_v41, %v1463_v49  ;;  %v1473_v60 = vrot.slane %v1389_v50, 4  ;;  %v1391_v61 = vmax.f32 %v1241_v51, 0.0 }
 0x2cc   : > { %v1459_v62 = vrot.slane %v1458_v53, 1  ;;  %v1470_v63 = vmax.f32 %v1468_v45, %v1469_v55  ;;  %v1479_v0 = vrot.slane %v1390_v56, 4  ;;  %v1392_v2 = vmax.f32 %v1243_v57, 0.0 }
 0x2cd   : > { %v1454_v3 = vmax.f32 %v1452_v48, %v1453_v58  ;;  %v1465_v4 = vrot.slane %v1464_v59, 1  ;;  %v1474_v5 = vmax.f32 %v1389_v50, %v1473_v60  ;;  %v1485_v6 = vrot.slane %v1391_v61, 4 }
 0x2ce   : > { %v1460_v7 = vmax.f32 %v1458_v53, %v1459_v62  ;;  %v1471_v8 = vrot.slane %v1470_v63, 1  ;;  %v1480_v9 = vmax.f32 %v1390_v56, %v1479_v0  ;;  %v1491_v10 = vrot.slane %v1392_v2, 4  ;;  %v1246_v11 = vpop.f32.mrb[24].mxu1 }
 0x2cf   : > { %v1466_v12 = vmax.f32 %v1464_v59, %v1465_v4  ;;  %v1475_v13 = vrot.slane %v1474_v5, 2  ;;  %v1486_v14 = vmax.f32 %v1391_v61, %v1485_v6  ;;  %v1247_v15 = vadd.f32 %v1246_v11, %v2633_v21  ;;  %v1248_v16 = vpop.f32.mrb[25].mxu1 }
 0x2d0   : > { %v1472_v17 = vmax.f32 %v1470_v63, %v1471_v8  ;;  %v1481_v18 = vrot.slane %v1480_v9, 2  ;;  %v1492_v19 = vmax.f32 %v1392_v2, %v1491_v10  ;;  %v1249_v20 = vadd.f32 %v1248_v16, %v2635_v28  ;;  %v1250_v22 = vpop.f32.mrb[26].mxu1 }
 0x2d1   : > { %v1898_v23 = vsel %vm1897_vm3, %v1466_v12, %v1454_v3  ;;  %v1476_v24 = vmax.f32 %v1474_v5, %v1475_v13  ;;  %v1487_v25 = vrot.slane %v1486_v14, 2  ;;  %v1393_v1 = vmax.f32 %v1247_v15, 0.0  ;;  %v1252_v26 = vpop.f32.mrb[27].mxu1 }
 0x2d2   : > { %v1911_v27 = vsel %vm1897_vm3, %v1472_v17, %v1460_v7  ;;  %v1482_v29 = vmax.f32 %v1480_v9, %v1481_v18  ;;  %v1493_v30 = vrot.slane %v1492_v19, 2  ;;  %v1394_v31 = vmax.f32 %v1249_v20, 0.0 }
 0x2d3   : > { %v1477_v32 = vrot.slane %v1476_v24, 1  ;;  %v1488_v33 = vmax.f32 %v1486_v14, %v1487_v25  ;;  %v1497_v54 = vrot.slane %v1393_v1, 4  ;;  %v1251_v34 = vadd.f32 %v1250_v22, %v2633_v21 }
 0x2d4   : > { %v1483_v35 = vrot.slane %v1482_v29, 1  ;;  %v1494_v36 = vmax.f32 %v1492_v19, %v1493_v30  ;;  %v1503_v37 = vrot.slane %v1394_v31, 4  ;;  %v1253_v38 = vadd.f32 %v1252_v26, %v2635_v28 }
 0x2d5   : > { %v1478_v39 = vmax.f32 %v1476_v24, %v1477_v32  ;;  %v1489_v40 = vrot.slane %v1488_v33, 1  ;;  %v1498_v41 = vmax.f32 %v1393_v1, %v1497_v54  ;;  %v1395_v42 = vmax.f32 %v1251_v34, 0.0 }
 0x2d6   : > { %v1484_v43 = vmax.f32 %v1482_v29, %v1483_v35  ;;  %v1495_v44 = vrot.slane %v1494_v36, 1  ;;  %v1504_v45 = vmax.f32 %v1394_v31, %v1503_v37  ;;  %v1396_v46 = vmax.f32 %v1253_v38, 0.0  ;;  %v1256_v47 = vpop.f32.mrb[28].mxu1 }
 0x2d7   : > { %v1900_v48 = vsel %vm1899_vm4, %v1478_v39, %v1898_v23  ;;  %v1490_v49 = vmax.f32 %v1488_v33, %v1489_v40  ;;  %v1499_v50 = vrot.slane %v1498_v41, 2  ;;  %v1509_v51 = vrot.slane %v1395_v42, 4  ;;  %v1258_v52 = vpop.f32.mrb[29].mxu1 }
 0x2d8   : > { %v1912_v53 = vsel %vm1899_vm4, %v1484_v43, %v1911_v27  ;;  %v1496_v55 = vmax.f32 %v1494_v36, %v1495_v44  ;;  %v1505_v56 = vrot.slane %v1504_v45, 2  ;;  %v1515_v57 = vrot.slane %v1396_v46, 4  ;;  %v1260_v58 = vpop.f32.mrb[30].mxu1 }
 0x2d9   : > { %v1902_v59 = vsel %vm1901_vm5, %v1490_v49, %v1900_v48  ;;  %v1500_v60 = vmax.f32 %v1498_v41, %v1499_v50  ;;  %v1510_v61 = vmax.f32 %v1395_v42, %v1509_v51  ;;  %v1257_v62 = vadd.f32 %v1256_v47, %v2633_v21  ;;  %v1262_v63 = vpop.f32.mrb[31].mxu1 }
 0x2da   : > { %v1913_v0 = vsel %vm1901_vm5, %v1496_v55, %v1912_v53  ;;  %v1506_v2 = vmax.f32 %v1504_v45, %v1505_v56  ;;  %v1516_v3 = vmax.f32 %v1396_v46, %v1515_v57  ;;  %v1259_v4 = vadd.f32 %v1258_v52, %v2635_v28 }
 0x2db   : > { %v1501_v5 = vrot.slane %v1500_v60, 1  ;;  %v1511_v6 = vrot.slane %v1510_v61, 2  ;;  %v1397_v7 = vmax.f32 %v1257_v62, 0.0  ;;  %v1261_v8 = vadd.f32 %v1260_v58, %v2633_v21 }
 0x2dc   : > { %v1507_v9 = vrot.slane %v1506_v2, 1  ;;  %v1517_v10 = vrot.slane %v1516_v3, 2  ;;  %v1398_v11 = vmax.f32 %v1259_v4, 0.0  ;;  %v1263_v12 = vadd.f32 %v1262_v63, %v2635_v28 }
 0x2dd   : > { %v1502_v13 = vmax.f32 %v1500_v60, %v1501_v5  ;;  %v1512_v14 = vmax.f32 %v1510_v61, %v1511_v6  ;;  %v1521_v15 = vrot.slane %v1397_v7, 4  ;;  %v1399_v16 = vmax.f32 %v1261_v8, 0.0 }
 0x2de   : > { %v1508_v17 = vmax.f32 %v1506_v2, %v1507_v9  ;;  %v1518_v18 = vmax.f32 %v1516_v3, %v1517_v10  ;;  %v1527_v19 = vrot.slane %v1398_v11, 4  ;;  %v1400_v20 = vmax.f32 %v1263_v12, 0.0  ;;  %v1266_v22 = vpop.f32.mrb[32].mxu1 }
 0x2df   : > { %v1904_v23 = vsel %vm1903_vm6, %v1502_v13, %v1902_v59  ;;  %v1513_v24 = vrot.slane %v1512_v14, 1  ;;  %v1522_v25 = vmax.f32 %v1397_v7, %v1521_v15  ;;  %v1533_v1 = vrot.slane %v1399_v16, 4  ;;  %v1268_v26 = vpop.f32.mrb[33].mxu1 }
 0x2e0   : > { %v1914_v27 = vsel %vm1903_vm6, %v1508_v17, %v1913_v0  ;;  %v1519_v29 = vrot.slane %v1518_v18, 1  ;;  %v1528_v30 = vmax.f32 %v1398_v11, %v1527_v19  ;;  %v1539_v31 = vrot.slane %v1400_v20, 4  ;;  %v1270_v32 = vpop.f32.mrb[34].mxu1 }
 0x2e1   : > { %v1514_v33 = vmax.f32 %v1512_v14, %v1513_v24  ;;  %v1523_v54 = vrot.slane %v1522_v25, 2  ;;  %v1534_v34 = vmax.f32 %v1399_v16, %v1533_v1  ;;  %v1267_v35 = vadd.f32 %v1266_v22, %v2633_v21  ;;  %v1272_v36 = vpop.f32.mrb[35].mxu1 }
 0x2e2   : > { %v1520_v37 = vmax.f32 %v1518_v18, %v1519_v29  ;;  %v1529_v38 = vrot.slane %v1528_v30, 2  ;;  %v1540_v39 = vmax.f32 %v1400_v20, %v1539_v31  ;;  %v1269_v40 = vadd.f32 %v1268_v26, %v2635_v28 }
 0x2e3   : > { %v1906_v41 = vsel %vm1905_vm7, %v1514_v33, %v1904_v23  ;;  %v1524_v42 = vmax.f32 %v1522_v25, %v1523_v54  ;;  %v1535_v43 = vrot.slane %v1534_v34, 2  ;;  %v1401_v44 = vmax.f32 %v1267_v35, 0.0 }
 0x2e4   : > { %v1915_v45 = vsel %vm1905_vm7, %v1520_v37, %v1914_v27  ;;  %v1530_v46 = vmax.f32 %v1528_v30, %v1529_v38  ;;  %v1541_v47 = vrot.slane %v1540_v39, 2  ;;  %v1402_v48 = vmax.f32 %v1269_v40, 0.0 }
 0x2e5   : > { %v1525_v49 = vrot.slane %v1524_v42, 1  ;;  %v1536_v50 = vmax.f32 %v1534_v34, %v1535_v43  ;;  %v1545_v51 = vrot.slane %v1401_v44, 4  ;;  %v1271_v52 = vadd.f32 %v1270_v32, %v2633_v21 }
 0x2e6   : > { %v1531_v53 = vrot.slane %v1530_v46, 1  ;;  %v1542_v55 = vmax.f32 %v1540_v39, %v1541_v47  ;;  %v1551_v56 = vrot.slane %v1402_v48, 4  ;;  %v1273_v57 = vadd.f32 %v1272_v36, %v2635_v28  ;;  %v1276_v58 = vpop.f32.mrb[36].mxu1 }
 0x2e7   : > { %v1526_v59 = vmax.f32 %v1524_v42, %v1525_v49  ;;  %v1537_v60 = vrot.slane %v1536_v50, 1  ;;  %v1546_v61 = vmax.f32 %v1401_v44, %v1545_v51  ;;  %v1403_v62 = vmax.f32 %v1271_v52, 0.0  ;;  %v1278_v63 = vpop.f32.mrb[37].mxu1 }
 0x2e8   : > { %v1532_v0 = vmax.f32 %v1530_v46, %v1531_v53  ;;  %v1543_v2 = vrot.slane %v1542_v55, 1  ;;  %v1552_v3 = vmax.f32 %v1402_v48, %v1551_v56  ;;  %v1404_v4 = vmax.f32 %v1273_v57, 0.0  ;;  %v1280_v5 = vpop.f32.mrb[38].mxu1 }
 0x2e9   : > { %v1908_v6 = vsel %vm1907_vm8, %v1526_v59, %v1906_v41  ;;  %v1538_v7 = vmax.f32 %v1536_v50, %v1537_v60  ;;  %v1547_v8 = vrot.slane %v1546_v61, 2  ;;  %v1557_v9 = vrot.slane %v1403_v62, 4  ;;  %v1282_v10 = vpop.f32.mrb[39].mxu1 }
 0x2ea   : > { %v1916_v11 = vsel %vm1907_vm8, %v1532_v0, %v1915_v45  ;;  %v1544_v12 = vmax.f32 %v1542_v55, %v1543_v2  ;;  %v1553_v13 = vrot.slane %v1552_v3, 2  ;;  %v1563_v14 = vrot.slane %v1404_v4, 4 }
 0x2eb   : > { %v1910_v15 = vsel %vm1909_vm9, %v1538_v7, %v1908_v6  ;;  %v1548_v16 = vmax.f32 %v1546_v61, %v1547_v8  ;;  %v1558_v17 = vmax.f32 %v1403_v62, %v1557_v9  ;;  %v1277_v18 = vadd.f32 %v1276_v58, %v2633_v21 }
 0x2ec   : > { %1968 = vst [vmem:[%s2682_s21] sm:$0xff] %v1910_v15  ;;  %v1917_v19 = vsel %vm1909_vm9, %v1544_v12, %v1916_v11  ;;  %v1554_v20 = vmax.f32 %v1552_v3, %v1553_v13  ;;  %v1564_v22 = vmax.f32 %v1404_v4, %v1563_v14  ;;  %v1279_v23 = vadd.f32 %v1278_v63, %v2635_v28 }
 0x2ed   : > { %1969 = vst [vmem:[%s2682_s21 + $0x8] sm:$0xff] %v1917_v19  ;;  %v1549_v24 = vrot.slane %v1548_v16, 1  ;;  %v1559_v25 = vrot.slane %v1558_v17, 2  ;;  %v1405_v1 = vmax.f32 %v1277_v18, 0.0  ;;  %v1281_v26 = vadd.f32 %v1280_v5, %v2633_v21 }
 0x2ee   : > { %v1555_v27 = vrot.slane %v1554_v20, 1  ;;  %v1565_v29 = vrot.slane %v1564_v22, 2  ;;  %v1406_v30 = vmax.f32 %v1279_v23, 0.0  ;;  %v1283_v31 = vadd.f32 %v1282_v10, %v2635_v28  ;;  %v1286_v32 = vpop.f32.mrb[40].mxu1 }
 0x2ef   : > { %v1550_v33 = vmax.f32 %v1548_v16, %v1549_v24  ;;  %v1560_v54 = vmax.f32 %v1558_v17, %v1559_v25  ;;  %v1569_v34 = vrot.slane %v1405_v1, 4  ;;  %v1407_v35 = vmax.f32 %v1281_v26, 0.0  ;;  %v1288_v36 = vpop.f32.mrb[41].mxu1 }
 0x2f0   : > { %v1556_v37 = vmax.f32 %v1554_v20, %v1555_v27  ;;  %v1566_v38 = vmax.f32 %v1564_v22, %v1565_v29  ;;  %v1575_v39 = vrot.slane %v1406_v30, 4  ;;  %v1408_v40 = vmax.f32 %v1283_v31, 0.0  ;;  %v1290_v41 = vpop.f32.mrb[42].mxu1 }
 0x2f1   : > { %v1561_v42 = vrot.slane %v1560_v54, 1  ;;  %v1570_v43 = vmax.f32 %v1405_v1, %v1569_v34  ;;  %v1581_v44 = vrot.slane %v1407_v35, 4  ;;  %v1287_v45 = vadd.f32 %v1286_v32, %v2633_v21  ;;  %v1292_v46 = vpop.f32.mrb[43].mxu1 }
 0x2f2   : > { %v1567_v47 = vrot.slane %v1566_v38, 1  ;;  %v1576_v48 = vmax.f32 %v1406_v30, %v1575_v39  ;;  %v1587_v49 = vrot.slane %v1408_v40, 4  ;;  %v1289_v50 = vadd.f32 %v1288_v36, %v2635_v28 }
 0x2f3   : > { %v1562_v51 = vmax.f32 %v1560_v54, %v1561_v42  ;;  %v1571_v52 = vrot.slane %v1570_v43, 2  ;;  %v1582_v53 = vmax.f32 %v1407_v35, %v1581_v44  ;;  %v1409_v55 = vmax.f32 %v1287_v45, 0.0 }
 0x2f4   : > { %v1568_v56 = vmax.f32 %v1566_v38, %v1567_v47  ;;  %v1577_v57 = vrot.slane %v1576_v48, 2  ;;  %v1588_v58 = vmax.f32 %v1408_v40, %v1587_v49  ;;  %v1410_v59 = vmax.f32 %v1289_v50, 0.0 }
 0x2f5   : > { %v1918_v60 = vsel %vm1897_vm3, %v1562_v51, %v1550_v33  ;;  %v1572_v61 = vmax.f32 %v1570_v43, %v1571_v52  ;;  %v1583_v62 = vrot.slane %v1582_v53, 2  ;;  %v1593_v63 = vrot.slane %v1409_v55, 4 }
 0x2f6   : > { %v1925_v0 = vsel %vm1897_vm3, %v1568_v56, %v1556_v37  ;;  %v1578_v2 = vmax.f32 %v1576_v48, %v1577_v57  ;;  %v1589_v3 = vrot.slane %v1588_v58, 2  ;;  %v1599_v4 = vrot.slane %v1410_v59, 4  ;;  %v1296_v5 = vpop.f32.mrb[44].mxu1 }
 0x2f7   : > { %v1573_v6 = vrot.slane %v1572_v61, 1  ;;  %v1584_v7 = vmax.f32 %v1582_v53, %v1583_v62  ;;  %v1594_v8 = vmax.f32 %v1409_v55, %v1593_v63  ;;  %v1291_v9 = vadd.f32 %v1290_v41, %v2633_v21  ;;  %v1298_v10 = vpop.f32.mrb[45].mxu1 }
 0x2f8   : > { %v1579_v11 = vrot.slane %v1578_v2, 1  ;;  %v1590_v12 = vmax.f32 %v1588_v58, %v1589_v3  ;;  %v1600_v13 = vmax.f32 %v1410_v59, %v1599_v4  ;;  %v1293_v14 = vadd.f32 %v1292_v46, %v2635_v28  ;;  %v1300_v15 = vpop.f32.mrb[46].mxu1 }
 0x2f9   : > { %v1574_v16 = vmax.f32 %v1572_v61, %v1573_v6  ;;  %v1585_v17 = vrot.slane %v1584_v7, 1  ;;  %v1595_v18 = vrot.slane %v1594_v8, 2  ;;  %v1411_v19 = vmax.f32 %v1291_v9, 0.0  ;;  %v1302_v20 = vpop.f32.mrb[47].mxu1 }
 0x2fa   : > { %v1580_v22 = vmax.f32 %v1578_v2, %v1579_v11  ;;  %v1591_v23 = vrot.slane %v1590_v12, 1  ;;  %v1601_v24 = vrot.slane %v1600_v13, 2  ;;  %v1412_v25 = vmax.f32 %v1293_v14, 0.0 }
 0x2fb   : > { %v1919_v1 = vsel %vm1899_vm4, %v1574_v16, %v1918_v60  ;;  %v1586_v26 = vmax.f32 %v1584_v7, %v1585_v17  ;;  %v1596_v27 = vmax.f32 %v1594_v8, %v1595_v18  ;;  %v1605_v29 = vrot.slane %v1411_v19, 4 }
 0x2fc   : > { %v1926_v30 = vsel %vm1899_vm4, %v1580_v22, %v1925_v0  ;;  %v1592_v31 = vmax.f32 %v1590_v12, %v1591_v23  ;;  %v1602_v32 = vmax.f32 %v1600_v13, %v1601_v24  ;;  %v1611_v33 = vrot.slane %v1412_v25, 4 }
 0x2fd   : > { %v1920_v54 = vsel %vm1901_vm5, %v1586_v26, %v1919_v1  ;;  %v1597_v34 = vrot.slane %v1596_v27, 1  ;;  %v1606_v35 = vmax.f32 %v1411_v19, %v1605_v29  ;;  %v1297_v36 = vadd.f32 %v1296_v5, %v2633_v21 }
 0x2fe   : > { %v1927_v37 = vsel %vm1901_vm5, %v1592_v31, %v1926_v30  ;;  %v1603_v38 = vrot.slane %v1602_v32, 1  ;;  %v1612_v39 = vmax.f32 %v1412_v25, %v1611_v33  ;;  %v1299_v40 = vadd.f32 %v1298_v10, %v2635_v28  ;;  %v1306_v41 = vpop.f32.mrb[48].mxu1 }
 0x2ff   : > { %v1598_v42 = vmax.f32 %v1596_v27, %v1597_v34  ;;  %v1607_v43 = vrot.slane %v1606_v35, 2  ;;  %v1413_v44 = vmax.f32 %v1297_v36, 0.0  ;;  %v1301_v45 = vadd.f32 %v1300_v15, %v2633_v21  ;;  %v1308_v46 = vpop.f32.mrb[49].mxu1 }
 0x300   : > { %v1604_v47 = vmax.f32 %v1602_v32, %v1603_v38  ;;  %v1613_v48 = vrot.slane %v1612_v39, 2  ;;  %v1414_v49 = vmax.f32 %v1299_v40, 0.0  ;;  %v1303_v50 = vadd.f32 %v1302_v20, %v2635_v28  ;;  %v1310_v51 = vpop.f32.mrb[50].mxu1 }
 0x301   : > { %v1921_v52 = vsel %vm1903_vm6, %v1598_v42, %v1920_v54  ;;  %v1608_v53 = vmax.f32 %v1606_v35, %v1607_v43  ;;  %v1617_v55 = vrot.slane %v1413_v44, 4  ;;  %v1415_v56 = vmax.f32 %v1301_v45, 0.0  ;;  %v1312_v57 = vpop.f32.mrb[51].mxu1 }
 0x302   : > { %v1928_v58 = vsel %vm1903_vm6, %v1604_v47, %v1927_v37  ;;  %v1614_v59 = vmax.f32 %v1612_v39, %v1613_v48  ;;  %v1623_v60 = vrot.slane %v1414_v49, 4  ;;  %v1416_v61 = vmax.f32 %v1303_v50, 0.0 }
 0x303   : > { %v1609_v62 = vrot.slane %v1608_v53, 1  ;;  %v1618_v63 = vmax.f32 %v1413_v44, %v1617_v55  ;;  %v1629_v0 = vrot.slane %v1415_v56, 4  ;;  %v1307_v2 = vadd.f32 %v1306_v41, %v2633_v21 }
 0x304   : > { %v1615_v3 = vrot.slane %v1614_v59, 1  ;;  %v1624_v4 = vmax.f32 %v1414_v49, %v1623_v60  ;;  %v1635_v5 = vrot.slane %v1416_v61, 4  ;;  %v1309_v6 = vadd.f32 %v1308_v46, %v2635_v28 }
 0x305   : > { %v1610_v7 = vmax.f32 %v1608_v53, %v1609_v62  ;;  %v1619_v8 = vrot.slane %v1618_v63, 2  ;;  %v1630_v9 = vmax.f32 %v1415_v56, %v1629_v0  ;;  %v1417_v10 = vmax.f32 %v1307_v2, 0.0 }
 0x306   : > { %v1616_v11 = vmax.f32 %v1614_v59, %v1615_v3  ;;  %v1625_v12 = vrot.slane %v1624_v4, 2  ;;  %v1636_v13 = vmax.f32 %v1416_v61, %v1635_v5  ;;  %v1418_v14 = vmax.f32 %v1309_v6, 0.0  ;;  %v1316_v15 = vpop.f32.mrb[52].mxu1 }
 0x307   : > { %v1922_v16 = vsel %vm1905_vm7, %v1610_v7, %v1921_v52  ;;  %v1620_v17 = vmax.f32 %v1618_v63, %v1619_v8  ;;  %v1631_v18 = vrot.slane %v1630_v9, 2  ;;  %v1641_v19 = vrot.slane %v1417_v10, 4  ;;  %v1318_v20 = vpop.f32.mrb[53].mxu1 }
 0x308   : > { %v1929_v22 = vsel %vm1905_vm7, %v1616_v11, %v1928_v58  ;;  %v1626_v23 = vmax.f32 %v1624_v4, %v1625_v12  ;;  %v1637_v24 = vrot.slane %v1636_v13, 2  ;;  %v1647_v25 = vrot.slane %v1418_v14, 4  ;;  %v1320_v1 = vpop.f32.mrb[54].mxu1 }
 0x309   : > { %v1621_v26 = vrot.slane %v1620_v17, 1  ;;  %v1632_v27 = vmax.f32 %v1630_v9, %v1631_v18  ;;  %v1642_v29 = vmax.f32 %v1417_v10, %v1641_v19  ;;  %v1311_v30 = vadd.f32 %v1310_v51, %v2633_v21  ;;  %v1322_v31 = vpop.f32.mrb[55].mxu1 }
 0x30a   : > { %v1627_v32 = vrot.slane %v1626_v23, 1  ;;  %v1638_v33 = vmax.f32 %v1636_v13, %v1637_v24  ;;  %v1648_v54 = vmax.f32 %v1418_v14, %v1647_v25  ;;  %v1313_v34 = vadd.f32 %v1312_v57, %v2635_v28 }
 0x30b   : > { %v1622_v35 = vmax.f32 %v1620_v17, %v1621_v26  ;;  %v1633_v36 = vrot.slane %v1632_v27, 1  ;;  %v1643_v37 = vrot.slane %v1642_v29, 2  ;;  %v1419_v38 = vmax.f32 %v1311_v30, 0.0 }
 0x30c   : > { %v1628_v39 = vmax.f32 %v1626_v23, %v1627_v32  ;;  %v1639_v40 = vrot.slane %v1638_v33, 1  ;;  %v1649_v41 = vrot.slane %v1648_v54, 2  ;;  %v1420_v42 = vmax.f32 %v1313_v34, 0.0 }
 0x30d   : > { %v1923_v43 = vsel %vm1907_vm8, %v1622_v35, %v1922_v16  ;;  %v1634_v44 = vmax.f32 %v1632_v27, %v1633_v36  ;;  %v1644_v45 = vmax.f32 %v1642_v29, %v1643_v37  ;;  %v1653_v46 = vrot.slane %v1419_v38, 4 }
 0x30e   : > { %v1930_v47 = vsel %vm1907_vm8, %v1628_v39, %v1929_v22  ;;  %v1640_v48 = vmax.f32 %v1638_v33, %v1639_v40  ;;  %v1650_v49 = vmax.f32 %v1648_v54, %v1649_v41  ;;  %v1659_v50 = vrot.slane %v1420_v42, 4  ;;  %v1326_v51 = vpop.f32.mrb[56].mxu1 }
 0x30f   : > { %v1924_v52 = vsel %vm1909_vm9, %v1634_v44, %v1923_v43  ;;  %v1645_v53 = vrot.slane %v1644_v45, 1  ;;  %v1654_v55 = vmax.f32 %v1419_v38, %v1653_v46  ;;  %v1317_v56 = vadd.f32 %v1316_v15, %v2633_v21  ;;  %v1328_v57 = vpop.f32.mrb[57].mxu1 }
 0x310   : > { %1970 = vst [vmem:[%s2682_s21 + $0x10] sm:$0xff] %v1924_v52  ;;  %v1931_v58 = vsel %vm1909_vm9, %v1640_v48, %v1930_v47  ;;  %v1651_v59 = vrot.slane %v1650_v49, 1  ;;  %v1660_v60 = vmax.f32 %v1420_v42, %v1659_v50  ;;  %v1319_v61 = vadd.f32 %v1318_v20, %v2635_v28  ;;  %v1330_v62 = vpop.f32.mrb[58].mxu1 }
 0x311   : > { %1971 = vst [vmem:[%s2682_s21 + $0x18] sm:$0xff] %v1931_v58  ;;  %v1646_v63 = vmax.f32 %v1644_v45, %v1645_v53  ;;  %v1655_v0 = vrot.slane %v1654_v55, 2  ;;  %v1421_v2 = vmax.f32 %v1317_v56, 0.0  ;;  %v1321_v3 = vadd.f32 %v1320_v1, %v2633_v21  ;;  %v1332_v4 = vpop.f32.mrb[59].mxu1 }
 0x312   : > { %v1652_v5 = vmax.f32 %v1650_v49, %v1651_v59  ;;  %v1661_v6 = vrot.slane %v1660_v60, 2  ;;  %v1422_v7 = vmax.f32 %v1319_v61, 0.0  ;;  %v1323_v8 = vadd.f32 %v1322_v31, %v2635_v28 }
 0x313   : > { %v1656_v9 = vmax.f32 %v1654_v55, %v1655_v0  ;;  %v1665_v10 = vrot.slane %v1421_v2, 4  ;;  %v1423_v11 = vmax.f32 %v1321_v3, 0.0  ;;  %v1327_v12 = vadd.f32 %v1326_v51, %v2633_v21 }
 0x314   : > { %v1662_v13 = vmax.f32 %v1660_v60, %v1661_v6  ;;  %v1671_v14 = vrot.slane %v1422_v7, 4  ;;  %v1424_v15 = vmax.f32 %v1323_v8, 0.0  ;;  %v1329_v16 = vadd.f32 %v1328_v57, %v2635_v28 }
 0x315   : > { %v1657_v17 = vrot.slane %v1656_v9, 1  ;;  %v1666_v18 = vmax.f32 %v1421_v2, %v1665_v10  ;;  %v1677_v19 = vrot.slane %v1423_v11, 4  ;;  %v1425_v20 = vmax.f32 %v1327_v12, 0.0 }
 0x316   : > { %v1663_v22 = vrot.slane %v1662_v13, 1  ;;  %v1672_v23 = vmax.f32 %v1422_v7, %v1671_v14  ;;  %v1683_v24 = vrot.slane %v1424_v15, 4  ;;  %v1426_v25 = vmax.f32 %v1329_v16, 0.0  ;;  %v1336_v1 = vpop.f32.mrb[60].mxu1 }
 0x317   : > { %v1658_v26 = vmax.f32 %v1656_v9, %v1657_v17  ;;  %v1667_v27 = vrot.slane %v1666_v18, 2  ;;  %v1678_v29 = vmax.f32 %v1423_v11, %v1677_v19  ;;  %v1689_v30 = vrot.slane %v1425_v20, 4  ;;  %v1338_v31 = vpop.f32.mrb[61].mxu1 }
 0x318   : > { %v1664_v32 = vmax.f32 %v1662_v13, %v1663_v22  ;;  %v1673_v33 = vrot.slane %v1672_v23, 2  ;;  %v1684_v54 = vmax.f32 %v1424_v15, %v1683_v24  ;;  %v1695_v34 = vrot.slane %v1426_v25, 4  ;;  %v1340_v35 = vpop.f32.mrb[62].mxu1 }
 0x319   : > { %v1932_v36 = vsel %vm1897_vm3, %v1658_v26, %v1646_v63  ;;  %v1668_v37 = vmax.f32 %v1666_v18, %v1667_v27  ;;  %v1679_v38 = vrot.slane %v1678_v29, 2  ;;  %v1690_v39 = vmax.f32 %v1425_v20, %v1689_v30  ;;  %v1342_v40 = vpop.f32.mrb[63].mxu1 }
 0x31a   : > { %v1939_v41 = vsel %vm1897_vm3, %v1664_v32, %v1652_v5  ;;  %v1674_v42 = vmax.f32 %v1672_v23, %v1673_v33  ;;  %v1685_v43 = vrot.slane %v1684_v54, 2  ;;  %v1696_v44 = vmax.f32 %v1426_v25, %v1695_v34 }
 0x31b   : > { %v1669_v45 = vrot.slane %v1668_v37, 1  ;;  %v1680_v46 = vmax.f32 %v1678_v29, %v1679_v38  ;;  %v1691_v47 = vrot.slane %v1690_v39, 2  ;;  %v1331_v48 = vadd.f32 %v1330_v62, %v2633_v21 }
 0x31c   : > { %v1675_v49 = vrot.slane %v1674_v42, 1  ;;  %v1686_v50 = vmax.f32 %v1684_v54, %v1685_v43  ;;  %v1697_v51 = vrot.slane %v1696_v44, 2  ;;  %v1333_v52 = vadd.f32 %v1332_v4, %v2635_v28 }
 0x31d   : > { %v1670_v53 = vmax.f32 %v1668_v37, %v1669_v45  ;;  %v1681_v55 = vrot.slane %v1680_v46, 1  ;;  %v1692_v56 = vmax.f32 %v1690_v39, %v1691_v47  ;;  %v1427_v57 = vmax.f32 %v1331_v48, 0.0 }
 0x31e   : > { %v1676_v58 = vmax.f32 %v1674_v42, %v1675_v49  ;;  %v1687_v59 = vrot.slane %v1686_v50, 1  ;;  %v1698_v60 = vmax.f32 %v1696_v44, %v1697_v51  ;;  %v1428_v61 = vmax.f32 %v1333_v52, 0.0  ;;  %v1346_v63 = vpop.f32.mrb[64].mxu1 }
 0x31f   : > { %v1933_v0 = vsel %vm1899_vm4, %v1670_v53, %v1932_v36  ;;  %v1682_v2 = vmax.f32 %v1680_v46, %v1681_v55  ;;  %v1693_v3 = vrot.slane %v1692_v56, 1  ;;  %v1701_v5 = vrot.slane %v1427_v57, 4  ;;  %v1348_v62 = vpop.f32.mrb[65].mxu1 }
 0x320   : > { %v1940_v6 = vsel %vm1899_vm4, %v1676_v58, %v1939_v41  ;;  %v1688_v7 = vmax.f32 %v1686_v50, %v1687_v59  ;;  %v1699_v8 = vrot.slane %v1698_v60, 1  ;;  %v1707_v4 = vrot.slane %v1428_v61, 4  ;;  %v1350_v9 = vpop.f32.mrb[66].mxu1 }
 0x321   : > { %v1934_v10 = vsel %vm1901_vm5, %v1682_v2, %v1933_v0  ;;  %v1694_v11 = vmax.f32 %v1692_v56, %v1693_v3  ;;  %v1702_v12 = vmax.f32 %v1427_v57, %v1701_v5  ;;  %v1337_v13 = vadd.f32 %v1336_v1, %v2633_v21  ;;  %v1352_v14 = vpop.f32.mrb[67].mxu1 }
 0x322   : > { %v1941_v15 = vsel %vm1901_vm5, %v1688_v7, %v1940_v6  ;;  %v1700_v16 = vmax.f32 %v1698_v60, %v1699_v8  ;;  %v1708_v17 = vmax.f32 %v1428_v61, %v1707_v4  ;;  %v1339_v18 = vadd.f32 %v1338_v31, %v2635_v28 }
 0x323   : > { %v1935_v19 = vsel %vm1903_vm6, %v1694_v11, %v1934_v10  ;;  %v1703_v20 = vrot.slane %v1702_v12, 2  ;;  %v1429_v22 = vmax.f32 %v1337_v13, 0.0  ;;  %v1341_v23 = vadd.f32 %v1340_v35, %v2633_v21 }
 0x324   : > { %v1942_v24 = vsel %vm1903_vm6, %v1700_v16, %v1941_v15  ;;  %v1709_v25 = vrot.slane %v1708_v17, 2  ;;  %v1430_v26 = vmax.f32 %v1339_v18, 0.0  ;;  %v1343_v27 = vadd.f32 %v1342_v40, %v2635_v28 }
 0x325   : > { %v1704_v1 = vmax.f32 %v1702_v12, %v1703_v20  ;;  %v1713_v29 = vrot.slane %v1429_v22, 4  ;;  %v1431_v30 = vmax.f32 %v1341_v23, 0.0  ;;  %v1347_v32 = vadd.f32 %v1346_v63, %v2633_v21 }
 0x326   : > { %v1710_v33 = vmax.f32 %v1708_v17, %v1709_v25  ;;  %v1719_v54 = vrot.slane %v1430_v26, 4  ;;  %v1432_v31 = vmax.f32 %v1343_v27, 0.0  ;;  %v1349_v34 = vadd.f32 %v1348_v62, %v2635_v28  ;;  %v1356_v36 = vpop.f32.mrb[68].mxu1 }
 0x327   : > { %v1705_v37 = vrot.slane %v1704_v1, 1  ;;  %v1714_v38 = vmax.f32 %v1429_v22, %v1713_v29  ;;  %v1725_v35 = vrot.slane %v1431_v30, 4  ;;  %v1433_v39 = vmax.f32 %v1347_v32, 0.0  ;;  %v1358_v41 = vpop.f32.mrb[69].mxu1 }
 0x328   : > { %v1711_v42 = vrot.slane %v1710_v33, 1  ;;  %v1720_v43 = vmax.f32 %v1430_v26, %v1719_v54  ;;  %v1731_v44 = vrot.slane %v1432_v31, 4  ;;  %v1434_v40 = vmax.f32 %v1349_v34, 0.0  ;;  %v1360_v45 = vpop.f32.mrb[70].mxu1 }
 0x329   : > { %v1706_v46 = vmax.f32 %v1704_v1, %v1705_v37  ;;  %v1715_v47 = vrot.slane %v1714_v38, 2  ;;  %v1726_v48 = vmax.f32 %v1431_v30, %v1725_v35  ;;  %v1737_v49 = vrot.slane %v1433_v39, 4  ;;  %v1362_v50 = vpop.f32.mrb[71].mxu1 }
 0x32a   : > { %v1712_v51 = vmax.f32 %v1710_v33, %v1711_v42  ;;  %v1721_v52 = vrot.slane %v1720_v43, 2  ;;  %v1732_v53 = vmax.f32 %v1432_v31, %v1731_v44  ;;  %v1743_v55 = vrot.slane %v1434_v40, 4 }
 0x32b   : > { %v1936_v56 = vsel %vm1905_vm7, %v1706_v46, %v1935_v19  ;;  %v1716_v57 = vmax.f32 %v1714_v38, %v1715_v47  ;;  %v1727_v58 = vrot.slane %v1726_v48, 2  ;;  %v1738_v59 = vmax.f32 %v1433_v39, %v1737_v49 }
 0x32c   : > { %v1943_v60 = vsel %vm1905_vm7, %v1712_v51, %v1942_v24  ;;  %v1722_v61 = vmax.f32 %v1720_v43, %v1721_v52  ;;  %v1733_v63 = vrot.slane %v1732_v53, 2  ;;  %v1744_v0 = vmax.f32 %v1434_v40, %v1743_v55 }
 0x32d   : > { %v1717_v2 = vrot.slane %v1716_v57, 1  ;;  %v1728_v3 = vmax.f32 %v1726_v48, %v1727_v58  ;;  %v1739_v5 = vrot.slane %v1738_v59, 2  ;;  %v1351_v62 = vadd.f32 %v1350_v9, %v2633_v21 }
 0x32e   : > { %v1723_v6 = vrot.slane %v1722_v61, 1  ;;  %v1734_v7 = vmax.f32 %v1732_v53, %v1733_v63  ;;  %v1745_v8 = vrot.slane %v1744_v0, 2  ;;  %v1353_v4 = vadd.f32 %v1352_v14, %v2635_v28  ;;  %v1366_v10 = vpop.f32.mrb[72].mxu1 }
 0x32f   : > { %v1718_v11 = vmax.f32 %v1716_v57, %v1717_v2  ;;  %v1729_v12 = vrot.slane %v1728_v3, 1  ;;  %v1740_v13 = vmax.f32 %v1738_v59, %v1739_v5  ;;  %v1435_v15 = vmax.f32 %v1351_v62, 0.0  ;;  %v1368_v16 = vpop.f32.mrb[73].mxu1 }
 0x330   : > { %v1724_v17 = vmax.f32 %v1722_v61, %v1723_v6  ;;  %v1735_v18 = vrot.slane %v1734_v7, 1  ;;  %v1746_v19 = vmax.f32 %v1744_v0, %v1745_v8  ;;  %v1436_v20 = vmax.f32 %v1353_v4, 0.0  ;;  %v2747_v22 = vpop.f32.mrb[74].mxu1 }
 0x331   : > { %v1937_v9 = vsel %vm1907_vm8, %v1718_v11, %v1936_v56  ;;  %v1730_v23 = vmax.f32 %v1728_v3, %v1729_v12  ;;  %v1741_v24 = vrot.slane %v1740_v13, 1  ;;  %v1749_v25 = vrot.slane %v1435_v15, 4  ;;  %v2750_v14 = vpop.f32.mrb[75].mxu1 }
 0x332   : > { %v1944_v26 = vsel %vm1907_vm8, %v1724_v17, %v1943_v60  ;;  %v1736_v27 = vmax.f32 %v1734_v7, %v1735_v18  ;;  %v1747_v1 = vrot.slane %v1746_v19, 1  ;;  %v1755_v29 = vrot.slane %v1436_v20, 4 }
 0x333   : > { %v1938_v30 = vsel %vm1909_vm9, %v1730_v23, %v1937_v9  ;;  %v1742_v32 = vmax.f32 %v1740_v13, %v1741_v24  ;;  %v1750_v33 = vmax.f32 %v1435_v15, %v1749_v25  ;;  %v1357_v54 = vadd.f32 %v1356_v36, %v2633_v21 }
 0x334   : > { %1972 = vst [vmem:[%s2682_s21 + $0x20] sm:$0xff] %v1938_v30  ;;  %v1945_v31 = vsel %vm1909_vm9, %v1736_v27, %v1944_v26  ;;  %v1748_v34 = vmax.f32 %v1746_v19, %v1747_v1  ;;  %v1756_v37 = vmax.f32 %v1436_v20, %v1755_v29  ;;  %v1359_v38 = vadd.f32 %v1358_v41, %v2635_v28 }
 0x335   : > { %1973 = vst [vmem:[%s2682_s21 + $0x28] sm:$0xff] %v1945_v31  ;;  %v1751_v35 = vrot.slane %v1750_v33, 2  ;;  %v1437_v39 = vmax.f32 %v1357_v54, 0.0  ;;  %v1361_v42 = vadd.f32 %v1360_v45, %v2633_v21  ;;  %v1363_v43 = vadd.f32 %v1362_v50, %v2635_v28 }
 0x336   : > { %v1757_v44 = vrot.slane %v1756_v37, 2  ;;  %v1438_v40 = vmax.f32 %v1359_v38, 0.0  ;;  %v1367_v46 = vadd.f32 %v1366_v10, %v2633_v21  ;;  %v1369_v36 = vadd.f32 %v1368_v16, %v2635_v28  ;;  %v2763_v47 = vpop.f32.mrb[76].mxu1 }
 0x337   : > { %v1752_v48 = vmax.f32 %v1750_v33, %v1751_v35  ;;  %v1761_v49 = vrot.slane %v1437_v39, 4  ;;  %v1439_v51 = vmax.f32 %v1361_v42, 0.0  ;;  %v1440_v52 = vmax.f32 %v1363_v43, 0.0  ;;  %v1378_v41 = vpop.f32.mrb[77].mxu1 }
 0x338   : > { %v1758_v53 = vmax.f32 %v1756_v37, %v1757_v44  ;;  %v1767_v55 = vrot.slane %v1438_v40, 4  ;;  %v1441_v56 = vmax.f32 %v1367_v46, 0.0  ;;  %v1442_v57 = vmax.f32 %v1369_v36, 0.0  ;;  %v1380_v45 = vpop.f32.mrb[78].mxu1 }
 0x339   : > { %v1753_v58 = vrot.slane %v1752_v48, 1  ;;  %v1762_v50 = vmax.f32 %v1437_v39, %v1761_v49  ;;  %v1773_v59 = vrot.slane %v1439_v51, 4  ;;  %v1779_v60 = vrot.slane %v1440_v52, 4  ;;  %v1382_v61 = vpop.f32.mrb[79].mxu1 }
 0x33a   : > { %v1759_v63 = vrot.slane %v1758_v53, 1  ;;  %v1768_v0 = vmax.f32 %v1438_v40, %v1767_v55  ;;  %v1785_v2 = vrot.slane %v1441_v56, 4  ;;  %v1791_v3 = vrot.slane %v1442_v57, 4 }
 0x33b   : > { %v1754_v5 = vmax.f32 %v1752_v48, %v1753_v58  ;;  %v1763_v62 = vrot.slane %v1762_v50, 2  ;;  %v1774_v6 = vmax.f32 %v1439_v51, %v1773_v59  ;;  %v1780_v7 = vmax.f32 %v1440_v52, %v1779_v60 }
 0x33c   : > { %v1760_v8 = vmax.f32 %v1758_v53, %v1759_v63  ;;  %v1769_v4 = vrot.slane %v1768_v0, 2  ;;  %v1786_v10 = vmax.f32 %v1441_v56, %v1785_v2  ;;  %v1792_v11 = vmax.f32 %v1442_v57, %v1791_v3 }
 0x33d   : > { %v1946_v12 = vsel %vm1897_vm3, %v1754_v5, %v1742_v32  ;;  %v1764_v13 = vmax.f32 %v1762_v50, %v1763_v62  ;;  %v1775_v15 = vrot.slane %v1774_v6, 2  ;;  %v1781_v16 = vrot.slane %v1780_v7, 2 }
 0x33e   : > { %v1953_v17 = vsel %vm1897_vm3, %v1760_v8, %v1748_v34  ;;  %v1770_v18 = vmax.f32 %v1768_v0, %v1769_v4  ;;  %v1787_v19 = vrot.slane %v1786_v10, 2  ;;  %v1793_v20 = vrot.slane %v1792_v11, 2 }
 0x33f   : > { %v1765_v9 = vrot.slane %v1764_v13, 1  ;;  %v1776_v23 = vmax.f32 %v1774_v6, %v1775_v15  ;;  %v1782_v24 = vmax.f32 %v1780_v7, %v1781_v16  ;;  %v1371_v25 = vadd.f32 %v2747_v22, %v2633_v21 }
 0x340   : > { %v1771_v26 = vrot.slane %v1770_v18, 1  ;;  %v1788_v27 = vmax.f32 %v1786_v10, %v1787_v19  ;;  %v1794_v1 = vmax.f32 %v1792_v11, %v1793_v20  ;;  %v1373_v29 = vadd.f32 %v2750_v14, %v2635_v28 }
 0x341   : > { %v1766_v30 = vmax.f32 %v1764_v13, %v1765_v9  ;;  %v1777_v32 = vrot.slane %v1776_v23, 1  ;;  %v1783_v33 = vrot.slane %v1782_v24, 1  ;;  %v1443_v54 = vmax.f32 %v1371_v25, 0.0 }
 0x342   : > { %v1772_v31 = vmax.f32 %v1770_v18, %v1771_v26  ;;  %v1789_v34 = vrot.slane %v1788_v27, 1  ;;  %v1795_v37 = vrot.slane %v1794_v1, 1  ;;  %v1444_v38 = vmax.f32 %v1373_v29, 0.0 }
 0x343   : > { %v1947_v35 = vsel %vm1899_vm4, %v1766_v30, %v1946_v12  ;;  %v1778_v39 = vmax.f32 %v1776_v23, %v1777_v32  ;;  %v1784_v42 = vmax.f32 %v1782_v24, %v1783_v33  ;;  %v1797_v43 = vrot.slane %v1443_v54, 4 }
 0x344   : > { %v1954_v22 = vsel %vm1899_vm4, %v1772_v31, %v1953_v17  ;;  %v1790_v44 = vmax.f32 %v1788_v27, %v1789_v34  ;;  %v1796_v40 = vmax.f32 %v1794_v1, %v1795_v37  ;;  %v1803_v46 = vrot.slane %v1444_v38, 4 }
 0x345   : > { %v1948_v14 = vsel %vm1901_vm5, %v1778_v39, %v1947_v35  ;;  %v1955_v36 = vsel %vm1901_vm5, %v1784_v42, %v1954_v22  ;;  %v1798_v48 = vmax.f32 %v1443_v54, %v1797_v43  ;;  %v1377_v49 = vadd.f32 %v2763_v47, %v2633_v21 }
 0x346   : > { %v1949_v51 = vsel %vm1903_vm6, %v1790_v44, %v1948_v14  ;;  %v1956_v52 = vsel %vm1903_vm6, %v1796_v40, %v1955_v36  ;;  %v1804_v53 = vmax.f32 %v1444_v38, %v1803_v46  ;;  %v1379_v55 = vadd.f32 %v1378_v41, %v2635_v28 }
 0x347   : > { %v1799_v56 = vrot.slane %v1798_v48, 2  ;;  %v1445_v57 = vmax.f32 %v1377_v49, 0.0  ;;  %v1381_v58 = vadd.f32 %v1380_v45, %v2633_v21  ;;  %v1383_v50 = vadd.f32 %v1382_v61, %v2635_v28 }
 0x348   : > { %v1805_v59 = vrot.slane %v1804_v53, 2  ;;  %v1446_v60 = vmax.f32 %v1379_v55, 0.0 }
 0x349   : > { %v1800_v63 = vmax.f32 %v1798_v48, %v1799_v56  ;;  %v1809_v0 = vrot.slane %v1445_v57, 4  ;;  %v1447_v2 = vmax.f32 %v1381_v58, 0.0  ;;  %v1448_v3 = vmax.f32 %v1383_v50, 0.0 }
 0x34a   : > { %v1806_v47 = vmax.f32 %v1804_v53, %v1805_v59  ;;  %v1815_v5 = vrot.slane %v1446_v60, 4 }
 0x34b   : > { %v1801_v62 = vrot.slane %v1800_v63, 1  ;;  %v1810_v6 = vmax.f32 %v1445_v57, %v1809_v0  ;;  %v1821_v7 = vrot.slane %v1447_v2, 4  ;;  %v1827_v8 = vrot.slane %v1448_v3, 4 }
 0x34c   : > { %v1807_v4 = vrot.slane %v1806_v47, 1  ;;  %v1816_v41 = vmax.f32 %v1446_v60, %v1815_v5 }
 0x34d   : > { %v1802_v10 = vmax.f32 %v1800_v63, %v1801_v62  ;;  %v1811_v11 = vrot.slane %v1810_v6, 2  ;;  %v1822_v12 = vmax.f32 %v1447_v2, %v1821_v7  ;;  %v1828_v21 = vmax.f32 %v1448_v3, %v1827_v8 }
 0x34e   : > { %v1808_v45 = vmax.f32 %v1806_v47, %v1807_v4  ;;  %v1817_v28 = vrot.slane %v1816_v41, 2 }
 0x34f   : > { %v1950_v61 = vsel %vm1905_vm7, %v1802_v10, %v1949_v51  ;;  %v1812_v13 = vmax.f32 %v1810_v6, %v1811_v11  ;;  %v1823_v15 = vrot.slane %v1822_v12, 2  ;;  %v1829_v16 = vrot.slane %v1828_v21, 2 }
 0x350   : > { %v1957_v17 = vsel %vm1905_vm7, %v1808_v45, %v1956_v52  ;;  %v1818_v18 = vmax.f32 %v1816_v41, %v1817_v28 }
 0x351   : > { %v1813_v19 = vrot.slane %v1812_v13, 1  ;;  %v1824_v20 = vmax.f32 %v1822_v12, %v1823_v15  ;;  %v1830_v9 = vmax.f32 %v1828_v21, %v1829_v16 }
 0x352   : > { %v1819_v23 = vrot.slane %v1818_v18, 1 }
 0x353   : > { %v1814_v24 = vmax.f32 %v1812_v13, %v1813_v19  ;;  %v1825_v25 = vrot.slane %v1824_v20, 1  ;;  %v1831_v26 = vrot.slane %v1830_v9, 1 }
 0x354   : > { %v1820_v27 = vmax.f32 %v1818_v18, %v1819_v23 }
 0x355   : > { %v1951_v1 = vsel %vm1907_vm8, %v1814_v24, %v1950_v61  ;;  %v1826_v29 = vmax.f32 %v1824_v20, %v1825_v25  ;;  %v1832_v30 = vmax.f32 %v1830_v9, %v1831_v26 }
 0x356   : > { %v1958_v32 = vsel %vm1907_vm8, %v1820_v27, %v1957_v17 }
 0x357   : > { %v1952_v33 = vsel %vm1909_vm9, %v1826_v29, %v1951_v1  ;;  %v1959_v54 = vsel %vm1909_vm9, %v1832_v30, %v1958_v32 }
 0x358   : > { %1974 = vst [vmem:[%s2682_s21 + $0x30] sm:$0xff] %v1952_v33  ;;  %1975 = vst [vmem:[%s2682_s21 + $0x38] sm:$0xff] %v1959_v54 }
 0x359 PF: > { %s17_s24 = sadd.s32 1, %s2325_s24  }
 0x35a   : > { %p14_p5 = scmp.ge.s32.totalorder %s17_s24, 4  }
 0x35c   :  { %16 = sbr.rel (!%p14_p5) target bundleno = 1 (0x1), region = 78 }

// kernel: backbone_forward.15
= control target key start
LH: loop header
LB: loop body
LE: loop exit
PB: predicated region body
PF: predicated region fallthrough
CT: control target
= control target key end

     0   :  { %s1984_s24 = smov 0   ;;  %s2344_s0 = inlined_call_operand.vmem [shape: bf16[256,259], index: 0, kind: input, shape index: {}]   ;;  %s2345_s1 = inlined_call_operand.vmem [shape: bf16[259,128], index: 1, kind: input, shape index: {}]   ;;  %s2346_s2 = inlined_call_operand.vmem [shape: f32[1,128], index: 2, kind: input, shape index: {}]   ;;  %s2347_s3 = inlined_call_operand.vmem [shape: bf16[128,128], index: 3, kind: input, shape index: {}]   ;;  %s2348_s4 = inlined_call_operand.vmem [shape: f32[1,128], index: 4, kind: input, shape index: {}]   ;;  %s2349_s5 = inlined_call_operand.vmem [shape: bf16[128,256], index: 5, kind: input, shape index: {}]   ;;  %s2350_s6 = inlined_call_operand.vmem [shape: f32[1,256], index: 6, kind: input, shape index: {}]   ;;  %s2351_s7 = inlined_call_operand.vmem [shape: f32[32,256], index: 7, kind: output, shape index: {}]  }
   0x1 LB: > { %s1599_s25 = sadd.s32 4294967295, %s1940_s24   ;;  %p1603_p0 = scmp.ge.s32.totalorder %s1940_s24, 1  ;;  %s1940_s24 = sphi %s1984_s24, %s17_s24  }
   0x2   : > { %p239_p1 = scmp.lt.s32.totalorder %s1940_s24, 3 }
   0x4   : > { %p240_p2 = pnand %p1603_p0, %p239_p1 }
   0x5   : > { %v1853_v0 = vld [vmem:[%s2345_s1 + $0x40] sm:$0xff] (!%p240_p2)   ;;  %s1604_s28 = sshll.u32 (!%p240_p2), %s1599_s25, 4  ;;  %v1855_v2 = vld [vmem:[%s2345_s1 + $0x48] sm:$0xff] (!%p240_p2)   ;;  %v1857_v4 = vld [vmem:[%s2345_s1 + $0x50] sm:$0xff] (!%p240_p2)   ;;  %vm604_vm0 = vcmask (!%p240_p2), 1040384   ;;  %vm605_vm1 = vcmask (!%p240_p2), 1041408  }
   0x6   : > { %243 = sbr.rel (%p240_p2) target bundleno = 787 (0x313), region = 48  ;;  %v1854_v1 = vld [vmem:[%s2345_s1] sm:$0xff] (!%p240_p2)   ;;  %1687 = vmatprep.subr.bf16.mxu0 (!%p240_p2), %v1853_v0  ;;  %p274_p3 = scmp.lt.s32.totalorder (!%p240_p2), %s1604_s28, 31  ;;  %v1856_v3 = vld [vmem:[%s2345_s1 + $0x8] sm:$0xff] (!%p240_p2)   ;;  %v1858_v5 = vld [vmem:[%s2345_s1 + $0x10] sm:$0xff] (!%p240_p2)   ;;  %v1942_v9 = vmov (!%p240_p2), 65535  }
   0x7   : > { %1688 = vmatpush3.bf16.msra.mxu0 (!%p240_p2), %v1854_v1  ;;  %v1859_v6 = vld [vmem:[%s2345_s1 + $0x58] sm:$0xff] (!%p240_p2)   ;;  %v1861_v8 = vld [vmem:[%s2345_s1 + $0x60] sm:$0xff] (!%p240_p2)   ;;  %v606_v10 = vsel (!%p240_p2), %vm604_vm0, 4294967295, %v1942_v9  ;;  %v1863_v12 = vld [vmem:[%s2345_s1 + $0x68] sm:$0xff] (!%p240_p2)   ;;  %vm579_vm2 = vcmask (!%p240_p2), 23552   ;;  %vm1498_vm3 = vcmask (!%p240_p2), 1041409  }
   0x8   : > { %1689 = vmatprep.subr.bf16.mxu0 (!%p240_p2), %v1855_v2  ;;  %v1860_v7 = vld [vmem:[%s2345_s1 + $0x18] sm:$0xff] (!%p240_p2)   ;;  %v1862_v11 = vld [vmem:[%s2345_s1 + $0x20] sm:$0xff] (!%p240_p2)   ;;  %v607_v13 = vsel (!%p240_p2), %vm605_vm1, %v606_v10, 0  ;;  %v1864_v14 = vld [vmem:[%s2345_s1 + $0x28] sm:$0xff] (!%p240_p2)   ;;  %vm1500_vm4 = vcmask (!%p240_p2), 1042434   ;;  %vm1502_vm5 = vcmask (!%p240_p2), 1043459  }
   0x9   : > { %v1872_v16 = vld [vmem:[%s2345_s1 + $0x80] ss:$0 sps:$4 sm:$0x33] (!%p240_p2)   ;;  %v1865_v18 = vld [vmem:[%s2345_s1 + $0x70] sm:$0xff] (!%p240_p2)   ;;  %v1867_v23 = vld [vmem:[%s2345_s1 + $0x78] sm:$0xff] (!%p240_p2)   ;;  %vm1504_vm6 = vcmask (!%p240_p2), 1044484  }
   0xa   : > { %v609_v19 = vand.u32 (!%p240_p2), %v1872_v16, %v607_v13  ;;  %v1866_v20 = vld [vmem:[%s2345_s1 + $0x30] sm:$0xff] (!%p240_p2)   ;;  %v1868_v24 = vld [vmem:[%s2345_s1 + $0x38] sm:$0xff] (!%p240_p2)   ;;  %v1902_v31 = vld [vmem:[%s2347_s3] sm:$0xff] (!%p240_p2)   ;;  %vm1506_vm7 = vcmask (!%p240_p2), 1045509   ;;  %vm1508_vm8 = vcmask (!%p240_p2), 1046534   ;;  %vm1510_vm9 = vcmask (!%p240_p2), 1047559  }
   0xb   : > { %1690 = vmatpush3.bf16.msra.mxu0 (!%p240_p2), %v1856_v3  ;;  %v1903_v33 = vld [vmem:[%s2347_s3 + $0x8] sm:$0xff] (!%p240_p2)   ;;  %v1904_v35 = vld [vmem:[%s2347_s3 + $0x10] sm:$0xff] (!%p240_p2)   ;;  %v1905_v48 = vld [vmem:[%s2347_s3 + $0x18] sm:$0xff] (!%p240_p2)  }
   0xc   : > { %1691 = vmatprep.subr.bf16.mxu0 (!%p240_p2), %v1857_v4  ;;  %1776 = vmatprep.subr.bf16.mxu1 (!%p240_p2), %v609_v19  ;;  %v1906_v49 = vld [vmem:[%s2347_s3 + $0x20] sm:$0xff] (!%p240_p2)   ;;  %v1907_v50 = vld [vmem:[%s2347_s3 + $0x28] sm:$0xff] (!%p240_p2)   ;;  %v1908_v51 = vld [vmem:[%s2347_s3 + $0x30] sm:$0xff] (!%p240_p2)  }
   0xd   : > { %s2353_s28 = smov (!%p274_p3, %s1604_s28), 31  ;;  %1777 = vmatpush3.bf16.msra.mxu1 %v609_v19  ;;  %v1909_v52 = vld [vmem:[%s2347_s3 + $0x38] sm:$0xff]   ;;  %v2109_v53 = vld [vmem:[%s2349_s5] ss:$8 sps:$4 sm:$0xff]   ;;  %v1912_v54 = vld [vmem:[%s2349_s5 + $0x4] ss:$8 sps:$4 sm:$0xff]  }
   0xe   : > { %s1842_s18 = smul.u32 12, %s2353_s28  ;;  %1794 = vmatprep.subr.bf16.mxu1 %v1902_v31  ;;  %v2117_v55 = vld [vmem:[%s2349_s5 + $0x14] ss:$8 sps:$4 sm:$0xff]   ;;  %v2123_v56 = vld [vmem:[%s2349_s5 + $0x10] ss:$8 sps:$4 sm:$0xff]  }
   0xf   : > { %1692 = vmatpush3.bf16.msra.mxu0 %v1858_v5  ;;  %v2129_v57 = vld [vmem:[%s2349_s5 + $0x24] ss:$8 sps:$4 sm:$0xff]   ;;  %v2135_v58 = vld [vmem:[%s2349_s5 + $0x20] ss:$8 sps:$4 sm:$0xff]   ;;  %v2141_v59 = vld [vmem:[%s2349_s5 + $0x34] ss:$8 sps:$4 sm:$0xff]  }
  0x10   : > { %1693 = vmatprep.subr.bf16.mxu0 %v1859_v6  ;;  %s2024_s27 = scalar_lea.vmem %s2344_s0, %s1842_s18  ;;  %v2147_v60 = vld [vmem:[%s2349_s5 + $0x30] ss:$8 sps:$4 sm:$0xff]   ;;  %v2153_v61 = vld [vmem:[%s2349_s5 + $0x44] ss:$8 sps:$4 sm:$0xff]   ;;  %v2159_v62 = vld [vmem:[%s2349_s5 + $0x40] ss:$8 sps:$4 sm:$0xff]  }
  0x11   : > { %v1871_v15 = vld [vmem:[%s2024_s27 + $0x4] ss:$12 sps:$4 sm:$0xff]   ;;  %v1873_v17 = vld [vmem:[%s2024_s27 + $0x8] ss:$12 sps:$4 sm:$0xff]   ;;  %v1874_v21 = vld [vmem:[%s2024_s27 + $0x20] ss:$12 sps:$4 sm:$0xff]  }
  0x12   : > { %643 = vmatprep.mubr.bf16.mxu0 %v1871_v15  ;;  %1778 = vmatprep.mubr.msk.bf16.mxu1 %vm579_vm2, %v1873_v17  ;;  %v1881_v22 = vld [vmem:[%s2024_s27 + $0x38] ss:$12 sps:$4 sm:$0xff]   ;;  %v1869_v25 = vld [vmem:[%s2024_s27] ss:$12 sps:$4 sm:$0xff]   ;;  %v1882_v26 = vld [vmem:[%s2024_s27 + $0x50] ss:$12 sps:$4 sm:$0xff]  }
  0x13   : > { %1694 = vmatpush3.bf16.msra.mxu0 %v1860_v7  ;;  %1779 = vmatmul.mubr.msk.bf16.vlgmr.msra.gmra.mrb[0].mxu1 %vm579_vm2, %v1874_v21  ;;  %v1875_v27 = vld [vmem:[%s2024_s27 + $0x1c] ss:$12 sps:$4 sm:$0xff]   ;;  %v1877_v29 = vld [vmem:[%s2024_s27 + $0x18] ss:$12 sps:$4 sm:$0xff]   ;;  %v1890_v30 = vld [vmem:[%s2024_s27 + $0x80] ss:$12 sps:$4 sm:$0xff]  }
  0x14   : > { %1695 = vmatprep.subr.bf16.mxu0 %v1861_v8  ;;  %1782 = vmatprep.mubr.msk.bf16.mxu1 %vm579_vm2, %v1881_v22  ;;  %v1889_v28 = vld [vmem:[%s2024_s27 + $0x68] ss:$12 sps:$4 sm:$0xff]   ;;  %v1897_v34 = vld [vmem:[%s2024_s27 + $0x98] ss:$12 sps:$4 sm:$0xff]   ;;  %v1880_v36 = vld [vmem:[%s2024_s27 + $0x30] ss:$12 sps:$4 sm:$0xff]  }
  0x15   : > { %v1878_v32 = vld [vmem:[%s2024_s27 + $0x34] ss:$12 sps:$4 sm:$0xff]   ;;  %1795 = vmatpush3.bf16.msra.mxu1 %v1902_v31  ;;  %v1898_v37 = vld [vmem:[%s2024_s27 + $0xb0] ss:$12 sps:$4 sm:$0xff]   ;;  %v1883_v38 = vld [vmem:[%s2024_s27 + $0x4c] ss:$12 sps:$4 sm:$0xff]  }
  0x16   : > { %1796 = vmatprep.subr.bf16.mxu1 %v1903_v33  ;;  %v1885_v39 = vld [vmem:[%s2024_s27 + $0x48] ss:$12 sps:$4 sm:$0xff]   ;;  %v1886_v40 = vld [vmem:[%s2024_s27 + $0x64] ss:$12 sps:$4 sm:$0xff]   ;;  %v1888_v41 = vld [vmem:[%s2024_s27 + $0x60] ss:$12 sps:$4 sm:$0xff]  }
  0x17   : > { %1696 = vmatpush3.bf16.msra.mxu0 %v1862_v11  ;;  %v1891_v42 = vld [vmem:[%s2024_s27 + $0x7c] ss:$12 sps:$4 sm:$0xff]   ;;  %v1893_v43 = vld [vmem:[%s2024_s27 + $0x78] ss:$12 sps:$4 sm:$0xff]   ;;  %v1894_v44 = vld [vmem:[%s2024_s27 + $0x94] ss:$12 sps:$4 sm:$0xff]  }
  0x18   : > { %1697 = vmatprep.subr.bf16.mxu0 %v1863_v12  ;;  %v1896_v45 = vld [vmem:[%s2024_s27 + $0x90] ss:$12 sps:$4 sm:$0xff]   ;;  %v1899_v46 = vld [vmem:[%s2024_s27 + $0xac] ss:$12 sps:$4 sm:$0xff]   ;;  %v1901_v47 = vld [vmem:[%s2024_s27 + $0xa8] ss:$12 sps:$4 sm:$0xff]  }
  0x19   : > { %1797 = vmatpush3.bf16.msra.mxu1 %v1903_v33  ;;  %v2165_v63 = vld [vmem:[%s2349_s5 + $0x54] ss:$8 sps:$4 sm:$0xff]   ;;  %v2171_v0 = vld [vmem:[%s2349_s5 + $0x50] ss:$8 sps:$4 sm:$0xff]   ;;  %v2180_v8 = vld [vmem:[%s2346_s2] ss:$0 sm:$0xff] }
  0x1a   : > { %1798 = vmatprep.subr.bf16.mxu1 %v1904_v35  ;;  %s2283_s27 = sshll.u32 %s1599_s25, 1 }
  0x1b   : > { %1698 = vmatpush3.bf16.msra.mxu0 %v1864_v14  ;;  %1783 = vmatmul.mubr.msk.bf16.gmra.mrb[4].mxu1 %vm579_vm2, %v1882_v26  ;;  %p281_p4 = scmp.lt.s32.totalorder %s2283_s27, 3 }
  0x1c   : > { %1699 = vmatprep.subr.bf16.mxu0 %v1865_v18  ;;  %1786 = vmatprep.mubr.msk.bf16.mxu1 %vm579_vm2, %v1889_v28 }
  0x1d   : > { %1799 = vmatpush3.bf16.msra.mxu1 %v1904_v35  ;;  %s2355_s27 = smov (!%p281_p4, %s2283_s27), 3 }
  0x1e   : > { %1800 = vmatprep.subr.bf16.mxu1 %v1905_v48  ;;  %s1686_s25 = sshll.u32 %s2355_s27, 4 }
  0x1f   : > { %1700 = vmatpush3.bf16.msra.mxu0 %v1866_v20  ;;  %s2306_s15 = scalar_lea.vmem %s2351_s7, %s1686_s25 }
  0x20   : > { %1701 = vmatprep.subr.bf16.mxu0 %v1867_v23 }
  0x21   : > { %1801 = vmatpush3.bf16.msra.mxu1 %v1905_v48 }
  0x22   : > { %1802 = vmatprep.subr.bf16.mxu1 %v1906_v49 }
  0x23   : > { %1702 = vmatpush3.bf16.msra.mxu0 %v1868_v24  ;;  %1787 = vmatmul.mubr.msk.bf16.gmra.mrb[8].mxu1 %vm579_vm2, %v1890_v30 }
  0x24   : > { %1790 = vmatprep.mubr.msk.bf16.mxu1 %vm579_vm2, %v1897_v34  ;;  %1129 = vmatprep.subr.bf16.mxu0 %v1912_v54 }
  0x25   : > { %1803 = vmatpush3.bf16.msra.mxu1 %v1906_v49 }
  0x26   : > { %644 = vmatmul.mubr.bf16.vlgmr.msra.gmra.mrb[0].mxu0 %v1869_v25  ;;  %1804 = vmatprep.subr.bf16.mxu1 %v1907_v50 }
  0x27   : > { %651 = vmatprep.mubr.bf16.mxu0 %v1875_v27  ;;  %1130 = vmatpush1.bf16.msra.mxu0 %v2109_v53 }
  0x28   : > { %1131 = vmatprep.subr.bf16.mxu0 %v2117_v55 }
  0x29   : > { %1805 = vmatpush3.bf16.msra.mxu1 %v1907_v50 }
  0x2a   : > { %1806 = vmatprep.subr.bf16.mxu1 %v1908_v51 }
  0x2b   : > { %1791 = vmatmul.mubr.msk.bf16.gmra.mrb[12].mxu1 %vm579_vm2, %v1898_v37  ;;  %1132 = vmatpush1.bf16.msra.mxu0 %v2123_v56 }
  0x2c   : > { %1133 = vmatprep.subr.bf16.mxu0 %v2129_v57 }
  0x2d   : > { %1807 = vmatpush3.bf16.msra.mxu1 %v1908_v51 }
  0x2e   : > { %652 = vmatmul.mubr.bf16.gmra.mrb[4].mxu0 %v1877_v29  ;;  %1808 = vmatprep.subr.bf16.mxu1 %v1909_v52 }
  0x2f   : > { %659 = vmatprep.mubr.bf16.mxu0 %v1878_v32  ;;  %1134 = vmatpush1.bf16.msra.mxu0 %v2135_v58 }
  0x30   : > { %1135 = vmatprep.subr.bf16.mxu0 %v2141_v59 }
  0x31   : > { %1809 = vmatpush3.bf16.msra.mxu1 %v1909_v52 }
  0x32   : > { %1826 = vmatprep.subr.bf16.mxu1 %v1912_v54 }
  0x33   : > { %1136 = vmatpush1.bf16.msra.mxu0 %v2147_v60 }
  0x34   : > { %1137 = vmatprep.subr.bf16.mxu0 %v2153_v61 }
  0x36   : > { %660 = vmatmul.mubr.bf16.gmra.mrb[8].mxu0 %v1880_v36 }
  0x37   : > { %667 = vmatprep.mubr.bf16.mxu0 %v1883_v38  ;;  %1138 = vmatpush1.bf16.msra.mxu0 %v2159_v62 }
  0x38   : > { %1139 = vmatprep.subr.bf16.mxu0 %v2165_v63 }
  0x3b   : > { %1140 = vmatpush1.bf16.msra.mxu0 %v2171_v0 }
  0x3e   : > { %668 = vmatmul.mubr.bf16.gmra.mrb[12].mxu0 %v1885_v39 }
  0x3f   : > { %675 = vmatprep.mubr.bf16.mxu0 %v1886_v40 }
  0x46   : > { %676 = vmatmul.mubr.bf16.gmra.mrb[16].mxu0 %v1888_v41 }
  0x47   : > { %683 = vmatprep.mubr.bf16.mxu0 %v1891_v42 }
  0x4e   : > { %684 = vmatmul.mubr.bf16.gmra.mrb[20].mxu0 %v1893_v43 }
  0x4f   : > { %691 = vmatprep.mubr.bf16.mxu0 %v1894_v44 }
  0x56   : > { %692 = vmatmul.mubr.bf16.gmra.mrb[24].mxu0 %v1896_v45 }
  0x57   : > { %699 = vmatprep.mubr.bf16.mxu0 %v1899_v46 }
  0x5e   : > { %700 = vmatmul.mubr.bf16.gmra.mrb[28].mxu0 %v1901_v47 }
  0xe6   : > { %v1780_v1 = vpop.f32.mrb[0].mxu1 }
  0xe7   : > { %v742_v2 = vpop.f32.mrb[1].mxu1 }
  0xe8   : > { %v1781_v3 = vpop.f32.mrb[2].mxu1 }
  0xe9   : > { %v745_v4 = vpop.f32.mrb[3].mxu1 }
  0xee   : > { %v2175_v6 = vpop.f32.mrb[4].mxu1 }
  0xef   : > { %v758_v9 = vpop.f32.mrb[5].mxu1 }
  0xf0   : > { %v1785_v12 = vpop.f32.mrb[6].mxu1 }
  0xf1   : > { %v761_v14 = vpop.f32.mrb[7].mxu1 }
  0xf6   : > { %v2184_v21 = vpop.f32.mrb[8].mxu1 }
  0xf7   : > { %v2186_v23 = vpop.f32.mrb[9].mxu1 }
  0xf8   : > { %v2188_v28 = vpop.f32.mrb[10].mxu1 }
  0xf9   : > { %v1703_v5 = vpop.f32.mrb[0].mxu0  ;;  %v777_v30 = vpop.f32.mrb[11].mxu1 }
  0xfa   : > { %v1704_v7 = vpop.f32.mrb[1].mxu0 }
  0xfb   : > { %v1705_v10 = vadd.f32 %v1704_v7, %v1703_v5  ;;  %v1706_v11 = vpop.f32.mrb[2].mxu0 }
  0xfc   : > { %v1707_v13 = vpop.f32.mrb[3].mxu0 }
  0xfd   : > { %v1708_v15 = vadd.f32 %v1707_v13, %v1706_v11  ;;  %v646_v16 = vadd.f32 %v1705_v10, %v2180_v8 }
  0xfe   : > { %v2192_v38 = vpop.f32.mrb[12].mxu1 }
  0xff   : > { %v743_v17 = vadd.f32 %v742_v2, %v646_v16  ;;  %v649_v18 = vadd.f32 %v1708_v15, %v2180_v8  ;;  %v2194_v40 = vpop.f32.mrb[13].mxu1 }
 0x100   : > { %v2196_v45 = vpop.f32.mrb[14].mxu1 }
 0x101   : > { %v746_v19 = vadd.f32 %v745_v4, %v649_v18  ;;  %v1709_v20 = vpop.f32.mrb[4].mxu0  ;;  %v805_v24 = vmax.f32 %v743_v17, 0.0  ;;  %v2198_v47 = vpop.f32.mrb[15].mxu1 }
 0x102   : > { %v1710_v22 = vpop.f32.mrb[5].mxu0 }
 0x103   : > { %v806_v25 = vmax.f32 %v746_v19, 0.0  ;;  %v1711_v26 = vadd.f32 %v1710_v22, %v1709_v20  ;;  %v1712_v27 = vpop.f32.mrb[6].mxu0 }
 0x104   : > { %v1713_v29 = vpop.f32.mrb[7].mxu0 }
 0x105   : > { %v838_v31 = vpack.c.bf16 %v806_v25, %v805_v24  ;;  %v654_v32 = vadd.f32 %v1711_v26, %v2180_v8  ;;  %v1714_v33 = vadd.f32 %v1713_v29, %v1712_v27 }
 0x107   : > { %v751_v34 = vadd.f32 %v1780_v1, %v654_v32  ;;  %v657_v35 = vadd.f32 %v1714_v33, %v2180_v8  ;;  %1810 = vmatprep.mubr.bf16.mxu1 %v838_v31 }
 0x109   : > { %v754_v36 = vadd.f32 %v1781_v3, %v657_v35  ;;  %v1715_v37 = vpop.f32.mrb[8].mxu0  ;;  %v807_v41 = vmax.f32 %v751_v34, 0.0 }
 0x10a   : > { %v1716_v39 = vpop.f32.mrb[9].mxu0 }
 0x10b   : > { %v808_v42 = vmax.f32 %v754_v36, 0.0  ;;  %v1717_v43 = vadd.f32 %v1716_v39, %v1715_v37  ;;  %v1718_v44 = vpop.f32.mrb[10].mxu0 }
 0x10c   : > { %v1719_v46 = vpop.f32.mrb[11].mxu0 }
 0x10d   : > { %v839_v48 = vpack.c.bf16 %v808_v42, %v807_v41  ;;  %v1720_v49 = vadd.f32 %v1719_v46, %v1718_v44  ;;  %v662_v50 = vadd.f32 %v1717_v43, %v2180_v8 }
 0x10f   : > { %v759_v51 = vadd.f32 %v758_v9, %v662_v50  ;;  %1811 = vmatmul.mubr.bf16.vlgmr.msra.gmra.mrb[16].mxu1 %v839_v48  ;;  %v665_v52 = vadd.f32 %v1720_v49, %v2180_v8 }
 0x110   : > { %1834 = vmatpush1.bf16.msra.mxu1 %v2109_v53 }
 0x111   : > { %v762_v54 = vadd.f32 %v761_v14, %v665_v52  ;;  %v1721_v1 = vpop.f32.mrb[12].mxu0  ;;  %1827 = vmatprep.subr.bf16.mxu1 %v2117_v55  ;;  %v809_v3 = vmax.f32 %v759_v51, 0.0 }
 0x112   : > { %v1722_v2 = vpop.f32.mrb[13].mxu0 }
 0x113   : > { %v810_v4 = vmax.f32 %v762_v54, 0.0  ;;  %v1723_v5 = vadd.f32 %v1722_v2, %v1721_v1  ;;  %v1724_v7 = vpop.f32.mrb[14].mxu0 }
 0x114   : > { %v1725_v10 = vpop.f32.mrb[15].mxu0  ;;  %1835 = vmatpush1.bf16.msra.mxu1 %v2123_v56 }
 0x115   : > { %v840_v11 = vpack.c.bf16 %v810_v4, %v809_v3  ;;  %v670_v9 = vadd.f32 %v1723_v5, %v2180_v8  ;;  %v1726_v13 = vadd.f32 %v1725_v10, %v1724_v7  ;;  %1828 = vmatprep.subr.bf16.mxu1 %v2129_v57 }
 0x117   : > { %v767_v53 = vadd.f32 %v2175_v6, %v670_v9  ;;  %v673_v14 = vadd.f32 %v1726_v13, %v2180_v8  ;;  %1814 = vmatprep.mubr.bf16.mxu1 %v840_v11  ;;  %v1930_v11 = vld [vmem:[%s2349_s5 + $0x64] ss:$8 sps:$4 sm:$0xff]   ;;  %v1928_v9 = vld [vmem:[%s2349_s5 + $0x60] ss:$8 sps:$4 sm:$0xff]  }
 0x118   : > { %1836 = vmatpush1.bf16.msra.mxu1 %v2135_v58  ;;  %1141 = vmatprep.subr.bf16.mxu0 %v1930_v11  ;;  %v1659_v13 = vld [vmem:[%s2348_s4] ss:$0 sm:$0xff] }
 0x119   : > { %v770_v55 = vadd.f32 %v1785_v12, %v673_v14  ;;  %v1727_v15 = vpop.f32.mrb[16].mxu0  ;;  %1829 = vmatprep.subr.bf16.mxu1 %v2141_v59  ;;  %v811_v17 = vmax.f32 %v767_v53, 0.0  ;;  %1142 = vmatpush1.bf16.msra.mxu0 %v1928_v9 }
 0x11a   : > { %v1728_v16 = vpop.f32.mrb[17].mxu0 }
 0x11b   : > { %v812_v56 = vmax.f32 %v770_v55, 0.0  ;;  %v1729_v18 = vadd.f32 %v1728_v16, %v1727_v15  ;;  %v1730_v19 = vpop.f32.mrb[18].mxu0 }
 0x11c   : > { %v1731_v20 = vpop.f32.mrb[19].mxu0  ;;  %1837 = vmatpush1.bf16.msra.mxu1 %v2147_v60 }
 0x11d   : > { %v1732_v57 = vadd.f32 %v1731_v20, %v1730_v19  ;;  %v678_v6 = vadd.f32 %v1729_v18, %v2180_v8  ;;  %v841_v22 = vpack.c.bf16 %v812_v56, %v811_v17  ;;  %1830 = vmatprep.subr.bf16.mxu1 %v2153_v61 }
 0x11f   : > { %v775_v58 = vadd.f32 %v2186_v23, %v678_v6  ;;  %1815 = vmatmul.mubr.bf16.gmra.mrb[20].mxu1 %v841_v22  ;;  %v681_v12 = vadd.f32 %v1732_v57, %v2180_v8 }
 0x120   : > { %1838 = vmatpush1.bf16.msra.mxu1 %v2159_v62 }
 0x121   : > { %v778_v59 = vadd.f32 %v777_v30, %v681_v12  ;;  %v1733_v24 = vpop.f32.mrb[20].mxu0  ;;  %1831 = vmatprep.subr.bf16.mxu1 %v2165_v63  ;;  %v813_v26 = vmax.f32 %v775_v58, 0.0 }
 0x122   : > { %v1734_v25 = vpop.f32.mrb[21].mxu0 }
 0x123   : > { %v814_v60 = vmax.f32 %v778_v59, 0.0  ;;  %v1735_v27 = vadd.f32 %v1734_v25, %v1733_v24  ;;  %v1736_v29 = vpop.f32.mrb[22].mxu0 }
 0x124   : > { %v1737_v31 = vpop.f32.mrb[23].mxu0  ;;  %1839 = vmatpush1.bf16.msra.mxu1 %v2171_v0 }
 0x125   : > { %v842_v61 = vpack.c.bf16 %v814_v60, %v813_v26  ;;  %v686_v23 = vadd.f32 %v1735_v27, %v2180_v8  ;;  %v1738_v32 = vadd.f32 %v1737_v31, %v1736_v29  ;;  %1832 = vmatprep.subr.bf16.mxu1 %v1930_v11 }
 0x127   : > { %v783_v33 = vadd.f32 %v2184_v21, %v686_v23  ;;  %v689_v62 = vadd.f32 %v1738_v32, %v2180_v8  ;;  %1818 = vmatprep.mubr.bf16.mxu1 %v842_v61 }
 0x128   : > { %1840 = vmatpush1.bf16.msra.mxu1 %v1928_v9  ;;  %v1029_v9 = vld [vmem:[%s2350_s6] sm:$0x3] }
 0x129   : > { %v786_v30 = vadd.f32 %v2188_v28, %v689_v62  ;;  %v1739_v63 = vpop.f32.mrb[24].mxu0  ;;  %v815_v35 = vmax.f32 %v783_v33, 0.0 }
 0x12a   : > { %v1740_v34 = vpop.f32.mrb[25].mxu0 }
 0x12b   : > { %v816_v36 = vmax.f32 %v786_v30, 0.0  ;;  %v1741_v37 = vadd.f32 %v1740_v34, %v1739_v63  ;;  %v1742_v39 = vpop.f32.mrb[26].mxu0 }
 0x12c   : > { %v1743_v41 = vpop.f32.mrb[27].mxu0 }
 0x12d   : > { %v1744_v42 = vadd.f32 %v1743_v41, %v1742_v39  ;;  %v694_v0 = vadd.f32 %v1741_v37, %v2180_v8  ;;  %v843_v43 = vpack.c.bf16 %v816_v36, %v815_v35 }
 0x12f   : > { %v791_v44 = vadd.f32 %v2194_v40, %v694_v0  ;;  %1819 = vmatmul.mubr.bf16.gmra.mrb[24].mxu1 %v843_v43  ;;  %v697_v21 = vadd.f32 %v1744_v42, %v2180_v8 }
 0x131   : > { %v794_v46 = vadd.f32 %v2198_v47, %v697_v21  ;;  %v1745_v48 = vpop.f32.mrb[28].mxu0  ;;  %v817_v49 = vmax.f32 %v791_v44, 0.0 }
 0x132   : > { %v1746_v28 = vpop.f32.mrb[29].mxu0 }
 0x133   : > { %v818_v50 = vmax.f32 %v794_v46, 0.0  ;;  %v1747_v51 = vadd.f32 %v1746_v28, %v1745_v48  ;;  %v1748_v52 = vpop.f32.mrb[30].mxu0 }
 0x134   : > { %v1749_v54 = vpop.f32.mrb[31].mxu0 }
 0x135   : > { %v844_v1 = vpack.c.bf16 %v818_v50, %v817_v49  ;;  %v702_v2 = vadd.f32 %v1747_v51, %v2180_v8  ;;  %v1750_v3 = vadd.f32 %v1749_v54, %v1748_v52 }
 0x137   : > { %v799_v4 = vadd.f32 %v2192_v38, %v702_v2  ;;  %v705_v40 = vadd.f32 %v1750_v3, %v2180_v8  ;;  %1822 = vmatprep.mubr.bf16.mxu1 %v844_v1  ;;  %v1933_v8 = vld [vmem:[%s2349_s5 + $0x74] ss:$8 sps:$4 sm:$0xff]   ;;  %v1931_v38 = vld [vmem:[%s2349_s5 + $0x70] ss:$8 sps:$4 sm:$0xff]  }
 0x138   : > { %1143 = vmatprep.subr.bf16.mxu0 %v1933_v8  ;;  %1833 = vmatprep.subr.bf16.mxu1 %v1933_v8 }
 0x139   : > { %v802_v5 = vadd.f32 %v2196_v45, %v705_v40  ;;  %v819_v7 = vmax.f32 %v799_v4, 0.0  ;;  %1144 = vmatpush1.bf16.msra.mxu0 %v1931_v38  ;;  %1841 = vmatpush1.bf16.msra.mxu1 %v1931_v38  ;;  %v1943_v45 = vmov 0  }
 0x13a   : > { %1161 = vmatprep.mubr.bf16.mxu0 %v1943_v45 }
 0x13b   : > { %v820_v47 = vmax.f32 %v802_v5, 0.0 }
 0x13d   : > { %v845_v10 = vpack.c.bf16 %v820_v47, %v819_v7  ;;  %v1039_v47 = vlaneseq }
 0x13f   : > { %1823 = vmatmul.mubr.bf16.gmra.mrb[28].mxu1 %v845_v10  ;;  %v1040_v10 = vshrl.u32 %v1039_v47, 7 }
 0x140   : > { %1181 = vmatprep.mubr.bf16.mxu1 %v1943_v45 }
 0x141   : > { %v1041_v11 = vsub.s32 0, %v1040_v10  ;;  %v1045_v8 = vsub.s32 1, %v1040_v10 }
 0x143   : > { %v2257_v38 = vrot.slane %v1029_v9, %v1041_v11 }
 0x1e2   : > { %v1812_v53 = vpop.f32.mrb[16].mxu1 }
 0x1e3   : > { %v943_v14 = vadd.f32 %v1812_v53, %v1659_v13  ;;  %v934_v55 = vpop.f32.mrb[17].mxu1 }
 0x1e4   : > { %v935_v15 = vadd.f32 %v1659_v13, %v934_v55  ;;  %v1813_v16 = vpop.f32.mrb[18].mxu1 }
 0x1e5   : > { %v946_v17 = vadd.f32 %v1813_v16, %v1659_v13  ;;  %v937_v56 = vpop.f32.mrb[19].mxu1  ;;  %v999_v19 = vmax.f32 %v943_v14, 0.0 }
 0x1e6   : > { %v938_v18 = vadd.f32 %v1659_v13, %v937_v56  ;;  %v997_v57 = vmax.f32 %v935_v15, 0.0 }
 0x1e7   : > { %v1000_v20 = vmax.f32 %v946_v17, 0.0 }
 0x1e8   : > { %v998_v6 = vmax.f32 %v938_v18, 0.0 }
 0x1e9   : > { %v1031_v22 = vpack.c.bf16 %v1000_v20, %v999_v19 }
 0x1ea   : > { %v1030_v58 = vpack.c.bf16 %v998_v6, %v997_v57 }
 0x1ec   : > { %1162 = vmatmul.mubr.bf16.vlgmr.msra.gmra.mrb[32].mxu0 %v1030_v58 }
 0x1ed   : > { %1171 = vmatprep.mubr.bf16.mxu0 %v1943_v45 }
 0x1f2   : > { %v1816_v12 = vpop.f32.mrb[20].mxu1 }
 0x1f3   : > { %v959_v59 = vadd.f32 %v1816_v12, %v1659_v13  ;;  %v950_v24 = vpop.f32.mrb[21].mxu1 }
 0x1f4   : > { %v951_v25 = vadd.f32 %v1659_v13, %v950_v24  ;;  %v1817_v26 = vpop.f32.mrb[22].mxu1  ;;  %1172 = vmatmul.mubr.bf16.gmra.mrb[36].mxu0 %v1031_v22 }
 0x1f5   : > { %v962_v60 = vadd.f32 %v1817_v26, %v1659_v13  ;;  %v953_v27 = vpop.f32.mrb[23].mxu1  ;;  %v1003_v31 = vmax.f32 %v959_v59, 0.0 }
 0x1f6   : > { %v954_v29 = vadd.f32 %v1659_v13, %v953_v27  ;;  %v1001_v23 = vmax.f32 %v951_v25, 0.0 }
 0x1f7   : > { %v1004_v61 = vmax.f32 %v962_v60, 0.0 }
 0x1f8   : > { %v1002_v32 = vmax.f32 %v954_v29, 0.0 }
 0x1f9   : > { %v1033_v33 = vpack.c.bf16 %v1004_v61, %v1003_v31 }
 0x1fa   : > { %v1032_v62 = vpack.c.bf16 %v1002_v32, %v1001_v23 }
 0x1fc   : > { %1182 = vmatmul.mubr.bf16.vlgmr.msra.gmra.mrb[32].mxu1 %v1032_v62 }
 0x1fd   : > { %1191 = vmatprep.mubr.bf16.mxu1 %v1943_v45 }
 0x202   : > { %v1820_v30 = vpop.f32.mrb[24].mxu1 }
 0x203   : > { %v975_v63 = vadd.f32 %v1820_v30, %v1659_v13  ;;  %v966_v34 = vpop.f32.mrb[25].mxu1 }
 0x204   : > { %v967_v35 = vadd.f32 %v1659_v13, %v966_v34  ;;  %v1821_v36 = vpop.f32.mrb[26].mxu1  ;;  %1192 = vmatmul.mubr.bf16.gmra.mrb[36].mxu1 %v1033_v33 }
 0x205   : > { %v978_v37 = vadd.f32 %v1821_v36, %v1659_v13  ;;  %v969_v39 = vpop.f32.mrb[27].mxu1  ;;  %1201 = vmatprep.mubr.bf16.mxu1 %v1943_v45  ;;  %v1007_v42 = vmax.f32 %v975_v63, 0.0 }
 0x206   : > { %v970_v41 = vadd.f32 %v1659_v13, %v969_v39  ;;  %v1005_v43 = vmax.f32 %v967_v35, 0.0 }
 0x207   : > { %v1008_v0 = vmax.f32 %v978_v37, 0.0 }
 0x208   : > { %v1006_v44 = vmax.f32 %v970_v41, 0.0 }
 0x209   : > { %v1035_v21 = vpack.c.bf16 %v1008_v0, %v1007_v42 }
 0x20a   : > { %v1034_v46 = vpack.c.bf16 %v1006_v44, %v1005_v43 }
 0x20c   : > { %1202 = vmatmul.mubr.bf16.gmra.mrb[40].mxu1 %v1034_v46 }
 0x20d   : > { %1211 = vmatprep.mubr.bf16.mxu1 %v1943_v45 }
 0x212   : > { %v1824_v48 = vpop.f32.mrb[28].mxu1 }
 0x213   : > { %v991_v28 = vadd.f32 %v1824_v48, %v1659_v13  ;;  %v982_v49 = vpop.f32.mrb[29].mxu1 }
 0x214   : > { %v983_v50 = vadd.f32 %v1659_v13, %v982_v49  ;;  %v1825_v51 = vpop.f32.mrb[30].mxu1  ;;  %1212 = vmatmul.mubr.bf16.gmra.mrb[44].mxu1 %v1035_v21 }
 0x215   : > { %v994_v52 = vadd.f32 %v1825_v51, %v1659_v13  ;;  %v985_v54 = vpop.f32.mrb[31].mxu1  ;;  %1221 = vmatprep.mubr.bf16.mxu1 %v1943_v45  ;;  %v1011_v2 = vmax.f32 %v991_v28, 0.0 }
 0x216   : > { %v986_v1 = vadd.f32 %v1659_v13, %v985_v54  ;;  %v1009_v4 = vmax.f32 %v983_v50, 0.0  ;;  %v2259_v13 = vrot.slane %v1029_v9, %v1045_v8 }
 0x217   : > { %v1012_v3 = vmax.f32 %v994_v52, 0.0 }
 0x218   : > { %v1010_v40 = vmax.f32 %v986_v1, 0.0 }
 0x219   : > { %v1037_v5 = vpack.c.bf16 %v1012_v3, %v1011_v2 }
 0x21a   : > { %v1036_v7 = vpack.c.bf16 %v1010_v40, %v1009_v4 }
 0x21c   : > { %1222 = vmatmul.mubr.bf16.gmra.mrb[48].mxu1 %v1036_v7 }
 0x21d   : > { %1231 = vmatprep.mubr.bf16.mxu1 %v1943_v45 }
 0x224   : > { %1232 = vmatmul.mubr.bf16.gmra.mrb[52].mxu1 %v1037_v5 }
 0x2bf   : > { %v1163_v53 = vpop.f32.mrb[32].mxu0 }
 0x2c0   : > { %v1164_v14 = vadd.f32 %v1163_v53, %v2257_v38  ;;  %v1165_v55 = vpop.f32.mrb[33].mxu0 }
 0x2c1   : > { %v1166_v15 = vadd.f32 %v1165_v55, %v2259_v13  ;;  %v1167_v45 = vpop.f32.mrb[34].mxu0 }
 0x2c2   : > { %v1242_v16 = vmax.f32 %v1164_v14, 0.0  ;;  %v1168_v17 = vadd.f32 %v1167_v45, %v2257_v38  ;;  %v1169_v56 = vpop.f32.mrb[35].mxu0 }
 0x2c3   : > { %v1243_v18 = vmax.f32 %v1166_v15, 0.0  ;;  %v1170_v19 = vadd.f32 %v1169_v56, %v2259_v13 }
 0x2c4   : > { %v1274_v20 = vrot.slane %v1242_v16, 4  ;;  %v1244_v57 = vmax.f32 %v1168_v17, 0.0 }
 0x2c5   : > { %v1280_v6 = vrot.slane %v1243_v18, 4  ;;  %v1245_v22 = vmax.f32 %v1170_v19, 0.0 }
 0x2c6   : > { %v1275_v58 = vmax.f32 %v1242_v16, %v1274_v20  ;;  %v1286_v12 = vrot.slane %v1244_v57, 4 }
 0x2c7   : > { %v1281_v59 = vmax.f32 %v1243_v18, %v1280_v6  ;;  %v1292_v24 = vrot.slane %v1245_v22, 4  ;;  %v1173_v25 = vpop.f32.mrb[36].mxu0 }
 0x2c8   : > { %v1276_v26 = vrot.slane %v1275_v58, 2  ;;  %v1287_v60 = vmax.f32 %v1244_v57, %v1286_v12  ;;  %v1174_v27 = vadd.f32 %v1173_v25, %v2257_v38  ;;  %v1175_v29 = vpop.f32.mrb[37].mxu0 }
 0x2c9   : > { %v1282_v31 = vrot.slane %v1281_v59, 2  ;;  %v1293_v61 = vmax.f32 %v1245_v22, %v1292_v24  ;;  %v1176_v23 = vadd.f32 %v1175_v29, %v2259_v13  ;;  %v1177_v32 = vpop.f32.mrb[38].mxu0 }
 0x2ca   : > { %v1277_v33 = vmax.f32 %v1275_v58, %v1276_v26  ;;  %v1288_v62 = vrot.slane %v1287_v60, 2  ;;  %v1246_v30 = vmax.f32 %v1174_v27, 0.0  ;;  %v1178_v63 = vadd.f32 %v1177_v32, %v2257_v38  ;;  %v1179_v34 = vpop.f32.mrb[39].mxu0 }
 0x2cb   : > { %v1283_v35 = vmax.f32 %v1281_v59, %v1282_v31  ;;  %v1294_v36 = vrot.slane %v1293_v61, 2  ;;  %v1247_v37 = vmax.f32 %v1176_v23, 0.0  ;;  %v1180_v39 = vadd.f32 %v1179_v34, %v2259_v13 }
 0x2cc   : > { %v1278_v41 = vrot.slane %v1277_v33, 1  ;;  %v1289_v42 = vmax.f32 %v1287_v60, %v1288_v62  ;;  %v1298_v0 = vrot.slane %v1246_v30, 4  ;;  %v1248_v43 = vmax.f32 %v1178_v63, 0.0 }
 0x2cd   : > { %v1284_v44 = vrot.slane %v1283_v35, 1  ;;  %v1295_v21 = vmax.f32 %v1293_v61, %v1294_v36  ;;  %v1304_v46 = vrot.slane %v1247_v37, 4  ;;  %v1249_v48 = vmax.f32 %v1180_v39, 0.0 }
 0x2ce   : > { %v1279_v28 = vmax.f32 %v1277_v33, %v1278_v41  ;;  %v1290_v49 = vrot.slane %v1289_v42, 1  ;;  %v1299_v50 = vmax.f32 %v1246_v30, %v1298_v0  ;;  %v1310_v51 = vrot.slane %v1248_v43, 4 }
 0x2cf   : > { %v1285_v52 = vmax.f32 %v1283_v35, %v1284_v44  ;;  %v1296_v54 = vrot.slane %v1295_v21, 1  ;;  %v1305_v1 = vmax.f32 %v1247_v37, %v1304_v46  ;;  %v1316_v2 = vrot.slane %v1249_v48, 4  ;;  %v1183_v3 = vpop.f32.mrb[32].mxu1 }
 0x2d0   : > { %v1291_v4 = vmax.f32 %v1289_v42, %v1290_v49  ;;  %v1300_v40 = vrot.slane %v1299_v50, 2  ;;  %v1311_v5 = vmax.f32 %v1248_v43, %v1310_v51  ;;  %v1184_v7 = vadd.f32 %v1183_v3, %v2257_v38  ;;  %v1185_v47 = vpop.f32.mrb[33].mxu1 }
 0x2d1   : > { %v1297_v10 = vmax.f32 %v1295_v21, %v1296_v54  ;;  %v1306_v11 = vrot.slane %v1305_v1, 2  ;;  %v1317_v9 = vmax.f32 %v1249_v48, %v1316_v2  ;;  %v1186_v8 = vadd.f32 %v1185_v47, %v2259_v13  ;;  %v1187_v53 = vpop.f32.mrb[34].mxu1 }
 0x2d2   : > { %v1499_v14 = vsel %vm1498_vm3, %v1291_v4, %v1279_v28  ;;  %v1301_v55 = vmax.f32 %v1299_v50, %v1300_v40  ;;  %v1312_v15 = vrot.slane %v1311_v5, 2  ;;  %v1250_v45 = vmax.f32 %v1184_v7, 0.0  ;;  %v1189_v16 = vpop.f32.mrb[35].mxu1 }
 0x2d3   : > { %v1512_v17 = vsel %vm1498_vm3, %v1297_v10, %v1285_v52  ;;  %v1307_v56 = vmax.f32 %v1305_v1, %v1306_v11  ;;  %v1318_v18 = vrot.slane %v1317_v9, 2  ;;  %v1251_v19 = vmax.f32 %v1186_v8, 0.0 }
 0x2d4   : > { %v1302_v20 = vrot.slane %v1301_v55, 1  ;;  %v1313_v57 = vmax.f32 %v1311_v5, %v1312_v15  ;;  %v1322_v6 = vrot.slane %v1250_v45, 4  ;;  %v1188_v22 = vadd.f32 %v1187_v53, %v2257_v38 }
 0x2d5   : > { %v1308_v58 = vrot.slane %v1307_v56, 1  ;;  %v1319_v12 = vmax.f32 %v1317_v9, %v1318_v18  ;;  %v1328_v59 = vrot.slane %v1251_v19, 4  ;;  %v1190_v24 = vadd.f32 %v1189_v16, %v2259_v13 }
 0x2d6   : > { %v1303_v25 = vmax.f32 %v1301_v55, %v1302_v20  ;;  %v1314_v26 = vrot.slane %v1313_v57, 1  ;;  %v1323_v60 = vmax.f32 %v1250_v45, %v1322_v6  ;;  %v1252_v27 = vmax.f32 %v1188_v22, 0.0 }
 0x2d7   : > { %v1309_v29 = vmax.f32 %v1307_v56, %v1308_v58  ;;  %v1320_v31 = vrot.slane %v1319_v12, 1  ;;  %v1329_v61 = vmax.f32 %v1251_v19, %v1328_v59  ;;  %v1253_v23 = vmax.f32 %v1190_v24, 0.0  ;;  %v1193_v32 = vpop.f32.mrb[36].mxu1 }
 0x2d8   : > { %v1501_v33 = vsel %vm1500_vm4, %v1303_v25, %v1499_v14  ;;  %v1315_v62 = vmax.f32 %v1313_v57, %v1314_v26  ;;  %v1324_v30 = vrot.slane %v1323_v60, 2  ;;  %v1334_v63 = vrot.slane %v1252_v27, 4  ;;  %v1195_v34 = vpop.f32.mrb[37].mxu1 }
 0x2d9   : > { %v1513_v35 = vsel %vm1500_vm4, %v1309_v29, %v1512_v17  ;;  %v1321_v36 = vmax.f32 %v1319_v12, %v1320_v31  ;;  %v1330_v37 = vrot.slane %v1329_v61, 2  ;;  %v1340_v39 = vrot.slane %v1253_v23, 4  ;;  %v1197_v41 = vpop.f32.mrb[38].mxu1 }
 0x2da   : > { %v1503_v42 = vsel %vm1502_vm5, %v1315_v62, %v1501_v33  ;;  %v1325_v0 = vmax.f32 %v1323_v60, %v1324_v30  ;;  %v1335_v43 = vmax.f32 %v1252_v27, %v1334_v63  ;;  %v1194_v44 = vadd.f32 %v1193_v32, %v2257_v38  ;;  %v1199_v21 = vpop.f32.mrb[39].mxu1 }
 0x2db   : > { %v1514_v46 = vsel %vm1502_vm5, %v1321_v36, %v1513_v35  ;;  %v1331_v48 = vmax.f32 %v1329_v61, %v1330_v37  ;;  %v1341_v28 = vmax.f32 %v1253_v23, %v1340_v39  ;;  %v1196_v49 = vadd.f32 %v1195_v34, %v2259_v13 }
 0x2dc   : > { %v1326_v50 = vrot.slane %v1325_v0, 1  ;;  %v1336_v51 = vrot.slane %v1335_v43, 2  ;;  %v1254_v52 = vmax.f32 %v1194_v44, 0.0  ;;  %v1198_v54 = vadd.f32 %v1197_v41, %v2257_v38 }
 0x2dd   : > { %v1332_v1 = vrot.slane %v1331_v48, 1  ;;  %v1342_v2 = vrot.slane %v1341_v28, 2  ;;  %v1255_v3 = vmax.f32 %v1196_v49, 0.0  ;;  %v1200_v4 = vadd.f32 %v1199_v21, %v2259_v13 }
 0x2de   : > { %v1327_v40 = vmax.f32 %v1325_v0, %v1326_v50  ;;  %v1337_v5 = vmax.f32 %v1335_v43, %v1336_v51  ;;  %v1346_v7 = vrot.slane %v1254_v52, 4  ;;  %v1256_v47 = vmax.f32 %v1198_v54, 0.0 }
 0x2df   : > { %v1333_v10 = vmax.f32 %v1331_v48, %v1332_v1  ;;  %v1343_v11 = vmax.f32 %v1341_v28, %v1342_v2  ;;  %v1352_v9 = vrot.slane %v1255_v3, 4  ;;  %v1257_v8 = vmax.f32 %v1200_v4, 0.0  ;;  %v1203_v53 = vpop.f32.mrb[40].mxu1 }
 0x2e0   : > { %v1505_v14 = vsel %vm1504_vm6, %v1327_v40, %v1503_v42  ;;  %v1338_v55 = vrot.slane %v1337_v5, 1  ;;  %v1347_v15 = vmax.f32 %v1254_v52, %v1346_v7  ;;  %v1358_v45 = vrot.slane %v1256_v47, 4  ;;  %v1205_v16 = vpop.f32.mrb[41].mxu1 }
 0x2e1   : > { %v1515_v17 = vsel %vm1504_vm6, %v1333_v10, %v1514_v46  ;;  %v1344_v56 = vrot.slane %v1343_v11, 1  ;;  %v1353_v18 = vmax.f32 %v1255_v3, %v1352_v9  ;;  %v1364_v19 = vrot.slane %v1257_v8, 4  ;;  %v1207_v20 = vpop.f32.mrb[42].mxu1 }
 0x2e2   : > { %v1339_v57 = vmax.f32 %v1337_v5, %v1338_v55  ;;  %v1348_v6 = vrot.slane %v1347_v15, 2  ;;  %v1359_v22 = vmax.f32 %v1256_v47, %v1358_v45  ;;  %v1204_v58 = vadd.f32 %v1203_v53, %v2257_v38  ;;  %v1209_v12 = vpop.f32.mrb[43].mxu1 }
 0x2e3   : > { %v1345_v59 = vmax.f32 %v1343_v11, %v1344_v56  ;;  %v1354_v24 = vrot.slane %v1353_v18, 2  ;;  %v1365_v25 = vmax.f32 %v1257_v8, %v1364_v19  ;;  %v1206_v26 = vadd.f32 %v1205_v16, %v2259_v13 }
 0x2e4   : > { %v1507_v60 = vsel %vm1506_vm7, %v1339_v57, %v1505_v14  ;;  %v1349_v27 = vmax.f32 %v1347_v15, %v1348_v6  ;;  %v1360_v29 = vrot.slane %v1359_v22, 2  ;;  %v1258_v31 = vmax.f32 %v1204_v58, 0.0 }
 0x2e5   : > { %v1516_v61 = vsel %vm1506_vm7, %v1345_v59, %v1515_v17  ;;  %v1355_v23 = vmax.f32 %v1353_v18, %v1354_v24  ;;  %v1366_v32 = vrot.slane %v1365_v25, 2  ;;  %v1259_v33 = vmax.f32 %v1206_v26, 0.0 }
 0x2e6   : > { %v1350_v62 = vrot.slane %v1349_v27, 1  ;;  %v1361_v30 = vmax.f32 %v1359_v22, %v1360_v29  ;;  %v1370_v63 = vrot.slane %v1258_v31, 4  ;;  %v1208_v34 = vadd.f32 %v1207_v20, %v2257_v38 }
 0x2e7   : > { %v1356_v35 = vrot.slane %v1355_v23, 1  ;;  %v1367_v36 = vmax.f32 %v1365_v25, %v1366_v32  ;;  %v1376_v37 = vrot.slane %v1259_v33, 4  ;;  %v1210_v39 = vadd.f32 %v1209_v12, %v2259_v13  ;;  %v1213_v41 = vpop.f32.mrb[44].mxu1 }
 0x2e8   : > { %v1351_v42 = vmax.f32 %v1349_v27, %v1350_v62  ;;  %v1362_v0 = vrot.slane %v1361_v30, 1  ;;  %v1371_v43 = vmax.f32 %v1258_v31, %v1370_v63  ;;  %v1260_v44 = vmax.f32 %v1208_v34, 0.0  ;;  %v1215_v21 = vpop.f32.mrb[45].mxu1 }
 0x2e9   : > { %v1357_v46 = vmax.f32 %v1355_v23, %v1356_v35  ;;  %v1368_v48 = vrot.slane %v1367_v36, 1  ;;  %v1377_v28 = vmax.f32 %v1259_v33, %v1376_v37  ;;  %v1261_v49 = vmax.f32 %v1210_v39, 0.0  ;;  %v1217_v50 = vpop.f32.mrb[46].mxu1 }
 0x2ea   : > { %v1509_v51 = vsel %vm1508_vm8, %v1351_v42, %v1507_v60  ;;  %v1363_v52 = vmax.f32 %v1361_v30, %v1362_v0  ;;  %v1372_v54 = vrot.slane %v1371_v43, 2  ;;  %v1382_v1 = vrot.slane %v1260_v44, 4  ;;  %v1219_v2 = vpop.f32.mrb[47].mxu1 }
 0x2eb   : > { %v1517_v3 = vsel %vm1508_vm8, %v1357_v46, %v1516_v61  ;;  %v1369_v4 = vmax.f32 %v1367_v36, %v1368_v48  ;;  %v1378_v40 = vrot.slane %v1377_v28, 2  ;;  %v1388_v5 = vrot.slane %v1261_v49, 4 }
 0x2ec   : > { %v1511_v7 = vsel %vm1510_vm9, %v1363_v52, %v1509_v51  ;;  %v1373_v47 = vmax.f32 %v1371_v43, %v1372_v54  ;;  %v1383_v10 = vmax.f32 %v1260_v44, %v1382_v1  ;;  %v1214_v11 = vadd.f32 %v1213_v41, %v2257_v38 }
 0x2ed   : > { %1537 = vst [vmem:[%s2306_s15] sm:$0xff] %v1511_v7  ;;  %v1518_v9 = vsel %vm1510_vm9, %v1369_v4, %v1517_v3  ;;  %v1379_v8 = vmax.f32 %v1377_v28, %v1378_v40  ;;  %v1389_v53 = vmax.f32 %v1261_v49, %v1388_v5  ;;  %v1216_v14 = vadd.f32 %v1215_v21, %v2259_v13 }
 0x2ee   : > { %1538 = vst [vmem:[%s2306_s15 + $0x8] sm:$0xff] %v1518_v9  ;;  %v1374_v55 = vrot.slane %v1373_v47, 1  ;;  %v1384_v15 = vrot.slane %v1383_v10, 2  ;;  %v1262_v45 = vmax.f32 %v1214_v11, 0.0  ;;  %v1218_v16 = vadd.f32 %v1217_v50, %v2257_v38 }
 0x2ef   : > { %v1380_v17 = vrot.slane %v1379_v8, 1  ;;  %v1390_v56 = vrot.slane %v1389_v53, 2  ;;  %v1263_v18 = vmax.f32 %v1216_v14, 0.0  ;;  %v1220_v19 = vadd.f32 %v1219_v2, %v2259_v13  ;;  %v1223_v20 = vpop.f32.mrb[48].mxu1 }
 0x2f0   : > { %v1375_v57 = vmax.f32 %v1373_v47, %v1374_v55  ;;  %v1385_v6 = vmax.f32 %v1383_v10, %v1384_v15  ;;  %v1394_v22 = vrot.slane %v1262_v45, 4  ;;  %v1264_v58 = vmax.f32 %v1218_v16, 0.0  ;;  %v1225_v12 = vpop.f32.mrb[49].mxu1 }
 0x2f1   : > { %v1381_v59 = vmax.f32 %v1379_v8, %v1380_v17  ;;  %v1391_v24 = vmax.f32 %v1389_v53, %v1390_v56  ;;  %v1400_v25 = vrot.slane %v1263_v18, 4  ;;  %v1265_v26 = vmax.f32 %v1220_v19, 0.0  ;;  %v1227_v60 = vpop.f32.mrb[50].mxu1 }
 0x2f2   : > { %v1386_v27 = vrot.slane %v1385_v6, 1  ;;  %v1395_v29 = vmax.f32 %v1262_v45, %v1394_v22  ;;  %v1406_v31 = vrot.slane %v1264_v58, 4  ;;  %v1224_v61 = vadd.f32 %v1223_v20, %v2257_v38  ;;  %v1229_v23 = vpop.f32.mrb[51].mxu1 }
 0x2f3   : > { %v1392_v32 = vrot.slane %v1391_v24, 1  ;;  %v1401_v33 = vmax.f32 %v1263_v18, %v1400_v25  ;;  %v1412_v62 = vrot.slane %v1265_v26, 4  ;;  %v1226_v30 = vadd.f32 %v1225_v12, %v2259_v13 }
 0x2f4   : > { %v1387_v63 = vmax.f32 %v1385_v6, %v1386_v27  ;;  %v1396_v34 = vrot.slane %v1395_v29, 2  ;;  %v1407_v35 = vmax.f32 %v1264_v58, %v1406_v31  ;;  %v1266_v36 = vmax.f32 %v1224_v61, 0.0 }
 0x2f5   : > { %v1393_v37 = vmax.f32 %v1391_v24, %v1392_v32  ;;  %v1402_v39 = vrot.slane %v1401_v33, 2  ;;  %v1413_v41 = vmax.f32 %v1265_v26, %v1412_v62  ;;  %v1267_v42 = vmax.f32 %v1226_v30, 0.0 }
 0x2f6   : > { %v1519_v0 = vsel %vm1498_vm3, %v1387_v63, %v1375_v57  ;;  %v1397_v43 = vmax.f32 %v1395_v29, %v1396_v34  ;;  %v1408_v44 = vrot.slane %v1407_v35, 2  ;;  %v1418_v21 = vrot.slane %v1266_v36, 4 }
 0x2f7   : > { %v1526_v46 = vsel %vm1498_vm3, %v1393_v37, %v1381_v59  ;;  %v1403_v48 = vmax.f32 %v1401_v33, %v1402_v39  ;;  %v1414_v28 = vrot.slane %v1413_v41, 2  ;;  %v1424_v49 = vrot.slane %v1267_v42, 4  ;;  %v1233_v50 = vpop.f32.mrb[52].mxu1 }
 0x2f8   : > { %v1398_v51 = vrot.slane %v1397_v43, 1  ;;  %v1409_v52 = vmax.f32 %v1407_v35, %v1408_v44  ;;  %v1419_v54 = vmax.f32 %v1266_v36, %v1418_v21  ;;  %v1228_v1 = vadd.f32 %v1227_v60, %v2257_v38  ;;  %v1235_v2 = vpop.f32.mrb[53].mxu1 }
 0x2f9   : > { %v1404_v3 = vrot.slane %v1403_v48, 1  ;;  %v1415_v4 = vmax.f32 %v1413_v41, %v1414_v28  ;;  %v1425_v40 = vmax.f32 %v1267_v42, %v1424_v49  ;;  %v1230_v5 = vadd.f32 %v1229_v23, %v2259_v13  ;;  %v1237_v7 = vpop.f32.mrb[54].mxu1 }
 0x2fa   : > { %v1399_v47 = vmax.f32 %v1397_v43, %v1398_v51  ;;  %v1410_v10 = vrot.slane %v1409_v52, 1  ;;  %v1420_v11 = vrot.slane %v1419_v54, 2  ;;  %v1268_v9 = vmax.f32 %v1228_v1, 0.0  ;;  %v1239_v8 = vpop.f32.mrb[55].mxu1 }
 0x2fb   : > { %v1405_v53 = vmax.f32 %v1403_v48, %v1404_v3  ;;  %v1416_v14 = vrot.slane %v1415_v4, 1  ;;  %v1426_v55 = vrot.slane %v1425_v40, 2  ;;  %v1269_v15 = vmax.f32 %v1230_v5, 0.0 }
 0x2fc   : > { %v1520_v45 = vsel %vm1500_vm4, %v1399_v47, %v1519_v0  ;;  %v1411_v16 = vmax.f32 %v1409_v52, %v1410_v10  ;;  %v1421_v17 = vmax.f32 %v1419_v54, %v1420_v11  ;;  %v1430_v56 = vrot.slane %v1268_v9, 4 }
 0x2fd   : > { %v1527_v18 = vsel %vm1500_vm4, %v1405_v53, %v1526_v46  ;;  %v1417_v19 = vmax.f32 %v1415_v4, %v1416_v14  ;;  %v1427_v20 = vmax.f32 %v1425_v40, %v1426_v55  ;;  %v1436_v57 = vrot.slane %v1269_v15, 4 }
 0x2fe   : > { %v1521_v6 = vsel %vm1502_vm5, %v1411_v16, %v1520_v45  ;;  %v1422_v22 = vrot.slane %v1421_v17, 1  ;;  %v1431_v58 = vmax.f32 %v1268_v9, %v1430_v56  ;;  %v1234_v12 = vadd.f32 %v1233_v50, %v2257_v38 }
 0x2ff   : > { %v1528_v59 = vsel %vm1502_vm5, %v1417_v19, %v1527_v18  ;;  %v1428_v24 = vrot.slane %v1427_v20, 1  ;;  %v1437_v25 = vmax.f32 %v1269_v15, %v1436_v57  ;;  %v1236_v26 = vadd.f32 %v1235_v2, %v2259_v13 }
 0x300   : > { %v1423_v60 = vmax.f32 %v1421_v17, %v1422_v22  ;;  %v1432_v27 = vrot.slane %v1431_v58, 2  ;;  %v1270_v29 = vmax.f32 %v1234_v12, 0.0  ;;  %v1238_v31 = vadd.f32 %v1237_v7, %v2257_v38 }
 0x301   : > { %v1429_v61 = vmax.f32 %v1427_v20, %v1428_v24  ;;  %v1438_v23 = vrot.slane %v1437_v25, 2  ;;  %v1271_v32 = vmax.f32 %v1236_v26, 0.0  ;;  %v1240_v33 = vadd.f32 %v1239_v8, %v2259_v13 }
 0x302   : > { %v1522_v62 = vsel %vm1504_vm6, %v1423_v60, %v1521_v6  ;;  %v1433_v30 = vmax.f32 %v1431_v58, %v1432_v27  ;;  %v1442_v63 = vrot.slane %v1270_v29, 4  ;;  %v1272_v34 = vmax.f32 %v1238_v31, 0.0 }
 0x303   : > { %v1529_v35 = vsel %vm1504_vm6, %v1429_v61, %v1528_v59  ;;  %v1439_v36 = vmax.f32 %v1437_v25, %v1438_v23  ;;  %v1448_v37 = vrot.slane %v1271_v32, 4  ;;  %v1273_v39 = vmax.f32 %v1240_v33, 0.0 }
 0x304   : > { %v1434_v41 = vrot.slane %v1433_v30, 1  ;;  %v1443_v42 = vmax.f32 %v1270_v29, %v1442_v63  ;;  %v1454_v0 = vrot.slane %v1272_v34, 4 }
 0x305   : > { %v1440_v43 = vrot.slane %v1439_v36, 1  ;;  %v1449_v38 = vmax.f32 %v1271_v32, %v1448_v37  ;;  %v1460_v44 = vrot.slane %v1273_v39, 4 }
 0x306   : > { %v1435_v21 = vmax.f32 %v1433_v30, %v1434_v41  ;;  %v1444_v46 = vrot.slane %v1443_v42, 2  ;;  %v1455_v48 = vmax.f32 %v1272_v34, %v1454_v0 }
 0x307   : > { %v1441_v13 = vmax.f32 %v1439_v36, %v1440_v43  ;;  %v1450_v28 = vrot.slane %v1449_v38, 2  ;;  %v1461_v49 = vmax.f32 %v1273_v39, %v1460_v44 }
 0x308   : > { %v1523_v50 = vsel %vm1506_vm7, %v1435_v21, %v1522_v62  ;;  %v1445_v51 = vmax.f32 %v1443_v42, %v1444_v46  ;;  %v1456_v52 = vrot.slane %v1455_v48, 2 }
 0x309   : > { %v1530_v54 = vsel %vm1506_vm7, %v1441_v13, %v1529_v35  ;;  %v1451_v1 = vmax.f32 %v1449_v38, %v1450_v28  ;;  %v1462_v2 = vrot.slane %v1461_v49, 2 }
 0x30a   : > { %v1446_v3 = vrot.slane %v1445_v51, 1  ;;  %v1457_v4 = vmax.f32 %v1455_v48, %v1456_v52 }
 0x30b   : > { %v1452_v40 = vrot.slane %v1451_v1, 1  ;;  %v1463_v5 = vmax.f32 %v1461_v49, %v1462_v2 }
 0x30c   : > { %v1447_v7 = vmax.f32 %v1445_v51, %v1446_v3  ;;  %v1458_v47 = vrot.slane %v1457_v4, 1 }
 0x30d   : > { %v1453_v10 = vmax.f32 %v1451_v1, %v1452_v40  ;;  %v1464_v11 = vrot.slane %v1463_v5, 1 }
 0x30e   : > { %v1524_v9 = vsel %vm1508_vm8, %v1447_v7, %v1523_v50  ;;  %v1459_v8 = vmax.f32 %v1457_v4, %v1458_v47 }
 0x30f   : > { %v1531_v53 = vsel %vm1508_vm8, %v1453_v10, %v1530_v54  ;;  %v1465_v14 = vmax.f32 %v1463_v5, %v1464_v11 }
 0x310   : > { %v1525_v55 = vsel %vm1510_vm9, %v1459_v8, %v1524_v9 }
 0x311   : > { %1539 = vst [vmem:[%s2306_s15 + $0x10] sm:$0xff] %v1525_v55  ;;  %v1532_v15 = vsel %vm1510_vm9, %v1465_v14, %v1531_v53 }
 0x312   : > { %1540 = vst [vmem:[%s2306_s15 + $0x18] sm:$0xff] %v1532_v15 }
 0x313 PF: > { %s17_s24 = sadd.s32 1, %s1940_s24  }
 0x314   : > { %p14_p5 = scmp.ge.s32.totalorder %s17_s24, 4  }
 0x316   :  { %16 = sbr.rel (!%p14_p5) target bundleno = 1 (0x1), region = 78 }

// kernel: backbone_forward.17
= control target key start
LH: loop header
LB: loop body
LE: loop exit
PB: predicated region body
PF: predicated region fallthrough
CT: control target
= control target key end

     0   :  { %s1503_s24 = smov 0   ;;  %s1749_s0 = inlined_call_operand.vmem [shape: bf16[128,259], index: 0, kind: input, shape index: {}]   ;;  %s1750_s1 = inlined_call_operand.vmem [shape: bf16[259,128], index: 1, kind: input, shape index: {}]   ;;  %s1751_s2 = inlined_call_operand.vmem [shape: f32[1,128], index: 2, kind: input, shape index: {}]   ;;  %s1752_s3 = inlined_call_operand.vmem [shape: bf16[128,128], index: 3, kind: input, shape index: {}]   ;;  %s1753_s4 = inlined_call_operand.vmem [shape: f32[1,128], index: 4, kind: input, shape index: {}]   ;;  %s1754_s5 = inlined_call_operand.vmem [shape: bf16[128,256], index: 5, kind: input, shape index: {}]   ;;  %s1755_s6 = inlined_call_operand.vmem [shape: f32[1,256], index: 6, kind: input, shape index: {}]   ;;  %s1756_s7 = inlined_call_operand.vmem [shape: f32[16,256], index: 7, kind: output, shape index: {}]  }
   0x1 LB: > { %s1509_s25 = sadd.s32 4294967295, %s1459_s24   ;;  %p1203_p0 = scmp.ge.s32.totalorder %s1459_s24, 1  ;;  %s1459_s24 = sphi %s1503_s24, %s17_s24  }
   0x2   : > { %p239_p1 = scmp.lt.s32.totalorder %s1459_s24, 3 }
   0x4   : > { %p240_p2 = pnand %p1203_p0, %p239_p1 }
   0x5   : > { %v1388_v0 = vld [vmem:[%s1750_s1 + $0x40] sm:$0xff] (!%p240_p2)   ;;  %s1204_s28 = sshll.u32 (!%p240_p2), %s1509_s25, 3  ;;  %v1390_v2 = vld [vmem:[%s1750_s1 + $0x48] sm:$0xff] (!%p240_p2)   ;;  %v1392_v4 = vld [vmem:[%s1750_s1 + $0x50] sm:$0xff] (!%p240_p2)   ;;  %vm513_vm0 = vcmask (!%p240_p2), 1040384   ;;  %vm514_vm1 = vcmask (!%p240_p2), 1041408  }
   0x6   : > { %243 = sbr.rel (%p240_p2) target bundleno = 752 (0x2f0), region = 48  ;;  %v1389_v1 = vld [vmem:[%s1750_s1] sm:$0xff] (!%p240_p2)   ;;  %1270 = vmatprep.subr.bf16.mxu0 (!%p240_p2), %v1388_v0  ;;  %p273_p3 = scmp.lt.s32.totalorder (!%p240_p2), %s1204_s28, 15  ;;  %v1391_v3 = vld [vmem:[%s1750_s1 + $0x8] sm:$0xff] (!%p240_p2)   ;;  %v1393_v5 = vld [vmem:[%s1750_s1 + $0x10] sm:$0xff] (!%p240_p2)   ;;  %v1461_v9 = vmov (!%p240_p2), 65535  }
   0x7   : > { %1271 = vmatpush3.bf16.msra.mxu0 (!%p240_p2), %v1389_v1  ;;  %v1394_v6 = vld [vmem:[%s1750_s1 + $0x58] sm:$0xff] (!%p240_p2)   ;;  %v1396_v8 = vld [vmem:[%s1750_s1 + $0x60] sm:$0xff] (!%p240_p2)   ;;  %v515_v10 = vsel (!%p240_p2), %vm513_vm0, 4294967295, %v1461_v9  ;;  %v1398_v12 = vld [vmem:[%s1750_s1 + $0x68] sm:$0xff] (!%p240_p2)   ;;  %vm500_vm2 = vcmask (!%p240_p2), 23552   ;;  %vm1119_vm3 = vcmask (!%p240_p2), 1041409  }
   0x8   : > { %1272 = vmatprep.subr.bf16.mxu0 (!%p240_p2), %v1390_v2  ;;  %v1395_v7 = vld [vmem:[%s1750_s1 + $0x18] sm:$0xff] (!%p240_p2)   ;;  %v1397_v11 = vld [vmem:[%s1750_s1 + $0x20] sm:$0xff] (!%p240_p2)   ;;  %v516_v13 = vsel (!%p240_p2), %vm514_vm1, %v515_v10, 0  ;;  %v1399_v14 = vld [vmem:[%s1750_s1 + $0x28] sm:$0xff] (!%p240_p2)   ;;  %vm1121_vm4 = vcmask (!%p240_p2), 1042434   ;;  %vm1123_vm5 = vcmask (!%p240_p2), 1043459  }
   0x9   : > { %v1407_v16 = vld [vmem:[%s1750_s1 + $0x80] ss:$0 sps:$4 sm:$0x33] (!%p240_p2)   ;;  %v1400_v18 = vld [vmem:[%s1750_s1 + $0x70] sm:$0xff] (!%p240_p2)   ;;  %v1402_v23 = vld [vmem:[%s1750_s1 + $0x78] sm:$0xff] (!%p240_p2)   ;;  %vm1125_vm6 = vcmask (!%p240_p2), 1044484  }
   0xa   : > { %v518_v19 = vand.u32 (!%p240_p2), %v1407_v16, %v516_v13  ;;  %v1401_v20 = vld [vmem:[%s1750_s1 + $0x30] sm:$0xff] (!%p240_p2)   ;;  %v1403_v24 = vld [vmem:[%s1750_s1 + $0x38] sm:$0xff] (!%p240_p2)   ;;  %v1421_v25 = vld [vmem:[%s1752_s3] sm:$0xff] (!%p240_p2)   ;;  %p279_p4 = scmp.lt.s32.totalorder (!%p240_p2), %s1509_s25, 1  ;;  %vm1127_vm7 = vcmask (!%p240_p2), 1045509   ;;  %vm1129_vm8 = vcmask (!%p240_p2), 1046534  }
   0xb   : > { %1273 = vmatpush3.bf16.msra.mxu0 (!%p240_p2), %v1391_v3  ;;  %v1422_v26 = vld [vmem:[%s1752_s3 + $0x8] sm:$0xff] (!%p240_p2)   ;;  %v1423_v30 = vld [vmem:[%s1752_s3 + $0x10] sm:$0xff] (!%p240_p2)   ;;  %v1424_v36 = vld [vmem:[%s1752_s3 + $0x18] sm:$0xff] (!%p240_p2)   ;;  %vm1131_vm9 = vcmask (!%p240_p2), 1047559  }
   0xc   : > { %1274 = vmatprep.subr.bf16.mxu0 (!%p240_p2), %v1392_v4  ;;  %1327 = vmatprep.subr.bf16.mxu1 (!%p240_p2), %v518_v19  ;;  %v1425_v37 = vld [vmem:[%s1752_s3 + $0x20] sm:$0xff] (!%p240_p2)   ;;  %v1426_v38 = vld [vmem:[%s1752_s3 + $0x28] sm:$0xff] (!%p240_p2)   ;;  %v1427_v39 = vld [vmem:[%s1752_s3 + $0x30] sm:$0xff] (!%p240_p2)  }
   0xd   : > { %s1758_s28 = smov (!%p273_p3, %s1204_s28), 15  ;;  %1328 = vmatpush3.bf16.msra.mxu1 %v518_v19  ;;  %v1428_v40 = vld [vmem:[%s1752_s3 + $0x38] sm:$0xff]   ;;  %v1613_v41 = vld [vmem:[%s1754_s5] ss:$8 sps:$4 sm:$0xff]   ;;  %v1431_v42 = vld [vmem:[%s1754_s5 + $0x4] ss:$8 sps:$4 sm:$0xff]  }
   0xe   : > { %s1377_s18 = smul.u32 12, %s1758_s28  ;;  %1337 = vmatprep.subr.bf16.mxu1 %v1421_v25  ;;  %v1621_v43 = vld [vmem:[%s1754_s5 + $0x14] ss:$8 sps:$4 sm:$0xff]   ;;  %v1627_v44 = vld [vmem:[%s1754_s5 + $0x10] ss:$8 sps:$4 sm:$0xff]   ;;  %s1760_s25 = smov (!%p279_p4, %s1509_s25), 1 }
   0xf   : > { %1275 = vmatpush3.bf16.msra.mxu0 %v1393_v5  ;;  %v1633_v45 = vld [vmem:[%s1754_s5 + $0x24] ss:$8 sps:$4 sm:$0xff]   ;;  %v1639_v46 = vld [vmem:[%s1754_s5 + $0x20] ss:$8 sps:$4 sm:$0xff]   ;;  %v1645_v47 = vld [vmem:[%s1754_s5 + $0x34] ss:$8 sps:$4 sm:$0xff]  }
  0x10   : > { %1276 = vmatprep.subr.bf16.mxu0 %v1394_v6  ;;  %s1544_s27 = scalar_lea.vmem %s1749_s0, %s1377_s18  ;;  %v1651_v48 = vld [vmem:[%s1754_s5 + $0x30] ss:$8 sps:$4 sm:$0xff]   ;;  %v1657_v49 = vld [vmem:[%s1754_s5 + $0x44] ss:$8 sps:$4 sm:$0xff]   ;;  %v1663_v50 = vld [vmem:[%s1754_s5 + $0x40] ss:$8 sps:$4 sm:$0xff]  }
  0x11   : > { %v1406_v15 = vld [vmem:[%s1544_s27 + $0x4] ss:$12 sps:$4 sm:$0xff]   ;;  %v1408_v17 = vld [vmem:[%s1544_s27 + $0x8] ss:$12 sps:$4 sm:$0xff]   ;;  %v1409_v21 = vld [vmem:[%s1544_s27 + $0x20] ss:$12 sps:$4 sm:$0xff]  }
  0x12   : > { %552 = vmatprep.mubr.bf16.mxu0 %v1406_v15  ;;  %1329 = vmatprep.mubr.msk.bf16.mxu1 %vm500_vm2, %v1408_v17  ;;  %v1416_v22 = vld [vmem:[%s1544_s27 + $0x38] ss:$12 sps:$4 sm:$0xff]   ;;  %v1404_v27 = vld [vmem:[%s1544_s27] ss:$12 sps:$4 sm:$0xff]   ;;  %v1417_v28 = vld [vmem:[%s1544_s27 + $0x50] ss:$12 sps:$4 sm:$0xff]  }
  0x13   : > { %1277 = vmatpush3.bf16.msra.mxu0 %v1395_v7  ;;  %1330 = vmatmul.mubr.msk.bf16.vlgmr.msra.gmra.mrb[0].mxu1 %vm500_vm2, %v1409_v21  ;;  %v1410_v29 = vld [vmem:[%s1544_s27 + $0x1c] ss:$12 sps:$4 sm:$0xff]   ;;  %v1412_v31 = vld [vmem:[%s1544_s27 + $0x18] ss:$12 sps:$4 sm:$0xff]   ;;  %v1413_v32 = vld [vmem:[%s1544_s27 + $0x34] ss:$12 sps:$4 sm:$0xff]  }
  0x14   : > { %1278 = vmatprep.subr.bf16.mxu0 %v1396_v8  ;;  %1333 = vmatprep.mubr.msk.bf16.mxu1 %vm500_vm2, %v1416_v22  ;;  %v1415_v33 = vld [vmem:[%s1544_s27 + $0x30] ss:$12 sps:$4 sm:$0xff]   ;;  %v1418_v34 = vld [vmem:[%s1544_s27 + $0x4c] ss:$12 sps:$4 sm:$0xff]   ;;  %v1420_v35 = vld [vmem:[%s1544_s27 + $0x48] ss:$12 sps:$4 sm:$0xff]  }
  0x15   : > { %1338 = vmatpush3.bf16.msra.mxu1 %v1421_v25  ;;  %v1669_v51 = vld [vmem:[%s1754_s5 + $0x54] ss:$8 sps:$4 sm:$0xff]   ;;  %v1675_v52 = vld [vmem:[%s1754_s5 + $0x50] ss:$8 sps:$4 sm:$0xff]   ;;  %v1208_v60 = vld [vmem:[%s1751_s2] ss:$0 sm:$0xff] }
  0x16   : > { %1339 = vmatprep.subr.bf16.mxu1 %v1422_v26  ;;  %s1269_s27 = sshll.u32 %s1760_s25, 4 }
  0x17   : > { %1279 = vmatpush3.bf16.msra.mxu0 %v1397_v11  ;;  %s283_s15 = scalar_lea.vmem %s1756_s7, %s1269_s27 }
  0x18   : > { %1280 = vmatprep.subr.bf16.mxu0 %v1398_v12 }
  0x19   : > { %1340 = vmatpush3.bf16.msra.mxu1 %v1422_v26 }
  0x1a   : > { %1341 = vmatprep.subr.bf16.mxu1 %v1423_v30 }
  0x1b   : > { %1281 = vmatpush3.bf16.msra.mxu0 %v1399_v14  ;;  %1334 = vmatmul.mubr.msk.bf16.gmra.mrb[4].mxu1 %vm500_vm2, %v1417_v28 }
  0x1c   : > { %1282 = vmatprep.subr.bf16.mxu0 %v1400_v18 }
  0x1d   : > { %1342 = vmatpush3.bf16.msra.mxu1 %v1423_v30 }
  0x1e   : > { %1343 = vmatprep.subr.bf16.mxu1 %v1424_v36 }
  0x1f   : > { %1283 = vmatpush3.bf16.msra.mxu0 %v1401_v20 }
  0x20   : > { %1284 = vmatprep.subr.bf16.mxu0 %v1402_v23 }
  0x21   : > { %1344 = vmatpush3.bf16.msra.mxu1 %v1424_v36 }
  0x22   : > { %1345 = vmatprep.subr.bf16.mxu1 %v1425_v37 }
  0x23   : > { %1285 = vmatpush3.bf16.msra.mxu0 %v1403_v24 }
  0x24   : > { %918 = vmatprep.subr.bf16.mxu0 %v1431_v42 }
  0x25   : > { %1346 = vmatpush3.bf16.msra.mxu1 %v1425_v37 }
  0x26   : > { %553 = vmatmul.mubr.bf16.vlgmr.msra.gmra.mrb[0].mxu0 %v1404_v27  ;;  %1347 = vmatprep.subr.bf16.mxu1 %v1426_v38 }
  0x27   : > { %560 = vmatprep.mubr.bf16.mxu0 %v1410_v29  ;;  %919 = vmatpush1.bf16.msra.mxu0 %v1613_v41 }
  0x28   : > { %920 = vmatprep.subr.bf16.mxu0 %v1621_v43 }
  0x29   : > { %1348 = vmatpush3.bf16.msra.mxu1 %v1426_v38 }
  0x2a   : > { %1349 = vmatprep.subr.bf16.mxu1 %v1427_v39 }
  0x2b   : > { %921 = vmatpush1.bf16.msra.mxu0 %v1627_v44 }
  0x2c   : > { %922 = vmatprep.subr.bf16.mxu0 %v1633_v45 }
  0x2d   : > { %1350 = vmatpush3.bf16.msra.mxu1 %v1427_v39 }
  0x2e   : > { %561 = vmatmul.mubr.bf16.gmra.mrb[4].mxu0 %v1412_v31  ;;  %1351 = vmatprep.subr.bf16.mxu1 %v1428_v40 }
  0x2f   : > { %568 = vmatprep.mubr.bf16.mxu0 %v1413_v32  ;;  %923 = vmatpush1.bf16.msra.mxu0 %v1639_v46 }
  0x30   : > { %924 = vmatprep.subr.bf16.mxu0 %v1645_v47 }
  0x31   : > { %1352 = vmatpush3.bf16.msra.mxu1 %v1428_v40 }
  0x32   : > { %1361 = vmatprep.subr.bf16.mxu1 %v1431_v42 }
  0x33   : > { %925 = vmatpush1.bf16.msra.mxu0 %v1651_v48 }
  0x34   : > { %926 = vmatprep.subr.bf16.mxu0 %v1657_v49 }
  0x36   : > { %569 = vmatmul.mubr.bf16.gmra.mrb[8].mxu0 %v1415_v33 }
  0x37   : > { %576 = vmatprep.mubr.bf16.mxu0 %v1418_v34  ;;  %927 = vmatpush1.bf16.msra.mxu0 %v1663_v50 }
  0x38   : > { %928 = vmatprep.subr.bf16.mxu0 %v1669_v51 }
  0x3b   : > { %929 = vmatpush1.bf16.msra.mxu0 %v1675_v52 }
  0x3e   : > { %577 = vmatmul.mubr.bf16.gmra.mrb[12].mxu0 %v1420_v35 }
  0xe6   : > { %v1331_v53 = vpop.f32.mrb[0].mxu1 }
  0xe7   : > { %v619_v54 = vpop.f32.mrb[1].mxu1 }
  0xe8   : > { %v1332_v55 = vpop.f32.mrb[2].mxu1 }
  0xe9   : > { %v622_v56 = vpop.f32.mrb[3].mxu1 }
  0xee   : > { %v1335_v58 = vpop.f32.mrb[4].mxu1 }
  0xef   : > { %v635_v61 = vpop.f32.mrb[5].mxu1 }
  0xf0   : > { %v1336_v0 = vpop.f32.mrb[6].mxu1 }
  0xf1   : > { %v638_v2 = vpop.f32.mrb[7].mxu1 }
  0xf9   : > { %v1286_v57 = vpop.f32.mrb[0].mxu0 }
  0xfa   : > { %v1287_v59 = vpop.f32.mrb[1].mxu0 }
  0xfb   : > { %v1288_v62 = vadd.f32 %v1287_v59, %v1286_v57  ;;  %v1289_v63 = vpop.f32.mrb[2].mxu0 }
  0xfc   : > { %v1290_v1 = vpop.f32.mrb[3].mxu0 }
  0xfd   : > { %v1291_v3 = vadd.f32 %v1290_v1, %v1289_v63  ;;  %v555_v4 = vadd.f32 %v1288_v62, %v1208_v60 }
  0xff   : > { %v620_v5 = vadd.f32 %v619_v54, %v555_v4  ;;  %v558_v6 = vadd.f32 %v1291_v3, %v1208_v60 }
 0x101   : > { %v623_v7 = vadd.f32 %v622_v56, %v558_v6  ;;  %v1292_v8 = vpop.f32.mrb[4].mxu0  ;;  %v650_v10 = vmax.f32 %v620_v5, 0.0 }
 0x102   : > { %v1293_v9 = vpop.f32.mrb[5].mxu0 }
 0x103   : > { %v651_v11 = vmax.f32 %v623_v7, 0.0  ;;  %v1294_v12 = vadd.f32 %v1293_v9, %v1292_v8  ;;  %v1295_v13 = vpop.f32.mrb[6].mxu0 }
 0x104   : > { %v1296_v14 = vpop.f32.mrb[7].mxu0 }
 0x105   : > { %v675_v15 = vpack.c.bf16 %v651_v11, %v650_v10  ;;  %v563_v16 = vadd.f32 %v1294_v12, %v1208_v60  ;;  %v1297_v17 = vadd.f32 %v1296_v14, %v1295_v13 }
 0x107   : > { %v628_v18 = vadd.f32 %v1331_v53, %v563_v16  ;;  %v566_v19 = vadd.f32 %v1297_v17, %v1208_v60  ;;  %1353 = vmatprep.mubr.bf16.mxu1 %v675_v15 }
 0x109   : > { %v631_v20 = vadd.f32 %v1332_v55, %v566_v19  ;;  %v1298_v21 = vpop.f32.mrb[8].mxu0  ;;  %v652_v23 = vmax.f32 %v628_v18, 0.0 }
 0x10a   : > { %v1299_v22 = vpop.f32.mrb[9].mxu0 }
 0x10b   : > { %v653_v24 = vmax.f32 %v631_v20, 0.0  ;;  %v1300_v25 = vadd.f32 %v1299_v22, %v1298_v21  ;;  %v1301_v26 = vpop.f32.mrb[10].mxu0  ;;  %v828_v20 = vlaneseq }
 0x10c   : > { %v1302_v27 = vpop.f32.mrb[11].mxu0 }
 0x10d   : > { %v676_v28 = vpack.c.bf16 %v653_v24, %v652_v23  ;;  %v1303_v29 = vadd.f32 %v1302_v27, %v1301_v26  ;;  %v571_v30 = vadd.f32 %v1300_v25, %v1208_v60  ;;  %v829_v21 = vshrl.u32 %v828_v20, 7  ;;  %v822_v23 = vld [vmem:[%s1755_s6] sm:$0x3] }
 0x10f   : > { %v636_v31 = vadd.f32 %v635_v61, %v571_v30  ;;  %1354 = vmatmul.mubr.bf16.vlgmr.msra.gmra.mrb[8].mxu1 %v676_v28  ;;  %v574_v32 = vadd.f32 %v1303_v29, %v1208_v60  ;;  %v830_v22 = vsub.s32 0, %v829_v21  ;;  %v834_v24 = vsub.s32 1, %v829_v21 }
 0x110   : > { %1369 = vmatpush1.bf16.msra.mxu1 %v1613_v41 }
 0x111   : > { %v639_v33 = vadd.f32 %v638_v2, %v574_v32  ;;  %v1304_v34 = vpop.f32.mrb[12].mxu0  ;;  %1362 = vmatprep.subr.bf16.mxu1 %v1621_v43  ;;  %v654_v36 = vmax.f32 %v636_v31, 0.0  ;;  %v1711_v25 = vrot.slane %v822_v23, %v830_v22  ;;  %v1713_v26 = vrot.slane %v822_v23, %v834_v24 }
 0x112   : > { %v1305_v35 = vpop.f32.mrb[13].mxu0 }
 0x113   : > { %v655_v37 = vmax.f32 %v639_v33, 0.0  ;;  %v1306_v38 = vadd.f32 %v1305_v35, %v1304_v34  ;;  %v1307_v39 = vpop.f32.mrb[14].mxu0 }
 0x114   : > { %v1308_v40 = vpop.f32.mrb[15].mxu0  ;;  %1370 = vmatpush1.bf16.msra.mxu1 %v1627_v44  ;;  %v1449_v44 = vld [vmem:[%s1754_s5 + $0x64] ss:$8 sps:$4 sm:$0xff]  }
 0x115   : > { %v677_v42 = vpack.c.bf16 %v655_v37, %v654_v36  ;;  %v579_v53 = vadd.f32 %v1306_v38, %v1208_v60  ;;  %v1309_v54 = vadd.f32 %v1308_v40, %v1307_v39  ;;  %1363 = vmatprep.subr.bf16.mxu1 %v1633_v45  ;;  %v1447_v45 = vld [vmem:[%s1754_s5 + $0x60] ss:$8 sps:$4 sm:$0xff]   ;;  %930 = vmatprep.subr.bf16.mxu0 %v1449_v44 }
 0x116   : > { %931 = vmatpush1.bf16.msra.mxu0 %v1447_v45 }
 0x117   : > { %v644_v55 = vadd.f32 %v1335_v58, %v579_v53  ;;  %v582_v56 = vadd.f32 %v1309_v54, %v1208_v60  ;;  %1357 = vmatprep.mubr.bf16.mxu1 %v677_v42 }
 0x118   : > { %1371 = vmatpush1.bf16.msra.mxu1 %v1639_v46  ;;  %v1452_v46 = vld [vmem:[%s1754_s5 + $0x74] ss:$8 sps:$4 sm:$0xff]  }
 0x119   : > { %v647_v41 = vadd.f32 %v1336_v0, %v582_v56  ;;  %1364 = vmatprep.subr.bf16.mxu1 %v1645_v47  ;;  %v656_v43 = vmax.f32 %v644_v55, 0.0  ;;  %v1450_v47 = vld [vmem:[%s1754_s5 + $0x70] ss:$8 sps:$4 sm:$0xff]   ;;  %932 = vmatprep.subr.bf16.mxu0 %v1452_v46 }
 0x11a   : > { %933 = vmatpush1.bf16.msra.mxu0 %v1450_v47 }
 0x11b   : > { %v657_v57 = vmax.f32 %v647_v41, 0.0 }
 0x11c   : > { %1372 = vmatpush1.bf16.msra.mxu1 %v1651_v48  ;;  %v1462_v48 = vmov 0  }
 0x11d   : > { %v678_v59 = vpack.c.bf16 %v657_v57, %v656_v43  ;;  %1365 = vmatprep.subr.bf16.mxu1 %v1657_v49  ;;  %950 = vmatprep.mubr.bf16.mxu0 %v1462_v48  ;;  %v1242_v49 = vld [vmem:[%s1753_s4] ss:$0 sm:$0xff] }
 0x11f   : > { %1358 = vmatmul.mubr.bf16.gmra.mrb[12].mxu1 %v678_v59 }
 0x120   : > { %1373 = vmatpush1.bf16.msra.mxu1 %v1663_v50  ;;  %980 = vmatprep.mubr.bf16.mxu1 %v1462_v48 }
 0x121   : > { %1366 = vmatprep.subr.bf16.mxu1 %v1669_v51 }
 0x124   : > { %1374 = vmatpush1.bf16.msra.mxu1 %v1675_v52 }
 0x125   : > { %1367 = vmatprep.subr.bf16.mxu1 %v1449_v44 }
 0x128   : > { %1375 = vmatpush1.bf16.msra.mxu1 %v1447_v45 }
 0x129   : > { %1368 = vmatprep.subr.bf16.mxu1 %v1452_v46 }
 0x12c   : > { %1376 = vmatpush1.bf16.msra.mxu1 %v1450_v47 }
 0x1e2   : > { %v1355_v50 = vpop.f32.mrb[8].mxu1 }
 0x1e3   : > { %v776_v51 = vadd.f32 %v1355_v50, %v1242_v49  ;;  %v767_v52 = vpop.f32.mrb[9].mxu1 }
 0x1e4   : > { %v768_v58 = vadd.f32 %v1242_v49, %v767_v52  ;;  %v1356_v60 = vpop.f32.mrb[10].mxu1 }
 0x1e5   : > { %v779_v61 = vadd.f32 %v1356_v60, %v1242_v49  ;;  %v770_v62 = vpop.f32.mrb[11].mxu1  ;;  %v800_v0 = vmax.f32 %v776_v51, 0.0 }
 0x1e6   : > { %v771_v63 = vadd.f32 %v1242_v49, %v770_v62  ;;  %v798_v2 = vmax.f32 %v768_v58, 0.0 }
 0x1e7   : > { %v801_v1 = vmax.f32 %v779_v61, 0.0 }
 0x1e8   : > { %v799_v3 = vmax.f32 %v771_v63, 0.0 }
 0x1e9   : > { %v824_v4 = vpack.c.bf16 %v801_v1, %v800_v0 }
 0x1ea   : > { %v823_v5 = vpack.c.bf16 %v799_v3, %v798_v2 }
 0x1ec   : > { %951 = vmatmul.mubr.bf16.vlgmr.msra.gmra.mrb[16].mxu0 %v823_v5 }
 0x1ed   : > { %960 = vmatprep.mubr.bf16.mxu0 %v1462_v48 }
 0x1f2   : > { %v1359_v6 = vpop.f32.mrb[12].mxu1 }
 0x1f3   : > { %v792_v7 = vadd.f32 %v1359_v6, %v1242_v49  ;;  %v783_v8 = vpop.f32.mrb[13].mxu1 }
 0x1f4   : > { %v784_v9 = vadd.f32 %v1242_v49, %v783_v8  ;;  %v1360_v10 = vpop.f32.mrb[14].mxu1  ;;  %961 = vmatmul.mubr.bf16.gmra.mrb[20].mxu0 %v824_v4 }
 0x1f5   : > { %v795_v11 = vadd.f32 %v1360_v10, %v1242_v49  ;;  %v786_v12 = vpop.f32.mrb[15].mxu1  ;;  %970 = vmatprep.mubr.bf16.mxu0 %v1462_v48  ;;  %v804_v14 = vmax.f32 %v792_v7, 0.0 }
 0x1f6   : > { %v787_v13 = vadd.f32 %v1242_v49, %v786_v12  ;;  %v802_v16 = vmax.f32 %v784_v9, 0.0 }
 0x1f7   : > { %v805_v15 = vmax.f32 %v795_v11, 0.0 }
 0x1f8   : > { %v803_v17 = vmax.f32 %v787_v13, 0.0 }
 0x1f9   : > { %v826_v18 = vpack.c.bf16 %v805_v15, %v804_v14 }
 0x1fa   : > { %v825_v19 = vpack.c.bf16 %v803_v17, %v802_v16 }
 0x1fb   : > { %981 = vmatmul.mubr.bf16.vlgmr.msra.gmra.mrb[16].mxu1 %v826_v18 }
 0x1fc   : > { %971 = vmatmul.mubr.bf16.gmra.mrb[24].mxu0 %v825_v19 }
 0x2bf   : > { %v952_v27 = vpop.f32.mrb[16].mxu0 }
 0x2c0   : > { %v953_v28 = vadd.f32 %v952_v27, %v1711_v25  ;;  %v954_v29 = vpop.f32.mrb[17].mxu0 }
 0x2c1   : > { %v955_v30 = vadd.f32 %v954_v29, %v1713_v26  ;;  %v956_v31 = vpop.f32.mrb[18].mxu0 }
 0x2c2   : > { %v991_v32 = vmax.f32 %v953_v28, 0.0  ;;  %v957_v33 = vadd.f32 %v956_v31, %v1711_v25  ;;  %v958_v34 = vpop.f32.mrb[19].mxu0 }
 0x2c3   : > { %v992_v35 = vmax.f32 %v955_v30, 0.0  ;;  %v959_v36 = vadd.f32 %v958_v34, %v1713_v26 }
 0x2c4   : > { %v1007_v37 = vrot.slane %v991_v32, 4  ;;  %v993_v38 = vmax.f32 %v957_v33, 0.0 }
 0x2c5   : > { %v1013_v39 = vrot.slane %v992_v35, 4  ;;  %v994_v40 = vmax.f32 %v959_v36, 0.0 }
 0x2c6   : > { %v1008_v42 = vmax.f32 %v991_v32, %v1007_v37  ;;  %v1019_v53 = vrot.slane %v993_v38, 4 }
 0x2c7   : > { %v1014_v54 = vmax.f32 %v992_v35, %v1013_v39  ;;  %v1025_v55 = vrot.slane %v994_v40, 4  ;;  %v962_v56 = vpop.f32.mrb[20].mxu0 }
 0x2c8   : > { %v1009_v41 = vrot.slane %v1008_v42, 2  ;;  %v1020_v43 = vmax.f32 %v993_v38, %v1019_v53  ;;  %v963_v57 = vadd.f32 %v962_v56, %v1711_v25  ;;  %v964_v59 = vpop.f32.mrb[21].mxu0 }
 0x2c9   : > { %v1015_v44 = vrot.slane %v1014_v54, 2  ;;  %v1026_v45 = vmax.f32 %v994_v40, %v1025_v55  ;;  %v965_v46 = vadd.f32 %v964_v59, %v1713_v26  ;;  %v966_v47 = vpop.f32.mrb[22].mxu0 }
 0x2ca   : > { %v1010_v48 = vmax.f32 %v1008_v42, %v1009_v41  ;;  %v1021_v49 = vrot.slane %v1020_v43, 2  ;;  %v995_v50 = vmax.f32 %v963_v57, 0.0  ;;  %v967_v51 = vadd.f32 %v966_v47, %v1711_v25  ;;  %v968_v52 = vpop.f32.mrb[23].mxu0 }
 0x2cb   : > { %v1016_v58 = vmax.f32 %v1014_v54, %v1015_v44  ;;  %v1027_v60 = vrot.slane %v1026_v45, 2  ;;  %v996_v61 = vmax.f32 %v965_v46, 0.0  ;;  %v969_v62 = vadd.f32 %v968_v52, %v1713_v26 }
 0x2cc   : > { %v1011_v63 = vrot.slane %v1010_v48, 1  ;;  %v1022_v0 = vmax.f32 %v1020_v43, %v1021_v49  ;;  %v1031_v1 = vrot.slane %v995_v50, 4  ;;  %v997_v2 = vmax.f32 %v967_v51, 0.0 }
 0x2cd   : > { %v1017_v3 = vrot.slane %v1016_v58, 1  ;;  %v1028_v4 = vmax.f32 %v1026_v45, %v1027_v60  ;;  %v1037_v5 = vrot.slane %v996_v61, 4  ;;  %v998_v6 = vmax.f32 %v969_v62, 0.0 }
 0x2ce   : > { %v1012_v7 = vmax.f32 %v1010_v48, %v1011_v63  ;;  %v1023_v8 = vrot.slane %v1022_v0, 1  ;;  %v1032_v9 = vmax.f32 %v995_v50, %v1031_v1  ;;  %v1043_v10 = vrot.slane %v997_v2, 4  ;;  %v982_v11 = vpop.f32.mrb[16].mxu1 }
 0x2cf   : > { %v1018_v12 = vmax.f32 %v1016_v58, %v1017_v3  ;;  %v1029_v13 = vrot.slane %v1028_v4, 1  ;;  %v1038_v14 = vmax.f32 %v996_v61, %v1037_v5  ;;  %v1049_v15 = vrot.slane %v998_v6, 4  ;;  %v972_v16 = vpop.f32.mrb[24].mxu0  ;;  %v984_v17 = vpop.f32.mrb[17].mxu1 }
 0x2d0   : > { %v1024_v18 = vmax.f32 %v1022_v0, %v1023_v8  ;;  %v1033_v19 = vrot.slane %v1032_v9, 2  ;;  %v1044_v20 = vmax.f32 %v997_v2, %v1043_v10  ;;  %v983_v21 = vadd.f32 %v982_v11, %v1711_v25  ;;  %v974_v22 = vpop.f32.mrb[25].mxu0  ;;  %v986_v23 = vpop.f32.mrb[18].mxu1 }
 0x2d1   : > { %v1030_v24 = vmax.f32 %v1028_v4, %v1029_v13  ;;  %v1039_v27 = vrot.slane %v1038_v14, 2  ;;  %v1050_v28 = vmax.f32 %v998_v6, %v1049_v15  ;;  %v973_v29 = vadd.f32 %v972_v16, %v1711_v25  ;;  %v976_v30 = vpop.f32.mrb[26].mxu0  ;;  %v988_v31 = vpop.f32.mrb[19].mxu1 }
 0x2d2   : > { %v1120_v32 = vsel %vm1119_vm3, %v1024_v18, %v1012_v7  ;;  %v1034_v33 = vmax.f32 %v1032_v9, %v1033_v19  ;;  %v1045_v34 = vrot.slane %v1044_v20, 2  ;;  %v1003_v35 = vmax.f32 %v983_v21, 0.0  ;;  %v978_v36 = vpop.f32.mrb[27].mxu0 }
 0x2d3   : > { %v1133_v37 = vsel %vm1119_vm3, %v1030_v24, %v1018_v12  ;;  %v1040_v38 = vmax.f32 %v1038_v14, %v1039_v27  ;;  %v1051_v39 = vrot.slane %v1050_v28, 2  ;;  %v999_v40 = vmax.f32 %v973_v29, 0.0 }
 0x2d4   : > { %v1035_v42 = vrot.slane %v1034_v33, 1  ;;  %v1046_v53 = vmax.f32 %v1044_v20, %v1045_v34  ;;  %v985_v54 = vadd.f32 %v984_v17, %v1713_v26  ;;  %v975_v43 = vadd.f32 %v974_v22, %v1713_v26 }
 0x2d5   : > { %v1041_v55 = vrot.slane %v1040_v38, 1  ;;  %v1052_v56 = vmax.f32 %v1050_v28, %v1051_v39  ;;  %v1055_v41 = vrot.slane %v999_v40, 4  ;;  %v1079_v44 = vrot.slane %v1003_v35, 4 }
 0x2d6   : > { %v1036_v57 = vmax.f32 %v1034_v33, %v1035_v42  ;;  %v1047_v59 = vrot.slane %v1046_v53, 1  ;;  %v1004_v45 = vmax.f32 %v985_v54, 0.0  ;;  %v1000_v49 = vmax.f32 %v975_v43, 0.0 }
 0x2d7   : > { %v1042_v46 = vmax.f32 %v1040_v38, %v1041_v55  ;;  %v1053_v47 = vrot.slane %v1052_v56, 1  ;;  %v1056_v48 = vmax.f32 %v999_v40, %v1055_v41  ;;  %v1080_v0 = vmax.f32 %v1003_v35, %v1079_v44 }
 0x2d8   : > { %v1122_v50 = vsel %vm1121_vm4, %v1036_v57, %v1120_v32  ;;  %v1048_v51 = vmax.f32 %v1046_v53, %v1047_v59  ;;  %v1085_v52 = vrot.slane %v1004_v45, 4  ;;  %v1061_v62 = vrot.slane %v1000_v49, 4 }
 0x2d9   : > { %v1134_v58 = vsel %vm1121_vm4, %v1042_v46, %v1133_v37  ;;  %v1054_v60 = vmax.f32 %v1052_v56, %v1053_v47  ;;  %v1057_v61 = vrot.slane %v1056_v48, 2  ;;  %v987_v1 = vadd.f32 %v986_v23, %v1711_v25 }
 0x2da   : > { %v1124_v63 = vsel %vm1123_vm5, %v1048_v51, %v1122_v50  ;;  %v1062_v4 = vmax.f32 %v1000_v49, %v1061_v62  ;;  %v977_v5 = vadd.f32 %v976_v30, %v1711_v25  ;;  %v1086_v6 = vmax.f32 %v1004_v45, %v1085_v52 }
 0x2db   : > { %v1135_v2 = vsel %vm1123_vm5, %v1054_v60, %v1134_v58  ;;  %v1058_v3 = vmax.f32 %v1056_v48, %v1057_v61  ;;  %v1005_v7 = vmax.f32 %v987_v1, 0.0  ;;  %v989_v8 = vadd.f32 %v988_v31, %v1713_v26 }
 0x2dc   : > { %v1063_v10 = vrot.slane %v1062_v4, 2  ;;  %v1001_v11 = vmax.f32 %v977_v5, 0.0  ;;  %v979_v12 = vadd.f32 %v978_v36, %v1713_v26  ;;  %v1081_v13 = vrot.slane %v1080_v0, 2 }
 0x2dd   : > { %v1059_v9 = vrot.slane %v1058_v3, 1  ;;  %v1091_v14 = vrot.slane %v1005_v7, 4  ;;  %v1006_v15 = vmax.f32 %v989_v8, 0.0  ;;  %v1087_v20 = vrot.slane %v1086_v6, 2 }
 0x2de   : > { %v1064_v17 = vmax.f32 %v1062_v4, %v1063_v10  ;;  %v1067_v18 = vrot.slane %v1001_v11, 4  ;;  %v1002_v19 = vmax.f32 %v979_v12, 0.0  ;;  %v1082_v26 = vmax.f32 %v1080_v0, %v1081_v13 }
 0x2df   : > { %v1060_v16 = vmax.f32 %v1058_v3, %v1059_v9  ;;  %v1092_v25 = vmax.f32 %v1005_v7, %v1091_v14  ;;  %v1097_v21 = vrot.slane %v1006_v15, 4  ;;  %v1088_v33 = vmax.f32 %v1086_v6, %v1087_v20 }
 0x2e0   : > { %v1065_v23 = vrot.slane %v1064_v17, 1  ;;  %v1068_v24 = vmax.f32 %v1001_v11, %v1067_v18  ;;  %v1073_v27 = vrot.slane %v1002_v19, 4  ;;  %v1083_v39 = vrot.slane %v1082_v26, 1 }
 0x2e1   : > { %v1126_v22 = vsel %vm1125_vm6, %v1060_v16, %v1124_v63  ;;  %v1093_v28 = vrot.slane %v1092_v25, 2  ;;  %v1098_v29 = vmax.f32 %v1006_v15, %v1097_v21  ;;  %v1089_v55 = vrot.slane %v1088_v33, 1 }
 0x2e2   : > { %v1066_v30 = vmax.f32 %v1064_v17, %v1065_v23  ;;  %v1069_v31 = vrot.slane %v1068_v24, 2  ;;  %v1074_v32 = vmax.f32 %v1002_v19, %v1073_v27  ;;  %v1084_v57 = vmax.f32 %v1082_v26, %v1083_v39 }
 0x2e3   : > { %v1094_v34 = vmax.f32 %v1092_v25, %v1093_v28  ;;  %v1099_v35 = vrot.slane %v1098_v29, 2  ;;  %v1090_v46 = vmax.f32 %v1088_v33, %v1089_v55 }
 0x2e4   : > { %v1136_v36 = vsel %vm1125_vm6, %v1066_v30, %v1135_v2  ;;  %v1070_v37 = vmax.f32 %v1068_v24, %v1069_v31  ;;  %v1075_v38 = vrot.slane %v1074_v32, 2 }
 0x2e5   : > { %v1100_v40 = vmax.f32 %v1098_v29, %v1099_v35  ;;  %v1095_v42 = vrot.slane %v1094_v34, 1 }
 0x2e6   : > { %v1071_v53 = vrot.slane %v1070_v37, 1  ;;  %v1076_v54 = vmax.f32 %v1074_v32, %v1075_v38 }
 0x2e7   : > { %v1101_v41 = vrot.slane %v1100_v40, 1  ;;  %v1096_v59 = vmax.f32 %v1094_v34, %v1095_v42 }
 0x2e8   : > { %v1072_v56 = vmax.f32 %v1070_v37, %v1071_v53  ;;  %v1077_v43 = vrot.slane %v1076_v54, 1 }
 0x2e9   : > { %v1102_v49 = vmax.f32 %v1100_v40, %v1101_v41 }
 0x2ea   : > { %v1128_v44 = vsel %vm1127_vm7, %v1072_v56, %v1126_v22  ;;  %v1078_v45 = vmax.f32 %v1076_v54, %v1077_v43 }
 0x2eb   : > { %v1130_v47 = vsel %vm1129_vm8, %v1084_v57, %v1128_v44 }
 0x2ec   : > { %v1132_v48 = vsel %vm1131_vm9, %v1096_v59, %v1130_v47  ;;  %v1137_v50 = vsel %vm1127_vm7, %v1078_v45, %v1136_v36 }
 0x2ed   : > { %1142 = vst [vmem:[%s283_s15] sm:$0xff] %v1132_v48  ;;  %v1138_v51 = vsel %vm1129_vm8, %v1090_v46, %v1137_v50 }
 0x2ee   : > { %v1139_v52 = vsel %vm1131_vm9, %v1102_v49, %v1138_v51 }
 0x2ef   : > { %1143 = vst [vmem:[%s283_s15 + $0x8] sm:$0xff] %v1139_v52 }
 0x2f0 PF: > { %s17_s24 = sadd.s32 1, %s1459_s24  }
 0x2f1   : > { %p14_p5 = scmp.ge.s32.totalorder %s17_s24, 4  }
 0x2f3   :  { %16 = sbr.rel (!%p14_p5) target bundleno = 1 (0x1), region = 78 }

// kernel: neg.22
= control target key start
LH: loop header
LB: loop body
LE: loop exit
PB: predicated region body
PF: predicated region fallthrough
CT: control target
= control target key end

     0   :  { %s72_s0 = inlined_call_operand.vmem [shape: f32[2,32,16], index: 0, kind: input, shape index: {}]   ;;  %s73_s1 = inlined_call_operand.vmem [shape: f32[2,32,16], index: 1, kind: output, shape index: {}]  }
   0x1   :  { %v2_v0 = vld [vmem:[%s72_s0] sm:$0xff]  ;;  %v32_v1 = vld [vmem:[%s72_s0 + $0x10] sm:$0xff]  ;;  %v34_v2 = vld [vmem:[%s72_s0 + $0x8] sm:$0xff] }
   0x2   :  { %v5_v3 = vxor.u32 2147483648, %v2_v0  ;;  %v12_v4 = vxor.u32 2147483648, %v32_v1  ;;  %v20_v5 = vxor.u32 2147483648, %v34_v2  ;;  %v36_v6 = vld [vmem:[%s72_s0 + $0x18] sm:$0xff] }
   0x3   :  { %v28_v7 = vxor.u32 2147483648, %v36_v6 }
   0x4   :  { %7 = vst [vmem:[%s73_s1] sm:$0xff] %v5_v3  ;;  %33 = vst [vmem:[%s73_s1 + $0x10] sm:$0xff] %v12_v4 }
   0x5   :  { %35 = vst [vmem:[%s73_s1 + $0x8] sm:$0xff] %v20_v5  ;;  %37 = vst [vmem:[%s73_s1 + $0x18] sm:$0xff] %v28_v7 }

// kernel: backbone_forward.18
= control target key start
LH: loop header
LB: loop body
LE: loop exit
PB: predicated region body
PF: predicated region fallthrough
CT: control target
= control target key end

     0   :  { %s1377_s18 = smov 0   ;;  %s1701_s0 = inlined_call_operand.vmem [shape: bf16[32,512], index: 0, kind: input, shape index: {}]   ;;  %s1702_s1 = inlined_call_operand.vmem [shape: bf16[512,256], index: 1, kind: input, shape index: {}]   ;;  %s1703_s2 = inlined_call_operand.vmem [shape: f32[1,256], index: 2, kind: input, shape index: {}]   ;;  %s1704_s3 = inlined_call_operand.vmem [shape: bf16[256,256], index: 3, kind: input, shape index: {}]   ;;  %s1705_s4 = inlined_call_operand.vmem [shape: f32[1,256], index: 4, kind: input, shape index: {}]   ;;  %s1706_s5 = inlined_call_operand.vmem [shape: f32[32,256], index: 5, kind: output, shape index: {}]  }
   0x1 LB: > { %s1058_s19 = sadd.s32 4294967295, %s1345_s18   ;;  %p1062_p0 = scmp.ge.s32.totalorder %s1345_s18, 1  ;;  %s1345_s18 = sphi %s1377_s18, %s15_s18  }
   0x2   : > { %p189_p1 = scmp.lt.s32.totalorder %s1345_s18, 3 }
   0x4   : > { %p190_p2 = pnand %p1062_p0, %p189_p1 }
   0x5   : > { %v1189_v0 = vld [vmem:[%s1702_s1 + $0x4] ss:$8 sps:$4 sm:$0xff] (!%p190_p2)   ;;  %v1191_v1 = vld [vmem:[%s1702_s1] ss:$8 sps:$4 sm:$0xff] (!%p190_p2)   ;;  %v1192_v2 = vld [vmem:[%s1702_s1 + $0x14] ss:$8 sps:$4 sm:$0xff] (!%p190_p2)  }
   0x6   : > { %193 = sbr.rel (%p190_p2) target bundleno = 576 (0x240), region = 40  ;;  %653 = vmatprep.subr.bf16.mxu0 (!%p190_p2), %v1189_v0  ;;  %v1194_v3 = vld [vmem:[%s1702_s1 + $0x10] ss:$8 sps:$4 sm:$0xff] (!%p190_p2)   ;;  %v1195_v4 = vld [vmem:[%s1702_s1 + $0x24] ss:$8 sps:$4 sm:$0xff] (!%p190_p2)   ;;  %s1063_s30 = sshll.u32 (!%p190_p2), %s1058_s19, 1 }
   0x7   : > { %654 = vmatpush1.bf16.msra.mxu0 (!%p190_p2), %v1191_v1  ;;  %v1197_v5 = vld [vmem:[%s1702_s1 + $0x20] ss:$8 sps:$4 sm:$0xff] (!%p190_p2)   ;;  %v1198_v6 = vld [vmem:[%s1702_s1 + $0x34] ss:$8 sps:$4 sm:$0xff] (!%p190_p2)   ;;  %p220_p3 = scmp.lt.s32.totalorder (!%p190_p2), %s1063_s30, 3 }
   0x8   : > { %655 = vmatprep.subr.bf16.mxu0 (!%p190_p2), %v1192_v2  ;;  %v1200_v7 = vld [vmem:[%s1702_s1 + $0x30] ss:$8 sps:$4 sm:$0xff] (!%p190_p2)   ;;  %v1201_v8 = vld [vmem:[%s1702_s1 + $0x44] ss:$8 sps:$4 sm:$0xff] (!%p190_p2)   ;;  %v1203_v9 = vld [vmem:[%s1702_s1 + $0x40] ss:$8 sps:$4 sm:$0xff] (!%p190_p2)  }
   0x9   : > { %v1204_v10 = vld [vmem:[%s1702_s1 + $0x54] ss:$8 sps:$4 sm:$0xff] (!%p190_p2)   ;;  %v1206_v11 = vld [vmem:[%s1702_s1 + $0x50] ss:$8 sps:$4 sm:$0xff] (!%p190_p2)   ;;  %v1207_v12 = vld [vmem:[%s1702_s1 + $0x64] ss:$8 sps:$4 sm:$0xff] (!%p190_p2)  }
   0xa   : > { %v1209_v14 = vld [vmem:[%s1702_s1 + $0x60] ss:$8 sps:$4 sm:$0xff] (!%p190_p2)   ;;  %v1210_v15 = vld [vmem:[%s1702_s1 + $0x74] ss:$8 sps:$4 sm:$0xff] (!%p190_p2)   ;;  %v1212_v16 = vld [vmem:[%s1702_s1 + $0x70] ss:$8 sps:$4 sm:$0xff] (!%p190_p2)  }
   0xb   : > { %656 = vmatpush1.bf16.msra.mxu0 (!%p190_p2), %v1194_v3  ;;  %v1213_v17 = vld [vmem:[%s1702_s1 + $0x84] ss:$8 sps:$4 sm:$0xff] (!%p190_p2)   ;;  %v1215_v18 = vld [vmem:[%s1702_s1 + $0x80] ss:$8 sps:$4 sm:$0xff] (!%p190_p2)   ;;  %v1216_v19 = vld [vmem:[%s1702_s1 + $0x94] ss:$8 sps:$4 sm:$0xff] (!%p190_p2)  }
   0xc   : > { %657 = vmatprep.subr.bf16.mxu0 (!%p190_p2), %v1195_v4  ;;  %v1218_v20 = vld [vmem:[%s1702_s1 + $0x90] ss:$8 sps:$4 sm:$0xff] (!%p190_p2)   ;;  %v1219_v21 = vld [vmem:[%s1702_s1 + $0xa4] ss:$8 sps:$4 sm:$0xff] (!%p190_p2)   ;;  %v1221_v22 = vld [vmem:[%s1702_s1 + $0xa0] ss:$8 sps:$4 sm:$0xff] (!%p190_p2)  }
   0xd   : > { %s1708_s30 = smov (!%p220_p3, %s1063_s30), 3  ;;  %v1222_v23 = vld [vmem:[%s1702_s1 + $0xb4] ss:$8 sps:$4 sm:$0xff]   ;;  %v1224_v24 = vld [vmem:[%s1702_s1 + $0xb0] ss:$8 sps:$4 sm:$0xff]  }
   0xe   : > { %s1171_s19 = sshll.u32 %s1708_s30, 4  ;;  %v1225_v25 = vld [vmem:[%s1702_s1 + $0xc4] ss:$8 sps:$4 sm:$0xff]   ;;  %v1293_v27 = vld [vmem:[%s1704_s3] ss:$8 sps:$4 sm:$0xff]  }
   0xf   : > { %658 = vmatpush1.bf16.msra.mxu0 %v1197_v5  ;;  %s1429_s24 = scalar_lea.vmem %s1701_s0, %s1171_s19  ;;  %v1291_v26 = vld [vmem:[%s1704_s3 + $0x4] ss:$8 sps:$4 sm:$0xff]   ;;  %v1227_v28 = vld [vmem:[%s1702_s1 + $0xc0] ss:$8 sps:$4 sm:$0xff]   ;;  %v1294_v29 = vld [vmem:[%s1704_s3 + $0x14] ss:$8 sps:$4 sm:$0xff]   ;;  %s231_s6 = scalar_lea.vmem %s1706_s5, %s1171_s19 }
  0x10   : > { %659 = vmatprep.subr.bf16.mxu0 %v1198_v6  ;;  %v1239_v13 = vld [vmem:[%s1429_s24 + $0x4] ss:$16 sps:$4 sm:$0xff]   ;;  %949 = vmatprep.subr.bf16.mxu1 %v1291_v26  ;;  %v1296_v31 = vld [vmem:[%s1704_s3 + $0x10] ss:$8 sps:$4 sm:$0xff]   ;;  %v1299_v35 = vld [vmem:[%s1704_s3 + $0x20] ss:$8 sps:$4 sm:$0xff]  }
  0x11   : > { %685 = vmatprep.mubr.bf16.mxu0 %v1239_v13  ;;  %v1228_v30 = vld [vmem:[%s1702_s1 + $0xd4] ss:$8 sps:$4 sm:$0xff]   ;;  %950 = vmatpush1.bf16.msra.mxu1 %v1293_v27  ;;  %v1297_v32 = vld [vmem:[%s1704_s3 + $0x24] ss:$8 sps:$4 sm:$0xff]   ;;  %v1230_v33 = vld [vmem:[%s1702_s1 + $0xd0] ss:$8 sps:$4 sm:$0xff]  }
  0x12   : > { %951 = vmatprep.subr.bf16.mxu1 %v1294_v29  ;;  %v1231_v34 = vld [vmem:[%s1702_s1 + $0xe4] ss:$8 sps:$4 sm:$0xff]   ;;  %v1300_v36 = vld [vmem:[%s1704_s3 + $0x34] ss:$8 sps:$4 sm:$0xff]   ;;  %v1233_v37 = vld [vmem:[%s1702_s1 + $0xe0] ss:$8 sps:$4 sm:$0xff]  }
  0x13   : > { %660 = vmatpush1.bf16.msra.mxu0 %v1200_v7  ;;  %v1234_v38 = vld [vmem:[%s1702_s1 + $0xf4] ss:$8 sps:$4 sm:$0xff]   ;;  %v1302_v39 = vld [vmem:[%s1704_s3 + $0x30] ss:$8 sps:$4 sm:$0xff]   ;;  %v1303_v40 = vld [vmem:[%s1704_s3 + $0x44] ss:$8 sps:$4 sm:$0xff]  }
  0x14   : > { %661 = vmatprep.subr.bf16.mxu0 %v1201_v8  ;;  %v1236_v41 = vld [vmem:[%s1702_s1 + $0xf0] ss:$8 sps:$4 sm:$0xff]   ;;  %v1242_v43 = vld [vmem:[%s1702_s1 + $0x104] ss:$8 sps:$4 sm:$0xff]   ;;  %v1305_v44 = vld [vmem:[%s1704_s3 + $0x40] ss:$8 sps:$4 sm:$0xff]  }
  0x15   : > { %952 = vmatpush1.bf16.msra.mxu1 %v1296_v31  ;;  %v1237_v42 = vld [vmem:[%s1429_s24] ss:$16 sps:$4 sm:$0xff]   ;;  %v1306_v46 = vld [vmem:[%s1704_s3 + $0x54] ss:$8 sps:$4 sm:$0xff]   ;;  %v1309_v50 = vld [vmem:[%s1704_s3 + $0x64] ss:$8 sps:$4 sm:$0xff]  }
  0x16   : > { %953 = vmatprep.subr.bf16.mxu1 %v1297_v32  ;;  %v1240_v45 = vld [vmem:[%s1702_s1 + $0x100] ss:$8 sps:$4 sm:$0xff]   ;;  %v1245_v47 = vld [vmem:[%s1702_s1 + $0x114] ss:$8 sps:$4 sm:$0xff]   ;;  %v1308_v49 = vld [vmem:[%s1704_s3 + $0x50] ss:$8 sps:$4 sm:$0xff]  }
  0x17   : > { %662 = vmatpush1.bf16.msra.mxu0 %v1203_v9  ;;  %v1290_v48 = vld [vmem:[%s1429_s24 + $0xc] ss:$16 sps:$4 sm:$0xff]   ;;  %v1243_v51 = vld [vmem:[%s1702_s1 + $0x110] ss:$8 sps:$4 sm:$0xff]   ;;  %v1311_v53 = vld [vmem:[%s1704_s3 + $0x60] ss:$8 sps:$4 sm:$0xff]  }
  0x18   : > { %663 = vmatprep.subr.bf16.mxu0 %v1204_v10  ;;  %v1248_v52 = vld [vmem:[%s1702_s1 + $0x124] ss:$8 sps:$4 sm:$0xff]   ;;  %v1312_v54 = vld [vmem:[%s1704_s3 + $0x74] ss:$8 sps:$4 sm:$0xff]   ;;  %v1246_v55 = vld [vmem:[%s1702_s1 + $0x120] ss:$8 sps:$4 sm:$0xff]  }
  0x19   : > { %954 = vmatpush1.bf16.msra.mxu1 %v1299_v35  ;;  %v1251_v56 = vld [vmem:[%s1702_s1 + $0x134] ss:$8 sps:$4 sm:$0xff]   ;;  %v1314_v57 = vld [vmem:[%s1704_s3 + $0x70] ss:$8 sps:$4 sm:$0xff]   ;;  %v1315_v58 = vld [vmem:[%s1704_s3 + $0x84] ss:$8 sps:$4 sm:$0xff]  }
  0x1a   : > { %955 = vmatprep.subr.bf16.mxu1 %v1300_v36  ;;  %v1249_v59 = vld [vmem:[%s1702_s1 + $0x130] ss:$8 sps:$4 sm:$0xff]   ;;  %v1254_v60 = vld [vmem:[%s1702_s1 + $0x144] ss:$8 sps:$4 sm:$0xff]   ;;  %v1317_v61 = vld [vmem:[%s1704_s3 + $0x80] ss:$8 sps:$4 sm:$0xff]   ;;  %v303_v36 = vlaneseq }
  0x1b   : > { %664 = vmatpush1.bf16.msra.mxu0 %v1206_v11  ;;  %v1318_v62 = vld [vmem:[%s1704_s3 + $0x94] ss:$8 sps:$4 sm:$0xff]   ;;  %v1252_v63 = vld [vmem:[%s1702_s1 + $0x140] ss:$8 sps:$4 sm:$0xff]   ;;  %v1320_v1 = vld [vmem:[%s1704_s3 + $0x90] ss:$8 sps:$4 sm:$0xff]  }
  0x1c   : > { %665 = vmatprep.subr.bf16.mxu0 %v1207_v12  ;;  %v1257_v0 = vld [vmem:[%s1702_s1 + $0x154] ss:$8 sps:$4 sm:$0xff]   ;;  %v1321_v2 = vld [vmem:[%s1704_s3 + $0xa4] ss:$8 sps:$4 sm:$0xff]   ;;  %v1255_v3 = vld [vmem:[%s1702_s1 + $0x150] ss:$8 sps:$4 sm:$0xff]  }
  0x1d   : > { %956 = vmatpush1.bf16.msra.mxu1 %v1302_v39  ;;  %v1260_v4 = vld [vmem:[%s1702_s1 + $0x164] ss:$8 sps:$4 sm:$0xff]   ;;  %v1323_v5 = vld [vmem:[%s1704_s3 + $0xa0] ss:$8 sps:$4 sm:$0xff]   ;;  %v1324_v6 = vld [vmem:[%s1704_s3 + $0xb4] ss:$8 sps:$4 sm:$0xff]  }
  0x1e   : > { %957 = vmatprep.subr.bf16.mxu1 %v1303_v40  ;;  %v1258_v7 = vld [vmem:[%s1702_s1 + $0x160] ss:$8 sps:$4 sm:$0xff]   ;;  %v1263_v8 = vld [vmem:[%s1702_s1 + $0x174] ss:$8 sps:$4 sm:$0xff]   ;;  %v1326_v9 = vld [vmem:[%s1704_s3 + $0xb0] ss:$8 sps:$4 sm:$0xff]  }
  0x1f   : > { %666 = vmatpush1.bf16.msra.mxu0 %v1209_v14  ;;  %v1327_v10 = vld [vmem:[%s1704_s3 + $0xc4] ss:$8 sps:$4 sm:$0xff]   ;;  %v1261_v11 = vld [vmem:[%s1702_s1 + $0x170] ss:$8 sps:$4 sm:$0xff]   ;;  %v1329_v13 = vld [vmem:[%s1704_s3 + $0xc0] ss:$8 sps:$4 sm:$0xff]  }
  0x20   : > { %667 = vmatprep.subr.bf16.mxu0 %v1210_v15  ;;  %v1266_v12 = vld [vmem:[%s1702_s1 + $0x184] ss:$8 sps:$4 sm:$0xff]   ;;  %v1330_v14 = vld [vmem:[%s1704_s3 + $0xd4] ss:$8 sps:$4 sm:$0xff]   ;;  %v1264_v15 = vld [vmem:[%s1702_s1 + $0x180] ss:$8 sps:$4 sm:$0xff]  }
  0x21   : > { %958 = vmatpush1.bf16.msra.mxu1 %v1305_v44  ;;  %v1284_v26 = vld [vmem:[%s1702_s1 + $0x1e4] ss:$8 sps:$4 sm:$0xff]   ;;  %v1282_v27 = vld [vmem:[%s1702_s1 + $0x1e0] ss:$8 sps:$4 sm:$0xff]   ;;  %v1285_v29 = vld [vmem:[%s1702_s1 + $0x1f0] ss:$8 sps:$4 sm:$0xff]  }
  0x22   : > { %959 = vmatprep.subr.bf16.mxu1 %v1306_v46  ;;  %v1332_v31 = vld [vmem:[%s1704_s3 + $0xd0] ss:$8 sps:$4 sm:$0xff]   ;;  %v1333_v32 = vld [vmem:[%s1704_s3 + $0xe4] ss:$8 sps:$4 sm:$0xff]   ;;  %v301_v39 = vld [vmem:[%s1703_s2] sm:$0x3] }
  0x23   : > { %668 = vmatpush1.bf16.msra.mxu0 %v1212_v16  ;;  %v1269_v16 = vld [vmem:[%s1702_s1 + $0x194] ss:$8 sps:$4 sm:$0xff]   ;;  %v1338_v35 = vld [vmem:[%s1704_s3 + $0xf0] ss:$8 sps:$4 sm:$0xff]  }
  0x24   : > { %669 = vmatprep.subr.bf16.mxu0 %v1213_v17  ;;  %v1267_v17 = vld [vmem:[%s1702_s1 + $0x190] ss:$8 sps:$4 sm:$0xff]  }
  0x25   : > { %960 = vmatpush1.bf16.msra.mxu1 %v1308_v49 }
  0x26   : > { %961 = vmatprep.subr.bf16.mxu1 %v1309_v50 }
  0x27   : > { %670 = vmatpush1.bf16.msra.mxu0 %v1215_v18  ;;  %v1272_v18 = vld [vmem:[%s1702_s1 + $0x1a4] ss:$8 sps:$4 sm:$0xff]  }
  0x28   : > { %671 = vmatprep.subr.bf16.mxu0 %v1216_v19  ;;  %v1270_v19 = vld [vmem:[%s1702_s1 + $0x1a0] ss:$8 sps:$4 sm:$0xff]  }
  0x29   : > { %962 = vmatpush1.bf16.msra.mxu1 %v1311_v53 }
  0x2a   : > { %963 = vmatprep.subr.bf16.mxu1 %v1312_v54 }
  0x2b   : > { %672 = vmatpush1.bf16.msra.mxu0 %v1218_v20  ;;  %v1275_v20 = vld [vmem:[%s1702_s1 + $0x1b4] ss:$8 sps:$4 sm:$0xff]  }
  0x2c   : > { %673 = vmatprep.subr.bf16.mxu0 %v1219_v21  ;;  %v1273_v21 = vld [vmem:[%s1702_s1 + $0x1b0] ss:$8 sps:$4 sm:$0xff]  }
  0x2d   : > { %964 = vmatpush1.bf16.msra.mxu1 %v1314_v57  ;;  %v775_v57 = vld [vmem:[%s1705_s4] sm:$0x3] }
  0x2e   : > { %965 = vmatprep.subr.bf16.mxu1 %v1315_v58 }
  0x2f   : > { %674 = vmatpush1.bf16.msra.mxu0 %v1221_v22  ;;  %v1278_v22 = vld [vmem:[%s1702_s1 + $0x1c4] ss:$8 sps:$4 sm:$0xff]  }
  0x30   : > { %675 = vmatprep.subr.bf16.mxu0 %v1222_v23  ;;  %v1276_v23 = vld [vmem:[%s1702_s1 + $0x1c0] ss:$8 sps:$4 sm:$0xff]  }
  0x31   : > { %966 = vmatpush1.bf16.msra.mxu1 %v1317_v61 }
  0x32   : > { %967 = vmatprep.subr.bf16.mxu1 %v1318_v62 }
  0x33   : > { %676 = vmatpush1.bf16.msra.mxu0 %v1224_v24  ;;  %v1281_v24 = vld [vmem:[%s1702_s1 + $0x1d4] ss:$8 sps:$4 sm:$0xff]  }
  0x34   : > { %677 = vmatprep.subr.bf16.mxu0 %v1225_v25  ;;  %v1279_v25 = vld [vmem:[%s1702_s1 + $0x1d0] ss:$8 sps:$4 sm:$0xff]  }
  0x35   : > { %968 = vmatpush1.bf16.msra.mxu1 %v1320_v1 }
  0x36   : > { %969 = vmatprep.subr.bf16.mxu1 %v1321_v2 }
  0x37   : > { %678 = vmatpush1.bf16.msra.mxu0 %v1227_v28  ;;  %v1287_v28 = vld [vmem:[%s1702_s1 + $0x1f4] ss:$8 sps:$4 sm:$0xff]  }
  0x38   : > { %679 = vmatprep.subr.bf16.mxu0 %v1228_v30  ;;  %v1288_v30 = vld [vmem:[%s1429_s24 + $0x8] ss:$16 sps:$4 sm:$0xff]  }
  0x39   : > { %970 = vmatpush1.bf16.msra.mxu1 %v1323_v5 }
  0x3a   : > { %971 = vmatprep.subr.bf16.mxu1 %v1324_v6 }
  0x3b   : > { %680 = vmatpush1.bf16.msra.mxu0 %v1230_v33  ;;  %v1335_v33 = vld [vmem:[%s1704_s3 + $0xe0] ss:$8 sps:$4 sm:$0xff]  }
  0x3c   : > { %681 = vmatprep.subr.bf16.mxu0 %v1231_v34  ;;  %v1336_v34 = vld [vmem:[%s1704_s3 + $0xf4] ss:$8 sps:$4 sm:$0xff]  }
  0x3d   : > { %972 = vmatpush1.bf16.msra.mxu1 %v1326_v9 }
  0x3e   : > { %973 = vmatprep.subr.bf16.mxu1 %v1327_v10 }
  0x3f   : > { %682 = vmatpush1.bf16.msra.mxu0 %v1233_v37  ;;  %v304_v37 = vshrl.u32 %v303_v36, 7 }
  0x40   : > { %683 = vmatprep.subr.bf16.mxu0 %v1234_v38 }
  0x41   : > { %974 = vmatpush1.bf16.msra.mxu1 %v1329_v13  ;;  %v305_v38 = vsub.s32 0, %v304_v37  ;;  %v309_v40 = vsub.s32 1, %v304_v37 }
  0x42   : > { %975 = vmatprep.subr.bf16.mxu1 %v1330_v14 }
  0x43   : > { %684 = vmatpush1.bf16.msra.mxu0 %v1236_v41  ;;  %v306_v41 = vrot.slane %v301_v39, %v305_v38  ;;  %v782_v58 = vrot.slane %v775_v57, %v305_v38 }
  0x44   : > { %696 = vmatprep.subr.bf16.mxu0 %v1242_v43 }
  0x45   : > { %976 = vmatpush1.bf16.msra.mxu1 %v1332_v31 }
  0x46   : > { %686 = vmatmul.mubr.bf16.vlgmr.msra.gmra.mrb[0].mxu0 %v1237_v42  ;;  %977 = vmatprep.subr.bf16.mxu1 %v1333_v32  ;;  %v310_v42 = vrot.slane %v301_v39, %v309_v40 }
  0x47   : > { %697 = vmatpush1.bf16.msra.mxu0 %v1240_v45  ;;  %728 = vmatprep.mubr.bf16.mxu0 %v1290_v48 }
  0x48   : > { %698 = vmatprep.subr.bf16.mxu0 %v1245_v47 }
  0x49   : > { %978 = vmatpush1.bf16.msra.mxu1 %v1335_v33 }
  0x4a   : > { %979 = vmatprep.subr.bf16.mxu1 %v1336_v34 }
  0x4b   : > { %699 = vmatpush1.bf16.msra.mxu0 %v1243_v51 }
  0x4c   : > { %700 = vmatprep.subr.bf16.mxu0 %v1248_v52 }
  0x4d   : > { %980 = vmatpush1.bf16.msra.mxu1 %v1338_v35 }
  0x4f   : > { %701 = vmatpush1.bf16.msra.mxu0 %v1246_v55 }
  0x50   : > { %702 = vmatprep.subr.bf16.mxu0 %v1251_v56 }
  0x53   : > { %703 = vmatpush1.bf16.msra.mxu0 %v1249_v59  ;;  %v786_v59 = vrot.slane %v775_v57, %v309_v40 }
  0x54   : > { %704 = vmatprep.subr.bf16.mxu0 %v1254_v60 }
  0x57   : > { %705 = vmatpush1.bf16.msra.mxu0 %v1252_v63 }
  0x58   : > { %706 = vmatprep.subr.bf16.mxu0 %v1257_v0 }
  0x5b   : > { %707 = vmatpush1.bf16.msra.mxu0 %v1255_v3 }
  0x5c   : > { %708 = vmatprep.subr.bf16.mxu0 %v1260_v4 }
  0x5f   : > { %709 = vmatpush1.bf16.msra.mxu0 %v1258_v7 }
  0x60   : > { %710 = vmatprep.subr.bf16.mxu0 %v1263_v8 }
  0x63   : > { %711 = vmatpush1.bf16.msra.mxu0 %v1261_v11 }
  0x64   : > { %712 = vmatprep.subr.bf16.mxu0 %v1266_v12 }
  0x67   : > { %713 = vmatpush1.bf16.msra.mxu0 %v1264_v15 }
  0x68   : > { %714 = vmatprep.subr.bf16.mxu0 %v1269_v16 }
  0x6b   : > { %715 = vmatpush1.bf16.msra.mxu0 %v1267_v17 }
  0x6c   : > { %716 = vmatprep.subr.bf16.mxu0 %v1272_v18 }
  0x6f   : > { %717 = vmatpush1.bf16.msra.mxu0 %v1270_v19 }
  0x70   : > { %718 = vmatprep.subr.bf16.mxu0 %v1275_v20 }
  0x73   : > { %719 = vmatpush1.bf16.msra.mxu0 %v1273_v21 }
  0x74   : > { %720 = vmatprep.subr.bf16.mxu0 %v1278_v22 }
  0x77   : > { %721 = vmatpush1.bf16.msra.mxu0 %v1276_v23 }
  0x78   : > { %722 = vmatprep.subr.bf16.mxu0 %v1281_v24 }
  0x7b   : > { %723 = vmatpush1.bf16.msra.mxu0 %v1279_v25 }
  0x7c   : > { %724 = vmatprep.subr.bf16.mxu0 %v1284_v26 }
  0x7f   : > { %725 = vmatpush1.bf16.msra.mxu0 %v1282_v27 }
  0x80   : > { %726 = vmatprep.subr.bf16.mxu0 %v1287_v28 }
  0x83   : > { %727 = vmatpush1.bf16.msra.mxu0 %v1285_v29 }
  0x86   : > { %729 = vmatmul.mubr.bf16.vlgmr.msra.gmra.mrb[0].mxu0 %v1288_v30 }
 0x159   : > { %v730_v43 = vpop.f32.mrb[0].mxu0 }
 0x15a   : > { %v1173_v44 = vadd.f32 %v730_v43, %v306_v41  ;;  %v732_v45 = vpop.f32.mrb[1].mxu0 }
 0x15b   : > { %v1174_v46 = vadd.f32 %v732_v45, %v310_v42  ;;  %v734_v47 = vpop.f32.mrb[2].mxu0 }
 0x15c   : > { %v1175_v48 = vadd.f32 %v734_v47, %v306_v41  ;;  %v736_v49 = vpop.f32.mrb[3].mxu0  ;;  %v739_v51 = vmax.f32 %v1173_v44, 0.0 }
 0x15d   : > { %v1176_v50 = vadd.f32 %v736_v49, %v310_v42  ;;  %v740_v53 = vmax.f32 %v1174_v46, 0.0 }
 0x15e   : > { %v741_v52 = vmax.f32 %v1175_v48, 0.0 }
 0x15f   : > { %v742_v54 = vmax.f32 %v1176_v50, 0.0 }
 0x160   : > { %v776_v55 = vpack.c.bf16 %v741_v52, %v739_v51 }
 0x161   : > { %v777_v56 = vpack.c.bf16 %v742_v54, %v740_v53 }
 0x163   : > { %981 = vmatprep.mubr.bf16.mxu1 %v777_v56 }
 0x164   : > { %982 = vmatmul.mubr.bf16.vlgmr.msra.gmra.mrb[0].mxu1 %v776_v55 }
 0x237   : > { %v983_v60 = vpop.f32.mrb[0].mxu1 }
 0x238   : > { %v984_v61 = vadd.f32 %v983_v60, %v782_v58  ;;  %v985_v62 = vpop.f32.mrb[1].mxu1 }
 0x239   : > { %v986_v63 = vadd.f32 %v985_v62, %v786_v59  ;;  %v987_v0 = vpop.f32.mrb[2].mxu1 }
 0x23a   : > { %v992_v1 = vmax.f32 %v984_v61, 0.0  ;;  %v988_v2 = vadd.f32 %v987_v0, %v782_v58  ;;  %v989_v3 = vpop.f32.mrb[3].mxu1 }
 0x23b   : > { %v993_v4 = vmax.f32 %v986_v63, 0.0  ;;  %v990_v5 = vadd.f32 %v989_v3, %v786_v59 }
 0x23c   : > { %996 = vst [vmem:[%s231_s6] sm:$0xff] %v992_v1  ;;  %v994_v6 = vmax.f32 %v988_v2, 0.0 }
 0x23d   : > { %997 = vst [vmem:[%s231_s6 + $0x8] sm:$0xff] %v993_v4  ;;  %v995_v7 = vmax.f32 %v990_v5, 0.0 }
 0x23e   : > { %998 = vst [vmem:[%s231_s6 + $0x10] sm:$0xff] %v994_v6 }
 0x23f   : > { %999 = vst [vmem:[%s231_s6 + $0x18] sm:$0xff] %v995_v7 }
 0x240 PF: > { %s15_s18 = sadd.s32 1, %s1345_s18  }
 0x241   : > { %p12_p4 = scmp.ge.s32.totalorder %s15_s18, 4  }
 0x243   :  { %14 = sbr.rel (!%p12_p4) target bundleno = 1 (0x1), region = 70 }

// kernel: backbone_forward.19
= control target key start
LH: loop header
LB: loop body
LE: loop exit
PB: predicated region body
PF: predicated region fallthrough
CT: control target
= control target key end

     0   :  { %10 = vsyncpa [#allocation3], 0  ;;  %s2307_s0 = inlined_call_operand.vmem [shape: bf16[64,512], index: 0, kind: input, shape index: {}]   ;;  %s2308_s1 = inlined_call_operand.vmem [shape: bf16[512,256], index: 1, kind: input, shape index: {}]   ;;  %s2309_s2 = inlined_call_operand.vmem [shape: f32[1,256], index: 2, kind: input, shape index: {}]   ;;  %s2310_s3 = inlined_call_operand.vmem [shape: bf16[256,384], index: 3, kind: input, shape index: {}]   ;;  %s2311_s4 = inlined_call_operand.vmem [shape: f32[1,384], index: 4, kind: input, shape index: {}]   ;;  %s2312_s5 = inlined_call_operand.hbm [shape: f32[64,384], index: 5, kind: output, shape index: {}]  }
   0x1   :  { %12 = vsyncpa [#allocation3 + $0x1], 0  ;;  %s1821_s18 = smov 0   ;;  %s1823_s19 = smov 0  }
   0x2   :  { %s1825_s20 = smov 0   ;;  %s1827_s21 = smov 0  }
   0x3 LB: > { %s1842_s22 = sadd.s32 4294967295, %s1786_s21   ;;  %s1332_s23 = sadd.s32 4294967294, %s1786_s21   ;;  %s1786_s21 = sphi %s1827_s21, %s2318_s21   ;;  %s1782_s20 = sphi %s1825_s20, %s2317_s20   ;;  %s1778_s19 = sphi %s1823_s19, %s2316_s19   ;;  %s1774_s18 = sphi %s1821_s18, %s2315_s18  }
   0x4   : > { %s1846_s24 = sadd.s32 1, %s1786_s21   ;;  %s135_s25 = sadd.s32 1, %s1782_s20 }
   0x5   : > { %s132_s26 = ssub.s32 %s1786_s21, %s1846_s24  ;;  %p145_p0 = scmp.ne.s32.totalorder %s1782_s20, %s1778_s19 }
   0x6   : > { %p133_p1 = scmp.eq.s32.totalorder %s132_s26, 0  ;;  %p146_p2 = scmp.eq.s32.totalorder %s1842_s22, 1 }
   0x7   : > { %p151_p3 = scmp.ne.s32.totalorder %s1778_s19, %s1774_s18  ;;  %p152_p4 = scmp.eq.s32.totalorder %s1332_s23, 1 }
   0x8   : > { %s1857_s27 = scalar_select %p133_p1, %s1782_s20, %s135_s25  }
   0x9   : > { %p1859_p5 = por %p146_p2, %p145_p0  ;;  %p1863_p6 = por %p152_p4, %p151_p3 }
   0xa   : > { %p1335_p7 = scmp.ge.s32.totalorder %s1786_s21, 1  ;;  %p192_p8 = scmp.lt.s32.totalorder %s1786_s21, 3 }
   0xc   : > { %p193_p9 = pnand %p1335_p7, %p192_p8 }
   0xd   : > { %v1552_v0 = vld [vmem:[%s2308_s1 + $0x4] ss:$8 sps:$4 sm:$0xff] (!%p193_p9)   ;;  %v1554_v1 = vld [vmem:[%s2308_s1] ss:$8 sps:$4 sm:$0xff] (!%p193_p9)   ;;  %v1555_v2 = vld [vmem:[%s2308_s1 + $0x14] ss:$8 sps:$4 sm:$0xff] (!%p193_p9)  }
   0xe   : > { %196 = sbr.rel (%p193_p9) target bundleno = 640 (0x280), region = 40  ;;  %674 = vmatprep.subr.bf16.mxu0 (!%p193_p9), %v1552_v0  ;;  %v1557_v3 = vld [vmem:[%s2308_s1 + $0x10] ss:$8 sps:$4 sm:$0xff] (!%p193_p9)   ;;  %v1558_v4 = vld [vmem:[%s2308_s1 + $0x24] ss:$8 sps:$4 sm:$0xff] (!%p193_p9)   ;;  %s1336_s15 = sshll.u32 (!%p193_p9), %s1842_s22, 2 }
   0xf   : > { %675 = vmatpush1.bf16.msra.mxu0 (!%p193_p9), %v1554_v1  ;;  %v1560_v5 = vld [vmem:[%s2308_s1 + $0x20] ss:$8 sps:$4 sm:$0xff] (!%p193_p9)   ;;  %v1561_v6 = vld [vmem:[%s2308_s1 + $0x34] ss:$8 sps:$4 sm:$0xff] (!%p193_p9)   ;;  %p222_p10 = scmp.lt.s32.totalorder (!%p193_p9), %s1336_s15, 7  ;;  %s218_s8 = sand.u32 (!%p193_p9), 1, %s1778_s19  }
  0x10   : > { %676 = vmatprep.subr.bf16.mxu0 (!%p193_p9), %v1555_v2  ;;  %v1563_v7 = vld [vmem:[%s2308_s1 + $0x30] ss:$8 sps:$4 sm:$0xff] (!%p193_p9)   ;;  %v1564_v8 = vld [vmem:[%s2308_s1 + $0x44] ss:$8 sps:$4 sm:$0xff] (!%p193_p9)   ;;  %v1566_v9 = vld [vmem:[%s2308_s1 + $0x40] ss:$8 sps:$4 sm:$0xff] (!%p193_p9)  }
  0x11   : > { %v1567_v10 = vld [vmem:[%s2308_s1 + $0x54] ss:$8 sps:$4 sm:$0xff] (!%p193_p9)   ;;  %v1569_v11 = vld [vmem:[%s2308_s1 + $0x50] ss:$8 sps:$4 sm:$0xff] (!%p193_p9)   ;;  %v1570_v12 = vld [vmem:[%s2308_s1 + $0x64] ss:$8 sps:$4 sm:$0xff] (!%p193_p9)  }
  0x12   : > { %v1572_v14 = vld [vmem:[%s2308_s1 + $0x60] ss:$8 sps:$4 sm:$0xff] (!%p193_p9)   ;;  %v1573_v15 = vld [vmem:[%s2308_s1 + $0x74] ss:$8 sps:$4 sm:$0xff] (!%p193_p9)   ;;  %v1575_v16 = vld [vmem:[%s2308_s1 + $0x70] ss:$8 sps:$4 sm:$0xff] (!%p193_p9)  }
  0x13   : > { %677 = vmatpush1.bf16.msra.mxu0 (!%p193_p9), %v1557_v3  ;;  %v1576_v17 = vld [vmem:[%s2308_s1 + $0x84] ss:$8 sps:$4 sm:$0xff] (!%p193_p9)   ;;  %v1578_v18 = vld [vmem:[%s2308_s1 + $0x80] ss:$8 sps:$4 sm:$0xff] (!%p193_p9)   ;;  %v1579_v19 = vld [vmem:[%s2308_s1 + $0x94] ss:$8 sps:$4 sm:$0xff] (!%p193_p9)  }
  0x14   : > { %678 = vmatprep.subr.bf16.mxu0 (!%p193_p9), %v1558_v4  ;;  %v1581_v20 = vld [vmem:[%s2308_s1 + $0x90] ss:$8 sps:$4 sm:$0xff] (!%p193_p9)   ;;  %v1582_v21 = vld [vmem:[%s2308_s1 + $0xa4] ss:$8 sps:$4 sm:$0xff] (!%p193_p9)   ;;  %v1584_v22 = vld [vmem:[%s2308_s1 + $0xa0] ss:$8 sps:$4 sm:$0xff] (!%p193_p9)  }
  0x15   : > { %s2320_s15 = smov (!%p222_p10, %s1336_s15), 7  ;;  %v1585_v23 = vld [vmem:[%s2308_s1 + $0xb4] ss:$8 sps:$4 sm:$0xff]   ;;  %v1587_v24 = vld [vmem:[%s2308_s1 + $0xb0] ss:$8 sps:$4 sm:$0xff]   ;;  %s1509_s9 = smul.u32 96, %s218_s8 }
  0x16   : > { %s1464_s12 = sshll.u32 %s2320_s15, 4  ;;  %v1588_v25 = vld [vmem:[%s2308_s1 + $0xc4] ss:$8 sps:$4 sm:$0xff]   ;;  %v1590_v26 = vld [vmem:[%s2308_s1 + $0xc0] ss:$8 sps:$4 sm:$0xff]   ;;  %s1510_s11 = smul.u32 1536, %s1842_s22 }
  0x17   : > { %679 = vmatpush1.bf16.msra.mxu0 %v1560_v5  ;;  %s1909_s23 = scalar_lea.vmem %s2307_s0, %s1464_s12  ;;  %v1591_v27 = vld [vmem:[%s2308_s1 + $0xd4] ss:$8 sps:$4 sm:$0xff]   ;;  %v1660_v28 = vld [vmem:[%s2310_s3 + $0x4] ss:$12 sps:$4 sm:$0xff]   ;;  %v1662_v29 = vld [vmem:[%s2310_s3] ss:$12 sps:$4 sm:$0xff]  }
  0x18   : > { %680 = vmatprep.subr.bf16.mxu0 %v1561_v6  ;;  %v1602_v13 = vld [vmem:[%s1909_s23 + $0x4] ss:$16 sps:$4 sm:$0xff]   ;;  %v1593_v30 = vld [vmem:[%s2308_s1 + $0xd0] ss:$8 sps:$4 sm:$0xff]   ;;  %1129 = vmatprep.subr.bf16.mxu1 %v1660_v28  ;;  %v1663_v31 = vld [vmem:[%s2310_s3 + $0x1c] ss:$12 sps:$4 sm:$0xff]   ;;  %s2258_s16 = scalar_lea.hbm %s2312_s5, %s1510_s11 }
  0x19   : > { %706 = vmatprep.mubr.bf16.mxu0 %v1602_v13  ;;  %v1594_v32 = vld [vmem:[%s2308_s1 + $0xe4] ss:$8 sps:$4 sm:$0xff]   ;;  %1130 = vmatpush1.bf16.msra.mxu1 %v1662_v29  ;;  %v1666_v34 = vld [vmem:[%s2310_s3 + $0x34] ss:$12 sps:$4 sm:$0xff]   ;;  %v1668_v37 = vld [vmem:[%s2310_s3 + $0x30] ss:$12 sps:$4 sm:$0xff]  }
  0x1a   : > { %v1665_v33 = vld [vmem:[%s2310_s3 + $0x18] ss:$12 sps:$4 sm:$0xff]   ;;  %1131 = vmatprep.subr.bf16.mxu1 %v1663_v31  ;;  %v1596_v35 = vld [vmem:[%s2308_s1 + $0xe0] ss:$8 sps:$4 sm:$0xff]   ;;  %v1597_v36 = vld [vmem:[%s2308_s1 + $0xf4] ss:$8 sps:$4 sm:$0xff]  }
  0x1b   : > { %681 = vmatpush1.bf16.msra.mxu0 %v1563_v7  ;;  %v1669_v38 = vld [vmem:[%s2310_s3 + $0x4c] ss:$12 sps:$4 sm:$0xff]   ;;  %v1671_v41 = vld [vmem:[%s2310_s3 + $0x48] ss:$12 sps:$4 sm:$0xff]   ;;  %v1672_v42 = vld [vmem:[%s2310_s3 + $0x64] ss:$12 sps:$4 sm:$0xff]  }
  0x1c   : > { %682 = vmatprep.subr.bf16.mxu0 %v1564_v8  ;;  %v1599_v39 = vld [vmem:[%s2308_s1 + $0xf0] ss:$8 sps:$4 sm:$0xff]   ;;  %v1605_v40 = vld [vmem:[%s2308_s1 + $0x104] ss:$8 sps:$4 sm:$0xff]   ;;  %v1603_v44 = vld [vmem:[%s2308_s1 + $0x100] ss:$8 sps:$4 sm:$0xff]  }
  0x1d   : > { %1132 = vmatpush1.bf16.msra.mxu1 %v1665_v33  ;;  %v1600_v43 = vld [vmem:[%s1909_s23] ss:$16 sps:$4 sm:$0xff]   ;;  %v1608_v45 = vld [vmem:[%s2308_s1 + $0x114] ss:$8 sps:$4 sm:$0xff]   ;;  %v1611_v50 = vld [vmem:[%s2308_s1 + $0x124] ss:$8 sps:$4 sm:$0xff]  }
  0x1e   : > { %1133 = vmatprep.subr.bf16.mxu1 %v1666_v34  ;;  %v1645_v46 = vld [vmem:[%s1909_s23 + $0x24] ss:$16 sps:$4 sm:$0xff]   ;;  %v1674_v47 = vld [vmem:[%s2310_s3 + $0x60] ss:$12 sps:$4 sm:$0xff]   ;;  %v1675_v48 = vld [vmem:[%s2310_s3 + $0x7c] ss:$12 sps:$4 sm:$0xff]  }
  0x1f   : > { %683 = vmatpush1.bf16.msra.mxu0 %v1566_v9  ;;  %v1606_v49 = vld [vmem:[%s2308_s1 + $0x110] ss:$8 sps:$4 sm:$0xff]   ;;  %v1678_v52 = vld [vmem:[%s2310_s3 + $0x94] ss:$12 sps:$4 sm:$0xff]   ;;  %v1656_v55 = vld [vmem:[%s1909_s23 + $0xc] ss:$16 sps:$4 sm:$0xff]  }
  0x20   : > { %684 = vmatprep.subr.bf16.mxu0 %v1567_v10  ;;  %v1677_v51 = vld [vmem:[%s2310_s3 + $0x78] ss:$12 sps:$4 sm:$0xff]   ;;  %v1647_v53 = vld [vmem:[%s1909_s23 + $0x20] ss:$16 sps:$4 sm:$0xff]   ;;  %v1614_v56 = vld [vmem:[%s2308_s1 + $0x134] ss:$8 sps:$4 sm:$0xff]  }
  0x21   : > { %1134 = vmatpush1.bf16.msra.mxu1 %v1668_v37  ;;  %v1609_v54 = vld [vmem:[%s2308_s1 + $0x120] ss:$8 sps:$4 sm:$0xff]   ;;  %v1680_v57 = vld [vmem:[%s2310_s3 + $0x90] ss:$12 sps:$4 sm:$0xff]   ;;  %v1681_v58 = vld [vmem:[%s2310_s3 + $0xac] ss:$12 sps:$4 sm:$0xff]  }
  0x22   : > { %1135 = vmatprep.subr.bf16.mxu1 %v1669_v38  ;;  %v1612_v59 = vld [vmem:[%s2308_s1 + $0x130] ss:$8 sps:$4 sm:$0xff]   ;;  %v1617_v60 = vld [vmem:[%s2308_s1 + $0x144] ss:$8 sps:$4 sm:$0xff]   ;;  %v1683_v61 = vld [vmem:[%s2310_s3 + $0xa8] ss:$12 sps:$4 sm:$0xff]  }
  0x23   : > { %685 = vmatpush1.bf16.msra.mxu0 %v1569_v11  ;;  %v1684_v62 = vld [vmem:[%s2310_s3 + $0xc4] ss:$12 sps:$4 sm:$0xff]   ;;  %v1615_v63 = vld [vmem:[%s2308_s1 + $0x140] ss:$8 sps:$4 sm:$0xff]   ;;  %v1620_v0 = vld [vmem:[%s2308_s1 + $0x154] ss:$8 sps:$4 sm:$0xff]  }
  0x24   : > { %686 = vmatprep.subr.bf16.mxu0 %v1570_v12  ;;  %v1686_v1 = vld [vmem:[%s2310_s3 + $0xc0] ss:$12 sps:$4 sm:$0xff]   ;;  %v1687_v2 = vld [vmem:[%s2310_s3 + $0xdc] ss:$12 sps:$4 sm:$0xff]   ;;  %v1618_v3 = vld [vmem:[%s2308_s1 + $0x150] ss:$8 sps:$4 sm:$0xff]  }
  0x25   : > { %1136 = vmatpush1.bf16.msra.mxu1 %v1671_v41  ;;  %v1623_v4 = vld [vmem:[%s2308_s1 + $0x164] ss:$8 sps:$4 sm:$0xff]   ;;  %v1690_v6 = vld [vmem:[%s2310_s3 + $0xf4] ss:$12 sps:$4 sm:$0xff]   ;;  %v1692_v9 = vld [vmem:[%s2310_s3 + $0xf0] ss:$12 sps:$4 sm:$0xff]   ;;  %v304_v41 = vlaneseq }
  0x26   : > { %1137 = vmatprep.subr.bf16.mxu1 %v1672_v42  ;;  %v1689_v5 = vld [vmem:[%s2310_s3 + $0xd8] ss:$12 sps:$4 sm:$0xff]   ;;  %v1621_v7 = vld [vmem:[%s2308_s1 + $0x160] ss:$8 sps:$4 sm:$0xff]   ;;  %v1626_v8 = vld [vmem:[%s2308_s1 + $0x174] ss:$8 sps:$4 sm:$0xff]  }
  0x27   : > { %687 = vmatpush1.bf16.msra.mxu0 %v1572_v14  ;;  %v1693_v10 = vld [vmem:[%s2310_s3 + $0x10c] ss:$12 sps:$4 sm:$0xff]   ;;  %v1695_v13 = vld [vmem:[%s2310_s3 + $0x108] ss:$12 sps:$4 sm:$0xff]   ;;  %v1696_v14 = vld [vmem:[%s2310_s3 + $0x124] ss:$12 sps:$4 sm:$0xff]  }
  0x28   : > { %688 = vmatprep.subr.bf16.mxu0 %v1573_v15  ;;  %v1624_v11 = vld [vmem:[%s2308_s1 + $0x170] ss:$8 sps:$4 sm:$0xff]   ;;  %v1629_v12 = vld [vmem:[%s2308_s1 + $0x184] ss:$8 sps:$4 sm:$0xff]   ;;  %v1627_v15 = vld [vmem:[%s2308_s1 + $0x180] ss:$8 sps:$4 sm:$0xff]  }
  0x29   : > { %1138 = vmatpush1.bf16.msra.mxu1 %v1674_v47  ;;  %v1642_v28 = vld [vmem:[%s2308_s1 + $0x1d0] ss:$8 sps:$4 sm:$0xff]   ;;  %v1650_v29 = vld [vmem:[%s2308_s1 + $0x1e4] ss:$8 sps:$4 sm:$0xff]   ;;  %v1653_v31 = vld [vmem:[%s2308_s1 + $0x1f4] ss:$8 sps:$4 sm:$0xff]  }
  0x2a   : > { %1139 = vmatprep.subr.bf16.mxu1 %v1675_v48  ;;  %v1654_v33 = vld [vmem:[%s1909_s23 + $0x8] ss:$16 sps:$4 sm:$0xff]   ;;  %v1657_v34 = vld [vmem:[%s1909_s23 + $0x2c] ss:$16 sps:$4 sm:$0xff]   ;;  %v2174_v42 = vshrl.u32 %v304_v41, 7  ;;  %s2240_s10 = scalar_lea.vmem [#allocation2], %s1509_s9 }
  0x2b   : > { %689 = vmatpush1.bf16.msra.mxu0 %v1575_v16  ;;  %v1632_v16 = vld [vmem:[%s2308_s1 + $0x194] ss:$8 sps:$4 sm:$0xff]   ;;  %v1705_v38 = vld [vmem:[%s2310_s3 + $0x16c] ss:$12 sps:$4 sm:$0xff]   ;;  %s1270_s12 = sshll.u32 %s2240_s10, 4  ;;  %s2266_s22 = scalar_lea.sflag [#allocation3], %s218_s8  ;;  %s2260_s12 = int_to_ptr.vmem [resolvable:$true] %s1270_s12 }
  0x2c   : > { %690 = vmatprep.subr.bf16.mxu0 %v1576_v17  ;;  %v1698_v17 = vld [vmem:[%s2310_s3 + $0x120] ss:$12 sps:$4 sm:$0xff]   ;;  %v1704_v37 = vld [vmem:[%s2310_s3 + $0x150] ss:$12 sps:$4 sm:$0xff]   ;;  %s1724_s17 = scalar_lea.vmem %s2260_s12, 1536  ;;  %s1788_s25 = smov [#allocation2]  }
  0x2d   : > { %1140 = vmatpush1.bf16.msra.mxu1 %v1677_v51  ;;  %p1725_p11 = scmp.ne.s32.totalorder %s2260_s12, %s1724_s17  ;;  %s1728_s26 = sshll.u32 %s1788_s25, 4  ;;  %s1729_s26 = int_to_ptr.vmem [resolvable:$false] %s1728_s26 }
  0x2e   : > { %1141 = vmatprep.subr.bf16.mxu1 %v1678_v52  ;;  %s1730_s30 = scalar_lea.vmem %s1729_s26, 3072  ;;  %p1731_p0 = scmp.lt.s32.totalorder %s2260_s12, %s1729_s26 }
  0x2f   : > { %691 = vmatpush1.bf16.msra.mxu0 %v1578_v18  ;;  %v1699_v18 = vld [vmem:[%s2310_s3 + $0x13c] ss:$12 sps:$4 sm:$0xff]   ;;  %p1726_p12 = pnand %p1725_p11, %p1859_p5  ;;  %p1732_p1 = scmp.lt.s32.totalorder %s1730_s30, %s1724_s17 }
  0x30   : > { %692 = vmatprep.subr.bf16.mxu0 %v1579_v19  ;;  %v1630_v19 = vld [vmem:[%s2308_s1 + $0x190] ss:$8 sps:$4 sm:$0xff]  }
  0x31   : > { %1142 = vmatpush1.bf16.msra.mxu1 %v1680_v57  ;;  %p1727_p13 = pneg %p1726_p12  ;;  %p1733_p2 = por %p1732_p1, %p1731_p0 }
  0x32   : > { %1143 = vmatprep.subr.bf16.mxu1 %v1681_v58 }
  0x33   : > { %693 = vmatpush1.bf16.msra.mxu0 %v1581_v20  ;;  %v1635_v20 = vld [vmem:[%s2308_s1 + $0x1a4] ss:$8 sps:$4 sm:$0xff]   ;;  %p1734_p3 = pnand %p1733_p2, %p1727_p13 }
  0x34   : > { %694 = vmatprep.subr.bf16.mxu0 %v1582_v21  ;;  %v1701_v21 = vld [vmem:[%s2310_s3 + $0x138] ss:$12 sps:$4 sm:$0xff]  }
  0x35   : > { %1144 = vmatpush1.bf16.msra.mxu1 %v1683_v61 }
  0x36   : > { %1145 = vmatprep.subr.bf16.mxu1 %v1684_v62 }
  0x37   : > { %695 = vmatpush1.bf16.msra.mxu0 %v1584_v22  ;;  %v1633_v22 = vld [vmem:[%s2308_s1 + $0x1a0] ss:$8 sps:$4 sm:$0xff]  }
  0x38   : > { %696 = vmatprep.subr.bf16.mxu0 %v1585_v23  ;;  %v1638_v23 = vld [vmem:[%s2308_s1 + $0x1b4] ss:$8 sps:$4 sm:$0xff]  }
  0x39   : > { %1146 = vmatpush1.bf16.msra.mxu1 %v1686_v1 }
  0x3a   : > { %1147 = vmatprep.subr.bf16.mxu1 %v1687_v2  ;;  %v1710_v2 = vld [vmem:[%s2310_s3 + $0xe0] ss:$12 sps:$4 sm:$0xff]  }
  0x3b   : > { %697 = vmatpush1.bf16.msra.mxu0 %v1587_v24  ;;  %v1636_v24 = vld [vmem:[%s2308_s1 + $0x1b0] ss:$8 sps:$4 sm:$0xff]  }
  0x3c   : > { %698 = vmatprep.subr.bf16.mxu0 %v1588_v25  ;;  %v1641_v25 = vld [vmem:[%s2308_s1 + $0x1c4] ss:$8 sps:$4 sm:$0xff]  }
  0x3d   : > { %1148 = vmatpush1.bf16.msra.mxu1 %v1689_v5 }
  0x3e   : > { %1149 = vmatprep.subr.bf16.mxu1 %v1690_v6 }
  0x3f   : > { %699 = vmatpush1.bf16.msra.mxu0 %v1590_v26  ;;  %v1639_v26 = vld [vmem:[%s2308_s1 + $0x1c0] ss:$8 sps:$4 sm:$0xff]  }
  0x40   : > { %700 = vmatprep.subr.bf16.mxu0 %v1591_v27  ;;  %v1644_v27 = vld [vmem:[%s2308_s1 + $0x1d4] ss:$8 sps:$4 sm:$0xff]  }
  0x41   : > { %1150 = vmatpush1.bf16.msra.mxu1 %v1692_v9 }
  0x42   : > { %1151 = vmatprep.subr.bf16.mxu1 %v1693_v10 }
  0x43   : > { %701 = vmatpush1.bf16.msra.mxu0 %v1593_v30  ;;  %v1648_v30 = vld [vmem:[%s2308_s1 + $0x1e0] ss:$8 sps:$4 sm:$0xff]  }
  0x44   : > { %702 = vmatprep.subr.bf16.mxu0 %v1594_v32  ;;  %v1651_v32 = vld [vmem:[%s2308_s1 + $0x1f0] ss:$8 sps:$4 sm:$0xff]  }
  0x45   : > { %1152 = vmatpush1.bf16.msra.mxu1 %v1695_v13 }
  0x46   : > { %1153 = vmatprep.subr.bf16.mxu1 %v1696_v14 }
  0x47   : > { %703 = vmatpush1.bf16.msra.mxu0 %v1596_v35  ;;  %v1659_v35 = vld [vmem:[%s1909_s23 + $0x28] ss:$16 sps:$4 sm:$0xff]  }
  0x48   : > { %704 = vmatprep.subr.bf16.mxu0 %v1597_v36  ;;  %v1702_v36 = vld [vmem:[%s2310_s3 + $0x154] ss:$12 sps:$4 sm:$0xff]  }
  0x49   : > { %1154 = vmatpush1.bf16.msra.mxu1 %v1698_v17  ;;  %v1714_v17 = vld [vmem:[%s2310_s3 + $0x110] ss:$12 sps:$4 sm:$0xff]  }
  0x4a   : > { %1155 = vmatprep.subr.bf16.mxu1 %v1699_v18  ;;  %v1715_v18 = vld [vmem:[%s2310_s3 + $0x50] ss:$12 sps:$4 sm:$0xff]  }
  0x4b   : > { %705 = vmatpush1.bf16.msra.mxu0 %v1599_v39  ;;  %v1707_v39 = vld [vmem:[%s2310_s3 + $0x168] ss:$12 sps:$4 sm:$0xff]  }
  0x4c   : > { %727 = vmatprep.subr.bf16.mxu0 %v1605_v40  ;;  %v1708_v40 = vld [vmem:[%s2310_s3 + $0xc8] ss:$12 sps:$4 sm:$0xff]  }
  0x4d   : > { %1156 = vmatpush1.bf16.msra.mxu1 %v1701_v21  ;;  %v1718_v21 = vld [vmem:[%s2310_s3 + $0x140] ss:$12 sps:$4 sm:$0xff]  }
  0x4e   : > { %707 = vmatmul.mubr.bf16.vlgmr.msra.gmra.mrb[0].mxu0 %v1600_v43  ;;  %1157 = vmatprep.subr.bf16.mxu1 %v1702_v36  ;;  %v306_v43 = vsub.s32 0, %v2174_v42 }
  0x4f   : > { %728 = vmatpush1.bf16.msra.mxu0 %v1603_v44  ;;  %716 = vmatprep.mubr.bf16.mxu0 %v1645_v46  ;;  %v302_v44 = vld [vmem:[%s2309_s2] sm:$0x3] }
  0x50   : > { %729 = vmatprep.subr.bf16.mxu0 %v1608_v45  ;;  %v310_v45 = vsub.s32 1, %v2174_v42  ;;  %v307_v46 = vrot.slane %v302_v44, %v306_v43 }
  0x51   : > { %1158 = vmatpush1.bf16.msra.mxu1 %v1704_v37 }
  0x52   : > { %1159 = vmatprep.subr.bf16.mxu1 %v1705_v38  ;;  %v311_v47 = vrot.slane %v302_v44, %v310_v45 }
  0x53   : > { %730 = vmatpush1.bf16.msra.mxu0 %v1606_v49 }
  0x54   : > { %731 = vmatprep.subr.bf16.mxu0 %v1611_v50 }
  0x55   : > { %1160 = vmatpush1.bf16.msra.mxu1 %v1707_v39 }
  0x56   : > { %717 = vmatmul.mubr.bf16.gmra.mrb[4].mxu0 %v1647_v53  ;;  %1465 = vmatprep.subr.bf16.mxu1 %v1708_v40 }
  0x57   : > { %732 = vmatpush1.bf16.msra.mxu0 %v1609_v54  ;;  %759 = vmatprep.mubr.bf16.mxu0 %v1656_v55 }
  0x58   : > { %733 = vmatprep.subr.bf16.mxu0 %v1614_v56 }
  0x5b   : > { %734 = vmatpush1.bf16.msra.mxu0 %v1612_v59 }
  0x5c   : > { %735 = vmatprep.subr.bf16.mxu0 %v1617_v60 }
  0x5f   : > { %736 = vmatpush1.bf16.msra.mxu0 %v1615_v63  ;;  %v1709_v63 = vld [vmem:[%s2310_s3 + $0x8] ss:$12 sps:$4 sm:$0xff]  }
  0x60   : > { %737 = vmatprep.subr.bf16.mxu0 %v1620_v0 }
  0x63   : > { %738 = vmatpush1.bf16.msra.mxu0 %v1618_v3 }
  0x64   : > { %739 = vmatprep.subr.bf16.mxu0 %v1623_v4 }
  0x67   : > { %740 = vmatpush1.bf16.msra.mxu0 %v1621_v7 }
  0x68   : > { %741 = vmatprep.subr.bf16.mxu0 %v1626_v8  ;;  %v1711_v8 = vld [vmem:[%s2310_s3 + $0x20] ss:$12 sps:$4 sm:$0xff]  }
  0x6b   : > { %742 = vmatpush1.bf16.msra.mxu0 %v1624_v11  ;;  %v1712_v11 = vld [vmem:[%s2310_s3 + $0xf8] ss:$12 sps:$4 sm:$0xff]  }
  0x6c   : > { %743 = vmatprep.subr.bf16.mxu0 %v1629_v12 }
  0x6f   : > { %744 = vmatpush1.bf16.msra.mxu0 %v1627_v15 }
  0x70   : > { %745 = vmatprep.subr.bf16.mxu0 %v1632_v16  ;;  %v1713_v16 = vld [vmem:[%s2310_s3 + $0x38] ss:$12 sps:$4 sm:$0xff]  }
  0x73   : > { %746 = vmatpush1.bf16.msra.mxu0 %v1630_v19  ;;  %v1716_v19 = vld [vmem:[%s2310_s3 + $0x128] ss:$12 sps:$4 sm:$0xff]  }
  0x74   : > { %747 = vmatprep.subr.bf16.mxu0 %v1635_v20  ;;  %v1717_v20 = vld [vmem:[%s2310_s3 + $0x68] ss:$12 sps:$4 sm:$0xff]  }
  0x77   : > { %748 = vmatpush1.bf16.msra.mxu0 %v1633_v22  ;;  %v1719_v22 = vld [vmem:[%s2310_s3 + $0x80] ss:$12 sps:$4 sm:$0xff]  }
  0x78   : > { %749 = vmatprep.subr.bf16.mxu0 %v1638_v23  ;;  %v1720_v23 = vld [vmem:[%s2310_s3 + $0x158] ss:$12 sps:$4 sm:$0xff]  }
  0x7b   : > { %750 = vmatpush1.bf16.msra.mxu0 %v1636_v24  ;;  %v1721_v24 = vld [vmem:[%s2310_s3 + $0x98] ss:$12 sps:$4 sm:$0xff]  }
  0x7c   : > { %751 = vmatprep.subr.bf16.mxu0 %v1641_v25  ;;  %v1722_v25 = vld [vmem:[%s2310_s3 + $0x170] ss:$12 sps:$4 sm:$0xff]  }
  0x7f   : > { %752 = vmatpush1.bf16.msra.mxu0 %v1639_v26  ;;  %v1723_v26 = vld [vmem:[%s2310_s3 + $0xb0] ss:$12 sps:$4 sm:$0xff]  }
  0x80   : > { %753 = vmatprep.subr.bf16.mxu0 %v1644_v27  ;;  %v852_v27 = vld [vmem:[%s2311_s4] sm:$0x7] }
  0x83   : > { %754 = vmatpush1.bf16.msra.mxu0 %v1642_v28  ;;  %v861_v28 = vrot.slane %v852_v27, %v306_v43 }
  0x84   : > { %755 = vmatprep.subr.bf16.mxu0 %v1650_v29  ;;  %v865_v29 = vrot.slane %v852_v27, %v310_v45 }
  0x87   : > { %756 = vmatpush1.bf16.msra.mxu0 %v1648_v30 }
  0x88   : > { %757 = vmatprep.subr.bf16.mxu0 %v1653_v31 }
  0x8b   : > { %758 = vmatpush1.bf16.msra.mxu0 %v1651_v32 }
  0x8e   : > { %760 = vmatmul.mubr.bf16.vlgmr.msra.gmra.mrb[0].mxu0 %v1654_v33 }
  0x8f   : > { %769 = vmatprep.mubr.bf16.mxu0 %v1657_v34 }
  0x96   : > { %770 = vmatmul.mubr.bf16.gmra.mrb[4].mxu0 %v1659_v35 }
 0x161   : > { %v761_v48 = vpop.f32.mrb[0].mxu0 }
 0x162   : > { %v1493_v49 = vadd.f32 %v761_v48, %v307_v46  ;;  %v763_v50 = vpop.f32.mrb[1].mxu0 }
 0x163   : > { %v1494_v51 = vadd.f32 %v763_v50, %v311_v47  ;;  %v765_v52 = vpop.f32.mrb[2].mxu0 }
 0x164   : > { %v1495_v53 = vadd.f32 %v765_v52, %v307_v46  ;;  %v767_v54 = vpop.f32.mrb[3].mxu0  ;;  %v780_v56 = vmax.f32 %v1493_v49, 0.0 }
 0x165   : > { %v1496_v55 = vadd.f32 %v767_v54, %v311_v47  ;;  %v781_v58 = vmax.f32 %v1494_v51, 0.0 }
 0x166   : > { %v782_v57 = vmax.f32 %v1495_v53, 0.0 }
 0x167   : > { %v783_v59 = vmax.f32 %v1496_v55, 0.0  ;;  %v868_v55 = vsub.s32 2, %v2174_v42 }
 0x168   : > { %v853_v60 = vpack.c.bf16 %v782_v57, %v780_v56 }
 0x169   : > { %v771_v61 = vpop.f32.mrb[4].mxu0  ;;  %v854_v62 = vpack.c.bf16 %v783_v59, %v781_v58  ;;  %v869_v57 = vrot.slane %v852_v27, %v868_v55 }
 0x16a   : > { %v1497_v0 = vadd.f32 %v771_v61, %v307_v46  ;;  %v773_v1 = vpop.f32.mrb[5].mxu0 }
 0x16b   : > { %v1498_v3 = vadd.f32 %v773_v1, %v311_v47  ;;  %v775_v4 = vpop.f32.mrb[6].mxu0  ;;  %1161 = vmatprep.mubr.bf16.mxu1 %v854_v62 }
 0x16c   : > { %v1499_v5 = vadd.f32 %v775_v4, %v307_v46  ;;  %v777_v6 = vpop.f32.mrb[7].mxu0  ;;  %1162 = vmatmul.mubr.bf16.vlgmr.msra.gmra.mrb[0].mxu1 %v853_v60  ;;  %v784_v9 = vmax.f32 %v1497_v0, 0.0 }
 0x16d   : > { %v1500_v7 = vadd.f32 %v777_v6, %v311_v47  ;;  %1466 = vmatpush3.bf16.msra.mxu1 %v1709_v63  ;;  %v785_v12 = vmax.f32 %v1498_v3, 0.0 }
 0x16e   : > { %v786_v10 = vmax.f32 %v1499_v5, 0.0  ;;  %1467 = vmatprep.subr.bf16.mxu1 %v1710_v2 }
 0x16f   : > { %v787_v13 = vmax.f32 %v1500_v7, 0.0 }
 0x170   : > { %v855_v14 = vpack.c.bf16 %v786_v10, %v784_v9 }
 0x171   : > { %v856_v15 = vpack.c.bf16 %v787_v13, %v785_v12  ;;  %1468 = vmatpush3.bf16.msra.mxu1 %v1711_v8 }
 0x172   : > { %1469 = vmatprep.subr.bf16.mxu1 %v1712_v11 }
 0x173   : > { %1171 = vmatprep.mubr.bf16.mxu1 %v856_v15 }
 0x174   : > { %1172 = vmatmul.mubr.bf16.gmra.mrb[4].mxu1 %v855_v14 }
 0x175   : > { %1470 = vmatpush3.bf16.msra.mxu1 %v1713_v16  ;;  %1214 = vmatprep.mubr.bf16.mxu1 %v854_v62 }
 0x176   : > { %1471 = vmatprep.subr.bf16.mxu1 %v1714_v17 }
 0x179   : > { %1472 = vmatpush3.bf16.msra.mxu1 %v1715_v18 }
 0x17a   : > { %1473 = vmatprep.subr.bf16.mxu1 %v1716_v19 }
 0x17d   : > { %1474 = vmatpush3.bf16.msra.mxu1 %v1717_v20 }
 0x17e   : > { %1475 = vmatprep.subr.bf16.mxu1 %v1718_v21 }
 0x181   : > { %1476 = vmatpush3.bf16.msra.mxu1 %v1719_v22 }
 0x182   : > { %1477 = vmatprep.subr.bf16.mxu1 %v1720_v23 }
 0x185   : > { %1478 = vmatpush3.bf16.msra.mxu1 %v1721_v24 }
 0x186   : > { %1479 = vmatprep.subr.bf16.mxu1 %v1722_v25 }
 0x189   : > { %1480 = vmatpush3.bf16.msra.mxu1 %v1723_v26 }
 0x18c   : > { %1215 = vmatmul.mubr.bf16.vlgmr.msra.gmra.mrb[8].mxu1 %v853_v60 }
 0x18d   : > { %1222 = vmatprep.mubr.bf16.mxu1 %v856_v15 }
 0x194   : > { %1223 = vmatmul.mubr.bf16.gmra.mrb[12].mxu1 %v855_v14 }
 0x23f   : > { %v1163_v30 = vpop.f32.mrb[0].mxu1 }
 0x240   : > { %v1164_v31 = vadd.f32 %v1163_v30, %v861_v28  ;;  %v1165_v32 = vpop.f32.mrb[1].mxu1 }
 0x241   : > { %v1166_v33 = vadd.f32 %v1165_v32, %v865_v29  ;;  %v1167_v34 = vpop.f32.mrb[2].mxu1 }
 0x242   : > { %v1231_v35 = vmax.f32 %v1164_v31, 0.0  ;;  %v1168_v36 = vadd.f32 %v1167_v34, %v861_v28  ;;  %v1169_v37 = vpop.f32.mrb[3].mxu1 }
 0x243   : > { %v1232_v38 = vmax.f32 %v1166_v33, 0.0  ;;  %v1170_v39 = vadd.f32 %v1169_v37, %v865_v29 }
 0x244   : > { %1243 = vst [vmem:[%s2240_s10] sm:$0xff] %v1231_v35  ;;  %v1234_v40 = vmax.f32 %v1168_v36, 0.0 }
 0x245   : > { %1244 = vst [vmem:[%s2240_s10 + $0x8] sm:$0xff] %v1232_v38  ;;  %v1235_v41 = vmax.f32 %v1170_v39, 0.0 }
 0x246   : > { %1246 = vst [vmem:[%s2240_s10 + $0x18] sm:$0xff] %v1234_v40 }
 0x247   : > { %1247 = vst [vmem:[%s2240_s10 + $0x20] sm:$0xff] %v1235_v41  ;;  %v1173_v43 = vpop.f32.mrb[4].mxu1 }
 0x248   : > { %v1174_v44 = vadd.f32 %v1173_v43, %v861_v28  ;;  %v1175_v45 = vpop.f32.mrb[5].mxu1 }
 0x249   : > { %v1176_v46 = vadd.f32 %v1175_v45, %v865_v29  ;;  %v1177_v47 = vpop.f32.mrb[6].mxu1 }
 0x24a   : > { %v1237_v48 = vmax.f32 %v1174_v44, 0.0  ;;  %v1178_v49 = vadd.f32 %v1177_v47, %v861_v28  ;;  %v1179_v50 = vpop.f32.mrb[7].mxu1 }
 0x24b   : > { %v1238_v51 = vmax.f32 %v1176_v46, 0.0  ;;  %v1180_v52 = vadd.f32 %v1179_v50, %v865_v29 }
 0x24c   : > { %1249 = vst [vmem:[%s2240_s10 + $0x30] sm:$0xff] %v1237_v48  ;;  %v1240_v53 = vmax.f32 %v1178_v49, 0.0 }
 0x24d   : > { %1250 = vst [vmem:[%s2240_s10 + $0x38] sm:$0xff] %v1238_v51  ;;  %v1241_v54 = vmax.f32 %v1180_v52, 0.0 }
 0x24e   : > { %1252 = vst [vmem:[%s2240_s10 + $0x48] sm:$0xff] %v1240_v53 }
 0x24f   : > { %1253 = vst [vmem:[%s2240_s10 + $0x50] sm:$0xff] %v1241_v54 }
 0x25f   : > { %v1481_v56 = vpop.f32.mrb[8].mxu1 }
 0x260   : > { %v1482_v58 = vpop.f32.mrb[9].mxu1 }
 0x261   : > { %v1483_v59 = vadd.f32 %v1482_v58, %v1481_v56  ;;  %v1484_v60 = vpop.f32.mrb[10].mxu1 }
 0x262   : > { %v1485_v61 = vpop.f32.mrb[11].mxu1 }
 0x263   : > { %v1217_v62 = vadd.f32 %v1483_v59, %v869_v57  ;;  %v1486_v63 = vadd.f32 %v1485_v61, %v1484_v60 }
 0x265   : > { %v1233_v0 = vmax.f32 %v1217_v62, 0.0  ;;  %v1220_v1 = vadd.f32 %v1486_v63, %v869_v57 }
 0x267   : > { %1245 = vst [vmem:[%s2240_s10 + $0x10] sm:$0xff] %v1233_v0  ;;  %v1236_v2 = vmax.f32 %v1220_v1, 0.0  ;;  %v1487_v3 = vpop.f32.mrb[12].mxu1 }
 0x268   : > { %v1488_v4 = vpop.f32.mrb[13].mxu1 }
 0x269   : > { %1248 = vst [vmem:[%s2240_s10 + $0x28] sm:$0xff] %v1236_v2  ;;  %v1489_v42 = vadd.f32 %v1488_v4, %v1487_v3  ;;  %v1490_v5 = vpop.f32.mrb[14].mxu1 }
 0x26a   : > { %v1491_v6 = vpop.f32.mrb[15].mxu1 }
 0x26b   : > { %v1225_v7 = vadd.f32 %v1489_v42, %v869_v57  ;;  %v1492_v8 = vadd.f32 %v1491_v6, %v1490_v5 }
 0x26d   : > { %v1239_v9 = vmax.f32 %v1225_v7, 0.0  ;;  %v1228_v10 = vadd.f32 %v1492_v8, %v869_v57 }
 0x26f   : > { %1251 = vst [vmem:[%s2240_s10 + $0x40] sm:$0xff] %v1239_v9  ;;  %v1242_v11 = vmax.f32 %v1228_v10, 0.0 }
 0x271   : > { %1254 = vst [vmem:[%s2240_s10 + $0x58] sm:$0xff] %v1242_v11 }
 0x272   : > { %1737 = shalt.err (!%p1734_p3)
}
 0x273   : > { %s1738_s23 = scalar_lea.hbm %s2258_s16, 1536  ;;  %s1742_s7 = scalar_lea.hbm %s2312_s5, 3072 }
 0x274   : > { %p1739_p4 = scmp.ne.s32.totalorder %s2258_s16, %s1738_s23  ;;  %p1743_p9 = scmp.lt.u32.totalorder %s2258_s16, %s2312_s5 }
 0x275   : > { %p1744_p10 = scmp.lt.u32.totalorder %s1742_s7, %s1738_s23  ;;  %p1746_p12 = scmp.lt.u32.totalorder %s1738_s23, %s2258_s16 }
 0x276   : > { %p1740_p7 = pnand %p1739_p4, %p1859_p5 }
 0x277   : > { %p1745_p11 = por %p1744_p10, %p1743_p9 }
 0x278   : > { %p1741_p8 = pneg %p1740_p7 }
 0x279   : > { %p1747_p13 = por %p1746_p12, %p1745_p11 }
 0x27b   : > { %p1748_p0 = pnand %p1747_p13, %p1741_p8 }
 0x27d   : > { %1751 = shalt.err (!%p1748_p0)
}
 0x27e   : > { %s1789_s10 = smov 384   ;;  %s1790_s11 = smov 24  }
 0x27f   : > { %1511 = dma.vmem_to_hbm [thread:$0]  (%p1859_p5), %s2260_s12, 1536, %s2258_s16, %s2266_s22, %s1789_s10, %s1789_s10, %s1790_s11  }
 0x280 PF: > { %p1517_p1 = scmp.ge.s32.totalorder %s1786_s21, 2  ;;  %s1285_s13 = sand.u32 1, %s1774_s18  }
 0x281   : > { %s1286_s14 = scalar_lea.sflag [#allocation3], %s1285_s13 }
 0x282   : > { %p1514_p2 = pnand %p1517_p1, %p1863_p6 }
 0x284   : > { %1769 = dma.done.wait (!%p1514_p2), %s1286_s14, 1536  }
 0x285   : > { %1771 = vsyncadd (!%p1514_p2), %s1286_s14, 4294965760  ;;  %p15_p3 = scmp.ge.s32.totalorder %s1846_s24, 4   ;;  %s2315_s18 = smov %s1778_s19 }
 0x286   : > { %s2316_s19 = smov %s1782_s20  ;;  %s2317_s20 = smov %s1857_s27 }
 0x287   : > { %s2318_s21 = smov %s1846_s24  ;;  %17 = sbr.rel (!%p15_p3) target bundleno = 3 (0x3), region = 75 }
 0x28e   :  { %1291 = vsyncpa [#allocation3], 1 }
 0x28f   :  { %1293 = vsyncpa [#allocation3 + $0x1], 1 }

</bundles_post_ra>
